<compile_context>
chip_gen: v5e
topology: v5e:2x2
jax: 0.10.0
libtpu: 0.0.40
codegen_flags: <defaults>
</compile_context>

<pallas_src>
import functools

import jax
import jax.numpy as jnp
from jax.experimental import pallas as pl
from jax.experimental.pallas import tpu as pltpu

_MASK = -1e30
_VMEM_LIMIT = 48 * 1024 * 1024  # safe on v5e/v6e (128 MiB phys) and v7x (64 MiB phys)


def _elu(v):
    # F.elu: v if v > 0 else exp(v) - 1 (clamp exp arg so unselected branch is finite)
    return jnp.where(v > 0, v, jnp.exp(jnp.minimum(v, 0.0)) - 1.0)


# ---------- projection kernel: h = (elu(x + b)) @ W ; scores = h @ [Adst | Asrc] ----------
def _proj_kernel(x_ref, b_ref, w_ref, a_ref, h_ref, sdst_ref, ssrcT_ref,
                 *, heads, apply_pre):
    x = x_ref[...]
    if apply_pre:                                   # fuse previous layer's bias + ELU
        x = _elu(x + b_ref[...])
    h = jnp.dot(x.astype(jnp.bfloat16), w_ref[...],
                preferred_element_type=jnp.float32)            # (TM, H*C) f32
    h_b = h.astype(jnp.bfloat16)                               # cast ONCE
    h_ref[...] = h_b
    s = jnp.dot(h_b, a_ref[...], preferred_element_type=jnp.float32)  # (TM, 2H)
    sdst_ref[...] = s[:, :heads]                               # dst scores, row oriented
    ssrcT_ref[...] = s[:, heads:].T                            # one transpose / row tile


def _proj_call(x_in, b_prev, w_bf, a_bf, *, heads, ch, apply_pre, tile):
    n_pad, fin = x_in.shape
    kernel = functools.partial(_proj_kernel, heads=heads, apply_pre=apply_pre)
    return pl.pallas_call(
        kernel,
        grid=(n_pad // tile,),
        out_shape=(jax.ShapeDtypeStruct((n_pad, heads * ch), jnp.bfloat16),
                   jax.ShapeDtypeStruct((n_pad, heads), jnp.float32),
                   jax.ShapeDtypeStruct((heads, n_pad), jnp.float32)),
        in_specs=[pl.BlockSpec((tile, fin), lambda i: (i, 0)),
                  pl.BlockSpec((1, fin), lambda i: (0, 0)),
                  pl.BlockSpec((fin, heads * ch), lambda i: (0, 0)),
                  pl.BlockSpec((heads * ch, 2 * heads), lambda i: (0, 0))],
        out_specs=(pl.BlockSpec((tile, heads * ch), lambda i: (i, 0)),
                   pl.BlockSpec((tile, heads), lambda i: (i, 0)),
                   pl.BlockSpec((heads, tile), lambda i: (0, i))),
        compiler_params=pltpu.CompilerParams(
            dimension_semantics=("parallel",),
            vmem_limit_bytes=_VMEM_LIMIT),
    )(x_in, b_prev, w_bf, a_bf)


# ---------- attention kernel: online softmax over src tiles, aggregation per head ----------
def _attn_kernel(adj_ref, sdst_ref, ssrcT_ref, h_ref, out_ref,
                 m_sc, l_sc, acc_sc, *, heads, ch):
    k = pl.program_id(1)

    @pl.when(k == 0)
    def _():
        m_sc[...] = jnp.full_like(m_sc, -jnp.inf)
        l_sc[...] = jnp.zeros_like(l_sc)
        acc_sc[...] = jnp.zeros_like(acc_sc)

    adj_ok = adj_ref[...].astype(jnp.float32) > 0.0            # (TM, TS) edge mask
    h_src = h_ref[...]                                         # (TS, H*C) bf16

    for hd in range(heads):                                    # tiny static unroll
        e = sdst_ref[:, hd:hd + 1] + ssrcT_ref[hd:hd + 1, :]   # (TM,1)+(1,TS) -> (TM,TS)
        e = jnp.maximum(e, 0.2 * e)                            # LeakyReLU(0.2)
        e = jnp.where(adj_ok, e, _MASK)
        m_prev = m_sc[:, hd:hd + 1]
        m_new = jnp.maximum(m_prev, jnp.max(e, axis=-1, keepdims=True))
        alpha = jnp.exp(m_prev - m_new)
        # explicit zero on non-edges keeps fully-masked tiles exact (exp(0)=1 otherwise)
        p = jnp.where(adj_ok, jnp.exp(e - m_new), 0.0)
        l_sc[:, hd:hd + 1] = alpha * l_sc[:, hd:hd + 1] + jnp.sum(p, -1, keepdims=True)
        acc_sc[:, hd * ch:(hd + 1) * ch] = (
            alpha * acc_sc[:, hd * ch:(hd + 1) * ch]
            + jnp.dot(p.astype(jnp.bfloat16), h_src[:, hd * ch:(hd + 1) * ch],
                      preferred_element_type=jnp.float32))
        m_sc[:, hd:hd + 1] = m_new

    @pl.when(k == pl.num_programs(1) - 1)
    def _():
        inv = pl.reciprocal(l_sc[...], approx=True)            # (TM, H) softmax denom
        parts = [acc_sc[:, hd * ch:(hd + 1) * ch] * inv[:, hd:hd + 1]
                 for hd in range(heads)]
        out_ref[...] = parts[0] if heads == 1 else jnp.concatenate(parts, axis=-1)


def _attn_call(adj, s_dst, s_srcT, h_bf, *, heads, ch, tile):
    n_pad = adj.shape[0]
    kernel = functools.partial(_attn_kernel, heads=heads, ch=ch)
    return pl.pallas_call(
        kernel,
        grid=(n_pad // tile, n_pad // tile),
        out_shape=jax.ShapeDtypeStruct((n_pad, heads * ch), jnp.float32),
        in_specs=[pl.BlockSpec((tile, tile), lambda i, k: (i, k)),        # adj int8 tile
                  pl.BlockSpec((tile, heads), lambda i, k: (i, 0)),       # dst scores
                  pl.BlockSpec((heads, tile), lambda i, k: (0, k)),       # src scores (T)
                  pl.BlockSpec((tile, heads * ch), lambda i, k: (k, 0))], # src h (bf16)
        out_specs=pl.BlockSpec((tile, heads * ch), lambda i, k: (i, 0)),
        scratch_shapes=[pltpu.VMEM((tile, heads), jnp.float32),
                        pltpu.VMEM((tile, heads), jnp.float32),
                        pltpu.VMEM((tile, heads * ch), jnp.float32)],
        compiler_params=pltpu.CompilerParams(
            dimension_semantics=("parallel", "arbitrary"),
            vmem_limit_bytes=_VMEM_LIMIT),
    )(adj, s_dst, s_srcT, h_bf)


# ---------- final kernel: ELU(prev + b) + global_mean_pool + Linear ----------
def _pool_kernel(h_ref, b_ref, batch_ref, wl_ref, bl_ref, out_ref, *, num_graphs):
    h = _elu(h_ref[...] + b_ref[...])                          # (N_pad, C)
    n = h.shape[0]
    gids = jax.lax.broadcasted_iota(jnp.int32, (num_graphs, n), 0)
    onehot = (gids == batch_ref[...]).astype(jnp.float32)      # (G, N_pad); pad rows excluded
    cnt = jnp.sum(onehot, axis=-1, keepdims=True)
    pooled = jnp.dot(onehot, h, preferred_element_type=jnp.float32) / cnt   # exact divide
    out_ref[...] = jnp.dot(pooled, wl_ref[...],
                           preferred_element_type=jnp.float32) + bl_ref[...]


def _pool_call(agg, b, batch_pad, wl, bl, *, num_graphs):
    n_pad = agg.shape[0]
    out_channels = wl.shape[1]
    kernel = functools.partial(_pool_kernel, num_graphs=num_graphs)
    vmem = lambda: pl.BlockSpec(memory_space=pltpu.MemorySpace.VMEM)
    # TODO(synk): for very large N_pad tile this over row blocks with an accumulator.
    return pl.pallas_call(
        kernel,
        out_shape=jax.ShapeDtypeStruct((num_graphs, out_channels), jnp.float32),
        in_specs=[vmem() for _ in range(5)],
        out_specs=vmem(),
        compiler_params=pltpu.CompilerParams(vmem_limit_bytes=_VMEM_LIMIT),
    )(agg, b.reshape(1, -1), batch_pad.reshape(1, n_pad), wl, bl.reshape(1, -1))


# ---------- wrapper ----------
def _block_diag_att(a):
    """a: (H, C) per-head attention vector -> (H*C, H) block-diagonal matrix."""
    H, C = a.shape
    eye = jnp.eye(H, dtype=a.dtype)
    return (a[:, :, None] * eye[:, None, :]).reshape(H * C, H)


def _round_up(x, m):
    return (x + m - 1) // m * m


def gat_forward(x, edge_index, batch, num_graphs, params, *, tile=None):
    """2-layer GAT forward: GATConv(heads, concat) -> ELU -> GATConv(1 head) -> ELU
    -> global_mean_pool -> Linear, tiled/padded to TPU-friendly sizes."""
    (W0, a_src0, a_dst0, b0, W1, a_src1, a_dst1, b1, Wl, bl) = params
    n = x.shape[0]
    heads0, ch0 = a_src0.shape
    heads1, ch1 = a_src1.shape

    if tile is None:
        tile = 512 if n >= 512 else 128
    n_pad = _round_up(n, tile)

    # pad nodes: padded rows get only a self loop (finite values) and batch id == num_graphs
    x_p = jnp.zeros((n_pad, x.shape[1]), x.dtype).at[:n].set(x)
    adj = jnp.zeros((n_pad, n_pad), jnp.int8)
    adj = adj.at[edge_index[1], edge_index[0]].set(1)            # (dst, src)
    adj = adj.at[jnp.arange(n_pad), jnp.arange(n_pad)].set(1)    # self loops (GATConv default)
    batch_p = jnp.full((n_pad,), num_graphs, jnp.int32).at[:n].set(batch)

    # per-layer fused operands: W bf16, [a_dst | a_src] block-diagonal bf16
    w0_bf = W0.astype(jnp.bfloat16)
    w1_bf = W1.astype(jnp.bfloat16)
    a0_bf = jnp.concatenate([_block_diag_att(a_dst0), _block_diag_att(a_src0)],
                            axis=1).astype(jnp.bfloat16)         # (H0*C0, 2*H0)
    a1_bf = jnp.concatenate([_block_diag_att(a_dst1), _block_diag_att(a_src1)],
                            axis=1).astype(jnp.bfloat16)         # (C1, 2)

    # layer 0: projection + scores, then tiled online-softmax attention (concat heads)
    zeros_b = jnp.zeros((1, x.shape[1]), jnp.float32)
    h0, sd0, ssT0 = _proj_call(x_p, zeros_b, w0_bf, a0_bf,
                               heads=heads0, ch=ch0, apply_pre=False, tile=tile)
    agg0 = _attn_call(adj, sd0, ssT0, h0, heads=heads0, ch=ch0, tile=tile)

    # layer 1 (last, single head, concat=False == identity): ELU(prev + b0) fused into proj
    h1, sd1, ssT1 = _proj_call(agg0, b0.reshape(1, -1), w1_bf, a1_bf,
                               heads=heads1, ch=ch1, apply_pre=True, tile=tile)
    agg1 = _attn_call(adj, sd1, ssT1, h1, heads=heads1, ch=ch1, tile=tile)

    # ELU(prev + b1) + mean pool over batch + final Linear
    return _pool_call(agg1, b1, batch_p, Wl, bl, num_graphs=num_graphs)


# ---------- pure-JAX reference (f32 dense softmax) ----------
def _ref_forward(x, adj, batch, num_graphs, params):
    (W0, a_src0, a_dst0, b0, W1, a_src1, a_dst1, b1, Wl, bl) = params
    adj_f = adj.astype(jnp.float32)

    def gat_layer(xin, W, a_src, a_dst):
        H, C = a_src.shape
        h = (xin @ W).reshape(-1, H, C)
        s_src = jnp.einsum("nhc,hc->nh", h, a_src)
        s_dst = jnp.einsum("nhc,hc->nh", h, a_dst)
        outs = []
        for hd in range(H):
            e = s_dst[:, hd][:, None] + s_src[:, hd][None, :]
            e = jnp.where(e > 0, e, 0.2 * e)
            e = jnp.where(adj_f > 0, e, -jnp.inf)
            p = jax.nn.softmax(e, axis=-1)
            outs.append(p @ h[:, hd, :])
        return jnp.concatenate(outs, axis=-1)

    h = jax.nn.elu(gat_layer(x, W0, a_src0, a_dst0) + b0)
    h = jax.nn.elu(gat_layer(h, W1, a_src1, a_dst1) + b1)
    onehot = (jnp.arange(num_graphs)[:, None] == batch[None, :]).astype(jnp.float32)
    pooled = (onehot @ h) / jnp.sum(onehot, axis=-1, keepdims=True)
    return pooled @ Wl + bl


if __name__ == "__main__":
    in_channels, hidden_channels, out_channels = 8, 8, 4
    heads = 4
    num_graphs, nodes_per_graph = 2, 8
    N = num_graphs * nodes_per_graph

    # deterministic graph: bidirectional ring within each graph
    src, dst = [], []
    for g in range(num_graphs):
        base = g * nodes_per_graph
        for i in range(nodes_per_graph):
            a = base + i
            b = base + (i + 1) % nodes_per_graph
            src += [a, b]
            dst += [b, a]
    edge_index = jnp.array([src, dst], dtype=jnp.int32)                      # (2, 32)
    batch = jnp.array([g for g in range(num_graphs) for _ in range(nodes_per_graph)],
                      dtype=jnp.int32)                                       # (16,)

    key = jax.random.PRNGKey(0)
    keys = jax.random.split(key, 10)
    x = jax.random.normal(keys[0], (N, in_channels), jnp.float32)

    # layer 0: GATConv(in_channels, hidden_channels, heads=4, concat=True)
    W0 = 0.3 * jax.random.normal(keys[1], (in_channels, heads * hidden_channels), jnp.float32)
    a_src0 = 0.3 * jax.random.normal(keys[2], (heads, hidden_channels), jnp.float32)
    a_dst0 = 0.3 * jax.random.normal(keys[3], (heads, hidden_channels), jnp.float32)
    b0 = 0.1 * jax.random.normal(keys[4], (heads * hidden_channels,), jnp.float32)

    # layer 1 (last): GATConv(heads*hidden, hidden, heads=1, concat=False)
    W1 = 0.3 * jax.random.normal(keys[5], (heads * hidden_channels, hidden_channels), jnp.float32)
    a_src1 = 0.3 * jax.random.normal(keys[6], (1, hidden_channels), jnp.float32)
    a_dst1 = 0.3 * jax.random.normal(keys[7], (1, hidden_channels), jnp.float32)
    b1 = 0.1 * jax.random.normal(keys[8], (hidden_channels,), jnp.float32)

    # final Linear(hidden_channels, out_channels)
    Wl = 0.3 * jax.random.normal(keys[9], (hidden_channels, out_channels), jnp.float32)
    bl = jnp.zeros((out_channels,), jnp.float32)

    params = (W0, a_src0, a_dst0, b0, W1, a_src1, a_dst1, b1, Wl, bl)

    forward = jax.jit(functools.partial(gat_forward, num_graphs=num_graphs, params=params))
    out = jax.block_until_ready(forward(x, edge_index, batch))               # (G, out_channels)
    assert out.shape == (num_graphs, out_channels)
    assert bool(jnp.all(jnp.isfinite(out)))

    # correctness vs f32 reference (bf16 MXU + approx-reciprocal softmax tolerance)
    adj_ref = jnp.zeros((N, N), jnp.float32).at[edge_index[1], edge_index[0]].set(1.0)
    adj_ref = adj_ref.at[jnp.arange(N), jnp.arange(N)].set(1.0)
    ref = _ref_forward(x, adj_ref, batch, num_graphs, params)
    assert bool(jnp.allclose(out, ref, rtol=5e-2, atol=5e-2)), (out, ref)

    print("KERNEL_OK")
</pallas_src>

<mosaic_0001>
module attributes {stable_mosaic.version = 11 : i64} {
  func.func @_attn_kernel(%arg0: i32, %arg1: i32, %arg2: memref<128x128xi8, #tpu.memory_space<vmem>>, %arg3: memref<128x4xf32, #tpu.memory_space<vmem>>, %arg4: memref<4x128xf32, #tpu.memory_space<vmem>>, %arg5: memref<128x32xbf16, #tpu.memory_space<vmem>>, %arg6: memref<128x32xf32, #tpu.memory_space<vmem>>, %arg7: memref<128x4xf32, #tpu.memory_space<vmem>>, %arg8: memref<128x4xf32, #tpu.memory_space<vmem>>, %arg9: memref<128x32xf32, #tpu.memory_space<vmem>>) attributes {dimension_semantics = [#tpu.dimension_semantics<parallel>, #tpu.dimension_semantics<arbitrary>], iteration_bounds = array<i64: 1, 1>, scalar_prefetch = 0 : i64, scratch_operands = 3 : i64, tpu.core_type = #tpu.core_type<tc>, window_params = [{transform_indices = @transform_0, window_bounds = array<i64: 128, 128>}, {transform_indices = @transform_1, window_bounds = array<i64: 128, 4>}, {transform_indices = @transform_2, window_bounds = array<i64: 4, 128>}, {transform_indices = @transform_3, window_bounds = array<i64: 128, 32>}, {transform_indices = @transform_4, window_bounds = array<i64: 128, 32>}]} {
    %c0_i32 = arith.constant 0 : i32
    %0 = arith.cmpi eq, %arg1, %c0_i32 : i32
    %1 = arith.extui %0 : i1 to i32
    %c0_i32_0 = arith.constant 0 : i32
    %2 = arith.cmpi ne, %1, %c0_i32_0 : i32
    scf.if %2 {
      %cst_88 = arith.constant 0xFF800000 : f32
      %155 = vector.broadcast %cst_88 : f32 to vector<128x4xf32>
      %c0_89 = arith.constant 0 : index
      %c0_90 = arith.constant 0 : index
      %156 = vector.load %arg7[%c0_89, %c0_90] : memref<128x4xf32, #tpu.memory_space<vmem>>, vector<128x4xf32>
      tpu.vector_store %arg7[%c0_89, %c0_90], %155 {strides = array<i32>} : memref<128x4xf32, #tpu.memory_space<vmem>>, vector<128x4xf32>,
      %cst_91 = arith.constant 0.000000e+00 : f32
      %157 = vector.broadcast %cst_91 : f32 to vector<128x4xf32>
      %c0_92 = arith.constant 0 : index
      %c0_93 = arith.constant 0 : index
      %158 = vector.load %arg8[%c0_92, %c0_93] : memref<128x4xf32, #tpu.memory_space<vmem>>, vector<128x4xf32>
      tpu.vector_store %arg8[%c0_92, %c0_93], %157 {strides = array<i32>} : memref<128x4xf32, #tpu.memory_space<vmem>>, vector<128x4xf32>,
      %cst_94 = arith.constant 0.000000e+00 : f32
      %159 = vector.broadcast %cst_94 : f32 to vector<128x32xf32>
      %c0_95 = arith.constant 0 : index
      %c0_96 = arith.constant 0 : index
      %160 = vector.load %arg9[%c0_95, %c0_96] : memref<128x32xf32, #tpu.memory_space<vmem>>, vector<128x32xf32>
      tpu.vector_store %arg9[%c0_95, %c0_96], %159 {strides = array<i32>} : memref<128x32xf32, #tpu.memory_space<vmem>>, vector<128x32xf32>,
    } else {
    }
    %c0 = arith.constant 0 : index
    %c0_1 = arith.constant 0 : index
    %3 = vector.load %arg2[%c0, %c0_1] : memref<128x128xi8, #tpu.memory_space<vmem>>, vector<128x128xi8>
    %4 = arith.sitofp %3 : vector<128x128xi8> to vector<128x128xf32>
    %cst = arith.constant 0.000000e+00 : f32
    %5 = vector.broadcast %cst : f32 to vector<128x128xf32>
    %6 = arith.cmpf ogt, %4, %5 : vector<128x128xf32>
    %c0_2 = arith.constant 0 : index
    %c0_3 = arith.constant 0 : index
    %7 = vector.load %arg5[%c0_2, %c0_3] : memref<128x32xbf16, #tpu.memory_space<vmem>>, vector<128x32xbf16>
    %c0_4 = arith.constant 0 : index
    %c0_5 = arith.constant 0 : index
    %8 = vector.load %arg3[%c0_4, %c0_5] : memref<128x4xf32, #tpu.memory_space<vmem>>, vector<128x1xf32>
    %c0_6 = arith.constant 0 : index
    %c0_7 = arith.constant 0 : index
    %9 = vector.load %arg4[%c0_6, %c0_7] : memref<4x128xf32, #tpu.memory_space<vmem>>, vector<1x128xf32>
    %10 = vector.broadcast %8 : vector<128x1xf32> to vector<128x128xf32>
    %11 = vector.broadcast %9 : vector<1x128xf32> to vector<128x128xf32>
    %12 = arith.addf %10, %11 : vector<128x128xf32>
    %cst_8 = arith.constant 2.000000e-01 : f32
    %13 = vector.broadcast %cst_8 : f32 to vector<128x128xf32>
    %14 = arith.mulf %13, %12 : vector<128x128xf32>
    %15 = arith.maximumf %12, %14 : vector<128x128xf32>
    %cst_9 = arith.constant -1.000000e+30 : f32
    %16 = vector.broadcast %cst_9 : f32 to vector<128x128xf32>
    %17 = arith.select %6, %15, %16 : vector<128x128xi1>, vector<128x128xf32>
    %c0_10 = arith.constant 0 : index
    %c0_11 = arith.constant 0 : index
    %18 = vector.load %arg7[%c0_10, %c0_11] : memref<128x4xf32, #tpu.memory_space<vmem>>, vector<128x1xf32>
    %cst_12 = arith.constant dense<0xFF800000> : vector<128xf32>
    %19 = vector.multi_reduction <maximumf>, %17, %cst_12 [1] : vector<128x128xf32> to vector<128xf32>
    %20 = vector.shape_cast %19 : vector<128xf32> to vector<128x1xf32>
    %21 = arith.maximumf %18, %20 : vector<128x1xf32>
    %22 = arith.subf %18, %21 : vector<128x1xf32>
    %23 = math.exp %22 : vector<128x1xf32>
    %24 = vector.broadcast %21 : vector<128x1xf32> to vector<128x128xf32>
    %25 = arith.subf %17, %24 : vector<128x128xf32>
    %26 = math.exp %25 : vector<128x128xf32>
    %cst_13 = arith.constant 0.000000e+00 : f32
    %27 = vector.broadcast %cst_13 : f32 to vector<128x128xf32>
    %28 = arith.select %6, %26, %27 : vector<128x128xi1>, vector<128x128xf32>
    %c0_14 = arith.constant 0 : index
    %c0_15 = arith.constant 0 : index
    %29 = vector.load %arg8[%c0_14, %c0_15] : memref<128x4xf32, #tpu.memory_space<vmem>>, vector<128x1xf32>
    %30 = arith.mulf %23, %29 : vector<128x1xf32>
    %cst_16 = arith.constant dense<0.000000e+00> : vector<128xf32>
    %31 = vector.multi_reduction <add>, %28, %cst_16 [1] : vector<128x128xf32> to vector<128xf32>
    %32 = vector.shape_cast %31 : vector<128xf32> to vector<128x1xf32>
    %33 = arith.addf %30, %32 : vector<128x1xf32>
    %c0_17 = arith.constant 0 : index
    %c0_18 = arith.constant 0 : index
    %34 = vector.load %arg8[%c0_17, %c0_18] : memref<128x4xf32, #tpu.memory_space<vmem>>, vector<128x1xf32>
    tpu.vector_store %arg8[%c0_17, %c0_18], %33 {strides = array<i32>} : memref<128x4xf32, #tpu.memory_space<vmem>>, vector<128x1xf32>,
    %c0_19 = arith.constant 0 : index
    %c0_20 = arith.constant 0 : index
    %35 = vector.load %arg9[%c0_19, %c0_20] : memref<128x32xf32, #tpu.memory_space<vmem>>, vector<128x8xf32>
    %36 = vector.broadcast %23 : vector<128x1xf32> to vector<128x8xf32>
    %37 = arith.mulf %36, %35 : vector<128x8xf32>
    %38 = arith.truncf %28 : vector<128x128xf32> to vector<128x128xbf16>
    %39 = vector.extract_strided_slice %7 {offsets = [0, 0], sizes = [128, 8], strides = [1, 1]} : vector<128x32xbf16> to vector<128x8xbf16>
    %cst_21 = arith.constant dense<0.000000e+00> : vector<128x8xf32>
    %40 = tpu.matmul %38, %39, %cst_21 {dimension_numbers = #tpu.dot_dimension_numbers<[1], [0], [0], [1], [0, 0, 1, 1], [], []>} : vector<128x128xbf16>, vector<128x8xbf16>, vector<128x8xf32> -> vector<128x8xf32>
    %41 = arith.addf %37, %40 : vector<128x8xf32>
    %c0_22 = arith.constant 0 : index
    %c0_23 = arith.constant 0 : index
    %42 = vector.load %arg9[%c0_22, %c0_23] : memref<128x32xf32, #tpu.memory_space<vmem>>, vector<128x8xf32>
    tpu.vector_store %arg9[%c0_22, %c0_23], %41 {strides = array<i32>} : memref<128x32xf32, #tpu.memory_space<vmem>>, vector<128x8xf32>,
    %c0_24 = arith.constant 0 : index
    %c0_25 = arith.constant 0 : index
    %43 = vector.load %arg7[%c0_24, %c0_25] : memref<128x4xf32, #tpu.memory_space<vmem>>, vector<128x1xf32>
    tpu.vector_store %arg7[%c0_24, %c0_25], %21 {strides = array<i32>} : memref<128x4xf32, #tpu.memory_space<vmem>>, vector<128x1xf32>,
    %c0_26 = arith.constant 0 : index
    %c1 = arith.constant 1 : index
    %44 = vector.load %arg3[%c0_26, %c1] : memref<128x4xf32, #tpu.memory_space<vmem>>, vector<128x1xf32>
    %c1_27 = arith.constant 1 : index
    %c0_28 = arith.constant 0 : index
    %45 = vector.load %arg4[%c1_27, %c0_28] : memref<4x128xf32, #tpu.memory_space<vmem>>, vector<1x128xf32>
    %46 = vector.broadcast %44 : vector<128x1xf32> to vector<128x128xf32>
    %47 = vector.broadcast %45 : vector<1x128xf32> to vector<128x128xf32>
    %48 = arith.addf %46, %47 : vector<128x128xf32>
    %cst_29 = arith.constant 2.000000e-01 : f32
    %49 = vector.broadcast %cst_29 : f32 to vector<128x128xf32>
    %50 = arith.mulf %49, %48 : vector<128x128xf32>
    %51 = arith.maximumf %48, %50 : vector<128x128xf32>
    %cst_30 = arith.constant -1.000000e+30 : f32
    %52 = vector.broadcast %cst_30 : f32 to vector<128x128xf32>
    %53 = arith.select %6, %51, %52 : vector<128x128xi1>, vector<128x128xf32>
    %c0_31 = arith.constant 0 : index
    %c1_32 = arith.constant 1 : index
    %54 = vector.load %arg7[%c0_31, %c1_32] : memref<128x4xf32, #tpu.memory_space<vmem>>, vector<128x1xf32>
    %cst_33 = arith.constant dense<0xFF800000> : vector<128xf32>
    %55 = vector.multi_reduction <maximumf>, %53, %cst_33 [1] : vector<128x128xf32> to vector<128xf32>
    %56 = vector.shape_cast %55 : vector<128xf32> to vector<128x1xf32>
    %57 = arith.maximumf %54, %56 : vector<128x1xf32>
    %58 = arith.subf %54, %57 : vector<128x1xf32>
    %59 = math.exp %58 : vector<128x1xf32>
    %60 = vector.broadcast %57 : vector<128x1xf32> to vector<128x128xf32>
    %61 = arith.subf %53, %60 : vector<128x128xf32>
    %62 = math.exp %61 : vector<128x128xf32>
    %cst_34 = arith.constant 0.000000e+00 : f32
    %63 = vector.broadcast %cst_34 : f32 to vector<128x128xf32>
    %64 = arith.select %6, %62, %63 : vector<128x128xi1>, vector<128x128xf32>
    %c0_35 = arith.constant 0 : index
    %c1_36 = arith.constant 1 : index
    %65 = vector.load %arg8[%c0_35, %c1_36] : memref<128x4xf32, #tpu.memory_space<vmem>>, vector<128x1xf32>
    %66 = arith.mulf %59, %65 : vector<128x1xf32>
    %cst_37 = arith.constant dense<0.000000e+00> : vector<128xf32>
    %67 = vector.multi_reduction <add>, %64, %cst_37 [1] : vector<128x128xf32> to vector<128xf32>
    %68 = vector.shape_cast %67 : vector<128xf32> to vector<128x1xf32>
    %69 = arith.addf %66, %68 : vector<128x1xf32>
    %c0_38 = arith.constant 0 : index
    %c1_39 = arith.constant 1 : index
    %70 = vector.load %arg8[%c0_38, %c1_39] : memref<128x4xf32, #tpu.memory_space<vmem>>, vector<128x1xf32>
    tpu.vector_store %arg8[%c0_38, %c1_39], %69 {strides = array<i32>} : memref<128x4xf32, #tpu.memory_space<vmem>>, vector<128x1xf32>,
    %c0_40 = arith.constant 0 : index
    %c8 = arith.constant 8 : index
    %71 = vector.load %arg9[%c0_40, %c8] : memref<128x32xf32, #tpu.memory_space<vmem>>, vector<128x8xf32>
    %72 = vector.broadcast %59 : vector<128x1xf32> to vector<128x8xf32>
    %73 = arith.mulf %72, %71 : vector<128x8xf32>
    %74 = arith.truncf %64 : vector<128x128xf32> to vector<128x128xbf16>
    %75 = vector.extract_strided_slice %7 {offsets = [0, 8], sizes = [128, 8], strides = [1, 1]} : vector<128x32xbf16> to vector<128x8xbf16>
    %cst_41 = arith.constant dense<0.000000e+00> : vector<128x8xf32>
    %76 = tpu.matmul %74, %75, %cst_41 {dimension_numbers = #tpu.dot_dimension_numbers<[1], [0], [0], [1], [0, 0, 1, 1], [], []>} : vector<128x128xbf16>, vector<128x8xbf16>, vector<128x8xf32> -> vector<128x8xf32>
    %77 = arith.addf %73, %76 : vector<128x8xf32>
    %c0_42 = arith.constant 0 : index
    %c8_43 = arith.constant 8 : index
    %78 = vector.load %arg9[%c0_42, %c8_43] : memref<128x32xf32, #tpu.memory_space<vmem>>, vector<128x8xf32>
    tpu.vector_store %arg9[%c0_42, %c8_43], %77 {strides = array<i32>} : memref<128x32xf32, #tpu.memory_space<vmem>>, vector<128x8xf32>,
    %c0_44 = arith.constant 0 : index
    %c1_45 = arith.constant 1 : index
    %79 = vector.load %arg7[%c0_44, %c1_45] : memref<128x4xf32, #tpu.memory_space<vmem>>, vector<128x1xf32>
    tpu.vector_store %arg7[%c0_44, %c1_45], %57 {strides = array<i32>} : memref<128x4xf32, #tpu.memory_space<vmem>>, vector<128x1xf32>,
    %c0_46 = arith.constant 0 : index
    %c2 = arith.constant 2 : index
    %80 = vector.load %arg3[%c0_46, %c2] : memref<128x4xf32, #tpu.memory_space<vmem>>, vector<128x1xf32>
    %c2_47 = arith.constant 2 : index
    %c0_48 = arith.constant 0 : index
    %81 = vector.load %arg4[%c2_47, %c0_48] : memref<4x128xf32, #tpu.memory_space<vmem>>, vector<1x128xf32>
    %82 = vector.broadcast %80 : vector<128x1xf32> to vector<128x128xf32>
    %83 = vector.broadcast %81 : vector<1x128xf32> to vector<128x128xf32>
    %84 = arith.addf %82, %83 : vector<128x128xf32>
    %cst_49 = arith.constant 2.000000e-01 : f32
    %85 = vector.broadcast %cst_49 : f32 to vector<128x128xf32>
    %86 = arith.mulf %85, %84 : vector<128x128xf32>
    %87 = arith.maximumf %84, %86 : vector<128x128xf32>
    %cst_50 = arith.constant -1.000000e+30 : f32
    %88 = vector.broadcast %cst_50 : f32 to vector<128x128xf32>
    %89 = arith.select %6, %87, %88 : vector<128x128xi1>, vector<128x128xf32>
    %c0_51 = arith.constant 0 : index
    %c2_52 = arith.constant 2 : index
    %90 = vector.load %arg7[%c0_51, %c2_52] : memref<128x4xf32, #tpu.memory_space<vmem>>, vector<128x1xf32>
    %cst_53 = arith.constant dense<0xFF800000> : vector<128xf32>
    %91 = vector.multi_reduction <maximumf>, %89, %cst_53 [1] : vector<128x128xf32> to vector<128xf32>
    %92 = vector.shape_cast %91 : vector<128xf32> to vector<128x1xf32>
    %93 = arith.maximumf %90, %92 : vector<128x1xf32>
    %94 = arith.subf %90, %93 : vector<128x1xf32>
    %95 = math.exp %94 : vector<128x1xf32>
    %96 = vector.broadcast %93 : vector<128x1xf32> to vector<128x128xf32>
    %97 = arith.subf %89, %96 : vector<128x128xf32>
    %98 = math.exp %97 : vector<128x128xf32>
    %cst_54 = arith.constant 0.000000e+00 : f32
    %99 = vector.broadcast %cst_54 : f32 to vector<128x128xf32>
    %100 = arith.select %6, %98, %99 : vector<128x128xi1>, vector<128x128xf32>
    %c0_55 = arith.constant 0 : index
    %c2_56 = arith.constant 2 : index
    %101 = vector.load %arg8[%c0_55, %c2_56] : memref<128x4xf32, #tpu.memory_space<vmem>>, vector<128x1xf32>
    %102 = arith.mulf %95, %101 : vector<128x1xf32>
    %cst_57 = arith.constant dense<0.000000e+00> : vector<128xf32>
    %103 = vector.multi_reduction <add>, %100, %cst_57 [1] : vector<128x128xf32> to vector<128xf32>
    %104 = vector.shape_cast %103 : vector<128xf32> to vector<128x1xf32>
    %105 = arith.addf %102, %104 : vector<128x1xf32>
    %c0_58 = arith.constant 0 : index
    %c2_59 = arith.constant 2 : index
    %106 = vector.load %arg8[%c0_58, %c2_59] : memref<128x4xf32, #tpu.memory_space<vmem>>, vector<128x1xf32>
    tpu.vector_store %arg8[%c0_58, %c2_59], %105 {strides = array<i32>} : memref<128x4xf32, #tpu.memory_space<vmem>>, vector<128x1xf32>,
    %c0_60 = arith.constant 0 : index
    %c16 = arith.constant 16 : index
    %107 = vector.load %arg9[%c0_60, %c16] : memref<128x32xf32, #tpu.memory_space<vmem>>, vector<128x8xf32>
    %108 = vector.broadcast %95 : vector<128x1xf32> to vector<128x8xf32>
    %109 = arith.mulf %108, %107 : vector<128x8xf32>
    %110 = arith.truncf %100 : vector<128x128xf32> to vector<128x128xbf16>
    %111 = vector.extract_strided_slice %7 {offsets = [0, 16], sizes = [128, 8], strides = [1, 1]} : vector<128x32xbf16> to vector<128x8xbf16>
    %cst_61 = arith.constant dense<0.000000e+00> : vector<128x8xf32>
    %112 = tpu.matmul %110, %111, %cst_61 {dimension_numbers = #tpu.dot_dimension_numbers<[1], [0], [0], [1], [0, 0, 1, 1], [], []>} : vector<128x128xbf16>, vector<128x8xbf16>, vector<128x8xf32> -> vector<128x8xf32>
    %113 = arith.addf %109, %112 : vector<128x8xf32>
    %c0_62 = arith.constant 0 : index
    %c16_63 = arith.constant 16 : index
    %114 = vector.load %arg9[%c0_62, %c16_63] : memref<128x32xf32, #tpu.memory_space<vmem>>, vector<128x8xf32>
    tpu.vector_store %arg9[%c0_62, %c16_63], %113 {strides = array<i32>} : memref<128x32xf32, #tpu.memory_space<vmem>>, vector<128x8xf32>,
    %c0_64 = arith.constant 0 : index
    %c2_65 = arith.constant 2 : index
    %115 = vector.load %arg7[%c0_64, %c2_65] : memref<128x4xf32, #tpu.memory_space<vmem>>, vector<128x1xf32>
    tpu.vector_store %arg7[%c0_64, %c2_65], %93 {strides = array<i32>} : memref<128x4xf32, #tpu.memory_space<vmem>>, vector<128x1xf32>,
    %c0_66 = arith.constant 0 : index
    %c3 = arith.constant 3 : index
    %116 = vector.load %arg3[%c0_66, %c3] : memref<128x4xf32, #tpu.memory_space<vmem>>, vector<128x1xf32>
    %c3_67 = arith.constant 3 : index
    %c0_68 = arith.constant 0 : index
    %117 = vector.load %arg4[%c3_67, %c0_68] : memref<4x128xf32, #tpu.memory_space<vmem>>, vector<1x128xf32>
    %118 = vector.broadcast %116 : vector<128x1xf32> to vector<128x128xf32>
    %119 = vector.broadcast %117 : vector<1x128xf32> to vector<128x128xf32>
    %120 = arith.addf %118, %119 : vector<128x128xf32>
    %cst_69 = arith.constant 2.000000e-01 : f32
    %121 = vector.broadcast %cst_69 : f32 to vector<128x128xf32>
    %122 = arith.mulf %121, %120 : vector<128x128xf32>
    %123 = arith.maximumf %120, %122 : vector<128x128xf32>
    %cst_70 = arith.constant -1.000000e+30 : f32
    %124 = vector.broadcast %cst_70 : f32 to vector<128x128xf32>
    %125 = arith.select %6, %123, %124 : vector<128x128xi1>, vector<128x128xf32>
    %c0_71 = arith.constant 0 : index
    %c3_72 = arith.constant 3 : index
    %126 = vector.load %arg7[%c0_71, %c3_72] : memref<128x4xf32, #tpu.memory_space<vmem>>, vector<128x1xf32>
    %cst_73 = arith.constant dense<0xFF800000> : vector<128xf32>
    %127 = vector.multi_reduction <maximumf>, %125, %cst_73 [1] : vector<128x128xf32> to vector<128xf32>
    %128 = vector.shape_cast %127 : vector<128xf32> to vector<128x1xf32>
    %129 = arith.maximumf %126, %128 : vector<128x1xf32>
    %130 = arith.subf %126, %129 : vector<128x1xf32>
    %131 = math.exp %130 : vector<128x1xf32>
    %132 = vector.broadcast %129 : vector<128x1xf32> to vector<128x128xf32>
    %133 = arith.subf %125, %132 : vector<128x128xf32>
    %134 = math.exp %133 : vector<128x128xf32>
    %cst_74 = arith.constant 0.000000e+00 : f32
    %135 = vector.broadcast %cst_74 : f32 to vector<128x128xf32>
    %136 = arith.select %6, %134, %135 : vector<128x128xi1>, vector<128x128xf32>
    %c0_75 = arith.constant 0 : index
    %c3_76 = arith.constant 3 : index
    %137 = vector.load %arg8[%c0_75, %c3_76] : memref<128x4xf32, #tpu.memory_space<vmem>>, vector<128x1xf32>
    %138 = arith.mulf %131, %137 : vector<128x1xf32>
    %cst_77 = arith.constant dense<0.000000e+00> : vector<128xf32>
    %139 = vector.multi_reduction <add>, %136, %cst_77 [1] : vector<128x128xf32> to vector<128xf32>
    %140 = vector.shape_cast %139 : vector<128xf32> to vector<128x1xf32>
    %141 = arith.addf %138, %140 : vector<128x1xf32>
    %c0_78 = arith.constant 0 : index
    %c3_79 = arith.constant 3 : index
    %142 = vector.load %arg8[%c0_78, %c3_79] : memref<128x4xf32, #tpu.memory_space<vmem>>, vector<128x1xf32>
    tpu.vector_store %arg8[%c0_78, %c3_79], %141 {strides = array<i32>} : memref<128x4xf32, #tpu.memory_space<vmem>>, vector<128x1xf32>,
    %c0_80 = arith.constant 0 : index
    %c24 = arith.constant 24 : index
    %143 = vector.load %arg9[%c0_80, %c24] : memref<128x32xf32, #tpu.memory_space<vmem>>, vector<128x8xf32>
    %144 = vector.broadcast %131 : vector<128x1xf32> to vector<128x8xf32>
    %145 = arith.mulf %144, %143 : vector<128x8xf32>
    %146 = arith.truncf %136 : vector<128x128xf32> to vector<128x128xbf16>
    %147 = vector.extract_strided_slice %7 {offsets = [0, 24], sizes = [128, 8], strides = [1, 1]} : vector<128x32xbf16> to vector<128x8xbf16>
    %cst_81 = arith.constant dense<0.000000e+00> : vector<128x8xf32>
    %148 = tpu.matmul %146, %147, %cst_81 {dimension_numbers = #tpu.dot_dimension_numbers<[1], [0], [0], [1], [0, 0, 1, 1], [], []>} : vector<128x128xbf16>, vector<128x8xbf16>, vector<128x8xf32> -> vector<128x8xf32>
    %149 = arith.addf %145, %148 : vector<128x8xf32>
    %c0_82 = arith.constant 0 : index
    %c24_83 = arith.constant 24 : index
    %150 = vector.load %arg9[%c0_82, %c24_83] : memref<128x32xf32, #tpu.memory_space<vmem>>, vector<128x8xf32>
    tpu.vector_store %arg9[%c0_82, %c24_83], %149 {strides = array<i32>} : memref<128x32xf32, #tpu.memory_space<vmem>>, vector<128x8xf32>,
    %c0_84 = arith.constant 0 : index
    %c3_85 = arith.constant 3 : index
    %151 = vector.load %arg7[%c0_84, %c3_85] : memref<128x4xf32, #tpu.memory_space<vmem>>, vector<128x1xf32>
    tpu.vector_store %arg7[%c0_84, %c3_85], %129 {strides = array<i32>} : memref<128x4xf32, #tpu.memory_space<vmem>>, vector<128x1xf32>,
    %c0_i32_86 = arith.constant 0 : i32
    %152 = arith.cmpi eq, %arg1, %c0_i32_86 : i32
    %153 = arith.extui %152 : i1 to i32
    %c0_i32_87 = arith.constant 0 : i32
    %154 = arith.cmpi ne, %153, %c0_i32_87 : i32
    scf.if %154 {
      %c0_88 = arith.constant 0 : index
      %c0_89 = arith.constant 0 : index
      %155 = vector.load %arg8[%c0_88, %c0_89] : memref<128x4xf32, #tpu.memory_space<vmem>>, vector<128x4xf32>
      %156 = tpu.reciprocal %155 {approx = true} : vector<128x4xf32> -> vector<128x4xf32>
      %c0_90 = arith.constant 0 : index
      %c0_91 = arith.constant 0 : index
      %157 = vector.load %arg9[%c0_90, %c0_91] : memref<128x32xf32, #tpu.memory_space<vmem>>, vector<128x8xf32>
      %158 = vector.extract_strided_slice %156 {offsets = [0, 0], sizes = [128, 1], strides = [1, 1]} : vector<128x4xf32> to vector<128x1xf32>
      %159 = vector.broadcast %158 : vector<128x1xf32> to vector<128x8xf32>
      %160 = arith.mulf %157, %159 : vector<128x8xf32>
      %c0_92 = arith.constant 0 : index
      %c8_93 = arith.constant 8 : index
      %161 = vector.load %arg9[%c0_92, %c8_93] : memref<128x32xf32, #tpu.memory_space<vmem>>, vector<128x8xf32>
      %162 = vector.extract_strided_slice %156 {offsets = [0, 1], sizes = [128, 1], strides = [1, 1]} : vector<128x4xf32> to vector<128x1xf32>
      %163 = vector.broadcast %162 : vector<128x1xf32> to vector<128x8xf32>
      %164 = arith.mulf %161, %163 : vector<128x8xf32>
      %c0_94 = arith.constant 0 : index
      %c16_95 = arith.constant 16 : index
      %165 = vector.load %arg9[%c0_94, %c16_95] : memref<128x32xf32, #tpu.memory_space<vmem>>, vector<128x8xf32>
      %166 = vector.extract_strided_slice %156 {offsets = [0, 2], sizes = [128, 1], strides = [1, 1]} : vector<128x4xf32> to vector<128x1xf32>
      %167 = vector.broadcast %166 : vector<128x1xf32> to vector<128x8xf32>
      %168 = arith.mulf %165, %167 : vector<128x8xf32>
      %c0_96 = arith.constant 0 : index
      %c24_97 = arith.constant 24 : index
      %169 = vector.load %arg9[%c0_96, %c24_97] : memref<128x32xf32, #tpu.memory_space<vmem>>, vector<128x8xf32>
      %170 = vector.extract_strided_slice %156 {offsets = [0, 3], sizes = [128, 1], strides = [1, 1]} : vector<128x4xf32> to vector<128x1xf32>
      %171 = vector.broadcast %170 : vector<128x1xf32> to vector<128x8xf32>
      %172 = arith.mulf %169, %171 : vector<128x8xf32>
      %173 = tpu.concatenate %160, %164, %168, %172 in 1 : vector<128x8xf32>, vector<128x8xf32>, vector<128x8xf32>, vector<128x8xf32> -> vector<128x32xf32>
      %c0_98 = arith.constant 0 : index
      %c0_99 = arith.constant 0 : index
      %174 = vector.load %arg6[%c0_98, %c0_99] : memref<128x32xf32, #tpu.memory_space<vmem>>, vector<128x32xf32>
      tpu.vector_store %arg6[%c0_98, %c0_99], %173 {strides = array<i32>} : memref<128x32xf32, #tpu.memory_space<vmem>>, vector<128x32xf32>,
    } else {
    }
    return
  }
  func.func @transform_0(%arg0: i32, %arg1: i32) -> (i32, i32) {
    %c0_i32 = arith.constant 0 : i32
    return %arg0, %arg1 : i32, i32
  }
  func.func @transform_1(%arg0: i32, %arg1: i32) -> (i32, i32) {
    %c0_i32 = arith.constant 0 : i32
    %c0_i32_0 = arith.constant 0 : i32
    return %arg0, %c0_i32 : i32, i32
  }
  func.func @transform_2(%arg0: i32, %arg1: i32) -> (i32, i32) {
    %c0_i32 = arith.constant 0 : i32
    %c0_i32_0 = arith.constant 0 : i32
    return %c0_i32, %arg1 : i32, i32
  }
  func.func @transform_3(%arg0: i32, %arg1: i32) -> (i32, i32) {
    %c0_i32 = arith.constant 0 : i32
    %c0_i32_0 = arith.constant 0 : i32
    return %arg1, %c0_i32 : i32, i32
  }
  func.func @transform_4(%arg0: i32, %arg1: i32) -> (i32, i32) {
    %c0_i32 = arith.constant 0 : i32
    %c0_i32_0 = arith.constant 0 : i32
    return %arg0, %c0_i32 : i32, i32
  }
}

module attributes {stable_mosaic.version = 11 : i64} {
  func.func @_proj_kernel(%arg0: i32, %arg1: memref<128x8xf32, #tpu.memory_space<vmem>>, %arg2: memref<1x8xf32, #tpu.memory_space<vmem>>, %arg3: memref<8x32xbf16, #tpu.memory_space<vmem>>, %arg4: memref<32x8xbf16, #tpu.memory_space<vmem>>, %arg5: memref<128x32xbf16, #tpu.memory_space<vmem>>, %arg6: memref<128x4xf32, #tpu.memory_space<vmem>>, %arg7: memref<4x128xf32, #tpu.memory_space<vmem>>) attributes {dimension_semantics = [#tpu.dimension_semantics<parallel>], iteration_bounds = array<i64: 1>, scalar_prefetch = 0 : i64, scratch_operands = 0 : i64, tpu.core_type = #tpu.core_type<tc>, window_params = [{transform_indices = @transform_0, window_bounds = array<i64: 128, 8>}, {pipeline_mode = #tpu.pipeline_mode<synchronous>, transform_indices = @transform_1, window_bounds = array<i64: 1, 8>}, {pipeline_mode = #tpu.pipeline_mode<synchronous>, transform_indices = @transform_2, window_bounds = array<i64: 8, 32>}, {pipeline_mode = #tpu.pipeline_mode<synchronous>, transform_indices = @transform_3, window_bounds = array<i64: 32, 8>}, {transform_indices = @transform_4, window_bounds = array<i64: 128, 32>}, {transform_indices = @transform_5, window_bounds = array<i64: 128, 4>}, {transform_indices = @transform_6, window_bounds = array<i64: 4, 128>}]} {
    %c0 = arith.constant 0 : index
    %c0_0 = arith.constant 0 : index
    %0 = vector.load %arg1[%c0, %c0_0] : memref<128x8xf32, #tpu.memory_space<vmem>>, vector<128x8xf32>
    %1 = arith.truncf %0 : vector<128x8xf32> to vector<128x8xbf16>
    %c0_1 = arith.constant 0 : index
    %c0_2 = arith.constant 0 : index
    %2 = vector.load %arg3[%c0_1, %c0_2] : memref<8x32xbf16, #tpu.memory_space<vmem>>, vector<8x32xbf16>
    %cst = arith.constant dense<0.000000e+00> : vector<128x32xf32>
    %3 = tpu.matmul %1, %2, %cst {dimension_numbers = #tpu.dot_dimension_numbers<[1], [0], [0], [1], [0, 0, 1, 1], [], []>} : vector<128x8xbf16>, vector<8x32xbf16>, vector<128x32xf32> -> vector<128x32xf32>
    %4 = arith.truncf %3 : vector<128x32xf32> to vector<128x32xbf16>
    %c0_3 = arith.constant 0 : index
    %c0_4 = arith.constant 0 : index
    %5 = vector.load %arg5[%c0_3, %c0_4] : memref<128x32xbf16, #tpu.memory_space<vmem>>, vector<128x32xbf16>
    tpu.vector_store %arg5[%c0_3, %c0_4], %4 {strides = array<i32>} : memref<128x32xbf16, #tpu.memory_space<vmem>>, vector<128x32xbf16>,
    %c0_5 = arith.constant 0 : index
    %c0_6 = arith.constant 0 : index
    %6 = vector.load %arg4[%c0_5, %c0_6] : memref<32x8xbf16, #tpu.memory_space<vmem>>, vector<32x8xbf16>
    %cst_7 = arith.constant dense<0.000000e+00> : vector<128x8xf32>
    %7 = tpu.matmul %4, %6, %cst_7 {dimension_numbers = #tpu.dot_dimension_numbers<[1], [0], [0], [1], [0, 0, 1, 1], [], []>} : vector<128x32xbf16>, vector<32x8xbf16>, vector<128x8xf32> -> vector<128x8xf32>
    %8 = vector.extract_strided_slice %7 {offsets = [0, 0], sizes = [128, 4], strides = [1, 1]} : vector<128x8xf32> to vector<128x4xf32>
    %c0_8 = arith.constant 0 : index
    %c0_9 = arith.constant 0 : index
    %9 = vector.load %arg6[%c0_8, %c0_9] : memref<128x4xf32, #tpu.memory_space<vmem>>, vector<128x4xf32>
    tpu.vector_store %arg6[%c0_8, %c0_9], %8 {strides = array<i32>} : memref<128x4xf32, #tpu.memory_space<vmem>>, vector<128x4xf32>,
    %10 = vector.extract_strided_slice %7 {offsets = [0, 4], sizes = [128, 4], strides = [1, 1]} : vector<128x8xf32> to vector<128x4xf32>
    %11 = tpu.transpose %10, [1, 0] : vector<128x4xf32> -> vector<4x128xf32>
    %c0_10 = arith.constant 0 : index
    %c0_11 = arith.constant 0 : index
    %12 = vector.load %arg7[%c0_10, %c0_11] : memref<4x128xf32, #tpu.memory_space<vmem>>, vector<4x128xf32>
    tpu.vector_store %arg7[%c0_10, %c0_11], %11 {strides = array<i32>} : memref<4x128xf32, #tpu.memory_space<vmem>>, vector<4x128xf32>,
    return
  }
  func.func @transform_0(%arg0: i32) -> (i32, i32) {
    %c0_i32 = arith.constant 0 : i32
    %c0_i32_0 = arith.constant 0 : i32
    return %arg0, %c0_i32 : i32, i32
  }
  func.func @transform_1(%arg0: i32) -> (i32, i32) {
    %c0_i32 = arith.constant 0 : i32
    %c0_i32_0 = arith.constant 0 : i32
    %c0_i32_1 = arith.constant 0 : i32
    return %c0_i32, %c0_i32_0 : i32, i32
  }
  func.func @transform_2(%arg0: i32) -> (i32, i32) {
    %c0_i32 = arith.constant 0 : i32
    %c0_i32_0 = arith.constant 0 : i32
    %c0_i32_1 = arith.constant 0 : i32
    return %c0_i32, %c0_i32_0 : i32, i32
  }
  func.func @transform_3(%arg0: i32) -> (i32, i32) {
    %c0_i32 = arith.constant 0 : i32
    %c0_i32_0 = arith.constant 0 : i32
    %c0_i32_1 = arith.constant 0 : i32
    return %c0_i32, %c0_i32_0 : i32, i32
  }
  func.func @transform_4(%arg0: i32) -> (i32, i32) {
    %c0_i32 = arith.constant 0 : i32
    %c0_i32_0 = arith.constant 0 : i32
    return %arg0, %c0_i32 : i32, i32
  }
  func.func @transform_5(%arg0: i32) -> (i32, i32) {
    %c0_i32 = arith.constant 0 : i32
    %c0_i32_0 = arith.constant 0 : i32
    return %arg0, %c0_i32 : i32, i32
  }
  func.func @transform_6(%arg0: i32) -> (i32, i32) {
    %c0_i32 = arith.constant 0 : i32
    %c0_i32_0 = arith.constant 0 : i32
    return %c0_i32, %arg0 : i32, i32
  }
}

module attributes {stable_mosaic.version = 11 : i64} {
  func.func @_proj_kernel(%arg0: i32, %arg1: memref<128x32xf32, #tpu.memory_space<vmem>>, %arg2: memref<1x32xf32, #tpu.memory_space<vmem>>, %arg3: memref<32x8xbf16, #tpu.memory_space<vmem>>, %arg4: memref<8x2xbf16, #tpu.memory_space<vmem>>, %arg5: memref<128x8xbf16, #tpu.memory_space<vmem>>, %arg6: memref<128x1xf32, #tpu.memory_space<vmem>>, %arg7: memref<1x128xf32, #tpu.memory_space<vmem>>) attributes {dimension_semantics = [#tpu.dimension_semantics<parallel>], iteration_bounds = array<i64: 1>, scalar_prefetch = 0 : i64, scratch_operands = 0 : i64, tpu.core_type = #tpu.core_type<tc>, window_params = [{transform_indices = @transform_0, window_bounds = array<i64: 128, 32>}, {pipeline_mode = #tpu.pipeline_mode<synchronous>, transform_indices = @transform_1, window_bounds = array<i64: 1, 32>}, {pipeline_mode = #tpu.pipeline_mode<synchronous>, transform_indices = @transform_2, window_bounds = array<i64: 32, 8>}, {pipeline_mode = #tpu.pipeline_mode<synchronous>, transform_indices = @transform_3, window_bounds = array<i64: 8, 2>}, {transform_indices = @transform_4, window_bounds = array<i64: 128, 8>}, {transform_indices = @transform_5, window_bounds = array<i64: 128, 1>}, {transform_indices = @transform_6, window_bounds = array<i64: 1, 128>}]} {
    %c0 = arith.constant 0 : index
    %c0_0 = arith.constant 0 : index
    %0 = vector.load %arg1[%c0, %c0_0] : memref<128x32xf32, #tpu.memory_space<vmem>>, vector<128x32xf32>
    %c0_1 = arith.constant 0 : index
    %c0_2 = arith.constant 0 : index
    %1 = vector.load %arg2[%c0_1, %c0_2] : memref<1x32xf32, #tpu.memory_space<vmem>>, vector<1x32xf32>
    %2 = vector.broadcast %1 : vector<1x32xf32> to vector<128x32xf32>
    %3 = arith.addf %0, %2 : vector<128x32xf32>
    %cst = arith.constant 0.000000e+00 : f32
    %4 = vector.broadcast %cst : f32 to vector<128x32xf32>
    %5 = arith.cmpf ogt, %3, %4 : vector<128x32xf32>
    %cst_3 = arith.constant 0.000000e+00 : f32
    %6 = vector.broadcast %cst_3 : f32 to vector<128x32xf32>
    %7 = arith.minimumf %3, %6 : vector<128x32xf32>
    %8 = math.exp %7 : vector<128x32xf32>
    %cst_4 = arith.constant 1.000000e+00 : f32
    %9 = vector.broadcast %cst_4 : f32 to vector<128x32xf32>
    %10 = arith.subf %8, %9 : vector<128x32xf32>
    %11 = arith.select %5, %3, %10 : vector<128x32xi1>, vector<128x32xf32>
    %12 = arith.truncf %11 : vector<128x32xf32> to vector<128x32xbf16>
    %c0_5 = arith.constant 0 : index
    %c0_6 = arith.constant 0 : index
    %13 = vector.load %arg3[%c0_5, %c0_6] : memref<32x8xbf16, #tpu.memory_space<vmem>>, vector<32x8xbf16>
    %cst_7 = arith.constant dense<0.000000e+00> : vector<128x8xf32>
    %14 = tpu.matmul %12, %13, %cst_7 {dimension_numbers = #tpu.dot_dimension_numbers<[1], [0], [0], [1], [0, 0, 1, 1], [], []>} : vector<128x32xbf16>, vector<32x8xbf16>, vector<128x8xf32> -> vector<128x8xf32>
    %15 = arith.truncf %14 : vector<128x8xf32> to vector<128x8xbf16>
    %c0_8 = arith.constant 0 : index
    %c0_9 = arith.constant 0 : index
    %16 = vector.load %arg5[%c0_8, %c0_9] : memref<128x8xbf16, #tpu.memory_space<vmem>>, vector<128x8xbf16>
    tpu.vector_store %arg5[%c0_8, %c0_9], %15 {strides = array<i32>} : memref<128x8xbf16, #tpu.memory_space<vmem>>, vector<128x8xbf16>,
    %c0_10 = arith.constant 0 : index
    %c0_11 = arith.constant 0 : index
    %17 = vector.load %arg4[%c0_10, %c0_11] : memref<8x2xbf16, #tpu.memory_space<vmem>>, vector<8x2xbf16>
    %cst_12 = arith.constant dense<0.000000e+00> : vector<128x2xf32>
    %18 = tpu.matmul %15, %17, %cst_12 {dimension_numbers = #tpu.dot_dimension_numbers<[1], [0], [0], [1], [0, 0, 1, 1], [], []>} : vector<128x8xbf16>, vector<8x2xbf16>, vector<128x2xf32> -> vector<128x2xf32>
    %19 = vector.extract_strided_slice %18 {offsets = [0, 0], sizes = [128, 1], strides = [1, 1]} : vector<128x2xf32> to vector<128x1xf32>
    %c0_13 = arith.constant 0 : index
    %c0_14 = arith.constant 0 : index
    %20 = vector.load %arg6[%c0_13, %c0_14] : memref<128x1xf32, #tpu.memory_space<vmem>>, vector<128x1xf32>
    tpu.vector_store %arg6[%c0_13, %c0_14], %19 {strides = array<i32>} : memref<128x1xf32, #tpu.memory_space<vmem>>, vector<128x1xf32>,
    %21 = vector.extract_strided_slice %18 {offsets = [0, 1], sizes = [128, 1], strides = [1, 1]} : vector<128x2xf32> to vector<128x1xf32>
    %22 = tpu.transpose %21, [1, 0] : vector<128x1xf32> -> vector<1x128xf32>
    %c0_15 = arith.constant 0 : index
    %c0_16 = arith.constant 0 : index
    %23 = vector.load %arg7[%c0_15, %c0_16] : memref<1x128xf32, #tpu.memory_space<vmem>>, vector<1x128xf32>
    tpu.vector_store %arg7[%c0_15, %c0_16], %22 {strides = array<i32>} : memref<1x128xf32, #tpu.memory_space<vmem>>, vector<1x128xf32>,
    return
  }
  func.func @transform_0(%arg0: i32) -> (i32, i32) {
    %c0_i32 = arith.constant 0 : i32
    %c0_i32_0 = arith.constant 0 : i32
    return %arg0, %c0_i32 : i32, i32
  }
  func.func @transform_1(%arg0: i32) -> (i32, i32) {
    %c0_i32 = arith.constant 0 : i32
    %c0_i32_0 = arith.constant 0 : i32
    %c0_i32_1 = arith.constant 0 : i32
    return %c0_i32, %c0_i32_0 : i32, i32
  }
  func.func @transform_2(%arg0: i32) -> (i32, i32) {
    %c0_i32 = arith.constant 0 : i32
    %c0_i32_0 = arith.constant 0 : i32
    %c0_i32_1 = arith.constant 0 : i32
    return %c0_i32, %c0_i32_0 : i32, i32
  }
  func.func @transform_3(%arg0: i32) -> (i32, i32) {
    %c0_i32 = arith.constant 0 : i32
    %c0_i32_0 = arith.constant 0 : i32
    %c0_i32_1 = arith.constant 0 : i32
    return %c0_i32, %c0_i32_0 : i32, i32
  }
  func.func @transform_4(%arg0: i32) -> (i32, i32) {
    %c0_i32 = arith.constant 0 : i32
    %c0_i32_0 = arith.constant 0 : i32
    return %arg0, %c0_i32 : i32, i32
  }
  func.func @transform_5(%arg0: i32) -> (i32, i32) {
    %c0_i32 = arith.constant 0 : i32
    %c0_i32_0 = arith.constant 0 : i32
    return %arg0, %c0_i32 : i32, i32
  }
  func.func @transform_6(%arg0: i32) -> (i32, i32) {
    %c0_i32 = arith.constant 0 : i32
    %c0_i32_0 = arith.constant 0 : i32
    return %c0_i32, %arg0 : i32, i32
  }
}

module attributes {stable_mosaic.version = 11 : i64} {
  func.func @_attn_kernel(%arg0: i32, %arg1: i32, %arg2: memref<128x128xi8, #tpu.memory_space<vmem>>, %arg3: memref<128x1xf32, #tpu.memory_space<vmem>>, %arg4: memref<1x128xf32, #tpu.memory_space<vmem>>, %arg5: memref<128x8xbf16, #tpu.memory_space<vmem>>, %arg6: memref<128x8xf32, #tpu.memory_space<vmem>>, %arg7: memref<128x1xf32, #tpu.memory_space<vmem>>, %arg8: memref<128x1xf32, #tpu.memory_space<vmem>>, %arg9: memref<128x8xf32, #tpu.memory_space<vmem>>) attributes {dimension_semantics = [#tpu.dimension_semantics<parallel>, #tpu.dimension_semantics<arbitrary>], iteration_bounds = array<i64: 1, 1>, scalar_prefetch = 0 : i64, scratch_operands = 3 : i64, tpu.core_type = #tpu.core_type<tc>, window_params = [{transform_indices = @transform_0, window_bounds = array<i64: 128, 128>}, {transform_indices = @transform_1, window_bounds = array<i64: 128, 1>}, {transform_indices = @transform_2, window_bounds = array<i64: 1, 128>}, {transform_indices = @transform_3, window_bounds = array<i64: 128, 8>}, {transform_indices = @transform_4, window_bounds = array<i64: 128, 8>}]} {
    %c0_i32 = arith.constant 0 : i32
    %0 = arith.cmpi eq, %arg1, %c0_i32 : i32
    %1 = arith.extui %0 : i1 to i32
    %c0_i32_0 = arith.constant 0 : i32
    %2 = arith.cmpi ne, %1, %c0_i32_0 : i32
    scf.if %2 {
      %cst_28 = arith.constant 0xFF800000 : f32
      %46 = vector.broadcast %cst_28 : f32 to vector<128x1xf32>
      %c0_29 = arith.constant 0 : index
      %c0_30 = arith.constant 0 : index
      %47 = vector.load %arg7[%c0_29, %c0_30] : memref<128x1xf32, #tpu.memory_space<vmem>>, vector<128x1xf32>
      tpu.vector_store %arg7[%c0_29, %c0_30], %46 {strides = array<i32>} : memref<128x1xf32, #tpu.memory_space<vmem>>, vector<128x1xf32>,
      %cst_31 = arith.constant 0.000000e+00 : f32
      %48 = vector.broadcast %cst_31 : f32 to vector<128x1xf32>
      %c0_32 = arith.constant 0 : index
      %c0_33 = arith.constant 0 : index
      %49 = vector.load %arg8[%c0_32, %c0_33] : memref<128x1xf32, #tpu.memory_space<vmem>>, vector<128x1xf32>
      tpu.vector_store %arg8[%c0_32, %c0_33], %48 {strides = array<i32>} : memref<128x1xf32, #tpu.memory_space<vmem>>, vector<128x1xf32>,
      %cst_34 = arith.constant 0.000000e+00 : f32
      %50 = vector.broadcast %cst_34 : f32 to vector<128x8xf32>
      %c0_35 = arith.constant 0 : index
      %c0_36 = arith.constant 0 : index
      %51 = vector.load %arg9[%c0_35, %c0_36] : memref<128x8xf32, #tpu.memory_space<vmem>>, vector<128x8xf32>
      tpu.vector_store %arg9[%c0_35, %c0_36], %50 {strides = array<i32>} : memref<128x8xf32, #tpu.memory_space<vmem>>, vector<128x8xf32>,
    } else {
    }
    %c0 = arith.constant 0 : index
    %c0_1 = arith.constant 0 : index
    %3 = vector.load %arg2[%c0, %c0_1] : memref<128x128xi8, #tpu.memory_space<vmem>>, vector<128x128xi8>
    %4 = arith.sitofp %3 : vector<128x128xi8> to vector<128x128xf32>
    %cst = arith.constant 0.000000e+00 : f32
    %5 = vector.broadcast %cst : f32 to vector<128x128xf32>
    %6 = arith.cmpf ogt, %4, %5 : vector<128x128xf32>
    %c0_2 = arith.constant 0 : index
    %c0_3 = arith.constant 0 : index
    %7 = vector.load %arg5[%c0_2, %c0_3] : memref<128x8xbf16, #tpu.memory_space<vmem>>, vector<128x8xbf16>
    %c0_4 = arith.constant 0 : index
    %c0_5 = arith.constant 0 : index
    %8 = vector.load %arg3[%c0_4, %c0_5] : memref<128x1xf32, #tpu.memory_space<vmem>>, vector<128x1xf32>
    %c0_6 = arith.constant 0 : index
    %c0_7 = arith.constant 0 : index
    %9 = vector.load %arg4[%c0_6, %c0_7] : memref<1x128xf32, #tpu.memory_space<vmem>>, vector<1x128xf32>
    %10 = vector.broadcast %8 : vector<128x1xf32> to vector<128x128xf32>
    %11 = vector.broadcast %9 : vector<1x128xf32> to vector<128x128xf32>
    %12 = arith.addf %10, %11 : vector<128x128xf32>
    %cst_8 = arith.constant 2.000000e-01 : f32
    %13 = vector.broadcast %cst_8 : f32 to vector<128x128xf32>
    %14 = arith.mulf %13, %12 : vector<128x128xf32>
    %15 = arith.maximumf %12, %14 : vector<128x128xf32>
    %cst_9 = arith.constant -1.000000e+30 : f32
    %16 = vector.broadcast %cst_9 : f32 to vector<128x128xf32>
    %17 = arith.select %6, %15, %16 : vector<128x128xi1>, vector<128x128xf32>
    %c0_10 = arith.constant 0 : index
    %c0_11 = arith.constant 0 : index
    %18 = vector.load %arg7[%c0_10, %c0_11] : memref<128x1xf32, #tpu.memory_space<vmem>>, vector<128x1xf32>
    %cst_12 = arith.constant dense<0xFF800000> : vector<128xf32>
    %19 = vector.multi_reduction <maximumf>, %17, %cst_12 [1] : vector<128x128xf32> to vector<128xf32>
    %20 = vector.shape_cast %19 : vector<128xf32> to vector<128x1xf32>
    %21 = arith.maximumf %18, %20 : vector<128x1xf32>
    %22 = arith.subf %18, %21 : vector<128x1xf32>
    %23 = math.exp %22 : vector<128x1xf32>
    %24 = vector.broadcast %21 : vector<128x1xf32> to vector<128x128xf32>
    %25 = arith.subf %17, %24 : vector<128x128xf32>
    %26 = math.exp %25 : vector<128x128xf32>
    %cst_13 = arith.constant 0.000000e+00 : f32
    %27 = vector.broadcast %cst_13 : f32 to vector<128x128xf32>
    %28 = arith.select %6, %26, %27 : vector<128x128xi1>, vector<128x128xf32>
    %c0_14 = arith.constant 0 : index
    %c0_15 = arith.constant 0 : index
    %29 = vector.load %arg8[%c0_14, %c0_15] : memref<128x1xf32, #tpu.memory_space<vmem>>, vector<128x1xf32>
    %30 = arith.mulf %23, %29 : vector<128x1xf32>
    %cst_16 = arith.constant dense<0.000000e+00> : vector<128xf32>
    %31 = vector.multi_reduction <add>, %28, %cst_16 [1] : vector<128x128xf32> to vector<128xf32>
    %32 = vector.shape_cast %31 : vector<128xf32> to vector<128x1xf32>
    %33 = arith.addf %30, %32 : vector<128x1xf32>
    %c0_17 = arith.constant 0 : index
    %c0_18 = arith.constant 0 : index
    %34 = vector.load %arg8[%c0_17, %c0_18] : memref<128x1xf32, #tpu.memory_space<vmem>>, vector<128x1xf32>
    tpu.vector_store %arg8[%c0_17, %c0_18], %33 {strides = array<i32>} : memref<128x1xf32, #tpu.memory_space<vmem>>, vector<128x1xf32>,
    %c0_19 = arith.constant 0 : index
    %c0_20 = arith.constant 0 : index
    %35 = vector.load %arg9[%c0_19, %c0_20] : memref<128x8xf32, #tpu.memory_space<vmem>>, vector<128x8xf32>
    %36 = vector.broadcast %23 : vector<128x1xf32> to vector<128x8xf32>
    %37 = arith.mulf %36, %35 : vector<128x8xf32>
    %38 = arith.truncf %28 : vector<128x128xf32> to vector<128x128xbf16>
    %cst_21 = arith.constant dense<0.000000e+00> : vector<128x8xf32>
    %39 = tpu.matmul %38, %7, %cst_21 {dimension_numbers = #tpu.dot_dimension_numbers<[1], [0], [0], [1], [0, 0, 1, 1], [], []>} : vector<128x128xbf16>, vector<128x8xbf16>, vector<128x8xf32> -> vector<128x8xf32>
    %40 = arith.addf %37, %39 : vector<128x8xf32>
    %c0_22 = arith.constant 0 : index
    %c0_23 = arith.constant 0 : index
    %41 = vector.load %arg9[%c0_22, %c0_23] : memref<128x8xf32, #tpu.memory_space<vmem>>, vector<128x8xf32>
    tpu.vector_store %arg9[%c0_22, %c0_23], %40 {strides = array<i32>} : memref<128x8xf32, #tpu.memory_space<vmem>>, vector<128x8xf32>,
    %c0_24 = arith.constant 0 : index
    %c0_25 = arith.constant 0 : index
    %42 = vector.load %arg7[%c0_24, %c0_25] : memref<128x1xf32, #tpu.memory_space<vmem>>, vector<128x1xf32>
    tpu.vector_store %arg7[%c0_24, %c0_25], %21 {strides = array<i32>} : memref<128x1xf32, #tpu.memory_space<vmem>>, vector<128x1xf32>,
    %c0_i32_26 = arith.constant 0 : i32
    %43 = arith.cmpi eq, %arg1, %c0_i32_26 : i32
    %44 = arith.extui %43 : i1 to i32
    %c0_i32_27 = arith.constant 0 : i32
    %45 = arith.cmpi ne, %44, %c0_i32_27 : i32
    scf.if %45 {
      %c0_28 = arith.constant 0 : index
      %c0_29 = arith.constant 0 : index
      %46 = vector.load %arg8[%c0_28, %c0_29] : memref<128x1xf32, #tpu.memory_space<vmem>>, vector<128x1xf32>
      %47 = tpu.reciprocal %46 {approx = true} : vector<128x1xf32> -> vector<128x1xf32>
      %c0_30 = arith.constant 0 : index
      %c0_31 = arith.constant 0 : index
      %48 = vector.load %arg9[%c0_30, %c0_31] : memref<128x8xf32, #tpu.memory_space<vmem>>, vector<128x8xf32>
      %49 = vector.broadcast %47 : vector<128x1xf32> to vector<128x8xf32>
      %50 = arith.mulf %48, %49 : vector<128x8xf32>
      %c0_32 = arith.constant 0 : index
      %c0_33 = arith.constant 0 : index
      %51 = vector.load %arg6[%c0_32, %c0_33] : memref<128x8xf32, #tpu.memory_space<vmem>>, vector<128x8xf32>
      tpu.vector_store %arg6[%c0_32, %c0_33], %50 {strides = array<i32>} : memref<128x8xf32, #tpu.memory_space<vmem>>, vector<128x8xf32>,
    } else {
    }
    return
  }
  func.func @transform_0(%arg0: i32, %arg1: i32) -> (i32, i32) {
    %c0_i32 = arith.constant 0 : i32
    return %arg0, %arg1 : i32, i32
  }
  func.func @transform_1(%arg0: i32, %arg1: i32) -> (i32, i32) {
    %c0_i32 = arith.constant 0 : i32
    %c0_i32_0 = arith.constant 0 : i32
    return %arg0, %c0_i32 : i32, i32
  }
  func.func @transform_2(%arg0: i32, %arg1: i32) -> (i32, i32) {
    %c0_i32 = arith.constant 0 : i32
    %c0_i32_0 = arith.constant 0 : i32
    return %c0_i32, %arg1 : i32, i32
  }
  func.func @transform_3(%arg0: i32, %arg1: i32) -> (i32, i32) {
    %c0_i32 = arith.constant 0 : i32
    %c0_i32_0 = arith.constant 0 : i32
    return %arg1, %c0_i32 : i32, i32
  }
  func.func @transform_4(%arg0: i32, %arg1: i32) -> (i32, i32) {
    %c0_i32 = arith.constant 0 : i32
    %c0_i32_0 = arith.constant 0 : i32
    return %arg0, %c0_i32 : i32, i32
  }
}

module attributes {stable_mosaic.version = 11 : i64} {
  func.func @_pool_kernel(%arg0: memref<128x8xf32, #tpu.memory_space<vmem>>, %arg1: memref<1x8xf32, #tpu.memory_space<vmem>>, %arg2: memref<1x128xi32, #tpu.memory_space<vmem>>, %arg3: memref<8x4xf32, #tpu.memory_space<vmem>>, %arg4: memref<1x4xf32, #tpu.memory_space<vmem>>, %arg5: memref<2x4xf32, #tpu.memory_space<vmem>>) attributes {dimension_semantics = [], scalar_prefetch = 0 : i64, scratch_operands = 0 : i64, tpu.core_type = #tpu.core_type<tc>} {
    %c0 = arith.constant 0 : index
    %c0_0 = arith.constant 0 : index
    %0 = vector.load %arg0[%c0, %c0_0] : memref<128x8xf32, #tpu.memory_space<vmem>>, vector<128x8xf32>
    %c0_1 = arith.constant 0 : index
    %c0_2 = arith.constant 0 : index
    %1 = vector.load %arg1[%c0_1, %c0_2] : memref<1x8xf32, #tpu.memory_space<vmem>>, vector<1x8xf32>
    %2 = vector.broadcast %1 : vector<1x8xf32> to vector<128x8xf32>
    %3 = arith.addf %0, %2 : vector<128x8xf32>
    %cst = arith.constant 0.000000e+00 : f32
    %4 = vector.broadcast %cst : f32 to vector<128x8xf32>
    %5 = arith.cmpf ogt, %3, %4 : vector<128x8xf32>
    %cst_3 = arith.constant 0.000000e+00 : f32
    %6 = vector.broadcast %cst_3 : f32 to vector<128x8xf32>
    %7 = arith.minimumf %3, %6 : vector<128x8xf32>
    %8 = math.exp %7 : vector<128x8xf32>
    %cst_4 = arith.constant 1.000000e+00 : f32
    %9 = vector.broadcast %cst_4 : f32 to vector<128x8xf32>
    %10 = arith.subf %8, %9 : vector<128x8xf32>
    %11 = arith.select %5, %3, %10 : vector<128x8xi1>, vector<128x8xf32>
    %12 = tpu.iota {dimensions = array<i32: 0>} : vector<2x128xi32>
    %c0_5 = arith.constant 0 : index
    %c0_6 = arith.constant 0 : index
    %13 = vector.load %arg2[%c0_5, %c0_6] : memref<1x128xi32, #tpu.memory_space<vmem>>, vector<1x128xi32>
    %14 = vector.broadcast %13 : vector<1x128xi32> to vector<2x128xi32>
    %15 = arith.cmpi eq, %12, %14 : vector<2x128xi32>
    %16 = arith.extui %15 : vector<2x128xi1> to vector<2x128xi32>
    %17 = arith.sitofp %16 : vector<2x128xi32> to vector<2x128xf32>
    %cst_7 = arith.constant dense<0.000000e+00> : vector<2xf32>
    %18 = vector.multi_reduction <add>, %17, %cst_7 [1] : vector<2x128xf32> to vector<2xf32>
    %19 = vector.shape_cast %18 : vector<2xf32> to vector<2x1xf32>
    %cst_8 = arith.constant dense<0.000000e+00> : vector<2x8xf32>
    %20 = tpu.matmul %17, %11, %cst_8 {dimension_numbers = #tpu.dot_dimension_numbers<[1], [0], [0], [1], [0, 0, 1, 1], [], []>} : vector<2x128xf32>, vector<128x8xf32>, vector<2x8xf32> -> vector<2x8xf32>
    %21 = vector.broadcast %19 : vector<2x1xf32> to vector<2x8xf32>
    %22 = arith.divf %20, %21 : vector<2x8xf32>
    %c0_9 = arith.constant 0 : index
    %c0_10 = arith.constant 0 : index
    %23 = vector.load %arg3[%c0_9, %c0_10] : memref<8x4xf32, #tpu.memory_space<vmem>>, vector<8x4xf32>
    %cst_11 = arith.constant dense<0.000000e+00> : vector<2x4xf32>
    %24 = tpu.matmul %22, %23, %cst_11 {dimension_numbers = #tpu.dot_dimension_numbers<[1], [0], [0], [1], [0, 0, 1, 1], [], []>} : vector<2x8xf32>, vector<8x4xf32>, vector<2x4xf32> -> vector<2x4xf32>
    %c0_12 = arith.constant 0 : index
    %c0_13 = arith.constant 0 : index
    %25 = vector.load %arg4[%c0_12, %c0_13] : memref<1x4xf32, #tpu.memory_space<vmem>>, vector<1x4xf32>
    %26 = vector.broadcast %25 : vector<1x4xf32> to vector<2x4xf32>
    %27 = arith.addf %24, %26 : vector<2x4xf32>
    %c0_14 = arith.constant 0 : index
    %c0_15 = arith.constant 0 : index
    %28 = vector.load %arg5[%c0_14, %c0_15] : memref<2x4xf32, #tpu.memory_space<vmem>>, vector<2x4xf32>
    tpu.vector_store %arg5[%c0_14, %c0_15], %27 {strides = array<i32>} : memref<2x4xf32, #tpu.memory_space<vmem>>, vector<2x4xf32>,
    return
  }
}

</mosaic_0001>

<bundles_post_ra>
// kernel: gat_forward.5
= control target key start
LH: loop header
LB: loop body
LE: loop exit
PB: predicated region body
PF: predicated region fallthrough
CT: control target
= control target key end

     0   :  { %vm71_vm0 = vcmask 1043456   ;;  %vm46_vm1 = vcmask 64512   ;;  %vm140_vm2 = vcmask 257024   ;;  %vm213_vm3 = vcmask 261120   ;;  %s443_s11 = smov 124   ;;  %s699_s1 = inlined_call_operand.vmem [shape: f32[1,8], index: 1, kind: input, shape index: {}]   ;;  %s700_s2 = inlined_call_operand.vmem [shape: bf16[8,32], index: 2, kind: input, shape index: {}]   ;;  %s701_s0 = inlined_call_operand.vmem [shape: f32[128,8], index: 0, kind: input, shape index: {}]   ;;  %s702_s3 = inlined_call_operand.vmem [shape: bf16[32,8], index: 3, kind: input, shape index: {}]   ;;  %s703_s4 = inlined_call_operand.vmem [shape: bf16[128,32], index: 4, kind: output, shape index: {0}]   ;;  %s704_s5 = inlined_call_operand.vmem [shape: f32[128,4], index: 5, kind: output, shape index: {1}]   ;;  %s705_s6 = inlined_call_operand.vmem [shape: f32[4,128], index: 6, kind: output, shape index: {2}]  }
   0x1   :  { %v45_v0 = vld [vmem:[%s700_s2] sm:$0xf]  ;;  %v22_v2 = vld [vmem:[%s701_s0 + $0x8] sm:$0xff]  ;;  %v23_v5 = vld [vmem:[%s701_s0 + $0x10] sm:$0xff]  ;;  %vm287_vm4 = vcmask 31744  }
   0x2   :  { %v21_v1 = vld [vmem:[%s701_s0] sm:$0xff]  ;;  %v73_v3 = vsel %vm71_vm0, %v45_v0, 0  ;;  %v24_v6 = vld [vmem:[%s701_s0 + $0x18] sm:$0xff]  ;;  %v26_v9 = vld [vmem:[%s701_s0 + $0x28] sm:$0xff] }
   0x3   :  { %v37_v4 = vpack.c.bf16 %v22_v2, %v21_v1  ;;  %82 = vmatpush.bf16.msra.mxu0 %v73_v3  ;;  %439 = vmatpush.bf16.msra.mxu3 %v73_v3  ;;  %v38_v7 = vpack.c.bf16 %v24_v6, %v23_v5  ;;  %v25_v8 = vld [vmem:[%s701_s0 + $0x20] sm:$0xff]  ;;  %v31_v11 = vld [vmem:[%s701_s0 + $0x50] sm:$0xff]  ;;  %v32_v12 = vld [vmem:[%s701_s0 + $0x58] sm:$0xff] }
   0x4   :  { %v39_v10 = vpack.c.bf16 %v26_v9, %v25_v8  ;;  %v42_v13 = vpack.c.bf16 %v32_v12, %v31_v11  ;;  %v27_v14 = vld [vmem:[%s701_s0 + $0x30] sm:$0xff]  ;;  %v28_v15 = vld [vmem:[%s701_s0 + $0x38] sm:$0xff]  ;;  %v33_v16 = vld [vmem:[%s701_s0 + $0x60] sm:$0xff] }
   0x5   :  { %v34_v17 = vld [vmem:[%s701_s0 + $0x68] sm:$0xff]  ;;  %v40_v18 = vpack.c.bf16 %v28_v15, %v27_v14  ;;  %v29_v20 = vld [vmem:[%s701_s0 + $0x40] sm:$0xff]  ;;  %v35_v23 = vld [vmem:[%s701_s0 + $0x70] sm:$0xff] }
   0x6   :  { %413 = vmatmul.msk.bf16.vlgmr.msra.gmra.mxu0 %vm46_vm1, %v37_v4  ;;  %418 = vmatmul.msk.bf16.vlgmr.msra.gmra.mxu3 %vm46_vm1, %v42_v13  ;;  %v43_v19 = vpack.c.bf16 %v34_v17, %v33_v16  ;;  %v30_v21 = vld [vmem:[%s701_s0 + $0x48] sm:$0xff]  ;;  %v36_v24 = vld [vmem:[%s701_s0 + $0x78] sm:$0xff]  ;;  %v437_v27 = vld [vmem:[%s702_s3] sm:$0xff] }
   0x7   :  { %v41_v22 = vpack.c.bf16 %v30_v21, %v29_v20  ;;  %v44_v25 = vpack.c.bf16 %v36_v24, %v35_v23  ;;  %v438_v26 = vld [vmem:[%s702_s3 + $0x8] sm:$0xff] }
   0x8   :  { %244 = vmatpush.bf16.msra.mxu1 %v438_v26  ;;  %440 = vmatpush.bf16.msra.mxu2 %v438_v26 }
   0xc   :  { %245 = vmatpush.bf16.msra.mxu1 %v437_v27  ;;  %441 = vmatpush.bf16.msra.mxu2 %v437_v27 }
  0x16   :  { %414 = vmatmul.msk.bf16.gmra.mxu0 %vm46_vm1, %v38_v7  ;;  %419 = vmatmul.msk.bf16.gmra.mxu3 %vm46_vm1, %v43_v19 }
  0x26   :  { %415 = vmatmul.msk.bf16.gmra.mxu0 %vm46_vm1, %v39_v10  ;;  %420 = vmatmul.msk.bf16.gmra.mxu3 %vm46_vm1, %v44_v25 }
  0x36   :  { %416 = vmatmul.msk.bf16.gmra.mxu0 %vm46_vm1, %v40_v18 }
  0x46   :  { %417 = vmatmul.msk.bf16.gmra.mxu0 %vm46_vm1, %v41_v22 }
  0x83   :  { %v84_v28 = vpop.f32.mrf.mxu0 }
  0x84   :  { %v124_v29 = vpack.c.bf16 %v84_v28, %v84_v28 }
  0x86   :  { %141 = vst.msk [vmem:[%s703_s4] sm:$0xf] %vm140_vm2, %v124_v29  ;;  %v177_v32 = vunpack.c.l.b16 %v124_v29 }
  0x89   :  { %v109_v45 = vpop.f32.mrf.mxu3 }
  0x8a   :  { %v134_v50 = vpack.c.bf16 %v109_v45, %v109_v45 }
  0x8b   :  { %v86_v30 = vpop.f32.mrf.mxu0 }
  0x8c   :  { %v125_v31 = vpack.c.bf16 %v86_v30, %v86_v30  ;;  %151 = vst.msk [vmem:[%s703_s4 + $0x28] sm:$0xf] %vm140_vm2, %v134_v50  ;;  %v187_v7 = vunpack.c.l.b16 %v134_v50 }
  0x8e   :  { %142 = vst.msk [vmem:[%s703_s4 + $0x4] sm:$0xf] %vm140_vm2, %v125_v31  ;;  %v178_v33 = vunpack.c.l.b16 %v125_v31 }
  0x90   :  { %v193_v34 = vpack.c.b16 %v178_v33, %v177_v32 }
  0x91   :  { %v111_v52 = vpop.f32.mrf.mxu3 }
  0x92   :  { %429 = vmatmul.msk.bf16.vlgmr.msra.gmra.mxu1 %vm213_vm3, %v193_v34  ;;  %v135_v54 = vpack.c.bf16 %v111_v52, %v111_v52 }
  0x93   :  { %v89_v35 = vpop.f32.mrf.mxu0 }
  0x94   :  { %v126_v36 = vpack.c.bf16 %v89_v35, %v89_v35  ;;  %152 = vst.msk [vmem:[%s703_s4 + $0x2c] sm:$0xf] %vm140_vm2, %v135_v54  ;;  %v188_v8 = vunpack.c.l.b16 %v135_v54 }
  0x96   :  { %143 = vst.msk [vmem:[%s703_s4 + $0x8] sm:$0xf] %vm140_vm2, %v126_v36  ;;  %v179_v39 = vunpack.c.l.b16 %v126_v36  ;;  %v198_v9 = vpack.c.b16 %v188_v8, %v187_v7 }
  0x99   :  { %v114_v56 = vpop.f32.mrf.mxu3 }
  0x9a   :  { %v136_v58 = vpack.c.bf16 %v114_v56, %v114_v56 }
  0x9b   :  { %v91_v37 = vpop.f32.mrf.mxu0 }
  0x9c   :  { %v127_v38 = vpack.c.bf16 %v91_v37, %v91_v37  ;;  %153 = vst.msk [vmem:[%s703_s4 + $0x30] sm:$0xf] %vm140_vm2, %v136_v58  ;;  %v189_v10 = vunpack.c.l.b16 %v136_v58 }
  0x9e   :  { %144 = vst.msk [vmem:[%s703_s4 + $0xc] sm:$0xf] %vm140_vm2, %v127_v38  ;;  %v180_v40 = vunpack.c.l.b16 %v127_v38 }
  0xa0   :  { %v194_v41 = vpack.c.b16 %v180_v40, %v179_v39 }
  0xa1   :  { %v116_v63 = vpop.f32.mrf.mxu3 }
  0xa2   :  { %430 = vmatmul.msk.bf16.gmra.mxu1 %vm213_vm3, %v194_v41  ;;  %v137_v1 = vpack.c.bf16 %v116_v63, %v116_v63 }
  0xa3   :  { %v94_v42 = vpop.f32.mrf.mxu0 }
  0xa4   :  { %v128_v43 = vpack.c.bf16 %v94_v42, %v94_v42  ;;  %154 = vst.msk [vmem:[%s703_s4 + $0x34] sm:$0xf] %vm140_vm2, %v137_v1  ;;  %v190_v11 = vunpack.c.l.b16 %v137_v1 }
  0xa6   :  { %145 = vst.msk [vmem:[%s703_s4 + $0x10] sm:$0xf] %vm140_vm2, %v128_v43  ;;  %v181_v47 = vunpack.c.l.b16 %v128_v43  ;;  %v199_v14 = vpack.c.b16 %v190_v11, %v189_v10 }
  0xa9   :  { %v119_v12 = vpop.f32.mrf.mxu3 }
  0xaa   :  { %v138_v13 = vpack.c.bf16 %v119_v12, %v119_v12 }
  0xab   :  { %v96_v44 = vpop.f32.mrf.mxu0 }
  0xac   :  { %v129_v46 = vpack.c.bf16 %v96_v44, %v96_v44  ;;  %155 = vst.msk [vmem:[%s703_s4 + $0x38] sm:$0xf] %vm140_vm2, %v138_v13  ;;  %v191_v17 = vunpack.c.l.b16 %v138_v13 }
  0xae   :  { %146 = vst.msk [vmem:[%s703_s4 + $0x14] sm:$0xf] %vm140_vm2, %v129_v46  ;;  %v182_v48 = vunpack.c.l.b16 %v129_v46 }
  0xb0   :  { %v195_v49 = vpack.c.b16 %v182_v48, %v181_v47 }
  0xb1   :  { %v121_v15 = vpop.f32.mrf.mxu3 }
  0xb2   :  { %431 = vmatmul.msk.bf16.gmra.mxu1 %vm213_vm3, %v195_v49  ;;  %v139_v16 = vpack.c.bf16 %v121_v15, %v121_v15 }
  0xb3   :  { %v99_v51 = vpop.f32.mrf.mxu0 }
  0xb4   :  { %v130_v53 = vpack.c.bf16 %v99_v51, %v99_v51  ;;  %156 = vst.msk [vmem:[%s703_s4 + $0x3c] sm:$0xf] %vm140_vm2, %v139_v16  ;;  %v192_v18 = vunpack.c.l.b16 %v139_v16 }
  0xb6   :  { %147 = vst.msk [vmem:[%s703_s4 + $0x18] sm:$0xf] %vm140_vm2, %v130_v53  ;;  %v183_v59 = vunpack.c.l.b16 %v130_v53  ;;  %v200_v19 = vpack.c.b16 %v192_v18, %v191_v17 }
  0xbb   :  { %v101_v55 = vpop.f32.mrf.mxu0 }
  0xbc   :  { %v131_v57 = vpack.c.bf16 %v101_v55, %v101_v55 }
  0xbe   :  { %148 = vst.msk [vmem:[%s703_s4 + $0x1c] sm:$0xf] %vm140_vm2, %v131_v57  ;;  %v184_v60 = vunpack.c.l.b16 %v131_v57 }
  0xc0   :  { %v196_v61 = vpack.c.b16 %v184_v60, %v183_v59 }
  0xc2   :  { %432 = vmatmul.msk.bf16.gmra.mxu1 %vm213_vm3, %v196_v61 }
  0xc3   :  { %v104_v62 = vpop.f32.mrf.mxu0 }
  0xc4   :  { %v132_v0 = vpack.c.bf16 %v104_v62, %v104_v62 }
  0xc6   :  { %149 = vst.msk [vmem:[%s703_s4 + $0x20] sm:$0xf] %vm140_vm2, %v132_v0  ;;  %v185_v4 = vunpack.c.l.b16 %v132_v0 }
  0xcb   :  { %v106_v2 = vpop.f32.mrf.mxu0 }
  0xcc   :  { %v133_v3 = vpack.c.bf16 %v106_v2, %v106_v2 }
  0xce   :  { %150 = vst.msk [vmem:[%s703_s4 + $0x24] sm:$0xf] %vm140_vm2, %v133_v3  ;;  %v186_v5 = vunpack.c.l.b16 %v133_v3 }
  0xd0   :  { %v197_v6 = vpack.c.b16 %v186_v5, %v185_v4 }
  0xd2   :  { %433 = vmatmul.msk.bf16.vlgmr.msra.gmra.mxu2 %vm213_vm3, %v197_v6 }
  0xe2   :  { %434 = vmatmul.msk.bf16.gmra.mxu2 %vm213_vm3, %v198_v9 }
  0xf2   :  { %435 = vmatmul.msk.bf16.gmra.mxu2 %vm213_vm3, %v199_v14 }
 0x102   :  { %436 = vmatmul.msk.bf16.gmra.mxu2 %vm213_vm3, %v200_v19 }
 0x10f   :  { %v247_v20 = vpop.f32.mrf.mxu1 }
 0x110   :  { %288 = vst.msk [vmem:[%s704_s5] sm:$0xff] %vm287_vm4, %v247_v20  ;;  %320 = vrot.lane.b32.xlu0 %v247_v20, %s443_s11 }
 0x117   :  { %v249_v21 = vpop.f32.mrf.mxu1 }
 0x118   :  { %289 = vst.msk [vmem:[%s704_s5 + $0x8] sm:$0xff] %vm287_vm4, %v249_v21  ;;  %322 = vrot.lane.b32.xlu0 %v249_v21, %s443_s11 }
 0x11f   :  { %v252_v22 = vpop.f32.mrf.mxu1 }
 0x120   :  { %290 = vst.msk [vmem:[%s704_s5 + $0x10] sm:$0xff] %vm287_vm4, %v252_v22  ;;  %324 = vrot.lane.b32.xlu1 %v252_v22, %s443_s11 }
 0x127   :  { %v254_v23 = vpop.f32.mrf.mxu1 }
 0x128   :  { %291 = vst.msk [vmem:[%s704_s5 + $0x18] sm:$0xff] %vm287_vm4, %v254_v23  ;;  %326 = vrot.lane.b32.xlu1 %v254_v23, %s443_s11 }
 0x12f   :  { %v257_v24 = vpop.f32.mrf.mxu1 }
 0x130   :  { %292 = vst.msk [vmem:[%s704_s5 + $0x20] sm:$0xff] %vm287_vm4, %v257_v24  ;;  %328 = vrot.lane.b32.xlu2 %v257_v24, %s443_s11 }
 0x137   :  { %v259_v25 = vpop.f32.mrf.mxu1 }
 0x138   :  { %293 = vst.msk [vmem:[%s704_s5 + $0x28] sm:$0xff] %vm287_vm4, %v259_v25  ;;  %330 = vrot.lane.b32.xlu2 %v259_v25, %s443_s11 }
 0x13f   :  { %v262_v26 = vpop.f32.mrf.mxu1 }
 0x140   :  { %294 = vst.msk [vmem:[%s704_s5 + $0x30] sm:$0xff] %vm287_vm4, %v262_v26  ;;  %332 = vrot.lane.b32.xlu0 %v262_v26, %s443_s11 }
 0x147   :  { %v264_v27 = vpop.f32.mrf.mxu1 }
 0x148   :  { %295 = vst.msk [vmem:[%s704_s5 + $0x38] sm:$0xff] %vm287_vm4, %v264_v27  ;;  %334 = vrot.lane.b32.xlu1 %v264_v27, %s443_s11 }
 0x155   :  { %v267_v28 = vpop.f32.mrf.mxu2 }
 0x156   :  { %296 = vst.msk [vmem:[%s704_s5 + $0x40] sm:$0xff] %vm287_vm4, %v267_v28  ;;  %336 = vrot.lane.b32.xlu2 %v267_v28, %s443_s11 }
 0x15d   :  { %v269_v29 = vpop.f32.mrf.mxu2 }
 0x15e   :  { %297 = vst.msk [vmem:[%s704_s5 + $0x48] sm:$0xff] %vm287_vm4, %v269_v29  ;;  %338 = vrot.lane.b32.xlu0 %v269_v29, %s443_s11 }
 0x165   :  { %v272_v30 = vpop.f32.mrf.mxu2 }
 0x166   :  { %298 = vst.msk [vmem:[%s704_s5 + $0x50] sm:$0xff] %vm287_vm4, %v272_v30  ;;  %340 = vrot.lane.b32.xlu1 %v272_v30, %s443_s11 }
 0x16d   :  { %v274_v31 = vpop.f32.mrf.mxu2 }
 0x16e   :  { %299 = vst.msk [vmem:[%s704_s5 + $0x58] sm:$0xff] %vm287_vm4, %v274_v31  ;;  %342 = vrot.lane.b32.xlu2 %v274_v31, %s443_s11 }
 0x175   :  { %v277_v32 = vpop.f32.mrf.mxu2 }
 0x176   :  { %300 = vst.msk [vmem:[%s704_s5 + $0x60] sm:$0xff] %vm287_vm4, %v277_v32  ;;  %344 = vrot.lane.b32.xlu0 %v277_v32, %s443_s11 }
 0x17d   :  { %v279_v33 = vpop.f32.mrf.mxu2 }
 0x17e   :  { %301 = vst.msk [vmem:[%s704_s5 + $0x68] sm:$0xff] %vm287_vm4, %v279_v33  ;;  %346 = vrot.lane.b32.xlu1 %v279_v33, %s443_s11 }
 0x182   :  { %v321_v36 = vpop.permute.xlu0 %320 }
 0x185   :  { %v282_v34 = vpop.f32.mrf.mxu2 }
 0x186   :  { %302 = vst.msk [vmem:[%s704_s5 + $0x70] sm:$0xff] %vm287_vm4, %v282_v34  ;;  %348 = vrot.lane.b32.xlu2 %v282_v34, %s443_s11 }
 0x18a   :  { %v323_v37 = vpop.permute.xlu0 %322  ;;  %v329_v40 = vpop.permute.xlu2 %328 }
 0x18d   :  { %v284_v35 = vpop.f32.mrf.mxu2 }
 0x18e   :  { %303 = vst.msk [vmem:[%s704_s5 + $0x78] sm:$0xff] %vm287_vm4, %v284_v35  ;;  %350 = vrot.lane.b32.xlu0 %v284_v35, %s443_s11 }
 0x192   :  { %v325_v38 = vpop.permute.xlu1 %324  ;;  %v331_v41 = vpop.permute.xlu2 %330 }
 0x19a   :  { %v327_v39 = vpop.permute.xlu1 %326 }
 0x1b0   :  { %v337_v44 = vpop.permute.xlu2 %336 }
 0x1b2   :  { %v333_v42 = vpop.permute.xlu0 %332 }
 0x1b3   :  { %368 = vxpose.xlu1.b32.start [1/16] (narrow) %v321_v36, 8 }
 0x1ba   :  { %v335_v43 = vpop.permute.xlu1 %334 }
 0x1bb   :  { %369 = vxpose.xlu1.b32.cont [2/16] (narrow) %v323_v37, 8 }
 0x1c3   :  { %370 = vxpose.xlu1.b32.cont [3/16] (narrow) %v325_v38, 8 }
 0x1c8   :  { %v343_v47 = vpop.permute.xlu2 %342 }
 0x1cb   :  { %371 = vxpose.xlu1.b32.cont [4/16] (narrow) %v327_v39, 8 }
 0x1d0   :  { %v339_v45 = vpop.permute.xlu0 %338 }
 0x1d3   :  { %372 = vxpose.xlu1.b32.cont [5/16] (narrow) %v329_v40, 8 }
 0x1d8   :  { %v341_v46 = vpop.permute.xlu1 %340 }
 0x1db   :  { %373 = vxpose.xlu1.b32.cont [6/16] (narrow) %v331_v41, 8 }
 0x1e0   :  { %v349_v50 = vpop.permute.xlu2 %348 }
 0x1e3   :  { %374 = vxpose.xlu1.b32.cont [7/16] (narrow) %v333_v42, 8 }
 0x1e8   :  { %v345_v48 = vpop.permute.xlu0 %344 }
 0x1eb   :  { %375 = vxpose.xlu1.b32.cont [8/16] (narrow) %v335_v43, 8 }
 0x1f0   :  { %v347_v49 = vpop.permute.xlu1 %346 }
 0x1f3   :  { %376 = vxpose.xlu1.b32.cont [9/16] (narrow) %v337_v44, 8 }
 0x1fb   :  { %377 = vxpose.xlu1.b32.cont [10/16] (narrow) %v339_v45, 8 }
 0x200   :  { %v351_v51 = vpop.permute.xlu0 %350 }
 0x203   :  { %378 = vxpose.xlu1.b32.cont [11/16] (narrow) %v341_v46, 8 }
 0x20b   :  { %379 = vxpose.xlu1.b32.cont [12/16] (narrow) %v343_v47, 8 }
 0x213   :  { %380 = vxpose.xlu1.b32.cont [13/16] (narrow) %v345_v48, 8 }
 0x21b   :  { %381 = vxpose.xlu1.b32.cont [14/16] (narrow) %v347_v49, 8 }
 0x223   :  { %382 = vxpose.xlu1.b32.cont [15/16] (narrow) %v349_v50, 8 }
 0x22b   :  { %383 = vxpose.xlu1.b32.end [16/16] (narrow) %v351_v51, 8 }
 0x257   :  { %v384_v52 = vpop.trf.xlu1 }
 0x258   :  { %400 = vst [vmem:[%s705_s6] sm:$0xf] %v384_v52 }

// kernel: gat_forward.7
= control target key start
LH: loop header
LB: loop body
LE: loop exit
PB: predicated region body
PF: predicated region fallthrough
CT: control target
= control target key end

     0   :  { %vm177_vm4 = vcmask 261120   ;;  %s608_s13 = smov 127   ;;  %s933_s2 = inlined_call_operand.vmem [shape: bf16[32,8], index: 2, kind: input, shape index: {}]   ;;  %s934_s0 = inlined_call_operand.vmem [shape: f32[128,32], index: 0, kind: input, shape index: {}]   ;;  %s935_s1 = inlined_call_operand.vmem [shape: f32[1,32], index: 1, kind: input, shape index: {}]   ;;  %s936_s3 = inlined_call_operand.vmem [shape: bf16[8,2], index: 3, kind: input, shape index: {}]   ;;  %s937_s4 = inlined_call_operand.vmem [shape: bf16[128,8], index: 4, kind: output, shape index: {0}]   ;;  %s938_s5 = inlined_call_operand.vmem [shape: f32[128,1], index: 5, kind: output, shape index: {1}]   ;;  %s939_s6 = inlined_call_operand.vmem [shape: f32[1,128], index: 6, kind: output, shape index: {2}]  }
   0x1   :  { %v570_v0 = vld [vmem:[%s933_s2 + $0x8] sm:$0xff]  ;;  %v569_v1 = vld [vmem:[%s933_s2] sm:$0xff]  ;;  %v23_v7 = vld [vmem:[%s934_s0 + $0x10] sm:$0xff] }
   0x2   :  { %v21_v2 = vld [vmem:[%s934_s0] sm:$0xff]  ;;  %v22_v3 = vld [vmem:[%s934_s0 + $0x8] sm:$0xff]  ;;  %208 = vmatpush.bf16.msra.mxu0 %v570_v0  ;;  %571 = vmatpush.bf16.msra.mxu2 %v570_v0  ;;  %v24_v12 = vld [vmem:[%s934_s0 + $0x18] sm:$0xff] }
   0x3   :  { %v659_v4 = vld [vmem:[%s935_s1] ss:$0 sm:$0xff]  ;;  %v30_v6 = vld [vmem:[%s934_s0 + $0x48] sm:$0xff]  ;;  %v31_v13 = vld [vmem:[%s934_s0 + $0x50] sm:$0xff] }
   0x4   :  { %v29_v5 = vld [vmem:[%s934_s0 + $0x40] sm:$0xff]  ;;  %v41_v8 = vadd.f32 %v659_v4, %v21_v2  ;;  %v42_v9 = vadd.f32 %v659_v4, %v22_v3  ;;  %v50_v11 = vadd.f32 %v659_v4, %v30_v6  ;;  %v681_v16 = vadd.f32 %v659_v4, %v23_v7  ;;  %v32_v17 = vld [vmem:[%s934_s0 + $0x58] sm:$0xff]  ;;  %v26_v46 = vld [vmem:[%s934_s0 + $0x28] sm:$0xff] }
   0x5   :  { %v49_v10 = vadd.f32 %v659_v4, %v29_v5  ;;  %v687_v20 = vadd.f32 %v659_v4, %v24_v12  ;;  %v690_v23 = vadd.f32 %v659_v4, %v31_v13  ;;  %v693_v26 = vadd.f32 %v659_v4, %v32_v17  ;;  %v25_v43 = vld [vmem:[%s934_s0 + $0x20] sm:$0xff]  ;;  %v34_v52 = vld [vmem:[%s934_s0 + $0x68] sm:$0xff] }
   0x6   :  { %v73_v14 = vmin.f32 %v41_v8, 0.0  ;;  %v74_v15 = vmin.f32 %v42_v9, 0.0  ;;  %209 = vmatpush.bf16.msra.mxu0 %v569_v1  ;;  %572 = vmatpush.bf16.msra.mxu2 %v569_v1  ;;  %v82_v19 = vmin.f32 %v50_v11, 0.0  ;;  %v75_v27 = vmin.f32 %v681_v16, 0.0  ;;  %v33_v49 = vld [vmem:[%s934_s0 + $0x60] sm:$0xff] }
   0x7   :  { %v81_v18 = vmin.f32 %v49_v10, 0.0  ;;  %v76_v28 = vmin.f32 %v687_v20, 0.0  ;;  %v83_v29 = vmin.f32 %v690_v23, 0.0  ;;  %v84_v30 = vmin.f32 %v693_v26, 0.0 }
   0x8   :  { %v89_v21 = vmul.f32 1.442695, %v73_v14  ;;  %v91_v22 = vmul.f32 1.442695, %v74_v15  ;;  %v107_v25 = vmul.f32 1.442695, %v82_v19  ;;  %v709_v51 = vadd.f32 %v659_v4, %v25_v43 }
   0x9   :  { %v105_v24 = vmul.f32 1.442695, %v81_v18  ;;  %v93_v31 = vmul.f32 1.442695, %v75_v27  ;;  %v95_v32 = vmul.f32 1.442695, %v76_v28  ;;  %v716_v54 = vadd.f32 %v659_v4, %v26_v46 }
   0xa   :  { %576 = vpow2.f32 %v89_v21  ;;  %vm57_vm0 = vcmp.gt.f32.partialorder %v41_v8, 0.0  ;;  %v109_v34 = vmul.f32 1.442695, %v83_v29  ;;  %vm58_vm1 = vcmp.gt.f32.partialorder %v42_v9, 0.0  ;;  %v27_v15 = vld [vmem:[%s934_s0 + $0x30] sm:$0xff]  ;;  %v36_v21 = vld [vmem:[%s934_s0 + $0x78] sm:$0xff] }
   0xb   :  { %578 = vpow2.f32 %v91_v22  ;;  %v111_v37 = vmul.f32 1.442695, %v84_v30  ;;  %vm65_vm2 = vcmp.gt.f32.partialorder %v49_v10, 0.0  ;;  %vm66_vm3 = vcmp.gt.f32.partialorder %v50_v11, 0.0 }
   0xc   :  { %580 = vpow2.f32 %v105_v24  ;;  %v719_v56 = vadd.f32 %v659_v4, %v33_v49  ;;  %v723_v58 = vadd.f32 %v659_v4, %v34_v52  ;;  %v77_v60 = vmin.f32 %v709_v51, 0.0 }
   0xd   :  { %582 = vpow2.f32 %v107_v25  ;;  %v78_v62 = vmin.f32 %v716_v54, 0.0  ;;  %vm59_vm5 = vcmp.gt.f32.partialorder %v681_v16, 0.0  ;;  %vm60_vm6 = vcmp.gt.f32.partialorder %v687_v20, 0.0 }
   0xe   :  { %584 = vpow2.f32 %v93_v31  ;;  %v85_v1 = vmin.f32 %v719_v56, 0.0  ;;  %v86_v2 = vmin.f32 %v723_v58, 0.0  ;;  %v97_v6 = vmul.f32 1.442695, %v77_v60 }
   0xf   :  { %586 = vpow2.f32 %v95_v32  ;;  %vm67_vm7 = vcmp.gt.f32.partialorder %v690_v23, 0.0  ;;  %vm68_vm8 = vcmp.gt.f32.partialorder %v693_v26, 0.0  ;;  %v99_v7 = vmul.f32 1.442695, %v78_v62 }
  0x10   :  { %v577_v33 = vpop.eup %576  ;;  %588 = vpow2.f32 %v109_v34  ;;  %v47_v18 = vadd.f32 %v659_v4, %v27_v15  ;;  %v56_v25 = vadd.f32 %v659_v4, %v36_v21  ;;  %vm61_vm9 = vcmp.gt.f32.partialorder %v709_v51, 0.0 }
  0x11   :  { %v579_v35 = vpop.eup %578  ;;  %v529_v36 = vadd.f32 -1.0, %v577_v33  ;;  %590 = vpow2.f32 %v111_v37  ;;  %vm62_vm10 = vcmp.gt.f32.partialorder %v716_v54, 0.0  ;;  %vm69_vm11 = vcmp.gt.f32.partialorder %v719_v56, 0.0 }
  0x12   :  { %v581_v38 = vpop.eup %580  ;;  %v530_v39 = vadd.f32 -1.0, %v579_v35  ;;  %592 = vpow2.f32 %v97_v6  ;;  %v79_v27 = vmin.f32 %v47_v18, 0.0  ;;  %v88_v33 = vmin.f32 %v56_v25, 0.0 }
  0x13   :  { %v583_v40 = vpop.eup %582  ;;  %v137_v41 = vsel %vm57_vm0, %v41_v8, %v529_v36  ;;  %v537_v42 = vadd.f32 -1.0, %v581_v38  ;;  %594 = vpow2.f32 %v99_v7  ;;  %vm70_vm12 = vcmp.gt.f32.partialorder %v723_v58, 0.0 }
  0x14   :  { %v138_v44 = vsel %vm58_vm1, %v42_v9, %v530_v39  ;;  %v538_v45 = vadd.f32 -1.0, %v583_v40  ;;  %v585_v55 = vpop.eup %584  ;;  %v101_v36 = vmul.f32 1.442695, %v79_v27  ;;  %v119_v40 = vmul.f32 1.442695, %v88_v33 }
  0x15   :  { %v153_v47 = vpack.c.bf16 %v138_v44, %v137_v41  ;;  %v145_v48 = vsel %vm65_vm2, %v49_v10, %v537_v42  ;;  %v587_v57 = vpop.eup %586  ;;  %v531_v63 = vadd.f32 -1.0, %v585_v55  ;;  %v113_v10 = vmul.f32 1.442695, %v85_v1 }
  0x16   :  { %v146_v50 = vsel %vm66_vm3, %v50_v11, %v538_v45  ;;  %v589_v59 = vpop.eup %588  ;;  %v532_v0 = vadd.f32 -1.0, %v587_v57  ;;  %v115_v11 = vmul.f32 1.442695, %v86_v2  ;;  %vm63_vm13 = vcmp.gt.f32.partialorder %v47_v18, 0.0 }
  0x17   :  { %553 = vmatmul.msk.bf16.vlgmr.msra.gmra.mxu0 %vm177_vm4, %v153_v47  ;;  %v157_v53 = vpack.c.bf16 %v146_v50, %v145_v48  ;;  %v591_v61 = vpop.eup %590  ;;  %v539_v3 = vadd.f32 -1.0, %v589_v59  ;;  %v139_v8 = vsel %vm59_vm5, %v681_v16, %v531_v63  ;;  %596 = vpow2.f32 %v113_v10  ;;  %v28_v16 = vld [vmem:[%s934_s0 + $0x38] sm:$0xff]  ;;  %v284_v59 = vld [vmem:[%s936_s3] sm:$0xf] }
  0x18   :  { %v540_v5 = vadd.f32 -1.0, %v591_v61  ;;  %v140_v9 = vsel %vm60_vm6, %v687_v20, %v532_v0  ;;  %598 = vpow2.f32 %v115_v11  ;;  %v48_v19 = vadd.f32 %v659_v4, %v28_v16  ;;  %v35_v20 = vld [vmem:[%s934_s0 + $0x70] sm:$0xff]  ;;  %v593_v22 = vpop.eup %592 }
  0x19   :  { %557 = vmatmul.msk.bf16.vlgmr.msra.gmra.mxu2 %vm177_vm4, %v157_v53  ;;  %v147_v12 = vsel %vm67_vm7, %v690_v23, %v539_v3  ;;  %v154_v14 = vpack.c.bf16 %v140_v9, %v139_v8  ;;  %v55_v23 = vadd.f32 %v659_v4, %v35_v20  ;;  %v595_v24 = vpop.eup %594  ;;  %v533_v30 = vadd.f32 -1.0, %v593_v22 }
  0x1a   :  { %v148_v13 = vsel %vm68_vm8, %v693_v26, %v540_v5  ;;  %v80_v29 = vmin.f32 %v48_v19, 0.0  ;;  %v534_v31 = vadd.f32 -1.0, %v595_v24  ;;  %600 = vpow2.f32 %v101_v36 }
  0x1b   :  { %v158_v17 = vpack.c.bf16 %v148_v13, %v147_v12  ;;  %v87_v32 = vmin.f32 %v55_v23, 0.0  ;;  %v141_v37 = vsel %vm61_vm9, %v709_v51, %v533_v30  ;;  %vm64_vm14 = vcmp.gt.f32.partialorder %v48_v19, 0.0 }
  0x1c   :  { %v103_v4 = vmul.f32 1.442695, %v80_v29  ;;  %v142_v38 = vsel %vm62_vm10, %v716_v54, %v534_v31  ;;  %vm71_vm15 = vcmp.gt.f32.partialorder %v55_v23, 0.0  ;;  %vm72_vm0 = vcmp.gt.f32.partialorder %v56_v25, 0.0 }
  0x1d   :  { %v597_v26 = vpop.eup %596  ;;  %v117_v39 = vmul.f32 1.442695, %v87_v32  ;;  %v155_v43 = vpack.c.bf16 %v142_v38, %v141_v37  ;;  %vm350_vm1 = vcmask 1043456   ;;  %vm267_vm2 = vcmask 60416  }
  0x1e   :  { %v599_v28 = vpop.eup %598  ;;  %v541_v34 = vadd.f32 -1.0, %v597_v26  ;;  %602 = vpow2.f32 %v103_v4  ;;  %v352_v60 = vsel %vm350_vm1, %v284_v59, 0  ;;  %vm325_vm3 = vcmask 64512  }
  0x1f   :  { %v542_v35 = vadd.f32 -1.0, %v599_v28  ;;  %604 = vpow2.f32 %v117_v39  ;;  %361 = vmatpush.bf16.msra.mxu1 %v352_v60  ;;  %573 = vmatpush.bf16.msra.mxu3 %v352_v60 }
  0x20   :  { %v149_v41 = vsel %vm69_vm11, %v719_v56, %v541_v34  ;;  %606 = vpow2.f32 %v119_v40  ;;  %v601_v45 = vpop.eup %600 }
  0x21   :  { %v150_v42 = vsel %vm70_vm12, %v723_v58, %v542_v35  ;;  %v535_v49 = vadd.f32 -1.0, %v601_v45 }
  0x22   :  { %v159_v44 = vpack.c.bf16 %v150_v42, %v149_v41 }
  0x23   :  { %v143_v53 = vsel %vm63_vm13, %v47_v18, %v535_v49 }
  0x24   :  { %v603_v46 = vpop.eup %602 }
  0x25   :  { %v605_v47 = vpop.eup %604  ;;  %v536_v50 = vadd.f32 -1.0, %v603_v46 }
  0x26   :  { %v607_v48 = vpop.eup %606  ;;  %v543_v51 = vadd.f32 -1.0, %v605_v47 }
  0x27   :  { %554 = vmatmul.msk.bf16.gmra.mxu0 %vm177_vm4, %v154_v14  ;;  %v544_v52 = vadd.f32 -1.0, %v607_v48  ;;  %v144_v54 = vsel %vm64_vm14, %v48_v19, %v536_v50 }
  0x28   :  { %v151_v55 = vsel %vm71_vm15, %v55_v23, %v543_v51  ;;  %v156_v57 = vpack.c.bf16 %v144_v54, %v143_v53 }
  0x29   :  { %558 = vmatmul.msk.bf16.gmra.mxu2 %vm177_vm4, %v158_v17  ;;  %v152_v56 = vsel %vm72_vm0, %v56_v25, %v544_v52 }
  0x2a   :  { %v160_v58 = vpack.c.bf16 %v152_v56, %v151_v55 }
  0x37   :  { %555 = vmatmul.msk.bf16.gmra.mxu0 %vm177_vm4, %v155_v43 }
  0x39   :  { %559 = vmatmul.msk.bf16.gmra.mxu2 %vm177_vm4, %v159_v44 }
  0x47   :  { %556 = vmatmul.msk.bf16.gmra.mxu0 %vm177_vm4, %v156_v57 }
  0x49   :  { %560 = vmatmul.msk.bf16.gmra.mxu2 %vm177_vm4, %v160_v58  ;;  %vm403_vm4 = vcmask 7168  }
  0x94   :  { %v211_v61 = vpop.f32.mrf.mxu0 }
  0x95   :  { %v251_v62 = vpack.c.bf16 %v211_v61, %v211_v61 }
  0x97   :  { %268 = vst.msk [vmem:[%s937_s4] sm:$0xf] %vm267_vm2, %v251_v62  ;;  %v301_v3 = vunpack.c.l.b16 %v251_v62 }
  0x9c   :  { %v213_v63 = vpop.f32.mrf.mxu0  ;;  %v231_v0 = vpop.f32.mrf.mxu2 }
  0x9d   :  { %v252_v1 = vpack.c.bf16 %v213_v63, %v213_v63  ;;  %v774_v2 = vpack.c.bf16 %v231_v0, %v231_v0 }
  0x9f   :  { %269 = vst.msk [vmem:[%s937_s4 + $0x4] sm:$0xf] %vm267_vm2, %v252_v1  ;;  %v302_v5 = vunpack.c.l.b16 %v252_v1  ;;  %v309_v50 = vunpack.c.l.b16 %v774_v2 }
  0xa0   :  { %276 = vst.msk [vmem:[%s937_s4 + $0x20] sm:$0xf] %vm267_vm2, %v774_v2 }
  0xa1   :  { %v317_v6 = vpack.c.b16 %v302_v5, %v301_v3 }
  0xa3   :  { %561 = vmatmul.msk.bf16.vlgmr.msra.gmra.mxu1 %vm325_vm3, %v317_v6 }
  0xa4   :  { %v216_v7 = vpop.f32.mrf.mxu0  ;;  %v233_v8 = vpop.f32.mrf.mxu2 }
  0xa5   :  { %v253_v9 = vpack.c.bf16 %v216_v7, %v216_v7  ;;  %v786_v10 = vpack.c.bf16 %v233_v8, %v233_v8 }
  0xa7   :  { %270 = vst.msk [vmem:[%s937_s4 + $0x8] sm:$0xf] %vm267_vm2, %v253_v9  ;;  %v303_v15 = vunpack.c.l.b16 %v253_v9  ;;  %v310_v51 = vunpack.c.l.b16 %v786_v10 }
  0xa8   :  { %277 = vst.msk [vmem:[%s937_s4 + $0x24] sm:$0xf] %vm267_vm2, %v786_v10 }
  0xa9   :  { %v321_v52 = vpack.c.b16 %v310_v51, %v309_v50 }
  0xac   :  { %v218_v11 = vpop.f32.mrf.mxu0  ;;  %v236_v12 = vpop.f32.mrf.mxu2 }
  0xad   :  { %v254_v13 = vpack.c.bf16 %v218_v11, %v218_v11  ;;  %v261_v14 = vpack.c.bf16 %v236_v12, %v236_v12 }
  0xaf   :  { %271 = vst.msk [vmem:[%s937_s4 + $0xc] sm:$0xf] %vm267_vm2, %v254_v13  ;;  %v304_v16 = vunpack.c.l.b16 %v254_v13  ;;  %v311_v20 = vunpack.c.l.b16 %v261_v14 }
  0xb0   :  { %278 = vst.msk [vmem:[%s937_s4 + $0x28] sm:$0xf] %vm267_vm2, %v261_v14 }
  0xb1   :  { %v318_v17 = vpack.c.b16 %v304_v16, %v303_v15 }
  0xb3   :  { %562 = vmatmul.msk.bf16.gmra.mxu1 %vm325_vm3, %v318_v17 }
  0xb4   :  { %v221_v18 = vpop.f32.mrf.mxu0  ;;  %v238_v19 = vpop.f32.mrf.mxu2 }
  0xb5   :  { %v255_v21 = vpack.c.bf16 %v221_v18, %v221_v18  ;;  %v262_v22 = vpack.c.bf16 %v238_v19, %v238_v19 }
  0xb7   :  { %272 = vst.msk [vmem:[%s937_s4 + $0x10] sm:$0xf] %vm267_vm2, %v255_v21  ;;  %v312_v23 = vunpack.c.l.b16 %v262_v22  ;;  %v305_v29 = vunpack.c.l.b16 %v255_v21 }
  0xb8   :  { %279 = vst.msk [vmem:[%s937_s4 + $0x2c] sm:$0xf] %vm267_vm2, %v262_v22 }
  0xb9   :  { %v322_v24 = vpack.c.b16 %v312_v23, %v311_v20 }
  0xbb   :  { %566 = vmatmul.msk.bf16.vlgmr.msra.gmra.mxu3 %vm325_vm3, %v322_v24 }
  0xbc   :  { %v223_v25 = vpop.f32.mrf.mxu0  ;;  %v241_v26 = vpop.f32.mrf.mxu2 }
  0xbd   :  { %v256_v27 = vpack.c.bf16 %v223_v25, %v223_v25  ;;  %v263_v28 = vpack.c.bf16 %v241_v26, %v241_v26 }
  0xbf   :  { %273 = vst.msk [vmem:[%s937_s4 + $0x14] sm:$0xf] %vm267_vm2, %v256_v27  ;;  %v306_v30 = vunpack.c.l.b16 %v256_v27  ;;  %v313_v34 = vunpack.c.l.b16 %v263_v28 }
  0xc0   :  { %280 = vst.msk [vmem:[%s937_s4 + $0x30] sm:$0xf] %vm267_vm2, %v263_v28 }
  0xc1   :  { %v319_v31 = vpack.c.b16 %v306_v30, %v305_v29 }
  0xc3   :  { %563 = vmatmul.msk.bf16.gmra.mxu1 %vm325_vm3, %v319_v31 }
  0xc4   :  { %v226_v32 = vpop.f32.mrf.mxu0  ;;  %v243_v33 = vpop.f32.mrf.mxu2 }
  0xc5   :  { %v257_v35 = vpack.c.bf16 %v226_v32, %v226_v32  ;;  %v264_v36 = vpack.c.bf16 %v243_v33, %v243_v33 }
  0xc7   :  { %274 = vst.msk [vmem:[%s937_s4 + $0x18] sm:$0xf] %vm267_vm2, %v257_v35  ;;  %v314_v4 = vunpack.c.l.b16 %v264_v36  ;;  %v307_v42 = vunpack.c.l.b16 %v257_v35 }
  0xc8   :  { %281 = vst.msk [vmem:[%s937_s4 + $0x34] sm:$0xf] %vm267_vm2, %v264_v36 }
  0xc9   :  { %v323_v37 = vpack.c.b16 %v314_v4, %v313_v34 }
  0xcb   :  { %567 = vmatmul.msk.bf16.gmra.mxu3 %vm325_vm3, %v323_v37 }
  0xcc   :  { %v228_v38 = vpop.f32.mrf.mxu0  ;;  %v246_v39 = vpop.f32.mrf.mxu2 }
  0xcd   :  { %v258_v40 = vpack.c.bf16 %v228_v38, %v228_v38  ;;  %v265_v41 = vpack.c.bf16 %v246_v39, %v246_v39 }
  0xcf   :  { %275 = vst.msk [vmem:[%s937_s4 + $0x1c] sm:$0xf] %vm267_vm2, %v258_v40  ;;  %v308_v43 = vunpack.c.l.b16 %v258_v40  ;;  %v315_v46 = vunpack.c.l.b16 %v265_v41 }
  0xd0   :  { %282 = vst.msk [vmem:[%s937_s4 + $0x38] sm:$0xf] %vm267_vm2, %v265_v41 }
  0xd1   :  { %v320_v44 = vpack.c.b16 %v308_v43, %v307_v42 }
  0xd3   :  { %564 = vmatmul.msk.bf16.gmra.mxu1 %vm325_vm3, %v320_v44 }
  0xd4   :  { %v248_v45 = vpop.f32.mrf.mxu2 }
  0xd5   :  { %v266_v47 = vpack.c.bf16 %v248_v45, %v248_v45 }
  0xd7   :  { %283 = vst.msk [vmem:[%s937_s4 + $0x3c] sm:$0xf] %vm267_vm2, %v266_v47  ;;  %v316_v48 = vunpack.c.l.b16 %v266_v47 }
  0xd9   :  { %v324_v49 = vpack.c.b16 %v316_v48, %v315_v46 }
  0xdb   :  { %568 = vmatmul.msk.bf16.gmra.mxu3 %vm325_vm3, %v324_v49 }
  0xe3   :  { %565 = vmatmul.msk.bf16.gmra.mxu1 %vm325_vm3, %v321_v52 }
 0x120   :  { %v363_v53 = vpop.f32.mrf.mxu1 }
 0x121   :  { %404 = vst.msk [vmem:[%s938_s5] sm:$0xff] %vm403_vm4, %v363_v53  ;;  %436 = vrot.lane.b32.xlu0 %v363_v53, %s608_s13 }
 0x128   :  { %v365_v54 = vpop.f32.mrf.mxu1 }
 0x129   :  { %405 = vst.msk [vmem:[%s938_s5 + $0x8] sm:$0xff] %vm403_vm4, %v365_v54  ;;  %438 = vrot.lane.b32.xlu0 %v365_v54, %s608_s13 }
 0x130   :  { %v368_v55 = vpop.f32.mrf.mxu1 }
 0x131   :  { %406 = vst.msk [vmem:[%s938_s5 + $0x10] sm:$0xff] %vm403_vm4, %v368_v55  ;;  %440 = vrot.lane.b32.xlu1 %v368_v55, %s608_s13 }
 0x138   :  { %v370_v56 = vpop.f32.mrf.mxu1 }
 0x139   :  { %407 = vst.msk [vmem:[%s938_s5 + $0x18] sm:$0xff] %vm403_vm4, %v370_v56  ;;  %442 = vrot.lane.b32.xlu1 %v370_v56, %s608_s13 }
 0x13e   :  { %v388_v57 = vpop.f32.mrf.mxu3 }
 0x13f   :  { %414 = vst.msk [vmem:[%s938_s5 + $0x50] sm:$0xff] %vm403_vm4, %v388_v57 }
 0x140   :  { %v373_v58 = vpop.f32.mrf.mxu1 }
 0x141   :  { %408 = vst.msk [vmem:[%s938_s5 + $0x20] sm:$0xff] %vm403_vm4, %v373_v58  ;;  %444 = vrot.lane.b32.xlu2 %v373_v58, %s608_s13 }
 0x146   :  { %v390_v59 = vpop.f32.mrf.mxu3 }
 0x147   :  { %415 = vst.msk [vmem:[%s938_s5 + $0x58] sm:$0xff] %vm403_vm4, %v390_v59 }
 0x148   :  { %v375_v60 = vpop.f32.mrf.mxu1 }
 0x149   :  { %409 = vst.msk [vmem:[%s938_s5 + $0x28] sm:$0xff] %vm403_vm4, %v375_v60  ;;  %446 = vrot.lane.b32.xlu2 %v375_v60, %s608_s13 }
 0x14e   :  { %v393_v61 = vpop.f32.mrf.mxu3 }
 0x14f   :  { %416 = vst.msk [vmem:[%s938_s5 + $0x60] sm:$0xff] %vm403_vm4, %v393_v61 }
 0x150   :  { %v378_v62 = vpop.f32.mrf.mxu1 }
 0x151   :  { %410 = vst.msk [vmem:[%s938_s5 + $0x30] sm:$0xff] %vm403_vm4, %v378_v62  ;;  %448 = vrot.lane.b32.xlu0 %v378_v62, %s608_s13 }
 0x156   :  { %v395_v63 = vpop.f32.mrf.mxu3 }
 0x157   :  { %417 = vst.msk [vmem:[%s938_s5 + $0x68] sm:$0xff] %vm403_vm4, %v395_v63 }
 0x158   :  { %v380_v0 = vpop.f32.mrf.mxu1 }
 0x159   :  { %411 = vst.msk [vmem:[%s938_s5 + $0x38] sm:$0xff] %vm403_vm4, %v380_v0  ;;  %450 = vrot.lane.b32.xlu1 %v380_v0, %s608_s13 }
 0x15e   :  { %v398_v1 = vpop.f32.mrf.mxu3 }
 0x15f   :  { %418 = vst.msk [vmem:[%s938_s5 + $0x70] sm:$0xff] %vm403_vm4, %v398_v1 }
 0x160   :  { %v383_v2 = vpop.f32.mrf.mxu1 }
 0x161   :  { %412 = vst.msk [vmem:[%s938_s5 + $0x40] sm:$0xff] %vm403_vm4, %v383_v2  ;;  %456 = vrot.lane.b32.xlu1 %v388_v57, %s608_s13  ;;  %452 = vrot.lane.b32.xlu2 %v383_v2, %s608_s13 }
 0x166   :  { %v400_v3 = vpop.f32.mrf.mxu3 }
 0x167   :  { %419 = vst.msk [vmem:[%s938_s5 + $0x78] sm:$0xff] %vm403_vm4, %v400_v3 }
 0x168   :  { %v385_v5 = vpop.f32.mrf.mxu1 }
 0x169   :  { %413 = vst.msk [vmem:[%s938_s5 + $0x48] sm:$0xff] %vm403_vm4, %v385_v5  ;;  %462 = vrot.lane.b32.xlu1 %v395_v63, %s608_s13  ;;  %458 = vrot.lane.b32.xlu2 %v390_v59, %s608_s13 }
 0x16a   :  { %454 = vrot.lane.b32.xlu0 %v385_v5, %s608_s13 }
 0x171   :  { %464 = vrot.lane.b32.xlu2 %v398_v1, %s608_s13 }
 0x172   :  { %460 = vrot.lane.b32.xlu0 %v393_v61, %s608_s13 }
 0x17a   :  { %466 = vrot.lane.b32.xlu0 %v400_v3, %s608_s13 }
 0x193   :  { %v437_v6 = vpop.permute.xlu0 %436 }
 0x19b   :  { %v439_v7 = vpop.permute.xlu0 %438  ;;  %v445_v10 = vpop.permute.xlu2 %444 }
 0x19e   :  { %484 = vxpose.xlu1.b32.start [1/16] (narrow) %v437_v6, 8 }
 0x1a3   :  { %v441_v8 = vpop.permute.xlu1 %440  ;;  %v447_v11 = vpop.permute.xlu2 %446 }
 0x1a6   :  { %485 = vxpose.xlu1.b32.cont [2/16] (narrow) %v439_v7, 8 }
 0x1ab   :  { %v443_v9 = vpop.permute.xlu1 %442 }
 0x1ae   :  { %486 = vxpose.xlu1.b32.cont [3/16] (narrow) %v441_v8, 8 }
 0x1b6   :  { %487 = vxpose.xlu1.b32.cont [4/16] (narrow) %v443_v9, 8 }
 0x1bb   :  { %v453_v14 = vpop.permute.xlu2 %452 }
 0x1be   :  { %488 = vxpose.xlu1.b32.cont [5/16] (narrow) %v445_v10, 8 }
 0x1c3   :  { %v449_v12 = vpop.permute.xlu0 %448  ;;  %v459_v17 = vpop.permute.xlu2 %458 }
 0x1c6   :  { %489 = vxpose.xlu1.b32.cont [6/16] (narrow) %v447_v11, 8 }
 0x1cb   :  { %v451_v13 = vpop.permute.xlu1 %450  ;;  %v465_v20 = vpop.permute.xlu2 %464 }
 0x1ce   :  { %490 = vxpose.xlu1.b32.cont [7/16] (narrow) %v449_v12, 8 }
 0x1d3   :  { %v457_v16 = vpop.permute.xlu1 %456 }
 0x1d6   :  { %491 = vxpose.xlu1.b32.cont [8/16] (narrow) %v451_v13, 8 }
 0x1db   :  { %v463_v19 = vpop.permute.xlu1 %462 }
 0x1dc   :  { %v455_v15 = vpop.permute.xlu0 %454 }
 0x1de   :  { %492 = vxpose.xlu1.b32.cont [9/16] (narrow) %v453_v14, 8 }
 0x1e4   :  { %v461_v18 = vpop.permute.xlu0 %460 }
 0x1e6   :  { %493 = vxpose.xlu1.b32.cont [10/16] (narrow) %v455_v15, 8 }
 0x1ec   :  { %v467_v21 = vpop.permute.xlu0 %466 }
 0x1ee   :  { %494 = vxpose.xlu1.b32.cont [11/16] (narrow) %v457_v16, 8 }
 0x1f6   :  { %495 = vxpose.xlu1.b32.cont [12/16] (narrow) %v459_v17, 8 }
 0x1fe   :  { %496 = vxpose.xlu1.b32.cont [13/16] (narrow) %v461_v18, 8 }
 0x206   :  { %497 = vxpose.xlu1.b32.cont [14/16] (narrow) %v463_v19, 8 }
 0x20e   :  { %498 = vxpose.xlu1.b32.cont [15/16] (narrow) %v465_v20, 8 }
 0x216   :  { %499 = vxpose.xlu1.b32.end [16/16] (narrow) %v467_v21, 8 }
 0x242   :  { %v500_v22 = vpop.trf.xlu1 }
 0x243   :  { %516 = vst [vmem:[%s939_s6] sm:$0x1] %v500_v22 }

// kernel: gat_forward.9
= control target key start
LH: loop header
LB: loop body
LE: loop exit
PB: predicated region body
PF: predicated region fallthrough
CT: control target
= control target key end

     0   :  { %v153_v2 = vlaneseq  ;;  %vm160_vm0 = vcmask 1041408   ;;  %v331_v33 = vmov 0.0   ;;  %s540_s0 = inlined_call_operand.vmem [shape: f32[128,8], index: 0, kind: input, shape index: {}]   ;;  %s541_s1 = inlined_call_operand.vmem [shape: f32[1,8], index: 1, kind: input, shape index: {}]   ;;  %s542_s2 = inlined_call_operand.vmem [shape: s32[1,128], index: 2, kind: input, shape index: {}]   ;;  %s543_s3 = inlined_call_operand.vmem [shape: f32[8,4], index: 3, kind: input, shape index: {}]   ;;  %s544_s4 = inlined_call_operand.vmem [shape: f32[1,4], index: 4, kind: input, shape index: {}]   ;;  %s545_s5 = inlined_call_operand.hbm [shape: f32[2,4], index: 5, kind: output, shape index: {}]  }
   0x1   :  { %v36_v0 = vld [vmem:[%s540_s0 + $0x78] sm:$0xff]  ;;  %v370_v1 = vld [vmem:[%s541_s1] ss:$0 sm:$0xff]  ;;  %v35_v3 = vld [vmem:[%s540_s0 + $0x70] sm:$0xff] }
   0x2   :  { %v34_v4 = vld [vmem:[%s540_s0 + $0x68] sm:$0xff]  ;;  %v33_v5 = vld [vmem:[%s540_s0 + $0x60] sm:$0xff]  ;;  %v382_v6 = vadd.f32 %v370_v1, %v36_v0  ;;  %v385_v7 = vadd.f32 %v370_v1, %v35_v3  ;;  %v32_v10 = vld [vmem:[%s540_s0 + $0x58] sm:$0xff]  ;;  %v407_v16 = vshrl.u32 %v153_v2, 7 }
   0x3   :  { %v388_v8 = vadd.f32 %v370_v1, %v34_v4  ;;  %v391_v9 = vadd.f32 %v370_v1, %v33_v5  ;;  %v31_v11 = vld [vmem:[%s540_s0 + $0x50] sm:$0xff]  ;;  %v400_v12 = vadd.f32 %v370_v1, %v32_v10  ;;  %v412_v17 = vld [vmem:[%s542_s2] ss:$0 sm:$0xff]  ;;  %v30_v20 = vld [vmem:[%s540_s0 + $0x48] sm:$0xff] }
   0x4   :  { %v403_v13 = vadd.f32 %v370_v1, %v31_v11  ;;  %v88_v14 = vmin.f32 %v382_v6, 0.0  ;;  %v87_v15 = vmin.f32 %v385_v7, 0.0  ;;  %v29_v24 = vld [vmem:[%s540_s0 + $0x40] sm:$0xff]  ;;  %vm157_vm1 = vcmp.eq.s32.totalorder %v407_v16, %v412_v17  ;;  %v28_v30 = vld [vmem:[%s540_s0 + $0x38] sm:$0xff]  ;;  %v27_v31 = vld [vmem:[%s540_s0 + $0x30] sm:$0xff] }
   0x5   :  { %v86_v18 = vmin.f32 %v388_v8, 0.0  ;;  %v85_v19 = vmin.f32 %v391_v9, 0.0  ;;  %v84_v23 = vmin.f32 %v400_v12, 0.0  ;;  %v427_v29 = vadd.f32 %v370_v1, %v30_v20  ;;  %v26_v36 = vld [vmem:[%s540_s0 + $0x28] sm:$0xff] }
   0x6   :  { %v119_v21 = vmul.f32 1.442695, %v88_v14  ;;  %v117_v22 = vmul.f32 1.442695, %v87_v15  ;;  %v83_v27 = vmin.f32 %v403_v13, 0.0  ;;  %v262_v34 = vsel %vm157_vm1, 1.0, %v331_v33 }
   0x7   :  { %v115_v25 = vmul.f32 1.442695, %v86_v18  ;;  %v113_v26 = vmul.f32 1.442695, %v85_v19  ;;  %v111_v28 = vmul.f32 1.442695, %v84_v23  ;;  %v439_v35 = vadd.f32 %v370_v1, %v29_v24 }
   0x8   :  { %271 = vpow2.f32 %v119_v21  ;;  %v109_v32 = vmul.f32 1.442695, %v83_v27  ;;  %v161_v37 = vsel %vm160_vm0, %v262_v34, 0.0  ;;  %v82_v38 = vmin.f32 %v427_v29, 0.0 }
   0x9   :  { %273 = vpow2.f32 %v117_v22 }
   0xa   :  { %275 = vpow2.f32 %v115_v25 }
   0xb   :  { %10 = vsyncpa [#allocation3], 0  ;;  %277 = vpow2.f32 %v113_v26  ;;  %162 = vadd.xlane.f32.xlu0 %v161_v37  ;;  %v81_v39 = vmin.f32 %v439_v35, 0.0  ;;  %v447_v40 = vadd.f32 %v370_v1, %v28_v30  ;;  %v107_v41 = vmul.f32 1.442695, %v82_v38  ;;  %v25_v46 = vld [vmem:[%s540_s0 + $0x20] sm:$0xff] }
   0xc   :  { %279 = vpow2.f32 %v111_v28  ;;  %v450_v42 = vadd.f32 %v370_v1, %v27_v31  ;;  %v453_v43 = vadd.f32 %v370_v1, %v26_v36  ;;  %vm72_vm2 = vcmp.gt.f32.partialorder %v382_v6, 0.0  ;;  %v24_v47 = vld [vmem:[%s540_s0 + $0x18] sm:$0xff]  ;;  %v23_v3 = vld [vmem:[%s540_s0 + $0x10] sm:$0xff]  ;;  %v22_v11 = vld [vmem:[%s540_s0 + $0x8] sm:$0xff]  ;;  %s333_s28 = smov [#allocation2]   ;;  %s237_s7 = sshll.u32 %s545_s5, 4  ;;  %s238_s7 = int_to_ptr.hbm [resolvable:$true] %s237_s7 }
   0xd   :  { %281 = vpow2.f32 %v109_v32  ;;  %v105_v44 = vmul.f32 1.442695, %v81_v39  ;;  %v80_v45 = vmin.f32 %v447_v40, 0.0  ;;  %vm71_vm3 = vcmp.gt.f32.partialorder %v385_v7, 0.0  ;;  %v21_v23 = vld [vmem:[%s540_s0] sm:$0xff]  ;;  %s235_s29 = sshll.u32 %s333_s28, 4  ;;  %s236_s29 = int_to_ptr.vmem [resolvable:$true] %s235_s29 }
   0xe   :  { %v272_v48 = vpop.eup %271  ;;  %vm70_vm4 = vcmp.gt.f32.partialorder %v388_v8, 0.0  ;;  %283 = vpow2.f32 %v107_v41  ;;  %v79_v49 = vmin.f32 %v450_v42, 0.0  ;;  %v78_v53 = vmin.f32 %v453_v43, 0.0 }
   0xf   :  { %v274_v50 = vpop.eup %273  ;;  %v261_v51 = vadd.f32 -1.0, %v272_v48  ;;  %285 = vpow2.f32 %v105_v44  ;;  %v103_v52 = vmul.f32 1.442695, %v80_v45  ;;  %v468_v57 = vadd.f32 %v370_v1, %v25_v46 }
  0x10   :  { %v276_v54 = vpop.eup %275  ;;  %v260_v55 = vadd.f32 -1.0, %v274_v50  ;;  %v101_v56 = vmul.f32 1.442695, %v79_v49  ;;  %v471_v58 = vadd.f32 %v370_v1, %v24_v47  ;;  %vm69_vm5 = vcmp.gt.f32.partialorder %v391_v9, 0.0 }
  0x11   :  { %v278_v59 = vpop.eup %277  ;;  %v152_v60 = vsel %vm72_vm2, %v382_v6, %v261_v51  ;;  %v259_v61 = vadd.f32 -1.0, %v276_v54  ;;  %287 = vpow2.f32 %v103_v52  ;;  %v99_v2 = vmul.f32 1.442695, %v78_v53 }
  0x12   :  { %v280_v62 = vpop.eup %279  ;;  %164 = vmatpush.msra.mxu0 %v152_v60  ;;  %v151_v63 = vsel %vm71_vm3, %v385_v7, %v260_v55  ;;  %v258_v0 = vadd.f32 -1.0, %v278_v59  ;;  %v77_v10 = vmin.f32 %v468_v57, 0.0  ;;  %vm68_vm6 = vcmp.gt.f32.partialorder %v400_v12, 0.0  ;;  %v199_v59 = vld [vmem:[%s543_s3] sm:$0xff] }
  0x13   :  { %v282_v4 = vpop.eup %281  ;;  %v150_v5 = vsel %vm70_vm4, %v388_v8, %v259_v61  ;;  %v257_v6 = vadd.f32 -1.0, %v280_v62  ;;  %289 = vpow2.f32 %v101_v56  ;;  %v76_v15 = vmin.f32 %v471_v58, 0.0  ;;  %223 = vmatpush.msra.mxu1 %v199_v59 }
  0x14   :  { %v284_v7 = vpop.eup %283  ;;  %165 = vmatpush.msra.mxu0 %v151_v63  ;;  %v256_v14 = vadd.f32 -1.0, %v282_v4  ;;  %v149_v8 = vsel %vm69_vm5, %v391_v9, %v258_v0  ;;  %vm67_vm7 = vcmp.gt.f32.partialorder %v403_v13, 0.0  ;;  %v97_v19 = vmul.f32 1.442695, %v77_v10  ;;  %v270_v10 = vld [vmem:[%s544_s4] ss:$0 sm:$0xff] }
  0x15   :  { %v286_v18 = vpop.eup %285  ;;  %v497_v20 = vadd.f32 %v370_v1, %v23_v3  ;;  %291 = vpow2.f32 %v99_v2  ;;  %v95_v21 = vmul.f32 1.442695, %v76_v15  ;;  %v500_v22 = vadd.f32 %v370_v1, %v22_v11 }
  0x16   :  { %166 = vmatpush.msra.mxu0 %v150_v5  ;;  %v148_v24 = vsel %vm68_vm6, %v400_v12, %v257_v6  ;;  %v255_v25 = vadd.f32 -1.0, %v284_v7  ;;  %v147_v27 = vsel %vm67_vm7, %v403_v13, %v256_v14  ;;  %vm66_vm8 = vcmp.gt.f32.partialorder %v427_v29, 0.0 }
  0x17   :  { %v75_v9 = vmin.f32 %v497_v20, 0.0  ;;  %v288_v26 = vpop.eup %287  ;;  %293 = vpow2.f32 %v97_v19  ;;  %v254_v28 = vadd.f32 -1.0, %v286_v18  ;;  %v74_v31 = vmin.f32 %v500_v22, 0.0 }
  0x18   :  { %167 = vmatpush.msra.mxu0 %v149_v8  ;;  %v41_v32 = vadd.f32 %v370_v1, %v21_v23  ;;  %vm65_vm9 = vcmp.gt.f32.partialorder %v439_v35, 0.0  ;;  %295 = vpow2.f32 %v95_v21  ;;  %v146_v12 = vsel %vm66_vm8, %v427_v29, %v255_v25 }
  0x19   :  { %v93_v30 = vmul.f32 1.442695, %v75_v9  ;;  %v290_v33 = vpop.eup %289  ;;  %v253_v34 = vadd.f32 -1.0, %v288_v26  ;;  %v91_v36 = vmul.f32 1.442695, %v74_v31  ;;  %vm64_vm10 = vcmp.gt.f32.partialorder %v447_v40, 0.0 }
  0x1a   :  { %168 = vmatpush.msra.mxu0 %v148_v24  ;;  %v73_v13 = vmin.f32 %v41_v32, 0.0  ;;  %v145_v38 = vsel %vm65_vm9, %v439_v35, %v254_v28  ;;  %v252_v39 = vadd.f32 -1.0, %v290_v33  ;;  %vm63_vm11 = vcmp.gt.f32.partialorder %v450_v42, 0.0 }
  0x1b   :  { %v292_v37 = vpop.eup %291  ;;  %297 = vpow2.f32 %v93_v30  ;;  %v144_v44 = vsel %vm64_vm10, %v447_v40, %v253_v34  ;;  %vm62_vm12 = vcmp.gt.f32.partialorder %v453_v43, 0.0  ;;  %vm61_vm13 = vcmp.gt.f32.partialorder %v468_v57, 0.0 }
  0x1c   :  { %169 = vmatpush.msra.mxu0 %v147_v27  ;;  %299 = vpow2.f32 %v91_v36  ;;  %v89_v1 = vmul.f32 1.442695, %v73_v13  ;;  %v251_v29 = vadd.f32 -1.0, %v292_v37  ;;  %v143_v46 = vsel %vm63_vm11, %v450_v42, %v252_v39 }
  0x1d   :  { %v294_v41 = vpop.eup %293  ;;  %vm60_vm14 = vcmp.gt.f32.partialorder %v471_v58, 0.0  ;;  %vm59_vm15 = vcmp.gt.f32.partialorder %v497_v20, 0.0  ;;  %vm58_vm0 = vcmp.gt.f32.partialorder %v500_v22, 0.0  ;;  %vm57_vm2 = vcmp.gt.f32.partialorder %v41_v32, 0.0 }
  0x1e   :  { %170 = vmatpush.msra.mxu0 %v146_v12  ;;  %v296_v45 = vpop.eup %295  ;;  %301 = vpow2.f32 %v89_v1  ;;  %v250_v47 = vadd.f32 -1.0, %v294_v41  ;;  %v142_v35 = vsel %vm62_vm12, %v453_v43, %v251_v29  ;;  %vm204_vm6 = vcmask 64512  }
  0x1f   :  { %v249_v49 = vadd.f32 -1.0, %v296_v45  ;;  %vm228_vm7 = vcmask 25600  }
  0x20   :  { %171 = vmatpush.msra.mxu0 %v145_v38  ;;  %v141_v40 = vsel %vm61_vm13, %v468_v57, %v250_v47  ;;  %v332_v57 = vmov 1.0  }
  0x21   :  { %v298_v48 = vpop.eup %297  ;;  %v140_v42 = vsel %vm60_vm14, %v471_v58, %v249_v49 }
  0x22   :  { %172 = vmatpush.msra.mxu0 %v144_v44  ;;  %v300_v50 = vpop.eup %299  ;;  %v248_v51 = vadd.f32 -1.0, %v298_v48 }
  0x23   :  { %v247_v53 = vadd.f32 -1.0, %v300_v50 }
  0x24   :  { %173 = vmatpush.msra.mxu0 %v143_v46  ;;  %v302_v52 = vpop.eup %301  ;;  %v139_v43 = vsel %vm59_vm15, %v497_v20, %v248_v51 }
  0x25   :  { %v246_v54 = vadd.f32 -1.0, %v302_v52  ;;  %v138_v55 = vsel %vm58_vm0, %v500_v22, %v247_v53 }
  0x26   :  { %174 = vmatpush.msra.mxu0 %v142_v35 }
  0x27   :  { %v137_v56 = vsel %vm57_vm2, %v41_v32, %v246_v54 }
  0x28   :  { %175 = vmatpush.msra.mxu0 %v141_v40 }
  0x2a   :  { %176 = vmatpush.msra.mxu0 %v140_v42 }
  0x2c   :  { %177 = vmatpush.msra.mxu0 %v139_v43 }
  0x2e   :  { %178 = vmatpush.msra.mxu0 %v138_v55 }
  0x30   :  { %179 = vmatpush.msra.mxu0 %v137_v56 }
  0x31   :  { %263 = vmatmul.msk.f32.vlgmr.msra.gmra.mxu0 %vm157_vm1, %v332_v57 }
  0x7e   :  { %v163_v58 = vpop.xlane.xlu0 %162 }
  0x7f   :  { %303 = vrcp.f32 %v163_v58  ;;  %vm189_vm3 = vweird.f32 %v163_v58  ;;  %v195_v0 = vand.u32 2147483648, %v163_v58  ;;  %v193_v3 = vand.u32 2147483647, %v163_v58 }
  0x81   :  { %v196_v4 = vor.u32 1.1754944e-38, %v195_v0  ;;  %vm194_vm1 = vcmp.eq.f32.partialorder %v193_v3, 8.507059e+37 }
  0x85   :  { %v304_v60 = vpop.eup %303 }
  0x86   :  { %v185_v61 = vmul.f32 %v304_v60, %v163_v58  ;;  %vm190_vm4 = vweird.f32 %v304_v60 }
  0x87   :  { %vm191_vm5 = vmor %vm189_vm3, %vm190_vm4 }
  0x88   :  { %v186_v62 = vsub.f32 1.0, %v185_v61 }
  0x8a   :  { %v187_v63 = vmul.f32 %v304_v60, %v186_v62 }
  0x8c   :  { %v188_v2 = vadd.f32 %v304_v60, %v187_v63 }
  0x8e   :  { %v192_v16 = vsel %vm191_vm5, %v304_v60, %v188_v2 }
  0x8f   :  { %v197_v5 = vsel %vm194_vm1, %v196_v4, %v192_v16 }
  0xae   :  { %v181_v17 = vpop.f32.mrf.mxu0 }
  0xaf   :  { %v198_v6 = vmul.f32 %v197_v5, %v181_v17 }
  0xb1   :  { %264 = vmatmul.msk.f32.vlgmr.msra.gmra.mxu1 %vm204_vm6, %v198_v6 }
 0x12e   :  { %v225_v11 = vpop.f32.mrf.mxu1 }
 0x12f   :  { %v226_v7 = vadd.f32 %v270_v10, %v225_v11 }
 0x131   :  { %229 = vst.msk [vmem:[#allocation2] sm:$0x3] %vm228_vm7, %v226_v7 }
 0x132   :  { %240 = dma.vmem_to_hbm [thread:$0]  %s236_s29, 32, %s238_s7, [#allocation3]  }
 0x133   :  { %329 = dma.done.wait [#allocation3], 32  }
 0x134   :  { %330 = vsyncadd [#allocation3], 4294967264 }
 0x135   :  { %245 = vsyncpa [#allocation3], 1 }

// kernel: gat_forward.8
= control target key start
LH: loop header
LB: loop body
LE: loop exit
PB: predicated region body
PF: predicated region fallthrough
CT: control target
= control target key end

     0   :  { %v1331_v0 = vmov 0   ;;  %vm2130_vm7 = vcmask 7168   ;;  %s2115_s1 = inlined_call_operand.vmem [shape: f32[128,1], index: 1, kind: input, shape index: {}]   ;;  %s2116_s2 = inlined_call_operand.vmem [shape: f32[1,128], index: 2, kind: input, shape index: {}]   ;;  %s2117_s0 = inlined_call_operand.vmem [shape: s8[128,128], index: 0, kind: input, shape index: {}]   ;;  %s2118_s3 = inlined_call_operand.vmem [shape: bf16[128,8], index: 3, kind: input, shape index: {}]   ;;  %s2119_s4 = inlined_call_operand.vmem [shape: f32[128,8], index: 4, kind: output, shape index: {}]  }
   0x1   :  { %1232 = vset.pattern.permute.xlu1 %v1331_v0  ;;  %1231 = vset.pattern.permute.xlu0 %v1331_v0  ;;  %v153_v1 = vld [vmem:[%s2115_s1 + $0x10] sm:$0xff]  ;;  %v151_v2 = vld [vmem:[%s2115_s1] sm:$0xff]  ;;  %v154_v4 = vld [vmem:[%s2115_s1 + $0x18] sm:$0xff] }
   0x2   :  { %180 = vperm.xlu1 %1232, %v153_v1   ;;  %170 = vperm.xlu0 %1231, %v151_v2   ;;  %v155_v3 = vld [vmem:[%s2115_s1 + $0x20] sm:$0xff]  ;;  %v152_v5 = vld [vmem:[%s2115_s1 + $0x8] sm:$0xff]  ;;  %v158_v7 = vld [vmem:[%s2115_s1 + $0x38] sm:$0xff] }
   0x3   :  { %1233 = vset.pattern.permute.xlu2 %v1331_v0  ;;  %v156_v6 = vld [vmem:[%s2115_s1 + $0x28] sm:$0xff]  ;;  %v157_v8 = vld [vmem:[%s2115_s1 + $0x30] sm:$0xff]  ;;  %v159_v9 = vld [vmem:[%s2115_s1 + $0x40] sm:$0xff] }
   0x4   :  { %190 = vperm.xlu2 %1233, %v155_v3   ;;  %v161_v10 = vld [vmem:[%s2115_s1 + $0x50] sm:$0xff]  ;;  %v160_v11 = vld [vmem:[%s2115_s1 + $0x48] sm:$0xff]  ;;  %v162_v12 = vld [vmem:[%s2115_s1 + $0x58] sm:$0xff] }
   0x5   :  { %v164_v13 = vld [vmem:[%s2115_s1 + $0x68] sm:$0xff]  ;;  %v163_v14 = vld [vmem:[%s2115_s1 + $0x60] sm:$0xff]  ;;  %v165_v15 = vld [vmem:[%s2115_s1 + $0x70] sm:$0xff] }
   0x6   :  { %v166_v16 = vld [vmem:[%s2115_s1 + $0x78] sm:$0xff]  ;;  %v1410_v17 = vld [vmem:[%s2117_s0 + $0x4] sm:$0xff]   ;;  %v1166_v18 = vld [vmem:[%s2117_s0] sm:$0xf]  }
   0x7   :  { %v1171_v19 = vunpack.c.0.s8 %v1410_v17  ;;  %v1167_v20 = vunpack.c.0.s8 %v1166_v18  ;;  %v1419_v21 = vld [vmem:[%s2116_s2] ss:$0 sm:$0xff]  ;;  %v1175_v30 = vunpack.c.2.s8 %v1410_v17  ;;  %v1168_v33 = vunpack.c.1.s8 %v1166_v18  ;;  %v1449_v45 = vld [vmem:[%s2117_s0 + $0xc] sm:$0xff]  }
   0x8   :  { %v1172_v47 = vunpack.c.1.s8 %v1410_v17  ;;  %v1179_v50 = vunpack.c.0.s8 %v1449_v45  ;;  %v1180_v51 = vunpack.c.1.s8 %v1449_v45  ;;  %v1176_v3 = vunpack.c.3.s8 %v1410_v17 }
   0x9   :  { %v1421_v25 = vcvt.s32.f32 %v1171_v19  ;;  %v1423_v26 = vcvt.s32.f32 %v1167_v20  ;;  %v1431_v37 = vcvt.s32.f32 %v1175_v30  ;;  %v1443_v42 = vcvt.s32.f32 %v1168_v33 }
   0xa   :  { %185 = vperm.xlu1 %1232, %v154_v4   ;;  %175 = vperm.xlu0 %1231, %v152_v5   ;;  %v1461_v54 = vcvt.s32.f32 %v1172_v47  ;;  %v1469_v59 = vcvt.s32.f32 %v1179_v50  ;;  %v1471_v60 = vcvt.s32.f32 %v1180_v51  ;;  %v1481_v4 = vld [vmem:[%s2117_s0 + $0x14] sm:$0xff]  }
   0xb   :  { %vm121_vm0 = vcmp.gt.f32.partialorder %v1421_v25, 0.0  ;;  %vm119_vm1 = vcmp.gt.f32.partialorder %v1423_v26, 0.0  ;;  %vm123_vm2 = vcmp.gt.f32.partialorder %v1431_v37, 0.0  ;;  %vm120_vm3 = vcmp.gt.f32.partialorder %v1443_v42, 0.0 }
   0xc   :  { %195 = vperm.xlu2 %1233, %v156_v6   ;;  %vm122_vm4 = vcmp.gt.f32.partialorder %v1461_v54, 0.0  ;;  %vm125_vm5 = vcmp.gt.f32.partialorder %v1469_v59, 0.0  ;;  %vm126_vm6 = vcmp.gt.f32.partialorder %v1471_v60, 0.0  ;;  %v1184_v6 = vunpack.c.3.s8 %v1449_v45 }
   0xd   :  { %v1191_v30 = vunpack.c.2.s8 %v1481_v4 }
   0xe   :  { %v1503_v17 = vcvt.s32.f32 %v1184_v6 }
  0x10   :  { %vm128_vm9 = vcmp.gt.f32.partialorder %v1503_v17, 0.0 }
  0x12   :  { %205 = vperm.xlu1 %1232, %v158_v7   ;;  %200 = vperm.xlu0 %1231, %v157_v8   ;;  %v1187_v7 = vunpack.c.0.s8 %v1481_v4 }
  0x14   :  { %210 = vperm.xlu2 %1233, %v159_v9   ;;  %v1505_v18 = vcvt.s32.f32 %v1187_v7 }
  0x16   :  { %vm129_vm10 = vcmp.gt.f32.partialorder %v1505_v18, 0.0 }
  0x1a   :  { %220 = vperm.xlu1 %1232, %v161_v10   ;;  %215 = vperm.xlu0 %1231, %v160_v11  }
  0x1c   :  { %225 = vperm.xlu2 %1233, %v162_v12  }
  0x22   :  { %235 = vperm.xlu1 %1232, %v164_v13   ;;  %230 = vperm.xlu0 %1231, %v163_v14   ;;  %v1499_v14 = vcvt.s32.f32 %v1176_v3 }
  0x24   :  { %240 = vperm.xlu2 %1233, %v165_v15   ;;  %vm124_vm8 = vcmp.gt.f32.partialorder %v1499_v14, 0.0 }
  0x2a   :  { %245 = vperm.xlu0 %1231, %v166_v16  }
  0x5e   :  { %v191_v22 = vpop.permute.xlu2 %190 }
  0x5f   :  { %v255_v27 = vadd.f32 %v1419_v21, %v191_v22  ;;  %v1332_v22 = vmov -inf  }
  0x60   :  { %24 = vst.msk [vmem:[#allocation2 + $0x10] sm:$0xff] %vm2130_vm7, %v1332_v22 }
  0x61   :  { %v271_v34 = vmul.f32 0.2, %v255_v27  ;;  %22 = vst.msk [vmem:[#allocation2] sm:$0xff] %vm2130_vm7, %v1332_v22 }
  0x62   :  { %23 = vst.msk [vmem:[#allocation2 + $0x8] sm:$0xff] %vm2130_vm7, %v1332_v22 }
  0x63   :  { %v287_v44 = vmax.f32 %v255_v27, %v271_v34  ;;  %25 = vst.msk [vmem:[#allocation2 + $0x18] sm:$0xff] %vm2130_vm7, %v1332_v22 }
  0x64   :  { %26 = vst.msk [vmem:[#allocation2 + $0x20] sm:$0xff] %vm2130_vm7, %v1332_v22 }
  0x65   :  { %v1459_v53 = vsel %vm123_vm2, %v287_v44, -1e+30  ;;  %27 = vst.msk [vmem:[#allocation2 + $0x28] sm:$0xff] %vm2130_vm7, %v1332_v22 }
  0x66   :  { %v196_v46 = vpop.permute.xlu2 %195  ;;  %28 = vst.msk [vmem:[#allocation2 + $0x30] sm:$0xff] %vm2130_vm7, %v1332_v22 }
  0x67   :  { %v256_v63 = vadd.f32 %v1419_v21, %v196_v46  ;;  %v1547_v46 = vcvt.s32.f32 %v1191_v30  ;;  %29 = vst.msk [vmem:[#allocation2 + $0x38] sm:$0xff] %vm2130_vm7, %v1332_v22 }
  0x68   :  { %30 = vst.msk [vmem:[#allocation2 + $0x40] sm:$0xff] %vm2130_vm7, %v1332_v22  ;;  %v1653_v30 = vld [vmem:[#allocation2] sm:$0xff] }
  0x69   :  { %v272_v10 = vmul.f32 0.2, %v256_v63  ;;  %2132 = vst [vmem:[#allocation5_spill] sm:$0xff] %v1547_v46  ;;  %vm131_vm12 = vcmp.gt.f32.partialorder %v1547_v46, 0.0 }
  0x6a   :  { %31 = vst.msk [vmem:[#allocation2 + $0x48] sm:$0xff] %vm2130_vm7, %v1332_v22 }
  0x6b   :  { %32 = vst.msk [vmem:[#allocation2 + $0x50] sm:$0xff] %vm2130_vm7, %v1332_v22 }
  0x6c   :  { %33 = vst.msk [vmem:[#allocation2 + $0x58] sm:$0xff] %vm2130_vm7, %v1332_v22 }
  0x6d   :  { %34 = vst.msk [vmem:[#allocation2 + $0x60] sm:$0xff] %vm2130_vm7, %v1332_v22 }
  0x6e   :  { %v211_v5 = vpop.permute.xlu2 %210  ;;  %35 = vst.msk [vmem:[#allocation2 + $0x68] sm:$0xff] %vm2130_vm7, %v1332_v22 }
  0x6f   :  { %36 = vst.msk [vmem:[#allocation2 + $0x70] sm:$0xff] %vm2130_vm7, %v1332_v22 }
  0x70   :  { %37 = vst.msk [vmem:[#allocation2 + $0x78] sm:$0xff] %vm2130_vm7, %v1332_v22 }
  0x74   :  { %v181_v23 = vpop.permute.xlu1 %180  ;;  %v171_v24 = vpop.permute.xlu0 %170 }
  0x75   :  { %v253_v28 = vadd.f32 %v1419_v21, %v181_v23  ;;  %v251_v29 = vadd.f32 %v1419_v21, %v171_v24  ;;  %v259_v23 = vadd.f32 %v1419_v21, %v211_v5  ;;  %v288_v24 = vmax.f32 %v256_v63, %v272_v10 }
  0x77   :  { %v269_v31 = vmul.f32 0.2, %v253_v28  ;;  %v267_v32 = vmul.f32 0.2, %v251_v29  ;;  %v275_v34 = vmul.f32 0.2, %v259_v23 }
  0x79   :  { %v285_v35 = vmax.f32 %v253_v28, %v269_v31  ;;  %v283_v36 = vmax.f32 %v251_v29, %v267_v32  ;;  %v1183_v29 = vunpack.c.2.s8 %v1449_v45  ;;  %v1192_v31 = vunpack.c.3.s8 %v1481_v4 }
  0x7a   :  { %v291_v51 = vmax.f32 %v259_v23, %v275_v34 }
  0x7b   :  { %v1435_v38 = vsel %vm121_vm0, %v285_v35, -1e+30  ;;  %v1439_v39 = vsel %vm119_vm1, %v283_v36, -1e+30  ;;  %v226_v35 = vpop.permute.xlu2 %225  ;;  %v1529_v36 = vsel %vm124_vm8, %v288_v24, -1e+30  ;;  %v1549_v47 = vcvt.s32.f32 %v1192_v31 }
  0x7c   :  { %v186_v40 = vpop.permute.xlu1 %185  ;;  %v176_v41 = vpop.permute.xlu0 %175  ;;  %335 = vmax.xlane.f32.xlu0 %v1435_v38  ;;  %331 = vmax.xlane.f32.xlu1 %v1439_v39  ;;  %v262_v50 = vadd.f32 %v1419_v21, %v226_v35  ;;  %v1662_v35 = vld [vmem:[#allocation2 + $0x8] sm:$0xff] }
  0x7d   :  { %v252_v43 = vadd.f32 %v1419_v21, %v176_v41  ;;  %v254_v48 = vadd.f32 %v1419_v21, %v186_v40  ;;  %2133 = vst [vmem:[#allocation6_spill] sm:$0xff] %v1549_v47  ;;  %vm2120_vm13 = vcmp.gt.f32.partialorder %v1549_v47, 0.0 }
  0x7f   :  { %v268_v49 = vmul.f32 0.2, %v252_v43  ;;  %v270_v55 = vmul.f32 0.2, %v254_v48 }
  0x81   :  { %v284_v52 = vmax.f32 %v252_v43, %v268_v49  ;;  %v286_v2 = vmax.f32 %v254_v48, %v270_v55  ;;  %v1541_v43 = vcvt.s32.f32 %v1183_v29  ;;  %v317_v29 = vld [vmem:[#allocation2 + $0x10] sm:$0xff] }
  0x83   :  { %v1465_v56 = vsel %vm120_vm3, %v284_v52, -1e+30  ;;  %v1493_v12 = vsel %vm122_vm4, %v286_v2, -1e+30  ;;  %v1227_v52 = vld [vmem:[%s2117_s0 + $0x1c] sm:$0xf]  }
  0x84   :  { %v206_v57 = vpop.permute.xlu1 %205  ;;  %v201_v58 = vpop.permute.xlu0 %200  ;;  %333 = vmax.xlane.f32.xlu2 %v1465_v56  ;;  %339 = vmax.xlane.f32.xlu1 %v1459_v53  ;;  %vm127_vm11 = vcmp.gt.f32.partialorder %v1541_v43, 0.0 }
  0x85   :  { %v258_v61 = vadd.f32 %v1419_v21, %v206_v57  ;;  %v257_v62 = vadd.f32 %v1419_v21, %v201_v58  ;;  %v1196_v58 = vunpack.c.1.s8 %v1227_v52 }
  0x87   :  { %v274_v0 = vmul.f32 0.2, %v258_v61  ;;  %v273_v1 = vmul.f32 0.2, %v257_v62  ;;  %v1592_v6 = vcvt.s32.f32 %v1196_v58 }
  0x89   :  { %v289_v8 = vmax.f32 %v257_v62, %v273_v1  ;;  %v290_v9 = vmax.f32 %v258_v61, %v274_v0  ;;  %v1188_v61 = vunpack.c.1.s8 %v1481_v4  ;;  %v278_v0 = vmul.f32 0.2, %v262_v50  ;;  %v241_v4 = vpop.permute.xlu2 %240  ;;  %2134 = vst [vmem:[#allocation7_spill] sm:$0xff] %v1592_v6 }
  0x8a   :  { %v1576_v1 = vsel %vm127_vm11, %v291_v51, -1e+30  ;;  %vm2131_vm14 = vcmp.gt.f32.partialorder %v1592_v6, 0.0  ;;  %v1671_v51 = vld [vmem:[#allocation2 + $0x30] sm:$0xff] }
  0x8b   :  { %v1489_v11 = vsel %vm125_vm5, %v289_v8, -1e+30  ;;  %v1497_v13 = vsel %vm126_vm6, %v290_v9, -1e+30  ;;  %v1594_v7 = vcvt.s32.f32 %v1188_v61  ;;  %v265_v9 = vadd.f32 %v1419_v21, %v241_v4  ;;  %v1690_v4 = vld [vmem:[#allocation2 + $0x48] sm:$0xff] }
  0x8c   :  { %v221_v15 = vpop.permute.xlu1 %220  ;;  %v216_v16 = vpop.permute.xlu0 %215  ;;  %343 = vmax.xlane.f32.xlu0 %v1489_v11  ;;  %337 = vmax.xlane.f32.xlu2 %v1493_v12 }
  0x8d   :  { %v261_v19 = vadd.f32 %v1419_v21, %v221_v15  ;;  %v260_v20 = vadd.f32 %v1419_v21, %v216_v16  ;;  %345 = vmax.xlane.f32.xlu1 %v1497_v13  ;;  %v294_v15 = vmax.f32 %v262_v50, %v278_v0  ;;  %vm130_vm15 = vcmp.gt.f32.partialorder %v1594_v7, 0.0 }
  0x8e   :  { %v1195_v16 = vunpack.c.0.s8 %v1227_v52  ;;  %v1673_v52 = vld [vmem:[#allocation2 + $0x18] sm:$0xff] }
  0x8f   :  { %v277_v27 = vmul.f32 0.2, %v261_v19  ;;  %v276_v28 = vmul.f32 0.2, %v260_v20  ;;  %v1609_v22 = vsel %vm130_vm15, %v294_v15, -1e+30 }
  0x91   :  { %v292_v32 = vmax.f32 %v260_v20, %v276_v28  ;;  %v293_v33 = vmax.f32 %v261_v19, %v277_v27  ;;  %v281_v20 = vmul.f32 0.2, %v265_v9  ;;  %v2121_v28 = vmov 0.0  }
  0x92   :  { %38 = vst.msk [vmem:[#allocation3] sm:$0xff] %vm2130_vm7, %v2121_v28 }
  0x93   :  { %v1535_v40 = vsel %vm128_vm9, %v292_v32, -1e+30  ;;  %v1539_v41 = vsel %vm129_vm10, %v293_v33, -1e+30  ;;  %v297_v24 = vmax.f32 %v265_v9, %v281_v20  ;;  %39 = vst.msk [vmem:[#allocation3 + $0x8] sm:$0xff] %vm2130_vm7, %v2121_v28 }
  0x94   :  { %v236_v44 = vpop.permute.xlu1 %235  ;;  %v231_v45 = vpop.permute.xlu0 %230  ;;  %349 = vmax.xlane.f32.xlu0 %v1535_v40  ;;  %341 = vmax.xlane.f32.xlu2 %v1529_v36  ;;  %40 = vst.msk [vmem:[#allocation3 + $0x10] sm:$0xff] %vm2130_vm7, %v2121_v28 }
  0x95   :  { %v264_v48 = vadd.f32 %v1419_v21, %v236_v44  ;;  %v263_v49 = vadd.f32 %v1419_v21, %v231_v45  ;;  %351 = vmax.xlane.f32.xlu1 %v1539_v41  ;;  %41 = vst.msk [vmem:[#allocation3 + $0x18] sm:$0xff] %vm2130_vm7, %v2121_v28  ;;  %v319_v44 = vld [vmem:[#allocation2 + $0x20] sm:$0xff] }
  0x96   :  { %42 = vst.msk [vmem:[#allocation3 + $0x20] sm:$0xff] %vm2130_vm7, %v2121_v28 }
  0x97   :  { %v280_v55 = vmul.f32 0.2, %v264_v48  ;;  %v279_v57 = vmul.f32 0.2, %v263_v49  ;;  %43 = vst.msk [vmem:[#allocation3 + $0x28] sm:$0xff] %vm2130_vm7, %v2121_v28 }
  0x98   :  { %44 = vst.msk [vmem:[#allocation3 + $0x30] sm:$0xff] %vm2130_vm7, %v2121_v28 }
  0x99   :  { %v295_v62 = vmax.f32 %v263_v49, %v279_v57  ;;  %v296_v63 = vmax.f32 %v264_v48, %v280_v55  ;;  %45 = vst.msk [vmem:[#allocation3 + $0x38] sm:$0xff] %vm2130_vm7, %v2121_v28  ;;  %v1675_v55 = vld [vmem:[#allocation2 + $0x38] sm:$0xff] }
  0x9a   :  { %46 = vst.msk [vmem:[#allocation3 + $0x40] sm:$0xff] %vm2130_vm7, %v2121_v28 }
  0x9b   :  { %v1582_v2 = vsel %vm131_vm12, %v295_v62, -1e+30  ;;  %v1586_v3 = vsel %vm2120_vm13, %v296_v63, -1e+30  ;;  %47 = vst.msk [vmem:[#allocation3 + $0x48] sm:$0xff] %vm2130_vm7, %v2121_v28 }
  0x9c   :  { %v246_v5 = vpop.permute.xlu0 %245  ;;  %355 = vmax.xlane.f32.xlu0 %v1582_v2  ;;  %347 = vmax.xlane.f32.xlu2 %v1576_v1  ;;  %48 = vst.msk [vmem:[#allocation3 + $0x50] sm:$0xff] %vm2130_vm7, %v2121_v28 }
  0x9d   :  { %v266_v8 = vadd.f32 %v1419_v21, %v246_v5  ;;  %357 = vmax.xlane.f32.xlu1 %v1586_v3  ;;  %v1613_v21 = vcvt.s32.f32 %v1195_v16  ;;  %49 = vst.msk [vmem:[#allocation3 + $0x58] sm:$0xff] %vm2130_vm7, %v2121_v28  ;;  %v1692_v5 = vld [vmem:[#allocation2 + $0x28] sm:$0xff] }
  0x9e   :  { %50 = vst.msk [vmem:[#allocation3 + $0x60] sm:$0xff] %vm2130_vm7, %v2121_v28 }
  0x9f   :  { %v282_v10 = vmul.f32 0.2, %v266_v8  ;;  %vm133_vm13 = vcmp.gt.f32.partialorder %v1613_v21, 0.0  ;;  %51 = vst.msk [vmem:[#allocation3 + $0x68] sm:$0xff] %vm2130_vm7, %v2121_v28 }
  0xa0   :  { %v1618_v27 = vsel %vm133_vm13, %v297_v24, -1e+30  ;;  %52 = vst.msk [vmem:[#allocation3 + $0x70] sm:$0xff] %vm2130_vm7, %v2121_v28 }
  0xa1   :  { %v298_v19 = vmax.f32 %v266_v8, %v282_v10  ;;  %53 = vst.msk [vmem:[#allocation3 + $0x78] sm:$0xff] %vm2130_vm7, %v2121_v28  ;;  %v1694_v8 = vld [vmem:[#allocation2 + $0x50] sm:$0xff] }
  0xa3   :  { %v1605_v23 = vsel %vm2131_vm14, %v298_v19, -1e+30  ;;  %vm1133_vm14 = vmpackc.low %vm120_vm3, %vm119_vm1 }
  0xa4   :  { %2135 = vst [vmem:[#allocation8_spill] sm:$0xff] %v1605_v23  ;;  %361 = vmax.xlane.f32.xlu0 %v1605_v23  ;;  %353 = vmax.xlane.f32.xlu2 %v1609_v22 }
  0xac   :  { %359 = vmax.xlane.f32.xlu2 %v1618_v27 }
  0xef   :  { %v336_v31 = vpop.xlane.xlu0 %335  ;;  %v332_v32 = vpop.xlane.xlu1 %331 }
  0xf0   :  { %v365_v33 = vmax.f32 %v317_v29, %v336_v31  ;;  %v1656_v34 = vmax.f32 %v1653_v30, %v332_v32  ;;  %v1714_v31 = vld [vmem:[#allocation2 + $0x60] sm:$0xff] }
  0xf1   :  { %v1716_v32 = vld [vmem:[#allocation2 + $0x40] sm:$0xff] }
  0xf2   :  { %920 = vst.msk [vmem:[#allocation2 + $0x10] sm:$0xff] %vm2130_vm7, %v365_v33  ;;  %439 = vperm.xlu0 %1231, %v365_v33   ;;  %429 = vperm.xlu1 %1232, %v1656_v34   ;;  %v381_v24 = vsub.f32 %v317_v29, %v365_v33 }
  0xf3   :  { %918 = vst.msk [vmem:[#allocation2] sm:$0xff] %vm2130_vm7, %v1656_v34 }
  0xf7   :  { %v334_v45 = vpop.xlane.xlu2 %333  ;;  %v340_v48 = vpop.xlane.xlu1 %339 }
  0xf8   :  { %v1665_v49 = vmax.f32 %v1662_v35, %v334_v45  ;;  %v367_v50 = vmax.f32 %v319_v44, %v340_v48  ;;  %v1718_v45 = vld [vmem:[#allocation2 + $0x68] sm:$0xff] }
  0xfa   :  { %919 = vst.msk [vmem:[#allocation2 + $0x8] sm:$0xff] %vm2130_vm7, %v1665_v49  ;;  %434 = vperm.xlu2 %1233, %v1665_v49   ;;  %449 = vperm.xlu0 %1231, %v367_v50   ;;  %v383_v33 = vsub.f32 %v319_v44, %v367_v50  ;;  %v379_v44 = vsub.f32 %v1653_v30, %v1656_v34 }
  0xfb   :  { %922 = vst.msk [vmem:[#allocation2 + $0x20] sm:$0xff] %vm2130_vm7, %v367_v50  ;;  %v380_v50 = vsub.f32 %v1662_v35, %v1665_v49 }
  0xfc   :  { %v395_v30 = vmul.f32 1.442695, %v379_v44 }
  0xfd   :  { %v397_v34 = vmul.f32 1.442695, %v380_v50 }
  0xff   :  { %v344_v57 = vpop.xlane.xlu0 %343  ;;  %v338_v58 = vpop.xlane.xlu2 %337 }
 0x100   :  { %v1678_v61 = vmax.f32 %v1671_v51, %v344_v57  ;;  %v1681_v62 = vmax.f32 %v1673_v52, %v338_v58  ;;  %v346_v63 = vpop.xlane.xlu1 %345  ;;  %v399_v58 = vmul.f32 1.442695, %v381_v24  ;;  %v1732_v24 = vld [vmem:[#allocation2 + $0x58] sm:$0xff] }
 0x101   :  { %v370_v0 = vmax.f32 %v1675_v55, %v346_v63 }
 0x102   :  { %924 = vst.msk [vmem:[#allocation2 + $0x30] sm:$0xff] %vm2130_vm7, %v1678_v61  ;;  %444 = vperm.xlu1 %1232, %v1681_v62   ;;  %1235 = vpow2.f32 %v399_v58  ;;  %v382_v35 = vsub.f32 %v1673_v52, %v1681_v62 }
 0x103   :  { %921 = vst.msk [vmem:[#allocation2 + $0x18] sm:$0xff] %vm2130_vm7, %v1681_v62  ;;  %464 = vperm.xlu0 %1231, %v370_v0   ;;  %v386_v58 = vsub.f32 %v1675_v55, %v370_v0 }
 0x104   :  { %925 = vst.msk [vmem:[#allocation2 + $0x38] sm:$0xff] %vm2130_vm7, %v370_v0  ;;  %v401_v0 = vmul.f32 1.442695, %v382_v35 }
 0x107   :  { %v350_v9 = vpop.xlane.xlu0 %349  ;;  %v342_v10 = vpop.xlane.xlu2 %341 }
 0x108   :  { %v1697_v15 = vmax.f32 %v1690_v4, %v350_v9  ;;  %v1700_v16 = vmax.f32 %v1692_v5, %v342_v10  ;;  %v352_v19 = vpop.xlane.xlu1 %351  ;;  %v1740_v47 = vpop.eup %1235 }
 0x109   :  { %v1703_v20 = vmax.f32 %v1694_v8, %v352_v19  ;;  %v1730_v19 = vld [vmem:[#allocation2 + $0x78] sm:$0xff] }
 0x10a   :  { %927 = vst.msk [vmem:[#allocation2 + $0x48] sm:$0xff] %vm2130_vm7, %v1697_v15  ;;  %454 = vperm.xlu2 %1233, %v1700_v16   ;;  %459 = vperm.xlu1 %1232, %v1678_v61   ;;  %v384_v49 = vsub.f32 %v1692_v5, %v1700_v16 }
 0x10b   :  { %923 = vst.msk [vmem:[#allocation2 + $0x28] sm:$0xff] %vm2130_vm7, %v1700_v16  ;;  %479 = vperm.xlu0 %1231, %v1703_v20   ;;  %v389_v55 = vsub.f32 %v1694_v8, %v1703_v20 }
 0x10c   :  { %928 = vst.msk [vmem:[#allocation2 + $0x50] sm:$0xff] %vm2130_vm7, %v1703_v20 }
 0x10d   :  { %v415_v62 = vmul.f32 1.442695, %v389_v55  ;;  %v1161_v55 = vld [vmem:[%s2118_s3 + $0x20] sm:$0xff] }
 0x10f   :  { %v356_v48 = vpop.xlane.xlu0 %355  ;;  %v348_v57 = vpop.xlane.xlu2 %347 }
 0x110   :  { %v1721_v63 = vmax.f32 %v1714_v31, %v356_v48  ;;  %v371_v9 = vmax.f32 %v1716_v32, %v348_v57  ;;  %v358_v10 = vpop.xlane.xlu1 %357 }
 0x111   :  { %v376_v29 = vmax.f32 %v1718_v45, %v358_v10  ;;  %v403_v10 = vmul.f32 1.442695, %v383_v33  ;;  %v1754_v33 = vld [vmem:[#allocation2 + $0x70] sm:$0xff] }
 0x112   :  { %930 = vst.msk [vmem:[#allocation2 + $0x60] sm:$0xff] %vm2130_vm7, %v1721_v63  ;;  %469 = vperm.xlu2 %1233, %v371_v9   ;;  %474 = vperm.xlu1 %1232, %v1697_v15   ;;  %v387_v5 = vsub.f32 %v1716_v32, %v371_v9  ;;  %v1164_v32 = vld [vmem:[%s2118_s3 + $0x38] sm:$0xff]  ;;  %v391_v35 = vsub.f32 %v1714_v31, %v1721_v63 }
 0x113   :  { %926 = vst.msk [vmem:[#allocation2 + $0x40] sm:$0xff] %vm2130_vm7, %v371_v9  ;;  %494 = vperm.xlu0 %1231, %v376_v29   ;;  %1237 = vpow2.f32 %v403_v10  ;;  %v405_v10 = vmul.f32 1.442695, %v384_v49  ;;  %v392_v8 = vsub.f32 %v1718_v45, %v376_v29  ;;  %836 = vmatpush.bf16.msra.mxu0 %v1164_v32  ;;  %v1163_v9 = vld [vmem:[%s2118_s3 + $0x30] sm:$0xff] }
 0x114   :  { %931 = vst.msk [vmem:[#allocation2 + $0x68] sm:$0xff] %vm2130_vm7, %v376_v29  ;;  %1239 = vpow2.f32 %v395_v30  ;;  %v411_v20 = vmul.f32 1.442695, %v387_v5  ;;  %1197 = vmatpush.bf16.msra.mxu1 %v1164_v32  ;;  %1198 = vmatpush.bf16.msra.mxu2 %v1164_v32 }
 0x115   :  { %1241 = vpow2.f32 %v397_v34  ;;  %v421_v34 = vmul.f32 1.442695, %v392_v8  ;;  %1199 = vmatpush.bf16.msra.mxu3 %v1164_v32 }
 0x117   :  { %v362_v48 = vpop.xlane.xlu0 %361  ;;  %v354_v57 = vpop.xlane.xlu2 %353  ;;  %837 = vmatpush.bf16.msra.mxu0 %v1163_v9 }
 0x118   :  { %v1735_v28 = vmax.f32 %v1730_v19, %v362_v48  ;;  %v1738_v6 = vmax.f32 %v1732_v24, %v354_v57  ;;  %v409_v57 = vmul.f32 1.442695, %v386_v58  ;;  %v385_v58 = vsub.f32 %v1671_v51, %v1678_v61  ;;  %1200 = vmatpush.bf16.msra.mxu1 %v1163_v9  ;;  %1201 = vmatpush.bf16.msra.mxu2 %v1163_v9 }
 0x119   :  { %v1759_v23 = vpop.eup %1237  ;;  %v388_v61 = vsub.f32 %v1690_v4, %v1697_v15  ;;  %1202 = vmatpush.bf16.msra.mxu3 %v1163_v9 }
 0x11a   :  { %933 = vst.msk [vmem:[#allocation2 + $0x78] sm:$0xff] %vm2130_vm7, %v1735_v28  ;;  %484 = vperm.xlu2 %1233, %v1738_v6   ;;  %489 = vperm.xlu1 %1232, %v1721_v63   ;;  %1243 = vpow2.f32 %v409_v57  ;;  %v1772_v52 = vpop.eup %1239  ;;  %v407_v16 = vmul.f32 1.442695, %v385_v58  ;;  %v390_v45 = vsub.f32 %v1732_v24, %v1738_v6  ;;  %v1159_v58 = vld [vmem:[%s2118_s3 + $0x10] sm:$0xff] }
 0x11b   :  { %929 = vst.msk [vmem:[#allocation2 + $0x58] sm:$0xff] %vm2130_vm7, %v1738_v6  ;;  %696 = vperm.xlu0 %1231, %v1740_v47   ;;  %v1774_v44 = vpop.eup %1241  ;;  %1245 = vpow2.f32 %v401_v0  ;;  %v413_v4 = vmul.f32 1.442695, %v388_v61  ;;  %v1162_v6 = vld [vmem:[%s2118_s3 + $0x28] sm:$0xff]  ;;  %v419_v0 = vmul.f32 1.442695, %v391_v35 }
 0x11c   :  { %1247 = vpow2.f32 %v405_v10  ;;  %v417_v15 = vmul.f32 1.442695, %v390_v45  ;;  %838 = vmatpush.bf16.msra.mxu0 %v1162_v6  ;;  %1203 = vmatpush.bf16.msra.mxu1 %v1162_v6 }
 0x11d   :  { %1249 = vpow2.f32 %v415_v62  ;;  %1204 = vmatpush.bf16.msra.mxu2 %v1162_v6  ;;  %1205 = vmatpush.bf16.msra.mxu3 %v1162_v6 }
 0x11e   :  { %1251 = vpow2.f32 %v407_v16 }
 0x11f   :  { %v360_v48 = vpop.xlane.xlu2 %359  ;;  %1253 = vpow2.f32 %v411_v20 }
 0x120   :  { %v1757_v46 = vmax.f32 %v1754_v33, %v360_v48  ;;  %v1776_v50 = vpop.eup %1243  ;;  %1255 = vpow2.f32 %v421_v34  ;;  %839 = vmatpush.bf16.msra.mxu0 %v1161_v55  ;;  %1206 = vmatpush.bf16.msra.mxu1 %v1161_v55  ;;  %v2136_v34 = vmov 0.0  }
 0x121   :  { %v1785_v30 = vpop.eup %1245  ;;  %1257 = vpow2.f32 %v413_v4  ;;  %1207 = vmatpush.bf16.msra.mxu2 %v1161_v55  ;;  %1208 = vmatpush.bf16.msra.mxu3 %v1161_v55 }
 0x122   :  { %932 = vst.msk [vmem:[#allocation2 + $0x70] sm:$0xff] %vm2130_vm7, %v1757_v46  ;;  %499 = vperm.xlu2 %1233, %v1757_v46   ;;  %504 = vperm.xlu1 %1232, %v1735_v28   ;;  %v1787_v48 = vpop.eup %1247  ;;  %1259 = vpow2.f32 %v417_v15  ;;  %v393_v49 = vsub.f32 %v1754_v33, %v1757_v46  ;;  %v1160_v46 = vld [vmem:[%s2118_s3 + $0x18] sm:$0xff]  ;;  %v394_v33 = vsub.f32 %v1730_v19, %v1735_v28  ;;  %v1158_v28 = vld [vmem:[%s2118_s3 + $0x8] sm:$0xff]  ;;  %v1157_v19 = vld [vmem:[%s2118_s3] sm:$0xff]  ;;  %vm54_vm7 = vcmask 64512  }
 0x123   :  { %706 = vperm.xlu0 %1231, %v1759_v23   ;;  %v1789_v51 = vpop.eup %1249  ;;  %1261 = vpow2.f32 %v419_v0  ;;  %55 = vst.msk [vmem:[#allocation4] sm:$0xff] %vm54_vm7, %v2136_v34 }
 0x124   :  { %v1804_v29 = vpop.eup %1251  ;;  %v423_v31 = vmul.f32 1.442695, %v393_v49  ;;  %840 = vmatpush.bf16.msra.mxu0 %v1160_v46  ;;  %1209 = vmatpush.bf16.msra.mxu1 %v1160_v46  ;;  %v425_v62 = vmul.f32 1.442695, %v394_v33  ;;  %56 = vst.msk [vmem:[#allocation4 + $0x8] sm:$0xff] %vm54_vm7, %v2136_v34 }
 0x125   :  { %v1806_v57 = vpop.eup %1253  ;;  %1210 = vmatpush.bf16.msra.mxu2 %v1160_v46  ;;  %1211 = vmatpush.bf16.msra.mxu3 %v1160_v46  ;;  %57 = vst.msk [vmem:[#allocation4 + $0x10] sm:$0xff] %vm54_vm7, %v2136_v34 }
 0x126   :  { %v1811_v24 = vpop.eup %1255  ;;  %1263 = vpow2.f32 %v423_v31  ;;  %58 = vst.msk [vmem:[#allocation4 + $0x18] sm:$0xff] %vm54_vm7, %v2136_v34 }
 0x127   :  { %v1823_v63 = vpop.eup %1257  ;;  %1265 = vpow2.f32 %v425_v62  ;;  %59 = vst.msk [vmem:[#allocation4 + $0x20] sm:$0xff] %vm54_vm7, %v2136_v34 }
 0x128   :  { %v1825_v10 = vpop.eup %1259  ;;  %841 = vmatpush.bf16.msra.mxu0 %v1159_v58  ;;  %1212 = vmatpush.bf16.msra.mxu1 %v1159_v58  ;;  %60 = vst.msk [vmem:[#allocation4 + $0x28] sm:$0xff] %vm54_vm7, %v2136_v34 }
 0x129   :  { %v1837_v5 = vpop.eup %1261  ;;  %1213 = vmatpush.bf16.msra.mxu2 %v1159_v58  ;;  %1214 = vmatpush.bf16.msra.mxu3 %v1159_v58  ;;  %61 = vst.msk [vmem:[#allocation4 + $0x30] sm:$0xff] %vm54_vm7, %v2136_v34 }
 0x12a   :  { %691 = vperm.xlu1 %1232, %v1774_v44   ;;  %686 = vperm.xlu2 %1233, %v1772_v52   ;;  %62 = vst.msk [vmem:[#allocation4 + $0x38] sm:$0xff] %vm54_vm7, %v2136_v34 }
 0x12b   :  { %721 = vperm.xlu0 %1231, %v1776_v50   ;;  %63 = vst.msk [vmem:[#allocation4 + $0x40] sm:$0xff] %vm54_vm7, %v2136_v34  ;;  %v669_v17 = vld [vmem:[#allocation4 + $0x8] sm:$0xff] }
 0x12c   :  { %v1839_v8 = vpop.eup %1263  ;;  %842 = vmatpush.bf16.msra.mxu0 %v1158_v28  ;;  %1215 = vmatpush.bf16.msra.mxu1 %v1158_v28  ;;  %64 = vst.msk [vmem:[#allocation4 + $0x48] sm:$0xff] %vm54_vm7, %v2136_v34 }
 0x12d   :  { %1216 = vmatpush.bf16.msra.mxu2 %v1158_v28  ;;  %1217 = vmatpush.bf16.msra.mxu3 %v1158_v28  ;;  %v1849_v16 = vpop.eup %1265  ;;  %65 = vst.msk [vmem:[#allocation4 + $0x50] sm:$0xff] %vm54_vm7, %v2136_v34 }
 0x12e   :  { %66 = vst.msk [vmem:[#allocation4 + $0x58] sm:$0xff] %vm54_vm7, %v2136_v34 }
 0x12f   :  { %67 = vst.msk [vmem:[#allocation4 + $0x60] sm:$0xff] %vm54_vm7, %v2136_v34 }
 0x130   :  { %843 = vmatpush.bf16.msra.mxu0 %v1157_v19  ;;  %1218 = vmatpush.bf16.msra.mxu1 %v1157_v19  ;;  %68 = vst.msk [vmem:[#allocation4 + $0x68] sm:$0xff] %vm54_vm7, %v2136_v34 }
 0x131   :  { %1219 = vmatpush.bf16.msra.mxu2 %v1157_v19  ;;  %1220 = vmatpush.bf16.msra.mxu3 %v1157_v19  ;;  %69 = vst.msk [vmem:[#allocation4 + $0x70] sm:$0xff] %vm54_vm7, %v2136_v34 }
 0x132   :  { %711 = vperm.xlu1 %1232, %v1787_v48   ;;  %701 = vperm.xlu2 %1233, %v1785_v30   ;;  %70 = vst.msk [vmem:[#allocation4 + $0x78] sm:$0xff] %vm54_vm7, %v2136_v34 }
 0x133   :  { %736 = vperm.xlu0 %1231, %v1789_v51  }
 0x13a   :  { %726 = vperm.xlu1 %1232, %v1806_v57   ;;  %716 = vperm.xlu2 %1233, %v1804_v29  }
 0x13b   :  { %751 = vperm.xlu0 %1231, %v1811_v24  }
 0x142   :  { %741 = vperm.xlu1 %1232, %v1825_v10   ;;  %731 = vperm.xlu2 %1233, %v1823_v63  }
 0x14a   :  { %756 = vperm.xlu1 %1232, %v1839_v8   ;;  %746 = vperm.xlu2 %1233, %v1837_v5  }
 0x152   :  { %761 = vperm.xlu2 %1233, %v1849_v16  }
 0x154   :  { %v435_v20 = vpop.permute.xlu2 %434 }
 0x155   :  { %v508_v61 = vsub.f32 %v1465_v56, %v435_v20 }
 0x157   :  { %v525_v4 = vmul.f32 1.442695, %v508_v61 }
 0x159   :  { %1267 = vpow2.f32 %v525_v4 }
 0x164   :  { %v440_v32 = vpop.permute.xlu0 %439  ;;  %v455_v45 = vpop.permute.xlu2 %454 }
 0x165   :  { %v509_v15 = vsub.f32 %v1435_v38, %v440_v32  ;;  %v430_v9 = vpop.permute.xlu1 %429  ;;  %v512_v38 = vsub.f32 %v1529_v36, %v455_v45  ;;  %v1268_v36 = vpop.eup %1267 }
 0x166   :  { %v507_v56 = vsub.f32 %v1439_v39, %v430_v9 }
 0x167   :  { %v527_v6 = vmul.f32 1.442695, %v509_v15  ;;  %v533_v55 = vmul.f32 1.442695, %v512_v38 }
 0x168   :  { %v523_v35 = vmul.f32 1.442695, %v507_v56  ;;  %v556_v56 = vsel %vm120_vm3, %v1268_v36, 0.0  ;;  %vm1136_vm3 = vmpackc.low %vm122_vm4, %vm121_vm0 }
 0x169   :  { %1269 = vpow2.f32 %v527_v6 }
 0x16a   :  { %1271 = vpow2.f32 %v523_v35 }
 0x16b   :  { %1273 = vpow2.f32 %v533_v55 }
 0x16c   :  { %v470_v39 = vpop.permute.xlu2 %469  ;;  %v450_v49 = vpop.permute.xlu0 %449 }
 0x16d   :  { %v511_v0 = vsub.f32 %v1459_v53, %v450_v49  ;;  %v515_v62 = vsub.f32 %v1576_v1, %v470_v39 }
 0x16f   :  { %v531_v31 = vmul.f32 1.442695, %v511_v0  ;;  %v1270_v46 = vpop.eup %1269  ;;  %v539_v32 = vmul.f32 1.442695, %v515_v62 }
 0x170   :  { %v1272_v33 = vpop.eup %1271  ;;  %v557_v28 = vsel %vm121_vm0, %v1270_v46, 0.0  ;;  %vm1142_vm0 = vmpackc.low %vm126_vm6, %vm125_vm5 }
 0x171   :  { %1275 = vpow2.f32 %v531_v31  ;;  %v555_v53 = vsel %vm119_vm1, %v1272_v33, 0.0  ;;  %v1134_v58 = vpack.c.bf16 %v1268_v36, %v1272_v33  ;;  %v1274_v45 = vpop.eup %1273  ;;  %vm1139_vm1 = vmpackc.low %vm124_vm8, %vm123_vm2 }
 0x172   :  { %603 = vadd.xlane.f32.xlu0 %v555_v53  ;;  %1277 = vpow2.f32 %v539_v32 }
 0x173   :  { %1135 = vmatmul.msk.bf16.vlgmr.msra.gmra.mxu0 %vm1133_vm14, %v1134_v58 }
 0x174   :  { %607 = vadd.xlane.f32.xlu1 %v557_v28  ;;  %v445_v19 = vpop.permute.xlu1 %444  ;;  %v485_v20 = vpop.permute.xlu2 %484 }
 0x175   :  { %v465_v34 = vpop.permute.xlu0 %464  ;;  %v510_v61 = vsub.f32 %v1493_v12, %v445_v19  ;;  %v518_v15 = vsub.f32 %v1609_v22, %v485_v20  ;;  %v560_v12 = vsel %vm124_vm8, %v1274_v45, 0.0  ;;  %vm1148_vm8 = vmpackc.low %vm130_vm15, %vm129_vm10 }
 0x176   :  { %v514_v26 = vsub.f32 %v1497_v13, %v465_v34 }
 0x177   :  { %v529_v4 = vmul.f32 1.442695, %v510_v61  ;;  %v1276_v1 = vpop.eup %1275  ;;  %v545_v6 = vmul.f32 1.442695, %v518_v15 }
 0x178   :  { %v1140_v9 = vpack.c.bf16 %v1274_v45, %v1276_v1  ;;  %v537_v35 = vmul.f32 1.442695, %v514_v26  ;;  %v1278_v55 = vpop.eup %1277 }
 0x179   :  { %1279 = vpow2.f32 %v529_v4 }
 0x17a   :  { %1141 = vmatmul.msk.bf16.vlgmr.msra.gmra.mxu1 %vm1139_vm1, %v1140_v9  ;;  %1281 = vpow2.f32 %v545_v6  ;;  %v2137_v9 = vld [vmem:[#allocation8_spill] sm:$0xff] }
 0x17b   :  { %605 = vadd.xlane.f32.xlu2 %v556_v56  ;;  %1283 = vpow2.f32 %v537_v35  ;;  %v2139_v35 = vld [vmem:[#allocation6_spill] sm:$0xff] }
 0x17c   :  { %613 = vadd.xlane.f32.xlu1 %v560_v12  ;;  %v460_v22 = vpop.permute.xlu1 %459  ;;  %v500_v49 = vpop.permute.xlu2 %499 }
 0x17d   :  { %v480_v38 = vpop.permute.xlu0 %479  ;;  %v513_v39 = vsub.f32 %v1489_v11, %v460_v22  ;;  %v521_v14 = vsub.f32 %v1618_v27, %v500_v49  ;;  %v559_v11 = vsel %vm123_vm2, %v1276_v1, 0.0  ;;  %vm1145_vm2 = vmpackc.low %vm128_vm9, %vm127_vm11 }
 0x17e   :  { %v517_v42 = vsub.f32 %v1539_v41, %v480_v38  ;;  %v563_v41 = vsel %vm127_vm11, %v1278_v55, 0.0 }
 0x17f   :  { %v535_v13 = vmul.f32 1.442695, %v513_v39  ;;  %v1280_v0 = vpop.eup %1279  ;;  %v551_v54 = vmul.f32 1.442695, %v521_v14 }
 0x180   :  { %v558_v36 = vsel %vm122_vm4, %v1280_v0, 0.0  ;;  %v1137_v31 = vpack.c.bf16 %v1280_v0, %v1270_v46  ;;  %v543_v33 = vmul.f32 1.442695, %v517_v42  ;;  %v1282_v53 = vpop.eup %1281  ;;  %vm2140_vm4 = vcmp.gt.f32.partialorder %v2139_v35, 0.0 }
 0x181   :  { %1285 = vpow2.f32 %v535_v13  ;;  %609 = vadd.xlane.f32.xlu0 %v558_v36  ;;  %v1284_v58 = vpop.eup %1283 }
 0x182   :  { %1287 = vpow2.f32 %v543_v33 }
 0x183   :  { %611 = vadd.xlane.f32.xlu2 %v559_v11  ;;  %1138 = vmatmul.msk.bf16.gmra.mxu0 %vm1136_vm3, %v1137_v31 }
 0x184   :  { %619 = vadd.xlane.f32.xlu1 %v563_v41  ;;  %v475_v25 = vpop.permute.xlu1 %474  ;;  %v687_v36 = vpop.permute.xlu2 %686 }
 0x185   :  { %v495_v62 = vpop.permute.xlu0 %494  ;;  %v516_v27 = vsub.f32 %v1535_v40, %v475_v25  ;;  %v562_v40 = vsel %vm126_vm6, %v1284_v58, 0.0  ;;  %vm2141_vm6 = vmmov %vm2140_vm4 }
 0x186   :  { %v520_v37 = vsub.f32 %v1586_v3, %v495_v62  ;;  %v566_v3 = vsel %vm130_vm15, %v1282_v53, 0.0 }
 0x187   :  { %v541_v46 = vmul.f32 1.442695, %v516_v27  ;;  %v1286_v28 = vpop.eup %1285 }
 0x188   :  { %v561_v19 = vsel %vm125_vm5, %v1286_v28, 0.0  ;;  %v1143_v20 = vpack.c.bf16 %v1284_v58, %v1286_v28  ;;  %v549_v34 = vmul.f32 1.442695, %v520_v37  ;;  %v1288_v45 = vpop.eup %1287  ;;  %vm1151_vm5 = vmpackc.low %vm2140_vm4, %vm131_vm12  ;;  %v571_v37 = vld [vmem:[#allocation3] sm:$0xff]  ;;  %v573_v28 = vld [vmem:[#allocation3 + $0x10] sm:$0xff] }
 0x189   :  { %1289 = vpow2.f32 %v541_v46  ;;  %615 = vadd.xlane.f32.xlu0 %v561_v19  ;;  %v565_v26 = vsel %vm129_vm10, %v1288_v45, 0.0  ;;  %v1149_v0 = vpack.c.bf16 %v1282_v53, %v1288_v45  ;;  %v587_v19 = vmul.f32 %v1772_v52, %v571_v37  ;;  %v572_v45 = vld [vmem:[#allocation3 + $0x8] sm:$0xff] }
 0x18a   :  { %1291 = vpow2.f32 %v551_v54  ;;  %1144 = vmatmul.msk.bf16.gmra.mxu1 %vm1142_vm0, %v1143_v20  ;;  %vm2145_vm10 = vcmask 7168  }
 0x18b   :  { %617 = vadd.xlane.f32.xlu2 %v562_v40  ;;  %1293 = vpow2.f32 %v549_v34  ;;  %vm2147_vm14 = vmmov %vm2145_vm10 }
 0x18c   :  { %625 = vadd.xlane.f32.xlu1 %v566_v3  ;;  %v490_v61 = vpop.permute.xlu1 %489  ;;  %v1966_v11 = vpop.permute.xlu2 %701  ;;  %v589_v3 = vmul.f32 %v1740_v47, %v573_v28  ;;  %vm2148_vm15 = vmmov %vm2145_vm10 }
 0x18d   :  { %v519_v32 = vsub.f32 %v1582_v2, %v490_v61  ;;  %v1964_v31 = vpop.permute.xlu0 %696  ;;  %vm2149_vm1 = vmmov %vm2145_vm10 }
 0x18e   :  { %vm2150_vm3 = vmmov %vm2149_vm1 }
 0x18f   :  { %v1290_v4 = vpop.eup %1289  ;;  %v547_v1 = vmul.f32 1.442695, %v519_v32  ;;  %vm2151_vm0 = vmmov %vm2149_vm1 }
 0x190   :  { %v1292_v59 = vpop.eup %1291  ;;  %v564_v60 = vsel %vm128_vm9, %v1290_v4, 0.0  ;;  %v1146_v15 = vpack.c.bf16 %v1290_v4, %v1278_v55  ;;  %v2142_v55 = vld [vmem:[#allocation7_spill] sm:$0xff]  ;;  %v576_v4 = vld [vmem:[#allocation3 + $0x28] sm:$0xff]  ;;  %vm2153_vm4 = vmmov %vm2151_vm0 }
 0x191   :  { %1295 = vpow2.f32 %v547_v1  ;;  %621 = vadd.xlane.f32.xlu0 %v564_v60  ;;  %v569_v2 = vsel %vm133_vm13, %v1292_v59, 0.0  ;;  %v1294_v12 = vpop.eup %1293  ;;  %vm2143_vm9 = vcmp.gt.f32.partialorder %v2142_v55, 0.0  ;;  %v668_v1 = vld [vmem:[#allocation4] sm:$0xff]  ;;  %v592_v52 = vmul.f32 %v1787_v48, %v576_v4 }
 0x192   :  { %1147 = vmatmul.msk.bf16.vlgmr.msra.gmra.mxu2 %vm1145_vm2, %v1146_v15  ;;  %v568_v49 = vsel %vm2141_vm6, %v1294_v12, 0.0  ;;  %vm2144_vm11 = vmmov %vm2143_vm9  ;;  %v579_v48 = vld [vmem:[#allocation3 + $0x40] sm:$0xff] }
 0x193   :  { %623 = vadd.xlane.f32.xlu2 %v565_v26  ;;  %vm2152_vm2 = vmmov %vm2151_vm0 }
 0x194   :  { %631 = vadd.xlane.f32.xlu1 %v569_v2  ;;  %v505_v43 = vpop.permute.xlu1 %504  ;;  %v1970_v33 = vpop.permute.xlu2 %716  ;;  %v764_v2 = vmul.f32 %v687_v36, %v668_v1  ;;  %vm2155_vm6 = vmmov %vm2151_vm0 }
 0x195   :  { %v522_v56 = vsub.f32 %v2137_v9, %v505_v43  ;;  %v707_v7 = vpop.permute.xlu0 %706 }
 0x197   :  { %v1296_v6 = vpop.eup %1295  ;;  %v553_v22 = vmul.f32 1.442695, %v522_v56 }
 0x198   :  { %v567_v38 = vsel %vm131_vm12, %v1296_v6, 0.0  ;;  %v1152_v39 = vpack.c.bf16 %v1294_v12, %v1296_v6  ;;  %vm1154_vm12 = vmpackc.low %vm2144_vm11, %vm133_vm13  ;;  %v574_v6 = vld [vmem:[#allocation3 + $0x18] sm:$0xff] }
 0x199   :  { %1297 = vpow2.f32 %v553_v22  ;;  %627 = vadd.xlane.f32.xlu0 %v567_v38  ;;  %vm2146_vm13 = vmmov %vm2145_vm10  ;;  %v575_v22 = vld [vmem:[#allocation3 + $0x20] sm:$0xff]  ;;  %v590_v35 = vmul.f32 %v1785_v30, %v574_v6 }
 0x19a   :  { %1153 = vmatmul.msk.bf16.vlgmr.msra.gmra.mxu3 %vm1151_vm5, %v1152_v39  ;;  %v591_v38 = vmul.f32 %v1759_v23, %v575_v22  ;;  %vm2154_vm5 = vmmov %vm2151_vm0 }
 0x19b   :  { %629 = vadd.xlane.f32.xlu2 %v568_v49  ;;  %vm2158_vm11 = vmmov %vm2151_vm0 }
 0x19c   :  { %v692_v18 = vpop.permute.xlu1 %691  ;;  %v1976_v21 = vpop.permute.xlu2 %731 }
 0x19d   :  { %v1972_v25 = vpop.permute.xlu0 %721  ;;  %v765_v28 = vmul.f32 %v692_v18, %v669_v17  ;;  %v582_v18 = vld [vmem:[#allocation3 + $0x58] sm:$0xff] }
 0x19f   :  { %v1298_v13 = vpop.eup %1297 }
 0x1a0   :  { %v570_v42 = vsel %vm2143_vm9, %v1298_v13, 0.0  ;;  %v1155_v14 = vpack.c.bf16 %v1298_v13, %v1292_v59  ;;  %v588_v59 = vmul.f32 %v1774_v44, %v572_v45  ;;  %v672_v44 = vld [vmem:[#allocation4 + $0x20] sm:$0xff]  ;;  %v670_v45 = vld [vmem:[#allocation4 + $0x10] sm:$0xff]  ;;  %vm2157_vm9 = vmmov %vm2151_vm0 }
 0x1a1   :  { %633 = vadd.xlane.f32.xlu0 %v570_v42  ;;  %v768_v55 = vmul.f32 %v707_v7, %v672_v44 }
 0x1a2   :  { %1150 = vmatmul.msk.bf16.gmra.mxu2 %vm1148_vm8, %v1149_v0  ;;  %vm2156_vm8 = vmmov %vm2151_vm0 }
 0x1a4   :  { %v1968_v41 = vpop.permute.xlu1 %711  ;;  %v1982_v54 = vpop.permute.xlu2 %746 }
 0x1a5   :  { %v1978_v27 = vpop.permute.xlu0 %736 }
 0x1aa   :  { %1156 = vmatmul.msk.bf16.gmra.mxu3 %vm1154_vm12, %v1155_v14  ;;  %v595_v14 = vmul.f32 %v1806_v57, %v579_v48  ;;  %v673_v57 = vld [vmem:[#allocation4 + $0x28] sm:$0xff]  ;;  %vm2159_vm12 = vmmov %vm2151_vm0 }
 0x1ab   :  { %v580_v48 = vld [vmem:[#allocation3 + $0x48] sm:$0xff] }
 0x1ac   :  { %v1974_v62 = vpop.permute.xlu1 %726  ;;  %v1989_v20 = vpop.permute.xlu2 %761 }
 0x1ad   :  { %v1984_v58 = vpop.permute.xlu0 %751 }
 0x1b4   :  { %v1980_v53 = vpop.permute.xlu1 %741 }
 0x1bc   :  { %v1986_v46 = vpop.permute.xlu1 %756 }
 0x1e5   :  { %v604_v40 = vpop.xlane.xlu0 %603 }
 0x1e6   :  { %v635_v34 = vadd.f32 %v604_v40, %v587_v19 }
 0x1e7   :  { %v608_v61 = vpop.xlane.xlu1 %607 }
 0x1e8   :  { %v637_v32 = vadd.f32 %v608_v61, %v589_v3  ;;  %652 = vst.msk [vmem:[#allocation3] sm:$0xff] %vm2145_vm10, %v635_v34  ;;  %v577_v61 = vld [vmem:[#allocation3 + $0x30] sm:$0xff]  ;;  %vm2160_vm10 = vmmov %vm2151_vm0 }
 0x1e9   :  { %v593_v4 = vmul.f32 %v1804_v29, %v577_v61  ;;  %v584_v61 = vld [vmem:[#allocation3 + $0x68] sm:$0xff] }
 0x1ea   :  { %654 = vst.msk [vmem:[#allocation3 + $0x10] sm:$0xff] %vm2146_vm13, %v637_v32  ;;  %v578_v32 = vld [vmem:[#allocation3 + $0x38] sm:$0xff] }
 0x1eb   :  { %v594_v1 = vmul.f32 %v1776_v50, %v578_v32  ;;  %v675_v32 = vld [vmem:[#allocation4 + $0x38] sm:$0xff] }
 0x1ee   :  { %v606_v60 = vpop.xlane.xlu2 %605 }
 0x1ef   :  { %v636_v15 = vadd.f32 %v606_v60, %v588_v59  ;;  %v614_v26 = vpop.xlane.xlu1 %613  ;;  %v937_v47 = vld [vmem:[#allocation3] sm:$0xff] }
 0x1f0   :  { %v640_v43 = vadd.f32 %v614_v26, %v592_v52  ;;  %v845_v9 = vpop.f32.mrf.mxu0  ;;  %1299 = vrcp.f32 %v937_v47 }
 0x1f1   :  { %653 = vst.msk [vmem:[#allocation3 + $0x8] sm:$0xff] %vm2147_vm14, %v636_v15  ;;  %v939_v56 = vld [vmem:[#allocation3 + $0x10] sm:$0xff]  ;;  %v885_v12 = vadd.f32 %v845_v9, %v764_v2  ;;  %v769_v15 = vmul.f32 %v1968_v41, %v673_v57 }
 0x1f2   :  { %657 = vst.msk [vmem:[#allocation3 + $0x28] sm:$0xff] %vm2148_vm15, %v640_v43  ;;  %1301 = vrcp.f32 %v939_v56  ;;  %v598_v43 = vmul.f32 %v1825_v10, %v582_v18  ;;  %v766_v56 = vmul.f32 %v1964_v31, %v670_v45  ;;  %v581_v10 = vld [vmem:[#allocation3 + $0x50] sm:$0xff]  ;;  %v600_v18 = vmul.f32 %v1811_v24, %v584_v61 }
 0x1f3   :  { %902 = vst.msk [vmem:[#allocation4] sm:$0xff] %vm54_vm7, %v885_v12  ;;  %v585_v31 = vld [vmem:[#allocation3 + $0x70] sm:$0xff] }
 0x1f4   :  { %v610_v39 = vpop.xlane.xlu0 %609 }
 0x1f5   :  { %v638_v42 = vadd.f32 %v610_v39, %v590_v35  ;;  %v671_v35 = vld [vmem:[#allocation4 + $0x18] sm:$0xff]  ;;  %v596_v39 = vmul.f32 %v1823_v63, %v580_v48 }
 0x1f6   :  { %v612_v49 = vpop.xlane.xlu2 %611  ;;  %v1300_v13 = vpop.eup %1299 }
 0x1f7   :  { %v639_v0 = vadd.f32 %v612_v49, %v591_v38  ;;  %v620_v36 = vpop.xlane.xlu1 %619  ;;  %987 = vperm.xlu0 %1231, %v1300_v13   ;;  %v855_v19 = vpop.f32.mrf.mxu1  ;;  %655 = vst.msk [vmem:[#allocation3 + $0x18] sm:$0xff] %vm2149_vm1, %v638_v42  ;;  %v674_v38 = vld [vmem:[#allocation4 + $0x30] sm:$0xff]  ;;  %v597_v49 = vmul.f32 %v1789_v51, %v581_v10  ;;  %v601_v42 = vmul.f32 %v1839_v8, %v585_v31  ;;  %v677_v31 = vld [vmem:[#allocation4 + $0x48] sm:$0xff] }
 0x1f8   :  { %v1302_v37 = vpop.eup %1301  ;;  %v938_v40 = vld [vmem:[#allocation3 + $0x8] sm:$0xff]  ;;  %v847_v3 = vpop.f32.mrf.mxu0  ;;  %v889_v30 = vadd.f32 %v855_v19, %v768_v55  ;;  %v643_v34 = vadd.f32 %v620_v36, %v595_v14  ;;  %v767_v19 = vmul.f32 %v1966_v11, %v671_v35 }
 0x1f9   :  { %997 = vperm.xlu2 %1233, %v1302_v37   ;;  %1303 = vrcp.f32 %v938_v40  ;;  %v942_v23 = vld [vmem:[#allocation3 + $0x28] sm:$0xff]  ;;  %656 = vst.msk [vmem:[#allocation3 + $0x20] sm:$0xff] %vm2150_vm3, %v639_v0  ;;  %v886_v7 = vadd.f32 %v847_v3, %v765_v28  ;;  %v770_v40 = vmul.f32 %v1970_v33, %v674_v38 }
 0x1fa   :  { %1305 = vrcp.f32 %v942_v23  ;;  %906 = vst.msk [vmem:[#allocation4 + $0x20] sm:$0xff] %vm54_vm7, %v889_v30 }
 0x1fb   :  { %903 = vst.msk [vmem:[#allocation4 + $0x8] sm:$0xff] %vm54_vm7, %v886_v7  ;;  %v583_v7 = vld [vmem:[#allocation3 + $0x60] sm:$0xff] }
 0x1fc   :  { %660 = vst.msk [vmem:[#allocation3 + $0x40] sm:$0xff] %vm2151_vm0, %v643_v34  ;;  %v616_v59 = vpop.xlane.xlu0 %615  ;;  %v599_v57 = vmul.f32 %v1837_v5, %v583_v7  ;;  %v683_v7 = vld [vmem:[#allocation4 + $0x78] sm:$0xff] }
 0x1fd   :  { %v641_v26 = vadd.f32 %v616_v59, %v593_v4  ;;  %v779_v61 = vmul.f32 %v1989_v20, %v683_v7 }
 0x1fe   :  { %v618_v60 = vpop.xlane.xlu2 %617  ;;  %v940_v6 = vld [vmem:[#allocation3 + $0x18] sm:$0xff] }
 0x1ff   :  { %v1304_v52 = vpop.eup %1303  ;;  %v642_v2 = vadd.f32 %v618_v60, %v594_v1  ;;  %v626_v47 = vpop.xlane.xlu1 %625  ;;  %658 = vst.msk [vmem:[#allocation3 + $0x30] sm:$0xff] %vm2152_vm2, %v641_v26  ;;  %1307 = vrcp.f32 %v940_v6 }
 0x200   :  { %v1306_v9 = vpop.eup %1305  ;;  %v857_v12 = vpop.f32.mrf.mxu1  ;;  %992 = vperm.xlu1 %1232, %v1304_v52   ;;  %v646_v22 = vadd.f32 %v626_v47, %v598_v43  ;;  %v941_v44 = vld [vmem:[#allocation3 + $0x20] sm:$0xff]  ;;  %v586_v47 = vld [vmem:[#allocation3 + $0x78] sm:$0xff] }
 0x201   :  { %v850_v29 = vpop.f32.mrf.mxu0  ;;  %v890_v50 = vadd.f32 %v857_v12, %v769_v15  ;;  %1012 = vperm.xlu2 %1233, %v1306_v9   ;;  %659 = vst.msk [vmem:[#allocation3 + $0x38] sm:$0xff] %vm2153_vm4, %v642_v2  ;;  %1309 = vrcp.f32 %v941_v44  ;;  %v771_v15 = vmul.f32 %v1972_v25, %v675_v32  ;;  %v676_v2 = vld [vmem:[#allocation4 + $0x40] sm:$0xff]  ;;  %v602_v25 = vmul.f32 %v1849_v16, %v586_v47 }
 0x202   :  { %v887_v41 = vadd.f32 %v850_v29, %v766_v56  ;;  %663 = vst.msk [vmem:[#allocation3 + $0x58] sm:$0xff] %vm2154_vm5, %v646_v22  ;;  %v772_v12 = vmul.f32 %v1974_v62, %v676_v2  ;;  %v773_v16 = vmul.f32 %v1976_v21, %v677_v31 }
 0x203   :  { %907 = vst.msk [vmem:[#allocation4 + $0x28] sm:$0xff] %vm54_vm7, %v890_v50  ;;  %v945_v17 = vld [vmem:[#allocation3 + $0x40] sm:$0xff] }
 0x204   :  { %904 = vst.msk [vmem:[#allocation4 + $0x10] sm:$0xff] %vm54_vm7, %v887_v41  ;;  %1311 = vrcp.f32 %v945_v17  ;;  %v622_v13 = vpop.xlane.xlu0 %621  ;;  %v680_v17 = vld [vmem:[#allocation4 + $0x60] sm:$0xff] }
 0x205   :  { %v1308_v0 = vpop.eup %1307  ;;  %v644_v14 = vadd.f32 %v622_v13, %v596_v39  ;;  %v776_v35 = vmul.f32 %v1982_v54, %v680_v17 }
 0x206   :  { %v624_v55 = vpop.xlane.xlu2 %623  ;;  %1002 = vperm.xlu0 %1231, %v1308_v0   ;;  %v943_v30 = vld [vmem:[#allocation3 + $0x30] sm:$0xff] }
 0x207   :  { %v645_v36 = vadd.f32 %v624_v55, %v597_v49  ;;  %v632_v37 = vpop.xlane.xlu1 %631  ;;  %v1310_v28 = vpop.eup %1309  ;;  %661 = vst.msk [vmem:[#allocation3 + $0x48] sm:$0xff] %vm2155_vm6, %v644_v14  ;;  %1313 = vrcp.f32 %v943_v30  ;;  %v678_v14 = vld [vmem:[#allocation4 + $0x50] sm:$0xff]  ;;  %v679_v30 = vld [vmem:[#allocation4 + $0x58] sm:$0xff] }
 0x208   :  { %v649_v3 = vadd.f32 %v632_v37, %v601_v42  ;;  %v860_v63 = vpop.f32.mrf.mxu1  ;;  %1007 = vperm.xlu1 %1232, %v1310_v28   ;;  %v944_v34 = vld [vmem:[#allocation3 + $0x38] sm:$0xff]  ;;  %v774_v21 = vmul.f32 %v1978_v27, %v678_v14 }
 0x209   :  { %v852_v51 = vpop.f32.mrf.mxu0  ;;  %662 = vst.msk [vmem:[#allocation3 + $0x50] sm:$0xff] %vm2156_vm8, %v645_v36  ;;  %v891_v23 = vadd.f32 %v860_v63, %v770_v40  ;;  %1315 = vrcp.f32 %v944_v34  ;;  %v948_v33 = vld [vmem:[#allocation3 + $0x58] sm:$0xff]  ;;  %v681_v36 = vld [vmem:[#allocation4 + $0x68] sm:$0xff]  ;;  %v775_v63 = vmul.f32 %v1980_v53, %v679_v30 }
 0x20a   :  { %v888_v8 = vadd.f32 %v852_v51, %v767_v19  ;;  %v1312_v11 = vpop.eup %1311  ;;  %666 = vst.msk [vmem:[#allocation3 + $0x70] sm:$0xff] %vm2157_vm9, %v649_v3  ;;  %1317 = vrcp.f32 %v948_v33  ;;  %v777_v54 = vmul.f32 %v1984_v58, %v681_v36  ;;  %v682_v51 = vld [vmem:[#allocation4 + $0x70] sm:$0xff] }
 0x20b   :  { %1027 = vperm.xlu2 %1233, %v1312_v11   ;;  %908 = vst.msk [vmem:[#allocation4 + $0x30] sm:$0xff] %vm54_vm7, %v891_v23  ;;  %v778_v34 = vmul.f32 %v1986_v46, %v682_v51  ;;  %v971_v32 = vld [vmem:[#allocation4 + $0x10] sm:$0xff]  ;;  %v974_v46 = vld [vmem:[#allocation4 + $0x28] sm:$0xff] }
 0x20c   :  { %905 = vst.msk [vmem:[#allocation4 + $0x18] sm:$0xff] %vm54_vm7, %v888_v8  ;;  %v628_v45 = vpop.xlane.xlu0 %627 }
 0x20d   :  { %v1314_v1 = vpop.eup %1313  ;;  %v647_v59 = vadd.f32 %v628_v45, %v599_v57 }
 0x20e   :  { %v630_v4 = vpop.xlane.xlu2 %629  ;;  %1017 = vperm.xlu0 %1231, %v1314_v1   ;;  %v946_v26 = vld [vmem:[#allocation3 + $0x48] sm:$0xff] }
 0x20f   :  { %v648_v60 = vadd.f32 %v630_v4, %v600_v18  ;;  %v1316_v52 = vpop.eup %1315  ;;  %664 = vst.msk [vmem:[#allocation3 + $0x60] sm:$0xff] %vm2158_vm11, %v647_v59  ;;  %1319 = vrcp.f32 %v946_v26  ;;  %v969_v59 = vld [vmem:[#allocation4] sm:$0xff] }
 0x210   :  { %v862_v43 = vpop.f32.mrf.mxu1  ;;  %1022 = vperm.xlu1 %1232, %v1316_v52   ;;  %v947_v5 = vld [vmem:[#allocation3 + $0x50] sm:$0xff]  ;;  %v1318_v56 = vpop.eup %1317 }
 0x211   :  { %665 = vst.msk [vmem:[#allocation3 + $0x68] sm:$0xff] %vm2159_vm12, %v648_v60  ;;  %v892_v24 = vadd.f32 %v862_v43, %v771_v15  ;;  %1321 = vrcp.f32 %v947_v5  ;;  %v951_v9 = vld [vmem:[#allocation3 + $0x70] sm:$0xff]  ;;  %v970_v43 = vld [vmem:[#allocation4 + $0x8] sm:$0xff] }
 0x212   :  { %1323 = vrcp.f32 %v951_v9 }
 0x213   :  { %909 = vst.msk [vmem:[#allocation4 + $0x38] sm:$0xff] %vm54_vm7, %v892_v24  ;;  %1042 = vperm.xlu2 %1233, %v1318_v56  }
 0x214   :  { %v634_v29 = vpop.xlane.xlu0 %633 }
 0x215   :  { %v865_v6 = vpop.f32.mrf.mxu2  ;;  %v1320_v22 = vpop.eup %1319  ;;  %v650_v44 = vadd.f32 %v634_v29, %v602_v25  ;;  %v973_v29 = vld [vmem:[#allocation4 + $0x20] sm:$0xff] }
 0x216   :  { %v893_v50 = vadd.f32 %v865_v6, %v772_v12  ;;  %1032 = vperm.xlu0 %1231, %v1320_v22   ;;  %v949_v48 = vld [vmem:[#allocation3 + $0x60] sm:$0xff]  ;;  %v972_v12 = vld [vmem:[#allocation4 + $0x18] sm:$0xff] }
 0x217   :  { %v1322_v41 = vpop.eup %1321  ;;  %667 = vst.msk [vmem:[#allocation3 + $0x78] sm:$0xff] %vm2160_vm10, %v650_v44  ;;  %1325 = vrcp.f32 %v949_v48  ;;  %v975_v44 = vld [vmem:[#allocation4 + $0x30] sm:$0xff] }
 0x218   :  { %910 = vst.msk [vmem:[#allocation4 + $0x40] sm:$0xff] %vm54_vm7, %v893_v50  ;;  %v1324_v10 = vpop.eup %1323  ;;  %1037 = vperm.xlu1 %1232, %v1322_v41   ;;  %v950_v62 = vld [vmem:[#allocation3 + $0x68] sm:$0xff] }
 0x219   :  { %1327 = vrcp.f32 %v950_v62 }
 0x21b   :  { %1057 = vperm.xlu2 %1233, %v1324_v10   ;;  %v976_v10 = vld [vmem:[#allocation4 + $0x38] sm:$0xff] }
 0x21d   :  { %v867_v38 = vpop.f32.mrf.mxu2  ;;  %v875_v39 = vpop.f32.mrf.mxu3 }
 0x21e   :  { %v894_v49 = vadd.f32 %v867_v38, %v773_v16  ;;  %v897_v13 = vadd.f32 %v875_v39, %v776_v35  ;;  %v1326_v55 = vpop.eup %1325  ;;  %v952_v0 = vld [vmem:[#allocation3 + $0x78] sm:$0xff] }
 0x21f   :  { %v1328_v42 = vpop.eup %1327  ;;  %1047 = vperm.xlu0 %1231, %v1326_v55   ;;  %1329 = vrcp.f32 %v952_v0  ;;  %v977_v20 = vld [vmem:[#allocation4 + $0x40] sm:$0xff] }
 0x220   :  { %911 = vst.msk [vmem:[#allocation4 + $0x48] sm:$0xff] %vm54_vm7, %v894_v49  ;;  %1052 = vperm.xlu1 %1232, %v1328_v42  }
 0x221   :  { %914 = vst.msk [vmem:[#allocation4 + $0x60] sm:$0xff] %vm54_vm7, %v897_v13 }
 0x225   :  { %v870_v37 = vpop.f32.mrf.mxu2  ;;  %v877_v28 = vpop.f32.mrf.mxu3 }
 0x226   :  { %v895_v19 = vadd.f32 %v870_v37, %v774_v21  ;;  %v898_v40 = vadd.f32 %v877_v28, %v777_v54  ;;  %v1330_v3 = vpop.eup %1329 }
 0x227   :  { %1062 = vperm.xlu0 %1231, %v1330_v3   ;;  %v978_v62 = vld [vmem:[#allocation4 + $0x48] sm:$0xff] }
 0x228   :  { %912 = vst.msk [vmem:[#allocation4 + $0x50] sm:$0xff] %vm54_vm7, %v895_v19  ;;  %v981_v13 = vld [vmem:[#allocation4 + $0x60] sm:$0xff] }
 0x229   :  { %915 = vst.msk [vmem:[#allocation4 + $0x68] sm:$0xff] %vm54_vm7, %v898_v40 }
 0x22d   :  { %v872_v8 = vpop.f32.mrf.mxu2  ;;  %v880_v27 = vpop.f32.mrf.mxu3 }
 0x22e   :  { %v896_v23 = vadd.f32 %v872_v8, %v775_v63  ;;  %v899_v58 = vadd.f32 %v880_v27, %v778_v34 }
 0x22f   :  { %v979_v38 = vld [vmem:[#allocation4 + $0x50] sm:$0xff] }
 0x230   :  { %913 = vst.msk [vmem:[#allocation4 + $0x58] sm:$0xff] %vm54_vm7, %v896_v23  ;;  %v982_v0 = vld [vmem:[#allocation4 + $0x68] sm:$0xff] }
 0x231   :  { %916 = vst.msk [vmem:[#allocation4 + $0x70] sm:$0xff] %vm54_vm7, %v899_v58 }
 0x235   :  { %v882_v11 = vpop.f32.mrf.mxu3 }
 0x236   :  { %v900_v33 = vadd.f32 %v882_v11, %v779_v61 }
 0x237   :  { %v980_v15 = vld [vmem:[#allocation4 + $0x58] sm:$0xff] }
 0x238   :  { %917 = vst.msk [vmem:[#allocation4 + $0x78] sm:$0xff] %vm54_vm7, %v900_v33  ;;  %v983_v47 = vld [vmem:[#allocation4 + $0x70] sm:$0xff] }
 0x23f   :  { %v984_v21 = vld [vmem:[#allocation4 + $0x78] sm:$0xff] }
 0x253   :  { %v998_v57 = vpop.permute.xlu2 %997 }
 0x254   :  { %v1067_v53 = vmul.f32 %v998_v57, %v971_v32 }
 0x256   :  { %1083 = vst.msk [vmem:[%s2119_s4 + $0x10] sm:$0xff] %vm54_vm7, %v1067_v53 }
 0x25b   :  { %v1013_v18 = vpop.permute.xlu2 %1012 }
 0x25c   :  { %v1070_v45 = vmul.f32 %v1013_v18, %v974_v46 }
 0x25e   :  { %1086 = vst.msk [vmem:[%s2119_s4 + $0x28] sm:$0xff] %vm54_vm7, %v1070_v45 }
 0x265   :  { %v1028_v4 = vpop.permute.xlu2 %1027 }
 0x266   :  { %v1073_v1 = vmul.f32 %v1028_v4, %v977_v20 }
 0x268   :  { %1089 = vst.msk [vmem:[%s2119_s4 + $0x40] sm:$0xff] %vm54_vm7, %v1073_v1 }
 0x269   :  { %v988_v60 = vpop.permute.xlu0 %987 }
 0x26a   :  { %v1065_v52 = vmul.f32 %v988_v60, %v969_v59 }
 0x26c   :  { %1081 = vst.msk [vmem:[%s2119_s4] sm:$0xff] %vm54_vm7, %v1065_v52 }
 0x26d   :  { %v1043_v26 = vpop.permute.xlu2 %1042 }
 0x26e   :  { %v1076_v2 = vmul.f32 %v1043_v26, %v980_v15 }
 0x270   :  { %1092 = vst.msk [vmem:[%s2119_s4 + $0x58] sm:$0xff] %vm54_vm7, %v1076_v2 }
 0x272   :  { %v993_v5 = vpop.permute.xlu1 %992 }
 0x273   :  { %v1066_v24 = vmul.f32 %v993_v5, %v970_v43 }
 0x275   :  { %1082 = vst.msk [vmem:[%s2119_s4 + $0x8] sm:$0xff] %vm54_vm7, %v1066_v24  ;;  %v1058_v9 = vpop.permute.xlu2 %1057 }
 0x276   :  { %v1079_v56 = vmul.f32 %v1058_v9, %v983_v47 }
 0x278   :  { %1095 = vst.msk [vmem:[%s2119_s4 + $0x70] sm:$0xff] %vm54_vm7, %v1079_v56  ;;  %v1003_v25 = vpop.permute.xlu0 %1002 }
 0x279   :  { %v1068_v6 = vmul.f32 %v1003_v25, %v972_v12 }
 0x27a   :  { %v1008_v50 = vpop.permute.xlu1 %1007 }
 0x27b   :  { %v1069_v22 = vmul.f32 %v1008_v50, %v973_v29  ;;  %1084 = vst.msk [vmem:[%s2119_s4 + $0x18] sm:$0xff] %vm54_vm7, %v1068_v6 }
 0x27d   :  { %1085 = vst.msk [vmem:[%s2119_s4 + $0x20] sm:$0xff] %vm54_vm7, %v1069_v22 }
 0x280   :  { %v1018_v41 = vpop.permute.xlu0 %1017 }
 0x281   :  { %v1071_v48 = vmul.f32 %v1018_v41, %v975_v44 }
 0x282   :  { %v1023_v31 = vpop.permute.xlu1 %1022 }
 0x283   :  { %v1072_v17 = vmul.f32 %v1023_v31, %v976_v10  ;;  %1087 = vst.msk [vmem:[%s2119_s4 + $0x30] sm:$0xff] %vm54_vm7, %v1071_v48 }
 0x285   :  { %1088 = vst.msk [vmem:[%s2119_s4 + $0x38] sm:$0xff] %vm54_vm7, %v1072_v17 }
 0x288   :  { %v1033_v16 = vpop.permute.xlu0 %1032 }
 0x289   :  { %v1074_v35 = vmul.f32 %v1033_v16, %v978_v62 }
 0x28a   :  { %v1038_v39 = vpop.permute.xlu1 %1037 }
 0x28b   :  { %v1075_v49 = vmul.f32 %v1038_v39, %v979_v38  ;;  %1090 = vst.msk [vmem:[%s2119_s4 + $0x48] sm:$0xff] %vm54_vm7, %v1074_v35 }
 0x28d   :  { %1091 = vst.msk [vmem:[%s2119_s4 + $0x50] sm:$0xff] %vm54_vm7, %v1075_v49 }
 0x291   :  { %v1048_v55 = vpop.permute.xlu0 %1047 }
 0x292   :  { %v1077_v42 = vmul.f32 %v1048_v55, %v981_v13  ;;  %v1053_v14 = vpop.permute.xlu1 %1052 }
 0x293   :  { %v1078_v36 = vmul.f32 %v1053_v14, %v982_v0 }
 0x294   :  { %1093 = vst.msk [vmem:[%s2119_s4 + $0x60] sm:$0xff] %vm54_vm7, %v1077_v42 }
 0x295   :  { %1094 = vst.msk [vmem:[%s2119_s4 + $0x68] sm:$0xff] %vm54_vm7, %v1078_v36 }
 0x299   :  { %v1063_v54 = vpop.permute.xlu0 %1062 }
 0x29a   :  { %v1080_v37 = vmul.f32 %v1063_v54, %v984_v21 }
 0x29c   :  { %1096 = vst.msk [vmem:[%s2119_s4 + $0x78] sm:$0xff] %vm54_vm7, %v1080_v37 }

// kernel: gat_forward.6
= control target key start
LH: loop header
LB: loop body
LE: loop exit
PB: predicated region body
PF: predicated region fallthrough
CT: control target
= control target key end

     0   :  { %v7589_v0 = vmov 0   ;;  %vm21_vm15 = vcmask 31744   ;;  %s4391_s30 = smov 120   ;;  %s4392_s18 = smov 8   ;;  %s7582_s1 = inlined_call_operand.vmem [shape: f32[128,4], index: 1, kind: input, shape index: {}]   ;;  %s7583_s2 = inlined_call_operand.vmem [shape: f32[4,128], index: 2, kind: input, shape index: {}]   ;;  %s7584_s0 = inlined_call_operand.vmem [shape: s8[128,128], index: 0, kind: input, shape index: {}]   ;;  %s7585_s3 = inlined_call_operand.vmem [shape: bf16[128,32], index: 3, kind: input, shape index: {}]   ;;  %s7586_s4 = inlined_call_operand.vmem [shape: f32[128,32], index: 4, kind: output, shape index: {}]  }
   0x1   :  { %4041 = vset.pattern.permute.xlu1 %v7589_v0  ;;  %4040 = vset.pattern.permute.xlu0 %v7589_v0  ;;  %v4429_v1 = vld [vmem:[%s7582_s1 + $0x10] sm:$0xff]  ;;  %v4434_v2 = vld [vmem:[%s7582_s1] sm:$0xff]  ;;  %v4448_v4 = vld [vmem:[%s7582_s1 + $0x18] sm:$0xff]  ;;  %s4394_s28 = smov 112   ;;  %s4395_s16 = smov 16  }
   0x2   :  { %v4439_v3 = vld [vmem:[%s7582_s1 + $0x20] sm:$0xff]  ;;  %180 = vperm.xlu1 %4041, %v4429_v1   ;;  %170 = vperm.xlu0 %4040, %v4434_v2   ;;  %v4453_v5 = vld [vmem:[%s7582_s1 + $0x8] sm:$0xff]  ;;  %v4466_v7 = vld [vmem:[%s7582_s1 + $0x38] sm:$0xff]  ;;  %s4397_s24 = smov 104  }
   0x3   :  { %4042 = vset.pattern.permute.xlu2 %v7589_v0  ;;  %v4458_v6 = vld [vmem:[%s7582_s1 + $0x28] sm:$0xff]  ;;  %v4471_v8 = vld [vmem:[%s7582_s1 + $0x30] sm:$0xff]  ;;  %v4476_v9 = vld [vmem:[%s7582_s1 + $0x40] sm:$0xff] }
   0x4   :  { %190 = vperm.xlu2 %4042, %v4439_v3   ;;  %v4484_v10 = vld [vmem:[%s7582_s1 + $0x50] sm:$0xff]  ;;  %v4489_v11 = vld [vmem:[%s7582_s1 + $0x48] sm:$0xff]  ;;  %v4494_v12 = vld [vmem:[%s7582_s1 + $0x58] sm:$0xff] }
   0x5   :  { %v4502_v13 = vld [vmem:[%s7582_s1 + $0x68] sm:$0xff]  ;;  %v4507_v14 = vld [vmem:[%s7582_s1 + $0x60] sm:$0xff]  ;;  %v165_v15 = vld [vmem:[%s7582_s1 + $0x70] sm:$0xff] }
   0x6   :  { %v166_v16 = vld [vmem:[%s7582_s1 + $0x78] sm:$0xff]  ;;  %v4520_v17 = vld [vmem:[%s7584_s0 + $0x4] sm:$0xff]   ;;  %v3990_v18 = vld [vmem:[%s7584_s0] sm:$0xf]  }
   0x7   :  { %v3995_v19 = vunpack.c.0.s8 %v4520_v17  ;;  %v3991_v20 = vunpack.c.0.s8 %v3990_v18  ;;  %v4529_v21 = vld [vmem:[%s7583_s2] ss:$0 sm:$0xff]  ;;  %v3999_v30 = vunpack.c.2.s8 %v4520_v17  ;;  %v3992_v33 = vunpack.c.1.s8 %v3990_v18  ;;  %v4562_v49 = vld [vmem:[%s7584_s0 + $0xc] sm:$0xff]  }
   0x8   :  { %v3996_v46 = vunpack.c.1.s8 %v4520_v17  ;;  %v4003_v50 = vunpack.c.0.s8 %v4562_v49  ;;  %v4004_v51 = vunpack.c.1.s8 %v4562_v49 }
   0x9   :  { %v4531_v25 = vcvt.s32.f32 %v3995_v19  ;;  %v4533_v26 = vcvt.s32.f32 %v3991_v20  ;;  %v4541_v37 = vcvt.s32.f32 %v3999_v30  ;;  %v4553_v42 = vcvt.s32.f32 %v3992_v33  ;;  %v4591_v20 = vld [vmem:[%s7584_s0 + $0x14] sm:$0xff]  }
   0xa   :  { %185 = vperm.xlu1 %4041, %v4448_v4   ;;  %175 = vperm.xlu0 %4040, %v4453_v5   ;;  %v4571_v54 = vcvt.s32.f32 %v3996_v46  ;;  %v4579_v59 = vcvt.s32.f32 %v4003_v50  ;;  %v4581_v60 = vcvt.s32.f32 %v4004_v51  ;;  %v4000_v19 = vunpack.c.3.s8 %v4520_v17 }
   0xb   :  { %7701 = vst [vmem:[#allocation5_spill] sm:$0xff] %v4531_v25  ;;  %vm7616_vm0 = vcmp.gt.f32.partialorder %v4531_v25, 0.0  ;;  %vm119_vm1 = vcmp.gt.f32.partialorder %v4533_v26, 0.0  ;;  %vm7615_vm2 = vcmp.gt.f32.partialorder %v4541_v37, 0.0  ;;  %vm120_vm3 = vcmp.gt.f32.partialorder %v4553_v42, 0.0 }
   0xc   :  { %195 = vperm.xlu2 %4042, %v4458_v6   ;;  %7702 = vst [vmem:[#allocation6_spill] sm:$0xff] %v4533_v26  ;;  %vm7613_vm4 = vcmp.gt.f32.partialorder %v4571_v54, 0.0  ;;  %vm7644_vm5 = vcmp.gt.f32.partialorder %v4579_v59, 0.0  ;;  %vm7645_vm6 = vcmp.gt.f32.partialorder %v4581_v60, 0.0  ;;  %v4015_v50 = vunpack.c.2.s8 %v4591_v20 }
   0xd   :  { %7703 = vst [vmem:[#allocation7_spill] sm:$0xff] %v4571_v54  ;;  %v4016_v51 = vunpack.c.3.s8 %v4591_v20 }
  0x12   :  { %205 = vperm.xlu1 %4041, %v4466_v7   ;;  %200 = vperm.xlu0 %4040, %v4471_v8  }
  0x14   :  { %210 = vperm.xlu2 %4042, %v4476_v9  }
  0x1a   :  { %220 = vperm.xlu1 %4041, %v4484_v10   ;;  %215 = vperm.xlu0 %4040, %v4489_v11  }
  0x1c   :  { %225 = vperm.xlu2 %4042, %v4494_v12  }
  0x22   :  { %235 = vperm.xlu1 %4041, %v4502_v13   ;;  %230 = vperm.xlu0 %4040, %v4507_v14  }
  0x24   :  { %240 = vperm.xlu2 %4042, %v165_v15  }
  0x2a   :  { %245 = vperm.xlu0 %4040, %v166_v16  }
  0x5e   :  { %v191_v22 = vpop.permute.xlu2 %190 }
  0x5f   :  { %v253_v27 = vadd.f32 %v4529_v21, %v191_v22 }
  0x61   :  { %v269_v34 = vmul.f32 0.2, %v253_v27 }
  0x63   :  { %v285_v44 = vmax.f32 %v253_v27, %v269_v34 }
  0x65   :  { %v4569_v53 = vsel %vm7615_vm2, %v285_v44, -1e+30 }
  0x66   :  { %v196_v45 = vpop.permute.xlu2 %195 }
  0x67   :  { %v254_v63 = vadd.f32 %v4529_v21, %v196_v45  ;;  %v4007_v45 = vunpack.c.2.s8 %v4562_v49 }
  0x6e   :  { %v211_v22 = vpop.permute.xlu2 %210 }
  0x6f   :  { %v257_v44 = vadd.f32 %v4529_v21, %v211_v22 }
  0x74   :  { %v181_v23 = vpop.permute.xlu1 %180  ;;  %v171_v24 = vpop.permute.xlu0 %170 }
  0x75   :  { %v251_v28 = vadd.f32 %v4529_v21, %v181_v23  ;;  %v249_v29 = vadd.f32 %v4529_v21, %v171_v24  ;;  %v4008_v23 = vunpack.c.3.s8 %v4562_v49  ;;  %v4011_v24 = vunpack.c.0.s8 %v4591_v20 }
  0x76   :  { %v273_v49 = vmul.f32 0.2, %v257_v44 }
  0x77   :  { %v267_v31 = vmul.f32 0.2, %v251_v28  ;;  %v265_v32 = vmul.f32 0.2, %v249_v29 }
  0x79   :  { %v283_v35 = vmax.f32 %v251_v28, %v267_v31  ;;  %v281_v36 = vmax.f32 %v249_v29, %v265_v32  ;;  %v270_v29 = vmul.f32 0.2, %v254_v63  ;;  %v4609_v32 = vcvt.s32.f32 %v4000_v19 }
  0x7a   :  { %v4648_v19 = vcvt.s32.f32 %v4016_v51 }
  0x7b   :  { %v4545_v38 = vsel %vm7616_vm0, %v283_v35, -1e+30  ;;  %v4549_v39 = vsel %vm119_vm1, %v281_v36, -1e+30  ;;  %7704 = vst [vmem:[#allocation8_spill] sm:$0xff] %v4609_v32  ;;  %v4613_v35 = vcvt.s32.f32 %v4008_v23  ;;  %v4615_v36 = vcvt.s32.f32 %v4011_v24 }
  0x7c   :  { %v186_v40 = vpop.permute.xlu1 %185  ;;  %v176_v41 = vpop.permute.xlu0 %175  ;;  %333 = vmax.xlane.f32.xlu0 %v4545_v38  ;;  %329 = vmax.xlane.f32.xlu1 %v4549_v39  ;;  %vm7633_vm7 = vcmp.gt.f32.partialorder %v4609_v32, 0.0  ;;  %7706 = vst [vmem:[#allocation10_spill] sm:$0xff] %v4648_v19  ;;  %v289_v24 = vmax.f32 %v257_v44, %v273_v49  ;;  %vm7587_vm12 = vcmp.gt.f32.partialorder %v4648_v19, 0.0 }
  0x7d   :  { %v250_v43 = vadd.f32 %v4529_v21, %v176_v41  ;;  %v252_v47 = vadd.f32 %v4529_v21, %v186_v40  ;;  %vm7635_vm8 = vcmp.gt.f32.partialorder %v4613_v35, 0.0  ;;  %vm7634_vm9 = vcmp.gt.f32.partialorder %v4615_v36, 0.0 }
  0x7f   :  { %v266_v48 = vmul.f32 0.2, %v250_v43  ;;  %v268_v55 = vmul.f32 0.2, %v252_v47 }
  0x81   :  { %v282_v52 = vmax.f32 %v250_v43, %v266_v48  ;;  %v284_v18 = vmax.f32 %v252_v47, %v268_v55  ;;  %v7593_v43 = vmov 1   ;;  %v286_v48 = vmax.f32 %v254_v63, %v270_v29 }
  0x82   :  { %4043 = vset.pattern.permute.xlu0 %v7593_v43  ;;  %4044 = vset.pattern.permute.xlu1 %v7593_v43  ;;  %v4642_v63 = vcvt.s32.f32 %v4007_v45 }
  0x83   :  { %v4575_v56 = vsel %vm120_vm3, %v282_v52, -1e+30  ;;  %v4603_v30 = vsel %vm7613_vm4, %v284_v18, -1e+30  ;;  %4045 = vset.pattern.permute.xlu2 %v7593_v43  ;;  %v4646_v18 = vcvt.s32.f32 %v4015_v50 }
  0x84   :  { %v206_v57 = vpop.permute.xlu1 %205  ;;  %v201_v58 = vpop.permute.xlu0 %200  ;;  %331 = vmax.xlane.f32.xlu2 %v4575_v56  ;;  %337 = vmax.xlane.f32.xlu1 %v4569_v53  ;;  %vm7631_vm10 = vcmp.gt.f32.partialorder %v4642_v63, 0.0 }
  0x85   :  { %v256_v61 = vadd.f32 %v4529_v21, %v206_v57  ;;  %v255_v62 = vadd.f32 %v4529_v21, %v201_v58  ;;  %v226_v57 = vpop.permute.xlu2 %225  ;;  %7705 = vst [vmem:[#allocation9_spill] sm:$0xff] %v4646_v18  ;;  %vm7614_vm11 = vcmp.gt.f32.partialorder %v4646_v18, 0.0  ;;  %v4663_v44 = vsel %vm7631_vm10, %v289_v24, -1e+30 }
  0x87   :  { %v272_v15 = vmul.f32 0.2, %v256_v61  ;;  %v271_v16 = vmul.f32 0.2, %v255_v62 }
  0x89   :  { %v287_v27 = vmax.f32 %v255_v62, %v271_v16  ;;  %v288_v28 = vmax.f32 %v256_v61, %v272_v15  ;;  %v4636_v61 = vsel %vm7633_vm7, %v286_v48, -1e+30 }
  0x8b   :  { %v4599_v17 = vsel %vm7644_vm5, %v287_v27, -1e+30  ;;  %v4607_v31 = vsel %vm7645_vm6, %v288_v28, -1e+30  ;;  %v4027_v27 = vld [vmem:[%s7584_s0 + $0x1c] sm:$0xf]   ;;  %v260_v28 = vadd.f32 %v4529_v21, %v226_v57 }
  0x8c   :  { %v221_v33 = vpop.permute.xlu1 %220  ;;  %v216_v34 = vpop.permute.xlu0 %215  ;;  %341 = vmax.xlane.f32.xlu0 %v4599_v17  ;;  %335 = vmax.xlane.f32.xlu2 %v4603_v30 }
  0x8d   :  { %v259_v40 = vadd.f32 %v4529_v21, %v221_v33  ;;  %v258_v41 = vadd.f32 %v4529_v21, %v216_v34  ;;  %343 = vmax.xlane.f32.xlu1 %v4607_v31  ;;  %v4020_v34 = vunpack.c.1.s8 %v4027_v27  ;;  %v241_v50 = vpop.permute.xlu2 %240 }
  0x8e   :  { %v263_v49 = vadd.f32 %v4529_v21, %v241_v50 }
  0x8f   :  { %v275_v46 = vmul.f32 0.2, %v259_v40  ;;  %v274_v47 = vmul.f32 0.2, %v258_v41 }
  0x91   :  { %v290_v52 = vmax.f32 %v258_v41, %v274_v47  ;;  %v291_v55 = vmax.f32 %v259_v40, %v275_v46  ;;  %v4012_v40 = vunpack.c.1.s8 %v4591_v20  ;;  %v276_v46 = vmul.f32 0.2, %v260_v28 }
  0x92   :  { %v4675_v20 = vcvt.s32.f32 %v4020_v34 }
  0x93   :  { %v4632_v58 = vsel %vm7635_vm8, %v290_v52, -1e+30  ;;  %v4640_v62 = vsel %vm7634_vm9, %v291_v55, -1e+30  ;;  %v4677_v52 = vcvt.s32.f32 %v4012_v40 }
  0x94   :  { %v236_v15 = vpop.permute.xlu1 %235  ;;  %v231_v16 = vpop.permute.xlu0 %230  ;;  %347 = vmax.xlane.f32.xlu0 %v4632_v58  ;;  %339 = vmax.xlane.f32.xlu2 %v4636_v61  ;;  %7707 = vst [vmem:[#allocation11_spill] sm:$0xff] %v4675_v20  ;;  %vm7588_vm13 = vcmp.gt.f32.partialorder %v4675_v20, 0.0 }
  0x95   :  { %v262_v22 = vadd.f32 %v4529_v21, %v236_v15  ;;  %v261_v23 = vadd.f32 %v4529_v21, %v231_v16  ;;  %349 = vmax.xlane.f32.xlu1 %v4640_v62  ;;  %v292_v15 = vmax.f32 %v260_v28, %v276_v46  ;;  %vm7632_vm14 = vcmp.gt.f32.partialorder %v4677_v52, 0.0 }
  0x96   :  { %v4019_v16 = vunpack.c.0.s8 %v4027_v27 }
  0x97   :  { %v278_v29 = vmul.f32 0.2, %v262_v22  ;;  %v277_v33 = vmul.f32 0.2, %v261_v23 }
  0x99   :  { %v293_v41 = vmax.f32 %v261_v23, %v277_v33  ;;  %v294_v45 = vmax.f32 %v262_v22, %v278_v29  ;;  %v279_v23 = vmul.f32 0.2, %v263_v49  ;;  %v4690_v29 = vsel %vm7632_vm14, %v292_v15, -1e+30 }
  0x9a   :  { %v4389_v33 = vmov -inf  }
  0x9b   :  { %v4667_v47 = vsel %vm7614_vm11, %v293_v41, -1e+30  ;;  %v4671_v48 = vsel %vm7587_vm12, %v294_v45, -1e+30  ;;  %v295_v28 = vmax.f32 %v263_v49, %v279_v23  ;;  %24 = vst.msk [vmem:[#allocation2 + $0x10] sm:$0xff] %vm21_vm15, %v4389_v33 }
  0x9c   :  { %v246_v51 = vpop.permute.xlu0 %245  ;;  %353 = vmax.xlane.f32.xlu0 %v4667_v47  ;;  %345 = vmax.xlane.f32.xlu2 %v4663_v44  ;;  %22 = vst.msk [vmem:[#allocation2] sm:$0xff] %vm21_vm15, %v4389_v33 }
  0x9d   :  { %v264_v55 = vadd.f32 %v4529_v21, %v246_v51  ;;  %355 = vmax.xlane.f32.xlu1 %v4671_v48  ;;  %v4694_v21 = vcvt.s32.f32 %v4019_v16  ;;  %23 = vst.msk [vmem:[#allocation2 + $0x8] sm:$0xff] %vm21_vm15, %v4389_v33 }
  0x9e   :  { %25 = vst.msk [vmem:[#allocation2 + $0x18] sm:$0xff] %vm21_vm15, %v4389_v33 }
  0x9f   :  { %v280_v57 = vmul.f32 0.2, %v264_v55  ;;  %7709 = vst [vmem:[#allocation13_spill] sm:$0xff] %v4694_v21  ;;  %vm133_vm12 = vcmp.gt.f32.partialorder %v4694_v21, 0.0 }
  0xa0   :  { %v4703_v27 = vsel %vm133_vm12, %v295_v28, -1e+30  ;;  %26 = vst.msk [vmem:[#allocation2 + $0x20] sm:$0xff] %vm21_vm15, %v4389_v33 }
  0xa1   :  { %v296_v22 = vmax.f32 %v264_v55, %v280_v57  ;;  %27 = vst.msk [vmem:[#allocation2 + $0x28] sm:$0xff] %vm21_vm15, %v4389_v33 }
  0xa2   :  { %28 = vst.msk [vmem:[#allocation2 + $0x30] sm:$0xff] %vm21_vm15, %v4389_v33 }
  0xa3   :  { %v4686_v24 = vsel %vm7588_vm13, %v296_v22, -1e+30  ;;  %29 = vst.msk [vmem:[#allocation2 + $0x38] sm:$0xff] %vm21_vm15, %v4389_v33  ;;  %vm7610_vm13 = vcmask 7168  }
  0xa4   :  { %7708 = vst [vmem:[#allocation12_spill] sm:$0xff] %v4686_v24  ;;  %359 = vmax.xlane.f32.xlu0 %v4686_v24  ;;  %351 = vmax.xlane.f32.xlu2 %v4690_v29  ;;  %v4778_v40 = vld [vmem:[#allocation2 + $0x8] sm:$0xff] }
  0xa5   :  { %30 = vst.msk [vmem:[#allocation2 + $0x40] sm:$0xff] %vm21_vm15, %v4389_v33  ;;  %v4798_v57 = vld [vmem:[#allocation2 + $0x18] sm:$0xff] }
  0xa6   :  { %31 = vst.msk [vmem:[#allocation2 + $0x48] sm:$0xff] %vm21_vm15, %v4389_v33 }
  0xa7   :  { %32 = vst.msk [vmem:[#allocation2 + $0x50] sm:$0xff] %vm21_vm15, %v4389_v33  ;;  %v4780_v41 = vld [vmem:[#allocation2 + $0x20] sm:$0xff] }
  0xa8   :  { %33 = vst.msk [vmem:[#allocation2 + $0x58] sm:$0xff] %vm21_vm15, %v4389_v33 }
  0xa9   :  { %34 = vst.msk [vmem:[#allocation2 + $0x60] sm:$0xff] %vm21_vm15, %v4389_v33  ;;  %v4796_v49 = vld [vmem:[#allocation2 + $0x30] sm:$0xff] }
  0xaa   :  { %35 = vst.msk [vmem:[#allocation2 + $0x68] sm:$0xff] %vm21_vm15, %v4389_v33  ;;  %v4800_v15 = vld [vmem:[#allocation2 + $0x38] sm:$0xff] }
  0xab   :  { %36 = vst.msk [vmem:[#allocation2 + $0x70] sm:$0xff] %vm21_vm15, %v4389_v33 }
  0xac   :  { %357 = vmax.xlane.f32.xlu2 %v4703_v27  ;;  %37 = vst.msk [vmem:[#allocation2 + $0x78] sm:$0xff] %vm21_vm15, %v4389_v33 }
  0xad   :  { %7712 = vst [vmem:[#allocation16_spill] sm:$0xff] %v4780_v41 }
  0xae   :  { %7714 = vst [vmem:[#allocation18_spill] sm:$0xff] %v4800_v15 }
  0xb6   :  { %956 = vperm.xlu1 %4044, %v4453_v5   ;;  %v7591_v5 = vmov 0.0  }
  0xb7   :  { %38 = vst.msk [vmem:[#allocation3] sm:$0xff] %vm21_vm15, %v7591_v5 }
  0xb8   :  { %951 = vperm.xlu0 %4043, %v4434_v2   ;;  %39 = vst.msk [vmem:[#allocation3 + $0x8] sm:$0xff] %vm21_vm15, %v7591_v5  ;;  %v4762_v2 = vld [vmem:[#allocation2] sm:$0xff] }
  0xb9   :  { %40 = vst.msk [vmem:[#allocation3 + $0x10] sm:$0xff] %vm21_vm15, %v7591_v5 }
  0xba   :  { %41 = vst.msk [vmem:[#allocation3 + $0x18] sm:$0xff] %vm21_vm15, %v7591_v5 }
  0xbb   :  { %42 = vst.msk [vmem:[#allocation3 + $0x20] sm:$0xff] %vm21_vm15, %v7591_v5 }
  0xbc   :  { %43 = vst.msk [vmem:[#allocation3 + $0x28] sm:$0xff] %vm21_vm15, %v7591_v5 }
  0xbd   :  { %44 = vst.msk [vmem:[#allocation3 + $0x30] sm:$0xff] %vm21_vm15, %v7591_v5 }
  0xbe   :  { %966 = vperm.xlu1 %4044, %v4448_v4   ;;  %45 = vst.msk [vmem:[#allocation3 + $0x38] sm:$0xff] %vm21_vm15, %v7591_v5 }
  0xbf   :  { %46 = vst.msk [vmem:[#allocation3 + $0x40] sm:$0xff] %vm21_vm15, %v7591_v5 }
  0xc0   :  { %976 = vperm.xlu0 %4043, %v4458_v6   ;;  %47 = vst.msk [vmem:[#allocation3 + $0x48] sm:$0xff] %vm21_vm15, %v7591_v5 }
  0xc1   :  { %48 = vst.msk [vmem:[#allocation3 + $0x50] sm:$0xff] %vm21_vm15, %v7591_v5 }
  0xc2   :  { %49 = vst.msk [vmem:[#allocation3 + $0x58] sm:$0xff] %vm21_vm15, %v7591_v5 }
  0xc3   :  { %50 = vst.msk [vmem:[#allocation3 + $0x60] sm:$0xff] %vm21_vm15, %v7591_v5 }
  0xc4   :  { %961 = vperm.xlu2 %4045, %v4429_v1   ;;  %51 = vst.msk [vmem:[#allocation3 + $0x68] sm:$0xff] %vm21_vm15, %v7591_v5  ;;  %v4760_v1 = vld [vmem:[#allocation2 + $0x10] sm:$0xff] }
  0xc5   :  { %52 = vst.msk [vmem:[#allocation3 + $0x70] sm:$0xff] %vm21_vm15, %v7591_v5 }
  0xc6   :  { %981 = vperm.xlu1 %4044, %v4471_v8   ;;  %53 = vst.msk [vmem:[#allocation3 + $0x78] sm:$0xff] %vm21_vm15, %v7591_v5  ;;  %vm7612_vm15 = vcmask 261120  }
  0xc7   :  { %7710 = vst [vmem:[#allocation14_spill] sm:$0xff] %v4760_v1 }
  0xc8   :  { %4048 = vset.pattern.permute.xlu0 %v7589_v0 }
  0xcc   :  { %971 = vperm.xlu2 %4045, %v4439_v3  }
  0xce   :  { %4046 = vset.pattern.permute.xlu1 %v7589_v0 }
  0xd4   :  { %4047 = vset.pattern.permute.xlu2 %v7589_v0 }
  0xef   :  { %v334_v3 = vpop.xlane.xlu0 %333  ;;  %v330_v4 = vpop.xlane.xlu1 %329 }
  0xf0   :  { %v4765_v6 = vmax.f32 %v4760_v1, %v334_v3  ;;  %v4768_v8 = vmax.f32 %v4762_v2, %v330_v4 }
  0xf2   :  { %7711 = vst [vmem:[#allocation15_spill] sm:$0xff] %v4765_v6  ;;  %437 = vperm.xlu0 %4048, %v4765_v6   ;;  %427 = vperm.xlu1 %4046, %v4768_v8   ;;  %v377_v20 = vsub.f32 %v4762_v2, %v4768_v8 }
  0xf3   :  { %918 = vst.msk [vmem:[#allocation2 + $0x10] sm:$0xff] %vm7610_vm13, %v4765_v6 }
  0xf4   :  { %916 = vst.msk [vmem:[#allocation2] sm:$0xff] %vm7610_vm13, %v4768_v8 }
  0xf7   :  { %v332_v45 = vpop.xlane.xlu2 %331  ;;  %v338_v46 = vpop.xlane.xlu1 %337 }
  0xf8   :  { %v4783_v50 = vmax.f32 %v4778_v40, %v332_v45  ;;  %v4786_v51 = vmax.f32 %v4780_v41, %v338_v46  ;;  %v4821_v45 = vld [vmem:[#allocation2 + $0x48] sm:$0xff] }
  0xf9   :  { %v318_v46 = vld [vmem:[#allocation2 + $0x28] sm:$0xff] }
  0xfa   :  { %7713 = vst [vmem:[#allocation17_spill] sm:$0xff] %v4786_v51  ;;  %432 = vperm.xlu2 %4047, %v4783_v50   ;;  %447 = vperm.xlu0 %4048, %v4786_v51   ;;  %v378_v4 = vsub.f32 %v4778_v40, %v4783_v50 }
  0xfb   :  { %917 = vst.msk [vmem:[#allocation2 + $0x8] sm:$0xff] %vm7610_vm13, %v4783_v50 }
  0xfc   :  { %920 = vst.msk [vmem:[#allocation2 + $0x20] sm:$0xff] %vm7610_vm13, %v4786_v51 }
  0xff   :  { %v342_v16 = vpop.xlane.xlu0 %341  ;;  %v336_v22 = vpop.xlane.xlu2 %335 }
 0x100   :  { %v4803_v23 = vmax.f32 %v4796_v49, %v342_v16  ;;  %v4806_v28 = vmax.f32 %v4798_v57, %v336_v22  ;;  %v344_v33 = vpop.xlane.xlu1 %343  ;;  %v4823_v16 = vld [vmem:[#allocation2 + $0x50] sm:$0xff] }
 0x101   :  { %v4809_v3 = vmax.f32 %v4800_v15, %v344_v33  ;;  %7716 = vst [vmem:[#allocation20_spill] sm:$0xff] %v4823_v16 }
 0x102   :  { %922 = vst.msk [vmem:[#allocation2 + $0x30] sm:$0xff] %vm7610_vm13, %v4803_v23  ;;  %442 = vperm.xlu1 %4046, %v4806_v28   ;;  %v380_v8 = vsub.f32 %v4798_v57, %v4806_v28 }
 0x103   :  { %7715 = vst [vmem:[#allocation19_spill] sm:$0xff] %v4809_v3  ;;  %462 = vperm.xlu0 %4048, %v4809_v3  }
 0x104   :  { %919 = vst.msk [vmem:[#allocation2 + $0x18] sm:$0xff] %vm7610_vm13, %v4806_v28  ;;  %v399_v50 = vmul.f32 1.442695, %v380_v8  ;;  %v3985_v8 = vld [vmem:[%s7585_s3 + $0x20] sm:$0xff] }
 0x105   :  { %923 = vst.msk [vmem:[#allocation2 + $0x38] sm:$0xff] %vm7610_vm13, %v4809_v3 }
 0x107   :  { %v348_v22 = vpop.xlane.xlu0 %347  ;;  %v340_v33 = vpop.xlane.xlu2 %339 }
 0x108   :  { %v4826_v0 = vmax.f32 %v4821_v45, %v348_v22  ;;  %v366_v55 = vmax.f32 %v318_v46, %v340_v33  ;;  %v350_v34 = vpop.xlane.xlu1 %349  ;;  %v4840_v22 = vld [vmem:[#allocation2 + $0x60] sm:$0xff]  ;;  %v4842_v33 = vld [vmem:[#allocation2 + $0x68] sm:$0xff] }
 0x109   :  { %v4829_v5 = vmax.f32 %v4823_v16, %v350_v34  ;;  %v321_v34 = vld [vmem:[#allocation2 + $0x40] sm:$0xff]  ;;  %7718 = vst [vmem:[#allocation22_spill] sm:$0xff] %v4842_v33 }
 0x10a   :  { %925 = vst.msk [vmem:[#allocation2 + $0x48] sm:$0xff] %vm7610_vm13, %v4826_v0  ;;  %452 = vperm.xlu2 %4047, %v366_v55   ;;  %457 = vperm.xlu1 %4046, %v4803_v23   ;;  %v382_v40 = vsub.f32 %v318_v46, %v366_v55  ;;  %v386_v46 = vsub.f32 %v4821_v45, %v4826_v0 }
 0x10b   :  { %7717 = vst [vmem:[#allocation21_spill] sm:$0xff] %v4829_v5  ;;  %477 = vperm.xlu0 %4048, %v4829_v5  }
 0x10c   :  { %921 = vst.msk [vmem:[#allocation2 + $0x28] sm:$0xff] %vm7610_vm13, %v366_v55 }
 0x10d   :  { %926 = vst.msk [vmem:[#allocation2 + $0x50] sm:$0xff] %vm7610_vm13, %v4829_v5 }
 0x10f   :  { %v354_v43 = vpop.xlane.xlu0 %353  ;;  %v346_v3 = vpop.xlane.xlu2 %345 }
 0x110   :  { %v4845_v15 = vmax.f32 %v4840_v22, %v354_v43  ;;  %v369_v51 = vmax.f32 %v321_v34, %v346_v3  ;;  %v356_v41 = vpop.xlane.xlu1 %355  ;;  %v4859_v43 = vld [vmem:[#allocation2 + $0x78] sm:$0xff] }
 0x111   :  { %v4848_v6 = vmax.f32 %v4842_v33, %v356_v41  ;;  %v324_v41 = vld [vmem:[#allocation2 + $0x58] sm:$0xff]  ;;  %v395_v33 = vmul.f32 1.442695, %v378_v4 }
 0x112   :  { %928 = vst.msk [vmem:[#allocation2 + $0x60] sm:$0xff] %vm7610_vm13, %v4845_v15  ;;  %467 = vperm.xlu2 %4047, %v369_v51   ;;  %472 = vperm.xlu1 %4046, %v4826_v0   ;;  %v385_v57 = vsub.f32 %v321_v34, %v369_v51  ;;  %v389_v45 = vsub.f32 %v4840_v22, %v4845_v15  ;;  %v3984_v22 = vld [vmem:[%s7585_s3 + $0x18] sm:$0xff] }
 0x113   :  { %7719 = vst [vmem:[#allocation23_spill] sm:$0xff] %v4848_v6  ;;  %492 = vperm.xlu0 %4048, %v4848_v6  }
 0x114   :  { %924 = vst.msk [vmem:[#allocation2 + $0x40] sm:$0xff] %vm7610_vm13, %v369_v51  ;;  %v409_v55 = vmul.f32 1.442695, %v385_v57  ;;  %v3983_v57 = vld [vmem:[%s7585_s3 + $0x10] sm:$0xff] }
 0x115   :  { %929 = vst.msk [vmem:[#allocation2 + $0x68] sm:$0xff] %vm7610_vm13, %v4848_v6  ;;  %v7720_v6 = vmov 1  }
 0x117   :  { %v360_v3 = vpop.xlane.xlu0 %359  ;;  %v352_v5 = vpop.xlane.xlu2 %351 }
 0x118   :  { %v4862_v16 = vmax.f32 %v4859_v43, %v360_v3  ;;  %v372_v1 = vmax.f32 %v324_v41, %v352_v5  ;;  %v327_v3 = vld [vmem:[#allocation2 + $0x70] sm:$0xff]  ;;  %v393_v5 = vmul.f32 1.442695, %v377_v20 }
 0x11a   :  { %931 = vst.msk [vmem:[#allocation2 + $0x78] sm:$0xff] %vm7610_vm13, %v4862_v16  ;;  %482 = vperm.xlu2 %4047, %v372_v1   ;;  %487 = vperm.xlu1 %4046, %v4845_v15   ;;  %4074 = vpow2.f32 %v393_v5  ;;  %v388_v51 = vsub.f32 %v324_v41, %v372_v1 }
 0x11b   :  { %927 = vst.msk [vmem:[#allocation2 + $0x58] sm:$0xff] %vm7610_vm13, %v372_v1  ;;  %4050 = vset.pattern.permute.xlu0 %v7720_v6  ;;  %4076 = vpow2.f32 %v395_v33  ;;  %v3987_v33 = vld [vmem:[%s7585_s3 + $0x30] sm:$0xff]  ;;  %v3986_v1 = vld [vmem:[%s7585_s3 + $0x28] sm:$0xff] }
 0x11c   :  { %991 = vperm.xlu0 %4050, %v4476_v9   ;;  %v403_v9 = vmul.f32 1.442695, %v382_v40  ;;  %4078 = vpow2.f32 %v399_v50  ;;  %v415_v34 = vmul.f32 1.442695, %v388_v51  ;;  %v417_v40 = vmul.f32 1.442695, %v389_v45 }
 0x11e   :  { %4080 = vpow2.f32 %v403_v9 }
 0x11f   :  { %v358_v24 = vpop.xlane.xlu2 %357 }
 0x120   :  { %v375_v2 = vmax.f32 %v327_v3, %v358_v24  ;;  %v4879_v19 = vpop.eup %4074  ;;  %v383_v24 = vsub.f32 %v4796_v49, %v4803_v23  ;;  %v3988_v49 = vld [vmem:[%s7585_s3 + $0x38] sm:$0xff]  ;;  %v411_v23 = vmul.f32 1.442695, %v386_v46 }
 0x121   :  { %v4881_v20 = vpop.eup %4076  ;;  %834 = vmatpush.bf16.msra.mxu0 %v3988_v49 }
 0x122   :  { %930 = vst.msk [vmem:[#allocation2 + $0x70] sm:$0xff] %vm7610_vm13, %v375_v2  ;;  %497 = vperm.xlu2 %4047, %v375_v2   ;;  %502 = vperm.xlu1 %4046, %v4862_v16   ;;  %v405_v28 = vmul.f32 1.442695, %v383_v24  ;;  %v4887_v4 = vpop.eup %4078  ;;  %v391_v41 = vsub.f32 %v327_v3, %v375_v2  ;;  %v392_v3 = vsub.f32 %v4859_v43, %v4862_v16  ;;  %v3982_v16 = vld [vmem:[%s7585_s3 + $0x8] sm:$0xff]  ;;  %v3981_v43 = vld [vmem:[%s7585_s3] sm:$0xff]  ;;  %vm5005_vm13 = vmpackc.low %vm120_vm3, %vm119_vm1 }
 0x124   :  { %1006 = vperm.xlu0 %4050, %v4494_v12   ;;  %v4889_v12 = vpop.eup %4080  ;;  %4082 = vpow2.f32 %v405_v28  ;;  %v421_v50 = vmul.f32 1.442695, %v391_v41  ;;  %v423_v2 = vmul.f32 1.442695, %v392_v3 }
 0x125   :  { %4084 = vpow2.f32 %v409_v55  ;;  %835 = vmatpush.bf16.msra.mxu0 %v3987_v33 }
 0x126   :  { %4086 = vpow2.f32 %v411_v23 }
 0x127   :  { %4088 = vpow2.f32 %v415_v34  ;;  %v4935_v46 = vpop.permute.xlu2 %961 }
 0x128   :  { %4090 = vpow2.f32 %v417_v40  ;;  %v4926_v24 = vpop.permute.xlu1 %956 }
 0x129   :  { %836 = vmatpush.bf16.msra.mxu0 %v3986_v1  ;;  %4092 = vpow2.f32 %v421_v50  ;;  %v7721_v1 = vmov 0.0  }
 0x12a   :  { %689 = vperm.xlu1 %4046, %v4881_v20   ;;  %684 = vperm.xlu2 %4047, %v4879_v19   ;;  %v4901_v5 = vpop.eup %4082  ;;  %4094 = vpow2.f32 %v423_v2  ;;  %v4955_v34 = vpop.permute.xlu0 %951  ;;  %55 = vst.msk [vmem:[#allocation4] sm:$0xff] %vm7612_vm15, %v7721_v1 }
 0x12b   :  { %v4903_v0 = vpop.eup %4084  ;;  %56 = vst.msk [vmem:[#allocation4 + $0x8] sm:$0xff] %vm7612_vm15, %v7721_v1 }
 0x12c   :  { %v4915_v9 = vpop.eup %4086  ;;  %57 = vst.msk [vmem:[#allocation4 + $0x10] sm:$0xff] %vm7612_vm15, %v7721_v1 }
 0x12d   :  { %v4917_v15 = vpop.eup %4088  ;;  %837 = vmatpush.bf16.msra.mxu0 %v3985_v8  ;;  %58 = vst.msk [vmem:[#allocation4 + $0x18] sm:$0xff] %vm7612_vm15, %v7721_v1 }
 0x12e   :  { %v4931_v28 = vpop.eup %4090  ;;  %59 = vst.msk [vmem:[#allocation4 + $0x20] sm:$0xff] %vm7612_vm15, %v7721_v1 }
 0x12f   :  { %v4933_v55 = vpop.eup %4092  ;;  %v4952_v23 = vpop.permute.xlu2 %971  ;;  %60 = vst.msk [vmem:[#allocation4 + $0x28] sm:$0xff] %vm7612_vm15, %v7721_v1 }
 0x130   :  { %v4945_v49 = vpop.eup %4094  ;;  %v4947_v51 = vpop.permute.xlu1 %966  ;;  %61 = vst.msk [vmem:[#allocation4 + $0x30] sm:$0xff] %vm7612_vm15, %v7721_v1 }
 0x131   :  { %838 = vmatpush.bf16.msra.mxu0 %v3984_v22  ;;  %62 = vst.msk [vmem:[#allocation4 + $0x38] sm:$0xff] %vm7612_vm15, %v7721_v1 }
 0x132   :  { %709 = vperm.xlu1 %4046, %v4889_v12   ;;  %699 = vperm.xlu2 %4047, %v4887_v4   ;;  %63 = vst.msk [vmem:[#allocation4 + $0x40] sm:$0xff] %vm7612_vm15, %v7721_v1 }
 0x133   :  { %64 = vst.msk [vmem:[#allocation4 + $0x48] sm:$0xff] %vm7612_vm15, %v7721_v1 }
 0x134   :  { %65 = vst.msk [vmem:[#allocation4 + $0x50] sm:$0xff] %vm7612_vm15, %v7721_v1 }
 0x135   :  { %839 = vmatpush.bf16.msra.mxu0 %v3983_v57  ;;  %66 = vst.msk [vmem:[#allocation4 + $0x58] sm:$0xff] %vm7612_vm15, %v7721_v1 }
 0x136   :  { %67 = vst.msk [vmem:[#allocation4 + $0x60] sm:$0xff] %vm7612_vm15, %v7721_v1 }
 0x137   :  { %68 = vst.msk [vmem:[#allocation4 + $0x68] sm:$0xff] %vm7612_vm15, %v7721_v1 }
 0x138   :  { %v4959_v33 = vpop.permute.xlu1 %981  ;;  %69 = vst.msk [vmem:[#allocation4 + $0x70] sm:$0xff] %vm7612_vm15, %v7721_v1 }
 0x139   :  { %840 = vmatpush.bf16.msra.mxu0 %v3982_v16  ;;  %70 = vst.msk [vmem:[#allocation4 + $0x78] sm:$0xff] %vm7612_vm15, %v7721_v1  ;;  %vm5025_vm15 = vmpackc.low %vm7613_vm4, %vm7616_vm0 }
 0x13a   :  { %724 = vperm.xlu1 %4046, %v4903_v0   ;;  %714 = vperm.xlu2 %4047, %v4901_v5  }
 0x13d   :  { %841 = vmatpush.bf16.msra.mxu0 %v3981_v43 }
 0x142   :  { %739 = vperm.xlu1 %4046, %v4917_v15   ;;  %729 = vperm.xlu2 %4047, %v4915_v9  }
 0x14a   :  { %754 = vperm.xlu1 %4046, %v4933_v55   ;;  %744 = vperm.xlu2 %4047, %v4931_v28  }
 0x152   :  { %4051 = vset.pattern.permute.xlu1 %v7720_v6  ;;  %759 = vperm.xlu2 %4047, %v4945_v49  }
 0x153   :  { %996 = vperm.xlu1 %4051, %v4489_v11  }
 0x154   :  { %v433_v45 = vpop.permute.xlu2 %432 }
 0x155   :  { %v506_v11 = vsub.f32 %v4575_v56, %v433_v45 }
 0x157   :  { %v523_v8 = vmul.f32 1.442695, %v506_v11 }
 0x159   :  { %4096 = vpow2.f32 %v523_v8 }
 0x15a   :  { %4049 = vset.pattern.permute.xlu2 %v7720_v6 }
 0x15b   :  { %1011 = vperm.xlu1 %4051, %v4507_v14   ;;  %986 = vperm.xlu2 %4049, %v4466_v7   ;;  %v4975_v14 = vpop.permute.xlu0 %976 }
 0x15f   :  { %v4999_v50 = vpop.eup %4096 }
 0x163   :  { %1001 = vperm.xlu2 %4049, %v4484_v10  }
 0x164   :  { %v453_v7 = vpop.permute.xlu2 %452  ;;  %v428_v41 = vpop.permute.xlu1 %427 }
 0x165   :  { %v505_v56 = vsub.f32 %v4549_v39, %v428_v41  ;;  %v438_v40 = vpop.permute.xlu0 %437  ;;  %v510_v41 = vsub.f32 %v4636_v61, %v453_v7 }
 0x166   :  { %v507_v3 = vsub.f32 %v4545_v38, %v438_v40 }
 0x167   :  { %v521_v10 = vmul.f32 1.442695, %v505_v56  ;;  %v531_v40 = vmul.f32 1.442695, %v510_v41 }
 0x168   :  { %v525_v1 = vmul.f32 1.442695, %v507_v3 }
 0x169   :  { %4098 = vpow2.f32 %v521_v10 }
 0x16a   :  { %4100 = vpow2.f32 %v525_v1 }
 0x16b   :  { %1016 = vperm.xlu2 %4049, %v4502_v13   ;;  %v7722_v13 = vmov 0 }
 0x16c   :  { %v468_v39 = vpop.permute.xlu2 %467  ;;  %v7723_v13 = vsel %vm5005_vm13, 4294967295, %v7722_v13 }
 0x16d   :  { %7724 = vst [vmem:[#allocation24_spill] sm:$0xff] %v7723_v13  ;;  %v448_v56 = vpop.permute.xlu0 %447 }
 0x16f   :  { %v4099_v22 = vpop.eup %4098 }
 0x170   :  { %v553_v2 = vsel %vm119_vm1, %v4099_v22, 0.0  ;;  %v3886_v57 = vpack.c.bf16 %v4999_v50, %v4099_v22 }
 0x171   :  { %601 = vadd.xlane.f32.xlu0 %v553_v2  ;;  %v4101_v2 = vpop.eup %4100 }
 0x172   :  { %3887 = vmatmul.msk.bf16.vlgmr.msra.gmra.mxu0 %vm5005_vm13, %v3886_v57  ;;  %v509_v57 = vsub.f32 %v4569_v53, %v448_v56 }
 0x174   :  { %v483_v16 = vpop.permute.xlu2 %482  ;;  %v443_v43 = vpop.permute.xlu1 %442  ;;  %v529_v3 = vmul.f32 1.442695, %v509_v57 }
 0x175   :  { %v508_v45 = vsub.f32 %v4603_v30, %v443_v43  ;;  %v7725_v30 = vmov 0  ;;  %v463_v56 = vpop.permute.xlu0 %462 }
 0x176   :  { %v7726_v30 = vsel %vm5025_vm15, 4294967295, %v7725_v30 }
 0x177   :  { %v527_v11 = vmul.f32 1.442695, %v508_v45  ;;  %7727 = vst [vmem:[#allocation25_spill] sm:$0xff] %v7726_v30  ;;  %v555_v45 = vsel %vm7616_vm0, %v4101_v2, 0.0 }
 0x179   :  { %4102 = vpow2.f32 %v527_v11 }
 0x17a   :  { %4104 = vpow2.f32 %v531_v40 }
 0x17c   :  { %v5017_v38 = vpop.permute.xlu2 %497  ;;  %v458_v8 = vpop.permute.xlu1 %457 }
 0x17d   :  { %v511_v10 = vsub.f32 %v4599_v17, %v458_v8  ;;  %v513_v17 = vsub.f32 %v4663_v44, %v468_v39  ;;  %v516_v8 = vsub.f32 %v4690_v29, %v483_v16 }
 0x17f   :  { %v533_v22 = vmul.f32 1.442695, %v511_v10  ;;  %v4103_v6 = vpop.eup %4102  ;;  %v537_v11 = vmul.f32 1.442695, %v513_v17  ;;  %v7728_v17 = vmov 0 }
 0x180   :  { %v556_v61 = vsel %vm7613_vm4, %v4103_v6, 0.0  ;;  %v3889_v7 = vpack.c.bf16 %v4103_v6, %v4101_v2  ;;  %v4105_v6 = vpop.eup %4104  ;;  %vm5061_vm4 = vmpackc.low %vm7633_vm7, %vm7615_vm2 }
 0x181   :  { %4106 = vpow2.f32 %v533_v22  ;;  %607 = vadd.xlane.f32.xlu0 %v556_v61  ;;  %v558_v40 = vsel %vm7633_vm7, %v4105_v6, 0.0  ;;  %v543_v61 = vmul.f32 1.442695, %v516_v8  ;;  %v7729_v17 = vsel %vm5061_vm4, 4294967295, %v7728_v17 }
 0x182   :  { %3890 = vmatmul.msk.bf16.gmra.mxu0 %vm5025_vm15, %v3889_v7  ;;  %4108 = vpow2.f32 %v529_v3  ;;  %7730 = vst [vmem:[#allocation26_spill] sm:$0xff] %v7729_v17 }
 0x184   :  { %v5034_v53 = vpop.permute.xlu2 %684  ;;  %v473_v43 = vpop.permute.xlu1 %472 }
 0x185   :  { %v514_v1 = vsub.f32 %v4632_v58, %v473_v43  ;;  %605 = vadd.xlane.f32.xlu1 %v555_v45  ;;  %v519_v43 = vsub.f32 %v4703_v27, %v5017_v38  ;;  %v554_v45 = vsel %vm120_vm3, %v4999_v50, 0.0  ;;  %v478_v38 = vpop.permute.xlu0 %477 }
 0x187   :  { %v539_v41 = vmul.f32 1.442695, %v514_v1  ;;  %v5039_v44 = vpop.eup %4106  ;;  %v5074_v1 = vld [vmem:[%s7583_s2 + $0x1] ss:$0 sm:$0xff] }
 0x188   :  { %v559_v39 = vsel %vm7644_vm5, %v5039_v44, 0.0  ;;  %v4109_v2 = vpop.eup %4108  ;;  %v1031_v50 = vadd.f32 %v5074_v1, %v4926_v24  ;;  %v1033_v30 = vadd.f32 %v5074_v1, %v4947_v51 }
 0x189   :  { %4110 = vpow2.f32 %v539_v41  ;;  %613 = vadd.xlane.f32.xlu0 %v559_v39  ;;  %v3892_v3 = vpack.c.bf16 %v4105_v6, %v4109_v2  ;;  %v549_v39 = vmul.f32 1.442695, %v519_v43 }
 0x18a   :  { %4112 = vpow2.f32 %v537_v11  ;;  %v1049_v32 = vmul.f32 0.2, %v1033_v30 }
 0x18c   :  { %v5045_v10 = vpop.permute.xlu2 %699  ;;  %v488_v58 = vpop.permute.xlu1 %487 }
 0x18d   :  { %v517_v22 = vsub.f32 %v4667_v47, %v488_v58  ;;  %611 = vadd.xlane.f32.xlu1 %v558_v40  ;;  %v512_v47 = vsub.f32 %v4607_v31, %v463_v56  ;;  %v1047_v58 = vmul.f32 0.2, %v1031_v50  ;;  %v515_v40 = vsub.f32 %v4640_v62, %v478_v38 }
 0x18e   :  { %v7731_v38 = vmov 0 }
 0x18f   :  { %v5050_v57 = vpop.eup %4110  ;;  %v545_v7 = vmul.f32 1.442695, %v517_v22  ;;  %v535_v41 = vmul.f32 1.442695, %v512_v47  ;;  %v557_v22 = vsel %vm7615_vm2, %v4109_v2, 0.0  ;;  %v1063_v62 = vmax.f32 %v1031_v50, %v1047_v58 }
 0x190   :  { %v562_v29 = vsel %vm7635_vm8, %v5050_v57, 0.0  ;;  %v5055_v16 = vpop.eup %4112  ;;  %v541_v47 = vmul.f32 1.442695, %v515_v40  ;;  %v1032_v2 = vadd.f32 %v5074_v1, %v4935_v46 }
 0x191   :  { %4114 = vpow2.f32 %v545_v7  ;;  %619 = vadd.xlane.f32.xlu0 %v562_v29  ;;  %v561_v27 = vsel %vm7631_vm10, %v5055_v16, 0.0  ;;  %v1034_v29 = vadd.f32 %v5074_v1, %v4952_v23  ;;  %v5121_v50 = vsel %vm120_vm3, %v1063_v62, -1e+30 }
 0x192   :  { %4116 = vpow2.f32 %v543_v61  ;;  %3893 = vmatmul.msk.bf16.gmra.mxu0 %vm5061_vm4, %v3892_v3  ;;  %v493_v3 = vpop.permute.xlu0 %492 }
 0x193   :  { %4118 = vpow2.f32 %v535_v41  ;;  %v518_v23 = vsub.f32 %v4671_v48, %v493_v3 }
 0x194   :  { %603 = vadd.xlane.f32.xlu2 %v554_v45  ;;  %v5078_v31 = vpop.permute.xlu2 %714  ;;  %v5080_v11 = vpop.permute.xlu1 %502  ;;  %4120 = vpow2.f32 %v549_v39  ;;  %v1048_v39 = vmul.f32 0.2, %v1032_v2 }
 0x195   :  { %617 = vadd.xlane.f32.xlu1 %v561_v27  ;;  %v1050_v27 = vmul.f32 0.2, %v1034_v29  ;;  %4122 = vpow2.f32 %v541_v47 }
 0x196   :  { %v1064_v47 = vmax.f32 %v1032_v2, %v1048_v39 }
 0x197   :  { %v5087_v6 = vpop.eup %4114  ;;  %v1066_v40 = vmax.f32 %v1034_v29, %v1050_v27  ;;  %v1030_v27 = vadd.f32 %v5074_v1, %v4955_v34 }
 0x198   :  { %v565_v8 = vsel %vm7614_vm11, %v5087_v6, 0.0  ;;  %v5092_v56 = vpop.eup %4116  ;;  %vm5114_vm11 = vmpackc.low %vm7645_vm6, %vm7644_vm5 }
 0x199   :  { %625 = vadd.xlane.f32.xlu0 %v565_v8  ;;  %v564_v7 = vsel %vm7632_vm14, %v5092_v56, 0.0  ;;  %v4119_v43 = vpop.eup %4118  ;;  %v7732_v38 = vsel %vm5114_vm11, 4294967295, %v7731_v38  ;;  %v5140_v3 = vsel %vm7615_vm2, %v1066_v40, -1e+30  ;;  %vm5163_vm2 = vmpackc.low %vm7635_vm8, %vm7631_vm10 }
 0x19a   :  { %v5108_v45 = vpop.eup %4120  ;;  %7733 = vst [vmem:[#allocation27_spill] sm:$0xff] %v7732_v38  ;;  %v3895_v46 = vpack.c.bf16 %v4119_v43, %v5039_v44  ;;  %v560_v41 = vsel %vm7645_vm6, %v4119_v43, 0.0  ;;  %v547_v44 = vmul.f32 1.442695, %v518_v23  ;;  %v992_v62 = vpop.permute.xlu0 %991 }
 0x19b   :  { %v567_v48 = vsel %vm133_vm12, %v5108_v45, 0.0  ;;  %v1038_v2 = vadd.f32 %v5074_v1, %v992_v62  ;;  %v7737_v62 = vld [vmem:[#allocation10_spill] sm:$0xff] }
 0x19c   :  { %v5097_v24 = vpop.permute.xlu2 %729  ;;  %609 = vadd.xlane.f32.xlu2 %v557_v22  ;;  %v5099_v61 = vpop.permute.xlu1 %689  ;;  %4124 = vpow2.f32 %v547_v44  ;;  %v3898_v44 = vpack.c.bf16 %v5050_v57, %v5055_v16 }
 0x19d   :  { %623 = vadd.xlane.f32.xlu1 %v564_v7  ;;  %v4123_v22 = vpop.eup %4122  ;;  %v1035_v7 = vadd.f32 %v5074_v1, %v4975_v14  ;;  %v5151_v14 = vsel %vm7616_vm0, %v1064_v47, -1e+30  ;;  %v1054_v40 = vmul.f32 0.2, %v1038_v2  ;;  %v1046_v47 = vmul.f32 0.2, %v1030_v27 }
 0x19e   :  { %v563_v43 = vsel %vm7634_vm9, %v4123_v22, 0.0  ;;  %vm7738_vm0 = vcmp.gt.f32.partialorder %v7737_v62, 0.0 }
 0x19f   :  { %v1070_v38 = vmax.f32 %v1038_v2, %v1054_v40 }
 0x1a1   :  { %1112 = vmax.xlane.f32.xlu0 %v5121_v50 }
 0x1a2   :  { %3896 = vmatmul.msk.bf16.gmra.mxu0 %vm5114_vm11, %v3895_v46  ;;  %v1051_v46 = vmul.f32 0.2, %v1035_v7  ;;  %v5157_v23 = vpop.eup %4124 }
 0x1a3   :  { %v566_v34 = vsel %vm7738_vm0, %v5157_v23, 0.0  ;;  %vm5209_vm0 = vmpackc.low %vm7632_vm14, %vm7634_vm9 }
 0x1a4   :  { %v5129_v8 = vpop.permute.xlu2 %744  ;;  %615 = vadd.xlane.f32.xlu2 %v560_v41  ;;  %v5131_v58 = vpop.permute.xlu1 %709  ;;  %v1067_v39 = vmax.f32 %v1035_v7, %v1051_v46 }
 0x1a5   :  { %629 = vadd.xlane.f32.xlu1 %v567_v48  ;;  %v7734_v48 = vmov 0 }
 0x1a6   :  { %v7735_v48 = vsel %vm5163_vm2, 4294967295, %v7734_v48  ;;  %v5178_v46 = vsel %vm7633_vm7, %v1067_v39, -1e+30 }
 0x1a7   :  { %7736 = vst [vmem:[#allocation28_spill] sm:$0xff] %v7735_v48  ;;  %v1062_v48 = vmax.f32 %v1030_v27, %v1046_v47  ;;  %v1065_v47 = vmax.f32 %v1033_v30, %v1049_v32 }
 0x1a9   :  { %1118 = vmax.xlane.f32.xlu0 %v5140_v3  ;;  %v5191_v25 = vsel %vm119_vm1, %v1062_v48, -1e+30  ;;  %v1036_v48 = vadd.f32 %v5074_v1, %v4959_v33  ;;  %v7742_v33 = vld [vmem:[#allocation12_spill] sm:$0xff] }
 0x1aa   :  { %v520_v32 = vsub.f32 %v7742_v33, %v5080_v11 }
 0x1ac   :  { %v5145_v41 = vpop.permute.xlu2 %759  ;;  %621 = vadd.xlane.f32.xlu2 %v563_v43  ;;  %v5147_v29 = vpop.permute.xlu1 %724 }
 0x1ad   :  { %1114 = vmax.xlane.f32.xlu1 %v5151_v14  ;;  %v1007_v43 = vpop.permute.xlu0 %1006 }
 0x1ae   :  { %v1041_v17 = vadd.f32 %v5074_v1, %v1007_v43 }
 0x1b0   :  { %v1057_v13 = vmul.f32 0.2, %v1041_v17 }
 0x1b2   :  { %3899 = vmatmul.msk.bf16.gmra.mxu0 %vm5163_vm2, %v3898_v44  ;;  %v1073_v40 = vmax.f32 %v1041_v17, %v1057_v13  ;;  %v1052_v17 = vmul.f32 0.2, %v1036_v48 }
 0x1b4   :  { %627 = vadd.xlane.f32.xlu2 %v566_v34  ;;  %v5174_v7 = vpop.permute.xlu1 %739  ;;  %v5187_v34 = vsel %vm7631_vm10, %v1070_v38, -1e+30  ;;  %vm7743_vm10 = vcmp.gt.f32.partialorder %v4571_v54, 0.0 }
 0x1b5   :  { %1120 = vmax.xlane.f32.xlu1 %v5178_v46  ;;  %v987_v57 = vpop.permute.xlu2 %986  ;;  %v5222_v30 = vsel %vm7743_vm10, %v1065_v47, -1e+30  ;;  %vm7744_vm10 = vcmp.gt.f32.partialorder %v7737_v62, 0.0 }
 0x1b6   :  { %v1037_v16 = vadd.f32 %v5074_v1, %v987_v57  ;;  %v7739_v57 = vmov 0  ;;  %vm7746_vm7 = vmmov %vm7744_vm10 }
 0x1b7   :  { %v7740_v57 = vsel %vm5209_vm0, 4294967295, %v7739_v57 }
 0x1b8   :  { %v1053_v44 = vmul.f32 0.2, %v1037_v16  ;;  %7741 = vst [vmem:[#allocation29_spill] sm:$0xff] %v7740_v57 }
 0x1ba   :  { %v1069_v39 = vmax.f32 %v1037_v16, %v1053_v44  ;;  %v3901_v16 = vpack.c.bf16 %v5092_v56, %v4123_v22  ;;  %v5216_v44 = vsel %vm7632_vm14, %v1073_v40, -1e+30  ;;  %v1068_v40 = vmax.f32 %v1036_v48, %v1052_v17 }
 0x1bb   :  { %vm7745_vm14 = vcmp.gt.f32.partialorder %v4646_v18, 0.0 }
 0x1bc   :  { %1110 = vmax.xlane.f32.xlu2 %v5191_v25  ;;  %v5196_v2 = vsel %vm7645_vm6, %v1069_v39, -1e+30  ;;  %v5198_v51 = vpop.permute.xlu1 %754  ;;  %vm1430_vm6 = vcmask 15368  }
 0x1bd   :  { %v1002_v27 = vpop.permute.xlu2 %1001  ;;  %1126 = vmax.xlane.f32.xlu1 %v5187_v34  ;;  %1124 = vmax.xlane.f32.xlu0 %v5196_v2 }
 0x1be   :  { %v1040_v38 = vadd.f32 %v5074_v1, %v1002_v27 }
 0x1c0   :  { %v1056_v43 = vmul.f32 0.2, %v1040_v38 }
 0x1c2   :  { %v1072_v13 = vmax.f32 %v1040_v38, %v1056_v43  ;;  %3902 = vmatmul.msk.bf16.gmra.mxu0 %vm5209_vm0, %v3901_v16  ;;  %v551_v38 = vmul.f32 1.442695, %v520_v32  ;;  %v7747_v32 = vmov 0 }
 0x1c4   :  { %1116 = vmax.xlane.f32.xlu2 %v5222_v30  ;;  %v5229_v56 = vsel %vm7634_vm9, %v1072_v13, -1e+30  ;;  %4126 = vpow2.f32 %v551_v38  ;;  %v5237_v13 = vsel %vm7644_vm5, %v1068_v40, -1e+30  ;;  %vm5250_vm9 = vmpackc.low %vm7746_vm7, %vm7745_vm14  ;;  %v7750_v40 = vld [vmem:[#allocation11_spill] sm:$0xff] }
 0x1c5   :  { %v1017_v22 = vpop.permute.xlu2 %1016  ;;  %1132 = vmax.xlane.f32.xlu1 %v5216_v44  ;;  %1130 = vmax.xlane.f32.xlu0 %v5229_v56  ;;  %v997_v39 = vpop.permute.xlu1 %996  ;;  %v7748_v32 = vsel %vm5250_vm9, 4294967295, %v7747_v32  ;;  %vm7752_vm7 = vmmov %vm7745_vm14 }
 0x1c6   :  { %v1043_v11 = vadd.f32 %v5074_v1, %v1017_v22  ;;  %v1039_v27 = vadd.f32 %v5074_v1, %v997_v39  ;;  %7749 = vst [vmem:[#allocation12_spill] sm:$0xff] %v7748_v32 }
 0x1c8   :  { %v1059_v47 = vmul.f32 0.2, %v1043_v11  ;;  %v1055_v43 = vmul.f32 0.2, %v1039_v27 }
 0x1ca   :  { %v1075_v16 = vmax.f32 %v1043_v11, %v1059_v47  ;;  %v1071_v22 = vmax.f32 %v1039_v27, %v1055_v43  ;;  %v4127_v17 = vpop.eup %4126  ;;  %v3904_v27 = vpack.c.bf16 %v5157_v23, %v5087_v6  ;;  %v7754_v6 = vmov 0 }
 0x1cb   :  { %v3907_v23 = vpack.c.bf16 %v4127_v17, %v5108_v45  ;;  %v666_v45 = vld [vmem:[#allocation4] sm:$0xff] }
 0x1cc   :  { %1122 = vmax.xlane.f32.xlu2 %v5237_v13  ;;  %v5242_v33 = vsel %vm7744_vm10, %v1075_v16, -1e+30  ;;  %v5256_v11 = vsel %vm7635_vm8, %v1071_v22, -1e+30  ;;  %vm7751_vm10 = vcmp.gt.f32.partialorder %v7750_v40, 0.0  ;;  %v569_v22 = vld [vmem:[#allocation3] sm:$0xff] }
 0x1cd   :  { %1136 = vmax.xlane.f32.xlu0 %v5242_v33  ;;  %v1012_v39 = vpop.permute.xlu1 %1011  ;;  %v568_v47 = vsel %vm7751_vm10, %v4127_v17, 0.0  ;;  %vm7753_vm14 = vmmov %vm7751_vm10  ;;  %vm7757_vm10 = vcmask 7168   ;;  %v762_v17 = vmul.f32 %v5034_v53, %v666_v45 }
 0x1ce   :  { %v1042_v48 = vadd.f32 %v5074_v1, %v1012_v39  ;;  %vm5274_vm8 = vmpackc.low %vm7753_vm14, %vm133_vm12  ;;  %v585_v39 = vmul.f32 %v4879_v19, %v569_v22  ;;  %v572_v22 = vld [vmem:[#allocation3 + $0x18] sm:$0xff] }
 0x1cf   :  { %v7755_v6 = vsel %vm5274_vm8, 4294967295, %v7754_v6  ;;  %vm7762_vm14 = vmmov %vm7757_vm10 }
 0x1d0   :  { %v1058_v38 = vmul.f32 0.2, %v1042_v48  ;;  %7756 = vst [vmem:[#allocation30_spill] sm:$0xff] %v7755_v6  ;;  %vm7773_vm5 = vmmov %vm7757_vm10 }
 0x1d2   :  { %3905 = vmatmul.msk.bf16.gmra.mxu0 %vm5250_vm9, %v3904_v27  ;;  %v1074_v43 = vmax.f32 %v1042_v48, %v1058_v38  ;;  %v946_v38 = vld [vmem:[%s7582_s1 + $0x70] sm:$0xff] }
 0x1d4   :  { %1128 = vmax.xlane.f32.xlu2 %v5256_v11  ;;  %v5267_v16 = vsel %vm7752_vm7, %v1074_v43, -1e+30  ;;  %v7759_v43 = vld [vmem:[#allocation15_spill] sm:$0xff]  ;;  %vm899_vm7 = vcmask 64512  }
 0x1d5   :  { %631 = vadd.xlane.f32.xlu0 %v568_v47  ;;  %v7758_v47 = vld [vmem:[#allocation14_spill] sm:$0xff] }
 0x1d6   :  { %v7760_v32 = vsub.f32 %v7758_v47, %v7759_v43 }
 0x1d8   :  { %v397_v57 = vmul.f32 1.442695, %v7760_v32 }
 0x1da   :  { %4128 = vpow2.f32 %v397_v57 }
 0x1dc   :  { %1134 = vmax.xlane.f32.xlu2 %v5267_v16 }
 0x1e0   :  { %v5290_v6 = vpop.eup %4128 }
 0x1e1   :  { %7761 = vst [vmem:[#allocation14_spill] sm:$0xff] %v5290_v6 }
 0x1e2   :  { %3908 = vmatmul.msk.bf16.gmra.mxu0 %vm5274_vm8, %v3907_v23 }
 0x1e4   :  { %v602_v48 = vpop.xlane.xlu0 %601 }
 0x1e5   :  { %v633_v27 = vadd.f32 %v602_v48, %v585_v39  ;;  %v571_v39 = vld [vmem:[#allocation3 + $0x10] sm:$0xff]  ;;  %v667_v48 = vld [vmem:[#allocation4 + $0x8] sm:$0xff] }
 0x1e6   :  { %v587_v32 = vmul.f32 %v5290_v6, %v571_v39  ;;  %v763_v57 = vmul.f32 %v5099_v61, %v667_v48  ;;  %v7763_v61 = vld [vmem:[#allocation16_spill] sm:$0xff]  ;;  %v7764_v48 = vld [vmem:[#allocation17_spill] sm:$0xff] }
 0x1e7   :  { %650 = vst.msk [vmem:[#allocation3] sm:$0xff] %vm7757_vm10, %v633_v27 }
 0x1e9   :  { %1021 = vperm.xlu0 %4050, %v946_v38   ;;  %v588_v38 = vmul.f32 %v4887_v4, %v572_v22 }
 0x1ef   :  { %v843_v23 = vpop.f32.mrf.mxu0 }
 0x1f0   :  { %v883_v19 = vadd.f32 %v843_v23, %v762_v17  ;;  %v575_v17 = vld [vmem:[#allocation3 + $0x30] sm:$0xff]  ;;  %v574_v23 = vld [vmem:[#allocation3 + $0x28] sm:$0xff] }
 0x1f1   :  { %v591_v4 = vmul.f32 %v4901_v5, %v575_v17  ;;  %v590_v39 = vmul.f32 %v4889_v12, %v574_v23  ;;  %v669_v5 = vld [vmem:[#allocation4 + $0x18] sm:$0xff] }
 0x1f2   :  { %900 = vst.msk [vmem:[#allocation4] sm:$0xff] %vm899_vm7, %v883_v19 }
 0x1f4   :  { %v608_v27 = vpop.xlane.xlu0 %607 }
 0x1f5   :  { %v636_v18 = vadd.f32 %v608_v27, %v588_v38  ;;  %v7765_v27 = vsub.f32 %v7763_v61, %v7764_v48  ;;  %v7769_v48 = vld [vmem:[#allocation19_spill] sm:$0xff] }
 0x1f7   :  { %653 = vst.msk [vmem:[#allocation3 + $0x18] sm:$0xff] %vm7762_vm14, %v636_v18  ;;  %v845_v53 = vpop.f32.mrf.mxu0  ;;  %v401_v18 = vmul.f32 1.442695, %v7765_v27  ;;  %vm7766_vm14 = vmmov %vm7757_vm10 }
 0x1f8   :  { %v606_v47 = vpop.xlane.xlu1 %605  ;;  %v884_v45 = vadd.f32 %v845_v53, %v763_v57  ;;  %v570_v53 = vld [vmem:[#allocation3 + $0x8] sm:$0xff] }
 0x1f9   :  { %v635_v43 = vadd.f32 %v606_v47, %v587_v32  ;;  %v578_v47 = vld [vmem:[#allocation3 + $0x48] sm:$0xff]  ;;  %4130 = vpow2.f32 %v401_v18  ;;  %v586_v17 = vmul.f32 %v4881_v20, %v570_v53  ;;  %v581_v20 = vld [vmem:[#allocation3 + $0x60] sm:$0xff] }
 0x1fa   :  { %901 = vst.msk [vmem:[#allocation4 + $0x8] sm:$0xff] %vm899_vm7, %v884_v45  ;;  %v594_v45 = vmul.f32 %v4915_v9, %v578_v47  ;;  %v597_v53 = vmul.f32 %v4931_v28, %v581_v20 }
 0x1fb   :  { %652 = vst.msk [vmem:[#allocation3 + $0x10] sm:$0xff] %vm7757_vm10, %v635_v43  ;;  %v577_v43 = vld [vmem:[#allocation3 + $0x40] sm:$0xff] }
 0x1fc   :  { %v614_v19 = vpop.xlane.xlu0 %613 }
 0x1fd   :  { %v639_v22 = vadd.f32 %v614_v19, %v591_v4  ;;  %v593_v19 = vmul.f32 %v4903_v0, %v577_v43  ;;  %v573_v0 = vld [vmem:[#allocation3 + $0x20] sm:$0xff] }
 0x1ff   :  { %656 = vst.msk [vmem:[#allocation3 + $0x30] sm:$0xff] %vm7766_vm14, %v639_v22  ;;  %v5305_v32 = vpop.f32.mrf.mxu0  ;;  %v765_v22 = vmul.f32 %v5045_v10, %v669_v5  ;;  %vm7771_vm14 = vmmov %vm7757_vm10  ;;  %v5317_v47 = vpop.eup %4130  ;;  %v580_v10 = vld [vmem:[#allocation3 + $0x58] sm:$0xff] }
 0x200   :  { %v612_v38 = vpop.xlane.xlu1 %611  ;;  %7767 = vst [vmem:[#allocation15_spill] sm:$0xff] %v5305_v32  ;;  %v589_v5 = vmul.f32 %v5317_v47, %v573_v0 }
 0x201   :  { %v638_v57 = vadd.f32 %v612_v38, %v590_v39  ;;  %v7768_v38 = vld [vmem:[#allocation18_spill] sm:$0xff]  ;;  %7772 = vst [vmem:[#allocation16_spill] sm:$0xff] %v5317_v47 }
 0x202   :  { %v7770_v27 = vsub.f32 %v7768_v38, %v7769_v48  ;;  %v576_v48 = vld [vmem:[#allocation3 + $0x38] sm:$0xff] }
 0x203   :  { %655 = vst.msk [vmem:[#allocation3 + $0x28] sm:$0xff] %vm7757_vm10, %v638_v57 }
 0x204   :  { %v620_v12 = vpop.xlane.xlu0 %619  ;;  %v407_v57 = vmul.f32 1.442695, %v7770_v27  ;;  %v583_v27 = vld [vmem:[#allocation3 + $0x70] sm:$0xff] }
 0x205   :  { %v642_v23 = vadd.f32 %v620_v12, %v594_v45 }
 0x206   :  { %4132 = vpow2.f32 %v407_v57  ;;  %v5334_v57 = vld [vmem:[#allocation2 + $0x8] sm:$0xff] }
 0x207   :  { %v604_v4 = vpop.xlane.xlu2 %603  ;;  %659 = vst.msk [vmem:[#allocation3 + $0x48] sm:$0xff] %vm7771_vm14, %v642_v23  ;;  %v850_v18 = vpop.f32.mrf.mxu0  ;;  %vm7778_vm14 = vmmov %vm7773_vm5 }
 0x208   :  { %v634_v61 = vadd.f32 %v604_v4, %v586_v17  ;;  %v618_v39 = vpop.xlane.xlu1 %617  ;;  %v886_v9 = vadd.f32 %v850_v18, %v765_v22  ;;  %v596_v17 = vmul.f32 %v4917_v15, %v580_v10  ;;  %v7775_v22 = vld [vmem:[#allocation21_spill] sm:$0xff]  ;;  %v671_v15 = vld [vmem:[#allocation4 + $0x28] sm:$0xff]  ;;  %v599_v10 = vmul.f32 %v4933_v55, %v583_v27  ;;  %v579_v55 = vld [vmem:[#allocation3 + $0x50] sm:$0xff] }
 0x209   :  { %v641_v32 = vadd.f32 %v618_v39, %v593_v19  ;;  %v7774_v19 = vld [vmem:[#allocation20_spill] sm:$0xff] }
 0x20a   :  { %651 = vst.msk [vmem:[#allocation3 + $0x8] sm:$0xff] %vm7757_vm10, %v634_v61  ;;  %v7776_v61 = vsub.f32 %v7774_v19, %v7775_v22  ;;  %vm7780_vm10 = vmmov %vm7773_vm5 }
 0x20b   :  { %658 = vst.msk [vmem:[#allocation3 + $0x40] sm:$0xff] %vm7773_vm5, %v641_v32 }
 0x20c   :  { %903 = vst.msk [vmem:[#allocation4 + $0x18] sm:$0xff] %vm899_vm7, %v886_v9  ;;  %v626_v43 = vpop.xlane.xlu0 %625  ;;  %v413_v32 = vmul.f32 1.442695, %v7776_v61  ;;  %v5331_v28 = vpop.eup %4132 }
 0x20d   :  { %v645_v45 = vadd.f32 %v626_v43, %v597_v53  ;;  %7779 = vst [vmem:[#allocation18_spill] sm:$0xff] %v5331_v28  ;;  %v592_v9 = vmul.f32 %v5331_v28, %v576_v48  ;;  %v767_v53 = vmul.f32 %v5131_v58, %v671_v15  ;;  %v672_v58 = vld [vmem:[#allocation4 + $0x30] sm:$0xff] }
 0x20e   :  { %4134 = vpow2.f32 %v413_v32  ;;  %v5352_v32 = vld [vmem:[#allocation2 + $0x20] sm:$0xff] }
 0x20f   :  { %v610_v12 = vpop.xlane.xlu2 %609  ;;  %662 = vst.msk [vmem:[#allocation3 + $0x60] sm:$0xff] %vm7773_vm5, %v645_v45  ;;  %v5328_v39 = vpop.f32.mrf.mxu0  ;;  %v7781_v45 = vld [vmem:[#allocation22_spill] sm:$0xff] }
 0x210   :  { %v637_v23 = vadd.f32 %v610_v12, %v589_v5  ;;  %v624_v4 = vpop.xlane.xlu1 %623  ;;  %7777 = vst [vmem:[#allocation17_spill] sm:$0xff] %v5328_v39  ;;  %v7782_v12 = vld [vmem:[#allocation23_spill] sm:$0xff] }
 0x211   :  { %v644_v38 = vadd.f32 %v624_v4, %v596_v17  ;;  %v7783_v17 = vsub.f32 %v7781_v45, %v7782_v12 }
 0x212   :  { %654 = vst.msk [vmem:[#allocation3 + $0x20] sm:$0xff] %vm7778_vm14, %v637_v23  ;;  %vm7785_vm14 = vmmov %vm7773_vm5 }
 0x213   :  { %661 = vst.msk [vmem:[#allocation3 + $0x58] sm:$0xff] %vm7780_vm10, %v644_v38  ;;  %v419_v23 = vmul.f32 1.442695, %v7783_v17  ;;  %vm7786_vm10 = vmmov %vm7773_vm5 }
 0x214   :  { %v1113_v18 = vpop.xlane.xlu0 %1112  ;;  %v5348_v61 = vpop.eup %4134 }
 0x215   :  { %v5338_v20 = vmax.f32 %v5334_v57, %v1113_v18  ;;  %7784 = vst [vmem:[#allocation19_spill] sm:$0xff] %v5348_v61  ;;  %4136 = vpow2.f32 %v419_v23  ;;  %v595_v48 = vmul.f32 %v5348_v61, %v579_v55  ;;  %v768_v18 = vmul.f32 %v5078_v31, %v672_v58  ;;  %v582_v31 = vld [vmem:[#allocation3 + $0x68] sm:$0xff] }
 0x217   :  { %v616_v0 = vpop.xlane.xlu2 %615  ;;  %1738 = vst.msk [vmem:[#allocation2 + $0x8] sm:$0xff] %vm1430_vm6, %v5338_v20  ;;  %v855_v4 = vpop.f32.mrf.mxu0 }
 0x218   :  { %v640_v43 = vadd.f32 %v616_v0, %v592_v9  ;;  %v630_v5 = vpop.xlane.xlu1 %629  ;;  %v888_v22 = vadd.f32 %v855_v4, %v767_v53  ;;  %v5359_v0 = vld [vmem:[#allocation2 + $0x10] sm:$0xff]  ;;  %v5373_v4 = vld [vmem:[#allocation2 + $0x28] sm:$0xff] }
 0x219   :  { %v647_v19 = vadd.f32 %v630_v5, %v599_v10  ;;  %7788 = vst [vmem:[#allocation21_spill] sm:$0xff] %v5373_v4 }
 0x21a   :  { %657 = vst.msk [vmem:[#allocation3 + $0x38] sm:$0xff] %vm7773_vm5, %v640_v43 }
 0x21b   :  { %664 = vst.msk [vmem:[#allocation3 + $0x70] sm:$0xff] %vm7785_vm14, %v647_v19  ;;  %v5367_v45 = vpop.eup %4136  ;;  %vm7795_vm14 = vmmov %vm7773_vm5 }
 0x21c   :  { %905 = vst.msk [vmem:[#allocation4 + $0x28] sm:$0xff] %vm899_vm7, %v888_v22  ;;  %v1119_v38 = vpop.xlane.xlu0 %1118  ;;  %v598_v12 = vmul.f32 %v5367_v45, %v582_v31 }
 0x21d   :  { %v5356_v27 = vmax.f32 %v5352_v32, %v1119_v38  ;;  %7787 = vst [vmem:[#allocation20_spill] sm:$0xff] %v5367_v45  ;;  %v674_v38 = vld [vmem:[#allocation4 + $0x40] sm:$0xff] }
 0x21f   :  { %v622_v15 = vpop.xlane.xlu2 %621  ;;  %1741 = vst.msk [vmem:[#allocation2 + $0x20] sm:$0xff] %vm1430_vm6, %v5356_v27  ;;  %v858_v53 = vpop.f32.mrf.mxu0 }
 0x220   :  { %v643_v9 = vadd.f32 %v622_v15, %v595_v48  ;;  %v1115_v10 = vpop.xlane.xlu1 %1114  ;;  %v889_v5 = vadd.f32 %v858_v53, %v768_v18  ;;  %v5385_v48 = vld [vmem:[#allocation2] sm:$0xff]  ;;  %v770_v18 = vmul.f32 %v5147_v29, %v674_v38 }
 0x221   :  { %v5364_v43 = vmax.f32 %v5359_v0, %v1115_v10  ;;  %v5391_v10 = vld [vmem:[#allocation2 + $0x38] sm:$0xff] }
 0x222   :  { %660 = vst.msk [vmem:[#allocation3 + $0x50] sm:$0xff] %vm7786_vm10, %v643_v9  ;;  %vm7798_vm10 = vcmp.gt.f32.partialorder %v4571_v54, 0.0 }
 0x223   :  { %1739 = vst.msk [vmem:[#allocation2 + $0x10] sm:$0xff] %vm1430_vm6, %v5364_v43 }
 0x224   :  { %906 = vst.msk [vmem:[#allocation4 + $0x30] sm:$0xff] %vm899_vm7, %v889_v5  ;;  %v5393_v5 = vld [vmem:[#allocation2 + $0x40] sm:$0xff] }
 0x225   :  { %7791 = vst [vmem:[#allocation31_spill] sm:$0xff] %v5393_v5 }
 0x227   :  { %v628_v17 = vpop.xlane.xlu2 %627  ;;  %v5375_v22 = vpop.f32.mrf.mxu0 }
 0x228   :  { %v646_v23 = vadd.f32 %v628_v17, %v598_v12  ;;  %v1121_v19 = vpop.xlane.xlu1 %1120  ;;  %7789 = vst [vmem:[#allocation22_spill] sm:$0xff] %v5375_v22  ;;  %v5421_v22 = vld [vmem:[#allocation2 + $0x58] sm:$0xff] }
 0x229   :  { %v5378_v55 = vmax.f32 %v5373_v4, %v1121_v19  ;;  %7792 = vst [vmem:[#allocation32_spill] sm:$0xff] %v5421_v22 }
 0x22a   :  { %663 = vst.msk [vmem:[#allocation3 + $0x68] sm:$0xff] %vm7773_vm5, %v646_v23  ;;  %vm7799_vm5 = vcmp.gt.f32.partialorder %v7750_v40, 0.0 }
 0x22b   :  { %7790 = vst [vmem:[#allocation23_spill] sm:$0xff] %v5378_v55 }
 0x22c   :  { %1742 = vst.msk [vmem:[#allocation2 + $0x28] sm:$0xff] %vm1430_vm6, %v5378_v55 }
 0x22f   :  { %v1111_v15 = vpop.xlane.xlu2 %1110  ;;  %v863_v12 = vpop.f32.mrf.mxu0 }
 0x230   :  { %v5389_v9 = vmax.f32 %v5385_v48, %v1111_v15  ;;  %v1125_v53 = vpop.xlane.xlu0 %1124  ;;  %v1127_v31 = vpop.xlane.xlu1 %1126  ;;  %v891_v29 = vadd.f32 %v863_v12, %v770_v18  ;;  %v675_v15 = vld [vmem:[#allocation4 + $0x48] sm:$0xff]  ;;  %v5419_v12 = vld [vmem:[#allocation2 + $0x50] sm:$0xff] }
 0x231   :  { %v5396_v17 = vmax.f32 %v5391_v10, %v1125_v53  ;;  %v5399_v23 = vmax.f32 %v5393_v5, %v1127_v31  ;;  %v5413_v53 = vld [vmem:[#allocation2 + $0x18] sm:$0xff]  ;;  %v771_v58 = vmul.f32 %v5097_v24, %v675_v15 }
 0x232   :  { %1737 = vst.msk [vmem:[#allocation2] sm:$0xff] %vm1430_vm6, %v5389_v9  ;;  %1208 = vperm.xlu0 %4050, %v5389_v9   ;;  %v677_v15 = vld [vmem:[#allocation4 + $0x58] sm:$0xff] }
 0x233   :  { %1744 = vst.msk [vmem:[#allocation2 + $0x38] sm:$0xff] %vm1430_vm6, %v5396_v17 }
 0x234   :  { %908 = vst.msk [vmem:[#allocation4 + $0x40] sm:$0xff] %vm899_vm7, %v891_v29 }
 0x235   :  { %1745 = vst.msk [vmem:[#allocation2 + $0x40] sm:$0xff] %vm1430_vm6, %v5399_v23 }
 0x237   :  { %v1117_v31 = vpop.xlane.xlu2 %1116  ;;  %v865_v39 = vpop.f32.mrf.mxu0 }
 0x238   :  { %v5417_v18 = vmax.f32 %v5413_v53, %v1117_v31  ;;  %v1131_v19 = vpop.xlane.xlu0 %1130  ;;  %v1133_v38 = vpop.xlane.xlu1 %1132  ;;  %v892_v24 = vadd.f32 %v865_v39, %v771_v58  ;;  %v5446_v39 = vld [vmem:[#allocation2 + $0x68] sm:$0xff] }
 0x239   :  { %v5424_v29 = vmax.f32 %v5419_v12, %v1131_v19  ;;  %v5427_v45 = vmax.f32 %v5421_v22, %v1133_v38  ;;  %v5441_v19 = vld [vmem:[#allocation2 + $0x30] sm:$0xff] }
 0x23a   :  { %1740 = vst.msk [vmem:[#allocation2 + $0x18] sm:$0xff] %vm1430_vm6, %v5417_v18  ;;  %1223 = vperm.xlu0 %4050, %v5417_v18  }
 0x23b   :  { %1747 = vst.msk [vmem:[#allocation2 + $0x50] sm:$0xff] %vm1430_vm6, %v5424_v29 }
 0x23c   :  { %909 = vst.msk [vmem:[#allocation4 + $0x48] sm:$0xff] %vm899_vm7, %v892_v24  ;;  %v584_v24 = vld [vmem:[#allocation3 + $0x78] sm:$0xff] }
 0x23d   :  { %1748 = vst.msk [vmem:[#allocation2 + $0x58] sm:$0xff] %vm1430_vm6, %v5427_v45  ;;  %v600_v6 = vmul.f32 %v4945_v49, %v584_v24  ;;  %v5470_v49 = vld [vmem:[#allocation2 + $0x60] sm:$0xff] }
 0x23e   :  { %7793 = vst [vmem:[#allocation33_spill] sm:$0xff] %v5441_v19 }
 0x23f   :  { %v1123_v38 = vpop.xlane.xlu2 %1122  ;;  %v5448_v61 = vpop.f32.mrf.mxu0  ;;  %7796 = vst [vmem:[#allocation35_spill] sm:$0xff] %v5470_v49 }
 0x240   :  { %v5444_v31 = vmax.f32 %v5441_v19, %v1123_v38  ;;  %v1137_v58 = vpop.xlane.xlu0 %1136  ;;  %7794 = vst [vmem:[#allocation34_spill] sm:$0xff] %v5448_v61  ;;  %v5458_v38 = vld [vmem:[#allocation2 + $0x48] sm:$0xff]  ;;  %v773_v61 = vmul.f32 %v5174_v7, %v677_v15 }
 0x241   :  { %v5451_v28 = vmax.f32 %v5446_v39, %v1137_v58 }
 0x242   :  { %1743 = vst.msk [vmem:[#allocation2 + $0x30] sm:$0xff] %vm1430_vm6, %v5444_v31  ;;  %1233 = vperm.xlu0 %4050, %v5378_v55   ;;  %v678_v55 = vld [vmem:[#allocation4 + $0x60] sm:$0xff] }
 0x243   :  { %1750 = vst.msk [vmem:[#allocation2 + $0x68] sm:$0xff] %vm1430_vm6, %v5451_v28 }
 0x247   :  { %v1129_v47 = vpop.xlane.xlu2 %1128  ;;  %v870_v5 = vpop.f32.mrf.mxu0 }
 0x248   :  { %v5463_v58 = vmax.f32 %v5458_v38, %v1129_v47  ;;  %v632_v22 = vpop.xlane.xlu0 %631  ;;  %v894_v19 = vadd.f32 %v870_v5, %v773_v61  ;;  %v774_v47 = vmul.f32 %v5129_v8, %v678_v55 }
 0x249   :  { %v648_v4 = vadd.f32 %v632_v22, %v600_v6 }
 0x24a   :  { %1746 = vst.msk [vmem:[#allocation2 + $0x48] sm:$0xff] %vm1430_vm6, %v5463_v58  ;;  %1248 = vperm.xlu0 %4050, %v5399_v23  }
 0x24b   :  { %665 = vst.msk [vmem:[#allocation3 + $0x78] sm:$0xff] %vm7795_vm14, %v648_v4  ;;  %vm7800_vm14 = vcmp.gt.f32.partialorder %v4541_v37, 0.0 }
 0x24c   :  { %911 = vst.msk [vmem:[#allocation4 + $0x58] sm:$0xff] %vm899_vm7, %v894_v19  ;;  %v680_v19 = vld [vmem:[#allocation4 + $0x70] sm:$0xff] }
 0x24d   :  { %v776_v8 = vmul.f32 %v5198_v51, %v680_v19  ;;  %v947_v51 = vld [vmem:[%s7582_s1 + $0x78] sm:$0xff] }
 0x24f   :  { %v1135_v7 = vpop.xlane.xlu2 %1134  ;;  %v873_v6 = vpop.f32.mrf.mxu0 }
 0x250   :  { %v5474_v15 = vmax.f32 %v5470_v49, %v1135_v7  ;;  %v895_v61 = vadd.f32 %v873_v6, %v774_v47  ;;  %v681_v6 = vld [vmem:[#allocation4 + $0x78] sm:$0xff] }
 0x252   :  { %1749 = vst.msk [vmem:[#allocation2 + $0x60] sm:$0xff] %vm1430_vm6, %v5474_v15  ;;  %1263 = vperm.xlu0 %4050, %v5427_v45  }
 0x253   :  { %912 = vst.msk [vmem:[#allocation4 + $0x60] sm:$0xff] %vm899_vm7, %v895_v61  ;;  %v777_v61 = vmul.f32 %v5145_v41, %v681_v6  ;;  %v5512_v6 = vld [vmem:[#allocation2 + $0x70] sm:$0xff] }
 0x257   :  { %v5480_v4 = vpop.f32.mrf.mxu0 }
 0x258   :  { %7797 = vst [vmem:[#allocation36_spill] sm:$0xff] %v5480_v4 }
 0x25b   :  { %v1022_v22 = vpop.permute.xlu0 %1021 }
 0x25c   :  { %v1044_v5 = vadd.f32 %v5074_v1, %v1022_v22 }
 0x25e   :  { %v1060_v24 = vmul.f32 0.2, %v1044_v5 }
 0x25f   :  { %v878_v7 = vpop.f32.mrf.mxu0 }
 0x260   :  { %v1076_v55 = vmax.f32 %v1044_v5, %v1060_v24  ;;  %v897_v49 = vadd.f32 %v878_v7, %v776_v8 }
 0x262   :  { %v5486_v47 = vsel %vm133_vm12, %v1076_v55, -1e+30  ;;  %914 = vst.msk [vmem:[#allocation4 + $0x70] sm:$0xff] %vm899_vm7, %v897_v49 }
 0x263   :  { %1138 = vmax.xlane.f32.xlu1 %v5486_v47 }
 0x267   :  { %v880_v4 = vpop.f32.mrf.mxu0 }
 0x268   :  { %v898_v22 = vadd.f32 %v880_v4, %v777_v61 }
 0x26a   :  { %915 = vst.msk [vmem:[#allocation4 + $0x78] sm:$0xff] %vm899_vm7, %v898_v22 }
 0x27c   :  { %1026 = vperm.xlu1 %4051, %v947_v51  }
 0x284   :  { %1213 = vperm.xlu1 %4051, %v5338_v20  }
 0x28c   :  { %1228 = vperm.xlu1 %4051, %v5356_v27  }
 0x294   :  { %1243 = vperm.xlu1 %4051, %v5396_v17  }
 0x29c   :  { %1258 = vperm.xlu1 %4051, %v5424_v29  }
 0x2a4   :  { %1273 = vperm.xlu1 %4051, %v5451_v28   ;;  %v1209_v41 = vpop.permute.xlu0 %1208 }
 0x2a5   :  { %v1286_v49 = vsub.f32 %v5191_v25, %v1209_v41 }
 0x2a7   :  { %v1302_v4 = vmul.f32 1.442695, %v1286_v49 }
 0x2a9   :  { %4138 = vpow2.f32 %v1302_v4 }
 0x2ac   :  { %v1224_v5 = vpop.permute.xlu0 %1223 }
 0x2ad   :  { %v1289_v19 = vsub.f32 %v5222_v30, %v1224_v5 }
 0x2af   :  { %v1308_v24 = vmul.f32 1.442695, %v1289_v19  ;;  %v5502_v8 = vpop.eup %4138 }
 0x2b0   :  { %v1334_v55 = vsel %vm119_vm1, %v5502_v8, 0.0 }
 0x2b1   :  { %4140 = vpow2.f32 %v1308_v24 }
 0x2b7   :  { %v5507_v7 = vpop.eup %4140 }
 0x2b8   :  { %v1337_v25 = vsel %vm7798_vm10, %v5507_v7, 0.0  ;;  %vm7801_vm10 = vcmp.gt.f32.partialorder %v4581_v60, 0.0 }
 0x2ce   :  { %1382 = vadd.xlane.f32.xlu1 %v1334_v55 }
 0x2d6   :  { %1388 = vadd.xlane.f32.xlu1 %v1337_v25  ;;  %v1139_v61 = vpop.xlane.xlu1 %1138 }
 0x2d7   :  { %v5515_v30 = vmax.f32 %v5512_v6, %v1139_v61 }
 0x2d9   :  { %1751 = vst.msk [vmem:[#allocation2 + $0x70] sm:$0xff] %vm1430_vm6, %v5515_v30  ;;  %1278 = vperm.xlu0 %4050, %v5515_v30  }
 0x2ee   :  { %v1027_v51 = vpop.permute.xlu1 %1026 }
 0x2ef   :  { %v1045_v41 = vadd.f32 %v5074_v1, %v1027_v51 }
 0x2f1   :  { %v1061_v49 = vmul.f32 0.2, %v1045_v41 }
 0x2f3   :  { %v1077_v4 = vmax.f32 %v1045_v41, %v1061_v49 }
 0x2f5   :  { %v5525_v5 = vsel %vm7799_vm5, %v1077_v4, -1e+30  ;;  %vm7802_vm5 = vcmp.gt.f32.partialorder %v4615_v36, 0.0 }
 0x2f6   :  { %1140 = vmax.xlane.f32.xlu2 %v5525_v5  ;;  %v1214_v19 = vpop.permute.xlu1 %1213 }
 0x2f7   :  { %v1287_v24 = vsub.f32 %v5121_v50, %v1214_v19 }
 0x2f9   :  { %v1304_v55 = vmul.f32 1.442695, %v1287_v24 }
 0x2fb   :  { %4142 = vpow2.f32 %v1304_v55 }
 0x2fe   :  { %v1229_v25 = vpop.permute.xlu1 %1228 }
 0x2ff   :  { %v1290_v61 = vsub.f32 %v5140_v3, %v1229_v25 }
 0x301   :  { %v5530_v22 = vpop.eup %4142  ;;  %v1310_v54 = vmul.f32 1.442695, %v1290_v61 }
 0x302   :  { %v1335_v1 = vsel %vm120_vm3, %v5530_v22, 0.0 }
 0x303   :  { %4144 = vpow2.f32 %v1310_v54  ;;  %1384 = vadd.xlane.f32.xlu0 %v1335_v1 }
 0x306   :  { %v1244_v51 = vpop.permute.xlu1 %1243 }
 0x307   :  { %v1293_v41 = vsub.f32 %v5196_v2, %v1244_v51 }
 0x309   :  { %v5536_v49 = vpop.eup %4144  ;;  %v1316_v50 = vmul.f32 1.442695, %v1293_v41 }
 0x30a   :  { %v1338_v4 = vsel %vm7800_vm14, %v5536_v49, 0.0  ;;  %vm7803_vm14 = vcmp.gt.f32.partialorder %v7737_v62, 0.0 }
 0x30b   :  { %4146 = vpow2.f32 %v1316_v50  ;;  %1390 = vadd.xlane.f32.xlu0 %v1338_v4  ;;  %v7805_v4 = vsub.f32 %v5413_v53, %v5417_v18  ;;  %v1234_v53 = vpop.permute.xlu0 %1233 }
 0x30e   :  { %1218 = vperm.xlu2 %4049, %v5364_v43   ;;  %v1259_v3 = vpop.permute.xlu1 %1258 }
 0x30f   :  { %v1296_v19 = vsub.f32 %v5229_v56, %v1259_v3  ;;  %v1180_v3 = vmul.f32 1.442695, %v7805_v4 }
 0x311   :  { %v5543_v24 = vpop.eup %4146  ;;  %v1322_v54 = vmul.f32 1.442695, %v1296_v19 }
 0x312   :  { %v1341_v2 = vsel %vm7801_vm10, %v5543_v24, 0.0 }
 0x313   :  { %4148 = vpow2.f32 %v1322_v54  ;;  %1396 = vadd.xlane.f32.xlu0 %v1341_v2  ;;  %v1350_v54 = vld [vmem:[#allocation3] sm:$0xff]  ;;  %v1249_v18 = vpop.permute.xlu0 %1248 }
 0x316   :  { %1238 = vperm.xlu2 %4049, %v5444_v31   ;;  %v1274_v55 = vpop.permute.xlu1 %1273 }
 0x317   :  { %v1299_v25 = vsub.f32 %v5242_v33, %v1274_v55  ;;  %v7804_v33 = vsub.f32 %v5385_v48, %v5389_v9 }
 0x319   :  { %v5550_v61 = vpop.eup %4148  ;;  %v1328_v1 = vmul.f32 1.442695, %v1299_v25  ;;  %v1174_v50 = vmul.f32 1.442695, %v7804_v33  ;;  %v1159_v33 = vsub.f32 %v5334_v57, %v5338_v20 }
 0x31a   :  { %v1344_v56 = vsel %vm7802_vm5, %v5550_v61, 0.0 }
 0x31b   :  { %4150 = vpow2.f32 %v1328_v1  ;;  %1402 = vadd.xlane.f32.xlu0 %v1344_v56  ;;  %v1353_v56 = vld [vmem:[#allocation3 + $0x18] sm:$0xff]  ;;  %v1176_v4 = vmul.f32 1.442695, %v1159_v33 }
 0x31c   :  { %4152 = vpow2.f32 %v1174_v50  ;;  %v5578_v50 = vpop.permute.xlu0 %1263 }
 0x31d   :  { %4154 = vpow2.f32 %v1180_v3  ;;  %v5580_v3 = vld [vmem:[#allocation2 + $0x78] sm:$0xff] }
 0x31e   :  { %1253 = vperm.xlu2 %4049, %v5463_v58   ;;  %4156 = vpow2.f32 %v1176_v4  ;;  %v1351_v4 = vld [vmem:[#allocation3 + $0x8] sm:$0xff] }
 0x321   :  { %v5556_v51 = vpop.eup %4150 }
 0x322   :  { %v1347_v41 = vsel %vm7803_vm14, %v5556_v51, 0.0  ;;  %v5568_v19 = vpop.eup %4152  ;;  %vm7812_vm14 = vcmp.gt.f32.partialorder %v4579_v59, 0.0 }
 0x323   :  { %1408 = vadd.xlane.f32.xlu0 %v1347_v41  ;;  %7806 = vst [vmem:[#allocation37_spill] sm:$0xff] %v5568_v19  ;;  %v1366_v2 = vmul.f32 %v5568_v19, %v1350_v54  ;;  %v5572_v1 = vpop.eup %4154 }
 0x324   :  { %7807 = vst [vmem:[#allocation38_spill] sm:$0xff] %v5572_v1  ;;  %v1369_v48 = vmul.f32 %v5572_v1, %v1353_v56  ;;  %v5591_v20 = vpop.eup %4156 }
 0x326   :  { %1268 = vperm.xlu2 %4049, %v5474_v15  }
 0x341   :  { %v1383_v55 = vpop.xlane.xlu1 %1382 }
 0x342   :  { %v1414_v25 = vadd.f32 %v1383_v55, %v1366_v2  ;;  %v1162_v55 = vsub.f32 %v5352_v32, %v5356_v27  ;;  %v1367_v32 = vmul.f32 %v5591_v20, %v1351_v4 }
 0x344   :  { %1431 = vst.msk [vmem:[#allocation3] sm:$0xff] %vm1430_vm6, %v1414_v25  ;;  %v1182_v56 = vmul.f32 1.442695, %v1162_v55 }
 0x346   :  { %4158 = vpow2.f32 %v1182_v56  ;;  %v1354_v56 = vld [vmem:[#allocation3 + $0x20] sm:$0xff] }
 0x349   :  { %v1389_v9 = vpop.xlane.xlu1 %1388 }
 0x34a   :  { %v1417_v41 = vadd.f32 %v1389_v9, %v1369_v48  ;;  %v1165_v9 = vsub.f32 %v5391_v10, %v5396_v17  ;;  %v1294_v17 = vsub.f32 %v5187_v34, %v1249_v18  ;;  %v1171_v18 = vsub.f32 %v5446_v39, %v5451_v28 }
 0x34b   :  { %v5589_v25 = vpop.permute.xlu0 %1278 }
 0x34c   :  { %1434 = vst.msk [vmem:[#allocation3 + $0x18] sm:$0xff] %vm1430_vm6, %v1417_v41  ;;  %v1291_v41 = vsub.f32 %v5178_v46, %v1234_v53  ;;  %v5599_v62 = vpop.eup %4158  ;;  %v1168_v46 = vsub.f32 %v5419_v12, %v5424_v29  ;;  %v1200_v39 = vmul.f32 1.442695, %v1171_v18 }
 0x34e   :  { %v1312_v55 = vmul.f32 1.442695, %v1291_v41  ;;  %v1318_v41 = vmul.f32 1.442695, %v1294_v17 }
 0x369   :  { %v1141_v54 = vpop.xlane.xlu2 %1140 }
 0x36a   :  { %v5583_v2 = vmax.f32 %v5580_v3, %v1141_v54  ;;  %v1188_v54 = vmul.f32 1.442695, %v1165_v9 }
 0x36c   :  { %1752 = vst.msk [vmem:[#allocation2 + $0x78] sm:$0xff] %vm1430_vm6, %v5583_v2 }
 0x371   :  { %v1219_v57 = vpop.permute.xlu2 %1218 }
 0x372   :  { %v1288_v48 = vsub.f32 %v5151_v14, %v1219_v57  ;;  %v7808_v57 = vld [vmem:[#allocation5_spill] sm:$0xff] }
 0x373   :  { %vm7809_vm10 = vcmp.gt.f32.partialorder %v7808_v57, 0.0 }
 0x374   :  { %v1306_v33 = vmul.f32 1.442695, %v1288_v48  ;;  %v1370_v48 = vmul.f32 %v5599_v62, %v1354_v56 }
 0x376   :  { %4160 = vpow2.f32 %v1306_v33  ;;  %v1385_v27 = vpop.xlane.xlu0 %1384 }
 0x377   :  { %v1415_v1 = vadd.f32 %v1385_v27, %v1367_v32  ;;  %4162 = vpow2.f32 %v1188_v54  ;;  %v1297_v32 = vsub.f32 %v5216_v44, %v5578_v50  ;;  %v1357_v54 = vld [vmem:[#allocation3 + $0x38] sm:$0xff] }
 0x378   :  { %4164 = vpow2.f32 %v1312_v55  ;;  %v7810_v55 = vld [vmem:[#allocation8_spill] sm:$0xff] }
 0x379   :  { %1432 = vst.msk [vmem:[#allocation3 + $0x8] sm:$0xff] %vm1430_vm6, %v1415_v1  ;;  %v1239_v19 = vpop.permute.xlu2 %1238  ;;  %vm7811_vm5 = vcmp.gt.f32.partialorder %v7810_v55, 0.0 }
 0x37a   :  { %v1292_v14 = vsub.f32 %v5237_v13, %v1239_v19  ;;  %v1194_v19 = vmul.f32 1.442695, %v1168_v46 }
 0x37c   :  { %v5604_v10 = vpop.eup %4160  ;;  %v1314_v53 = vmul.f32 1.442695, %v1292_v14 }
 0x37d   :  { %v1336_v1 = vsel %vm7809_vm10, %v5604_v10, 0.0  ;;  %v4163_v12 = vpop.eup %4162  ;;  %vm7813_vm10 = vcmp.gt.f32.partialorder %v4642_v63, 0.0 }
 0x37e   :  { %4166 = vpow2.f32 %v1314_v53  ;;  %1386 = vadd.xlane.f32.xlu2 %v1336_v1  ;;  %v1391_v13 = vpop.xlane.xlu0 %1390  ;;  %v5612_v33 = vpop.eup %4164  ;;  %v1373_v46 = vmul.f32 %v4163_v12, %v1357_v54  ;;  %v1324_v53 = vmul.f32 1.442695, %v1297_v32  ;;  %v1363_v54 = vld [vmem:[#allocation3 + $0x68] sm:$0xff] }
 0x37f   :  { %v1418_v9 = vadd.f32 %v1391_v13, %v1370_v48  ;;  %4168 = vpow2.f32 %v1194_v19  ;;  %v1339_v14 = vsel %vm7811_vm5, %v5612_v33, 0.0  ;;  %v1300_v13 = vsub.f32 %v5486_v47, %v5589_v25 }
 0x380   :  { %4170 = vpow2.f32 %v1318_v41  ;;  %vm7814_vm5 = vcmp.gt.f32.partialorder %v4613_v35, 0.0 }
 0x381   :  { %1435 = vst.msk [vmem:[#allocation3 + $0x20] sm:$0xff] %vm1430_vm6, %v1418_v9  ;;  %v1254_v29 = vpop.permute.xlu2 %1253  ;;  %v1360_v9 = vld [vmem:[#allocation3 + $0x50] sm:$0xff]  ;;  %v1330_v32 = vmul.f32 1.442695, %v1300_v13  ;;  %v1160_v13 = vsub.f32 %v5359_v0, %v5364_v43  ;;  %v4365_v0 = vld [vmem:[%s7585_s3 + $0x38] sm:$0xff]  ;;  %v7819_v43 = vld [vmem:[#allocation21_spill] sm:$0xff] }
 0x382   :  { %v1295_v34 = vsub.f32 %v5256_v11, %v1254_v29 }
 0x384   :  { %v5617_v4 = vpop.eup %4166  ;;  %v1320_v27 = vmul.f32 1.442695, %v1295_v34 }
 0x385   :  { %v1340_v11 = vsel %vm7812_vm14, %v5617_v4, 0.0  ;;  %v4169_v56 = vpop.eup %4168  ;;  %vm7815_vm14 = vcmp.gt.f32.partialorder %v4677_v52, 0.0 }
 0x386   :  { %4172 = vpow2.f32 %v1320_v27  ;;  %1392 = vadd.xlane.f32.xlu2 %v1339_v14  ;;  %1394 = vadd.xlane.f32.xlu1 %v1340_v11  ;;  %v1397_v28 = vpop.xlane.xlu0 %1396  ;;  %v5628_v50 = vpop.eup %4170  ;;  %v1376_v34 = vmul.f32 %v4169_v56, %v1360_v9  ;;  %v7816_v11 = vld [vmem:[#allocation9_spill] sm:$0xff]  ;;  %v7820_v9 = vld [vmem:[#allocation23_spill] sm:$0xff] }
 0x387   :  { %v1421_v17 = vadd.f32 %v1397_v28, %v1373_v46  ;;  %4174 = vpow2.f32 %v1200_v39  ;;  %v1342_v41 = vsel %vm7813_vm10, %v5628_v50, 0.0  ;;  %vm7817_vm10 = vcmp.gt.f32.partialorder %v7816_v11, 0.0 }
 0x388   :  { %4176 = vpow2.f32 %v1324_v53 }
 0x389   :  { %1438 = vst.msk [vmem:[#allocation3 + $0x38] sm:$0xff] %vm1430_vm6, %v1421_v17  ;;  %v1269_v44 = vpop.permute.xlu2 %1268 }
 0x38a   :  { %v1298_v1 = vsub.f32 %v5267_v16, %v1269_v44 }
 0x38c   :  { %v5631_v48 = vpop.eup %4172  ;;  %v1326_v19 = vmul.f32 1.442695, %v1298_v1  ;;  %v4362_v1 = vld [vmem:[%s7585_s3 + $0x8] sm:$0xff] }
 0x38d   :  { %v1343_v29 = vsel %vm7814_vm5, %v5631_v48, 0.0  ;;  %v4175_v27 = vpop.eup %4174  ;;  %1569 = vrot.lane.b32.xlu0 %v4362_v1, %s4391_s30  ;;  %vm7832_vm5 = vcmp.gt.f32.partialorder %v7750_v40, 0.0 }
 0x38e   :  { %4178 = vpow2.f32 %v1326_v19  ;;  %1398 = vadd.xlane.f32.xlu2 %v1342_v41  ;;  %1400 = vadd.xlane.f32.xlu1 %v1343_v29  ;;  %v1403_v16 = vpop.xlane.xlu0 %1402  ;;  %v5642_v47 = vpop.eup %4176  ;;  %v1379_v28 = vmul.f32 %v4175_v27, %v1363_v54  ;;  %v4363_v19 = vld [vmem:[%s7585_s3 + $0x20] sm:$0xff]  ;;  %v7821_v41 = vsub.f32 %v7819_v43, %v7820_v9 }
 0x38f   :  { %v1424_v18 = vadd.f32 %v1403_v16, %v1376_v34  ;;  %4180 = vpow2.f32 %v1330_v32  ;;  %v1345_v14 = vsel %vm7815_vm14, %v5642_v47, 0.0  ;;  %v1352_v32 = vld [vmem:[#allocation3 + $0x10] sm:$0xff] }
 0x390   :  { %v1184_v29 = vmul.f32 1.442695, %v7821_v41 }
 0x391   :  { %1441 = vst.msk [vmem:[#allocation3 + $0x50] sm:$0xff] %vm1430_vm6, %v1424_v18  ;;  %v4366_v18 = vld [vmem:[%s7585_s3 + $0x18] sm:$0xff] }
 0x394   :  { %v5644_v25 = vpop.eup %4178 }
 0x395   :  { %v1346_v46 = vsel %vm7817_vm10, %v5644_v25, 0.0  ;;  %v5653_v53 = vpop.eup %4180  ;;  %1575 = vrot.lane.b32.xlu0 %v4363_v19, %s4391_s30  ;;  %v1356_v19 = vld [vmem:[#allocation3 + $0x30] sm:$0xff]  ;;  %vm7859_vm10 = vcmp.gt.f32.partialorder %v7808_v57, 0.0 }
 0x396   :  { %1404 = vadd.xlane.f32.xlu2 %v1345_v14  ;;  %1406 = vadd.xlane.f32.xlu1 %v1346_v46  ;;  %v1409_v39 = vpop.xlane.xlu0 %1408  ;;  %v1348_v44 = vsel %vm133_vm12, %v5653_v53, 0.0  ;;  %v7822_v14 = vld [vmem:[#allocation31_spill] sm:$0xff] }
 0x397   :  { %v1427_v17 = vadd.f32 %v1409_v39, %v1379_v28  ;;  %v7823_v46 = vsub.f32 %v7822_v14, %v5399_v23  ;;  %v1355_v23 = vld [vmem:[#allocation3 + $0x28] sm:$0xff] }
 0x399   :  { %1444 = vst.msk [vmem:[#allocation3 + $0x68] sm:$0xff] %vm1430_vm6, %v1427_v17  ;;  %v1190_v28 = vmul.f32 1.442695, %v7823_v46 }
 0x39d   :  { %1581 = vrot.lane.b32.xlu0 %v4365_v0, %s4391_s30  ;;  %v7826_v0 = vld [vmem:[#allocation32_spill] sm:$0xff] }
 0x39e   :  { %1410 = vadd.xlane.f32.xlu2 %v1348_v44  ;;  %v7827_v43 = vsub.f32 %v7826_v0, %v5427_v45 }
 0x3a0   :  { %v1196_v9 = vmul.f32 1.442695, %v7827_v43 }
 0x3b6   :  { %1283 = vperm.xlu2 %4049, %v5583_v2  }
 0x3be   :  { %1470 = vperm.xlu2 %4049, %v5591_v20   ;;  %v4364_v20 = vld [vmem:[%s7585_s3] sm:$0xff] }
 0x3c6   :  { %1485 = vperm.xlu2 %4049, %v5599_v62   ;;  %v1178_v62 = vmul.f32 1.442695, %v1160_v13 }
 0x3c8   :  { %4182 = vpow2.f32 %v1178_v62 }
 0x3c9   :  { %4184 = vpow2.f32 %v1184_v29 }
 0x3ce   :  { %1500 = vperm.xlu2 %4049, %v4163_v12   ;;  %v7818_v12 = vld [vmem:[#allocation33_spill] sm:$0xff]  ;;  %v5684_v16 = vpop.eup %4182 }
 0x3cf   :  { %v5696_v44 = vpop.eup %4184 }
 0x3d0   :  { %7824 = vst [vmem:[#allocation5_spill] sm:$0xff] %v5696_v44  ;;  %v1371_v62 = vmul.f32 %v5696_v44, %v1355_v23  ;;  %v1362_v23 = vld [vmem:[#allocation3 + $0x60] sm:$0xff]  ;;  %v6034_v44 = vld [vmem:[#allocation2 + $0x28] sm:$0xff] }
 0x3d1   :  { %7873 = vst [vmem:[#allocation51_spill] sm:$0xff] %v6034_v44 }
 0x3d6   :  { %1515 = vperm.xlu2 %4049, %v4169_v56   ;;  %v1164_v56 = vsub.f32 %v7818_v12, %v5444_v31  ;;  %v1167_v31 = vsub.f32 %v5458_v38, %v5463_v58  ;;  %v4367_v38 = vld [vmem:[%s7585_s3 + $0x30] sm:$0xff] }
 0x3d7   :  { %v7825_v58 = vld [vmem:[#allocation35_spill] sm:$0xff] }
 0x3d8   :  { %v1186_v34 = vmul.f32 1.442695, %v1164_v56  ;;  %v1192_v17 = vmul.f32 1.442695, %v1167_v31  ;;  %v1170_v13 = vsub.f32 %v7825_v58, %v5474_v15  ;;  %v1358_v15 = vld [vmem:[#allocation3 + $0x40] sm:$0xff] }
 0x3da   :  { %4186 = vpow2.f32 %v1186_v34  ;;  %v1198_v34 = vmul.f32 1.442695, %v1170_v13  ;;  %v1361_v13 = vld [vmem:[#allocation3 + $0x58] sm:$0xff] }
 0x3db   :  { %4188 = vpow2.f32 %v1190_v28 }
 0x3dc   :  { %4190 = vpow2.f32 %v1192_v17 }
 0x3dd   :  { %4192 = vpow2.f32 %v1196_v9 }
 0x3de   :  { %1530 = vperm.xlu2 %4049, %v4175_v27   ;;  %v1368_v27 = vmul.f32 %v5684_v16, %v1352_v32  ;;  %4194 = vpow2.f32 %v1198_v34  ;;  %v1359_v32 = vld [vmem:[#allocation3 + $0x48] sm:$0xff] }
 0x3e0   :  { %v4187_v1 = vpop.eup %4186 }
 0x3e6   :  { %1567 = vrot.lane.b32.xlu2 %v4364_v20, %s4391_s30  ;;  %v1372_v20 = vmul.f32 %v4187_v1, %v1356_v19 }
 0x3ee   :  { %1573 = vrot.lane.b32.xlu2 %v4366_v18, %s4391_s30  ;;  %v5709_v18 = vpop.eup %4188 }
 0x3ef   :  { %7828 = vst [vmem:[#allocation8_spill] sm:$0xff] %v5709_v18  ;;  %v4191_v31 = vpop.eup %4190 }
 0x3f1   :  { %v1387_v54 = vpop.xlane.xlu2 %1386 }
 0x3f2   :  { %v1416_v39 = vadd.f32 %v1387_v54, %v1368_v27  ;;  %v1374_v27 = vmul.f32 %v5709_v18, %v1358_v15  ;;  %v1375_v54 = vmul.f32 %v4191_v31, %v1359_v32 }
 0x3f4   :  { %1433 = vst.msk [vmem:[#allocation3 + $0x10] sm:$0xff] %vm1430_vm6, %v1416_v39  ;;  %v7829_v39 = vsub.f32 %v5512_v6, %v5515_v30  ;;  %v1364_v30 = vld [vmem:[#allocation3 + $0x70] sm:$0xff] }
 0x3f6   :  { %1579 = vrot.lane.b32.xlu2 %v4367_v38, %s4391_s30  ;;  %v1202_v17 = vmul.f32 1.442695, %v7829_v39  ;;  %v5717_v38 = vpop.eup %4192 }
 0x3f7   :  { %7830 = vst [vmem:[#allocation33_spill] sm:$0xff] %v5717_v38  ;;  %v4195_v58 = vpop.eup %4194  ;;  %v1377_v19 = vmul.f32 %v5717_v38, %v1361_v13  ;;  %v6029_v38 = vld [vmem:[#allocation2 + $0x30] sm:$0xff] }
 0x3f8   :  { %4196 = vpow2.f32 %v1202_v17 }
 0x3f9   :  { %v1393_v12 = vpop.xlane.xlu2 %1392  ;;  %v1395_v56 = vpop.xlane.xlu1 %1394 }
 0x3fa   :  { %v1419_v41 = vadd.f32 %v1393_v12, %v1371_v62  ;;  %v1420_v29 = vadd.f32 %v1395_v56, %v1372_v20  ;;  %v1378_v62 = vmul.f32 %v4195_v58, %v1362_v23 }
 0x3fc   :  { %1436 = vst.msk [vmem:[#allocation3 + $0x28] sm:$0xff] %vm1430_vm6, %v1419_v41 }
 0x3fd   :  { %1437 = vst.msk [vmem:[#allocation3 + $0x30] sm:$0xff] %vm1430_vm6, %v1420_v29 }
 0x3fe   :  { %v5723_v6 = vpop.eup %4196 }
 0x3ff   :  { %7831 = vst [vmem:[#allocation21_spill] sm:$0xff] %v5723_v6  ;;  %v1380_v43 = vmul.f32 %v5723_v6, %v1364_v30  ;;  %v1570_v13 = vpop.permute.xlu0 %1569 }
 0x401   :  { %v1399_v14 = vpop.xlane.xlu2 %1398  ;;  %v1401_v45 = vpop.xlane.xlu1 %1400 }
 0x402   :  { %v1422_v46 = vadd.f32 %v1399_v14, %v1374_v27  ;;  %v1423_v28 = vadd.f32 %v1401_v45, %v1375_v54  ;;  %v1173_v54 = vsub.f32 %v5580_v3, %v5583_v2  ;;  %v4368_v45 = vld [vmem:[%s7585_s3 + $0x10] sm:$0xff] }
 0x404   :  { %1439 = vst.msk [vmem:[#allocation3 + $0x40] sm:$0xff] %vm1430_vm6, %v1422_v46  ;;  %v1204_v14 = vmul.f32 1.442695, %v1173_v54 }
 0x405   :  { %1440 = vst.msk [vmem:[#allocation3 + $0x48] sm:$0xff] %vm1430_vm6, %v1423_v28 }
 0x409   :  { %v1405_v20 = vpop.xlane.xlu2 %1404  ;;  %v1407_v12 = vpop.xlane.xlu1 %1406 }
 0x40a   :  { %v1425_v56 = vadd.f32 %v1405_v20, %v1377_v19  ;;  %v1426_v0 = vadd.f32 %v1407_v12, %v1378_v62  ;;  %v1576_v19 = vpop.permute.xlu0 %1575 }
 0x40c   :  { %1442 = vst.msk [vmem:[#allocation3 + $0x58] sm:$0xff] %vm1430_vm6, %v1425_v56 }
 0x40d   :  { %1443 = vst.msk [vmem:[#allocation3 + $0x60] sm:$0xff] %vm1430_vm6, %v1426_v0 }
 0x411   :  { %v1411_v9 = vpop.xlane.xlu2 %1410 }
 0x412   :  { %v1428_v41 = vadd.f32 %v1411_v9, %v1380_v43  ;;  %v1582_v12 = vpop.permute.xlu0 %1581 }
 0x413   :  { %1591 = vmatpush.bf16.msra.mxu1 %v1582_v12 }
 0x414   :  { %1445 = vst.msk [vmem:[#allocation3 + $0x70] sm:$0xff] %vm1430_vm6, %v1428_v41 }
 0x419   :  { %v1284_v29 = vpop.permute.xlu2 %1283 }
 0x41a   :  { %v1301_v34 = vsub.f32 %v5525_v5, %v1284_v29 }
 0x41c   :  { %v1332_v15 = vmul.f32 1.442695, %v1301_v34  ;;  %v3910_v34 = vpack.c.bf16 %v5530_v22, %v5502_v8  ;;  %v3922_v8 = vpack.c.bf16 %v5631_v48, %v5628_v50 }
 0x41e   :  { %4198 = vpow2.f32 %v1332_v15 }
 0x41f   :  { %4200 = vpow2.f32 %v1204_v14  ;;  %v3916_v14 = vpack.c.bf16 %v5612_v33, %v5536_v49  ;;  %v3928_v49 = vpack.c.bf16 %v5556_v51, %v5644_v25 }
 0x424   :  { %v5729_v32 = vpop.eup %4198 }
 0x425   :  { %v1349_v27 = vsel %vm7832_vm5, %v5729_v32, 0.0  ;;  %v4201_v5 = vpop.eup %4200  ;;  %vm7860_vm5 = vcmp.gt.f32.partialorder %v4579_v59, 0.0 }
 0x426   :  { %1412 = vadd.xlane.f32.xlu1 %v1349_v27  ;;  %v3913_v27 = vpack.c.bf16 %v5507_v7, %v5604_v10  ;;  %v3925_v7 = vpack.c.bf16 %v5642_v47, %v5550_v61  ;;  %v6090_v10 = vld [vmem:[#allocation2 + $0x50] sm:$0xff] }
 0x43f   :  { %1475 = vperm.xlu1 %4051, %v5684_v16   ;;  %v4369_v16 = vld [vmem:[%s7585_s3 + $0x28] sm:$0xff] }
 0x447   :  { %1495 = vperm.xlu1 %4051, %v4187_v1   ;;  %v5745_v1 = vpop.permute.xlu2 %1470 }
 0x44f   :  { %1510 = vperm.xlu1 %4051, %v4191_v31   ;;  %v5747_v3 = vpop.permute.xlu2 %1485  ;;  %v1365_v31 = vld [vmem:[#allocation3 + $0x78] sm:$0xff] }
 0x450   :  { %7833 = vst [vmem:[#allocation23_spill] sm:$0xff] %v5747_v3  ;;  %v1381_v28 = vmul.f32 %v4201_v5, %v1365_v31 }
 0x457   :  { %1525 = vperm.xlu1 %4051, %v4195_v58   ;;  %v5749_v2 = vpop.permute.xlu2 %1500 }
 0x458   :  { %7834 = vst [vmem:[#allocation31_spill] sm:$0xff] %v5749_v2 }
 0x45f   :  { %1540 = vperm.xlu1 %4051, %v4201_v5   ;;  %v5751_v46 = vpop.permute.xlu2 %1515  ;;  %v6112_v5 = vld [vmem:[#allocation2 + $0x68] sm:$0xff] }
 0x460   :  { %7835 = vst [vmem:[#allocation35_spill] sm:$0xff] %v5751_v46 }
 0x467   :  { %1571 = vrot.lane.b32.xlu1 %v4368_v45, %s4391_s30  ;;  %v5754_v58 = vpop.permute.xlu2 %1530  ;;  %v3919_v45 = vpack.c.bf16 %v5543_v24, %v5617_v4  ;;  %v3931_v24 = vpack.c.bf16 %v5729_v32, %v5653_v53  ;;  %v6088_v4 = vld [vmem:[#allocation2 + $0x58] sm:$0xff] }
 0x468   :  { %7836 = vst [vmem:[#allocation32_spill] sm:$0xff] %v5754_v58 }
 0x469   :  { %7877 = vst [vmem:[#allocation55_spill] sm:$0xff] %v6088_v4 }
 0x46f   :  { %1577 = vrot.lane.b32.xlu1 %v4369_v16, %s4391_s30  ;;  %v1568_v23 = vpop.permute.xlu2 %1567 }
 0x477   :  { %v1574_v20 = vpop.permute.xlu2 %1573 }
 0x47f   :  { %v1580_v0 = vpop.permute.xlu2 %1579 }
 0x480   :  { %1592 = vmatpush.bf16.msra.mxu1 %v1580_v0 }
 0x499   :  { %v1413_v39 = vpop.xlane.xlu1 %1412 }
 0x49a   :  { %v1429_v17 = vadd.f32 %v1413_v39, %v1381_v28  ;;  %v7662_v39 = vmov 2  }
 0x49b   :  { %4052 = vset.pattern.permute.xlu2 %v7662_v39  ;;  %4053 = vset.pattern.permute.xlu0 %v7662_v39 }
 0x49c   :  { %1446 = vst.msk [vmem:[#allocation3 + $0x78] sm:$0xff] %vm1430_vm6, %v1429_v17  ;;  %4054 = vset.pattern.permute.xlu1 %v7662_v39  ;;  %vm7681_vm6 = vcmask 130112  }
 0x4b1   :  { %v5756_v62 = vpop.permute.xlu1 %1475 }
 0x4b2   :  { %7837 = vst [vmem:[#allocation39_spill] sm:$0xff] %v5756_v62 }
 0x4b9   :  { %v5758_v56 = vpop.permute.xlu1 %1495 }
 0x4c1   :  { %v5760_v30 = vpop.permute.xlu1 %1510 }
 0x4c9   :  { %v5762_v43 = vpop.permute.xlu1 %1525 }
 0x4d1   :  { %v5764_v9 = vpop.permute.xlu1 %1540 }
 0x4d9   :  { %v1572_v41 = vpop.permute.xlu1 %1571 }
 0x4e1   :  { %v1578_v29 = vpop.permute.xlu1 %1577 }
 0x4e2   :  { %1593 = vmatpush.bf16.msra.mxu1 %v1578_v29  ;;  %v1753_v29 = vld [vmem:[%s7582_s1] sm:$0xff] }
 0x4e6   :  { %1594 = vmatpush.bf16.msra.mxu1 %v1576_v19  ;;  %v1448_v19 = vld [vmem:[#allocation4 + $0x8] sm:$0xff] }
 0x4ea   :  { %1595 = vmatpush.bf16.msra.mxu1 %v1574_v20  ;;  %v1544_v20 = vmul.f32 %v5745_v1, %v1448_v19  ;;  %v1756_v1 = vld [vmem:[%s7582_s1 + $0x18] sm:$0xff] }
 0x4ee   :  { %1596 = vmatpush.bf16.msra.mxu1 %v1572_v41 }
 0x4f2   :  { %1597 = vmatpush.bf16.msra.mxu1 %v1570_v13 }
 0x4f6   :  { %1598 = vmatpush.bf16.msra.mxu1 %v1568_v23 }
 0x4f9   :  { %3911 = vmatmul.msk.bf16.vlgmr.msra.gmra.mxu1 %vm5005_vm13, %v3910_v34 }
 0x509   :  { %3914 = vmatmul.msk.bf16.gmra.mxu1 %vm5025_vm15, %v3913_v27  ;;  %v1754_v27 = vld [vmem:[%s7582_s1 + $0x8] sm:$0xff] }
 0x519   :  { %3917 = vmatmul.msk.bf16.gmra.mxu1 %vm5061_vm4, %v3916_v14 }
 0x529   :  { %3920 = vmatmul.msk.bf16.gmra.mxu1 %vm5114_vm11, %v3919_v45  ;;  %v1758_v45 = vld [vmem:[%s7582_s1 + $0x28] sm:$0xff] }
 0x539   :  { %3923 = vmatmul.msk.bf16.gmra.mxu1 %vm5163_vm2, %v3922_v8  ;;  %v1759_v8 = vld [vmem:[%s7582_s1 + $0x30] sm:$0xff] }
 0x549   :  { %3926 = vmatmul.msk.bf16.gmra.mxu1 %vm5209_vm0, %v3925_v7  ;;  %v1755_v7 = vld [vmem:[%s7582_s1 + $0x10] sm:$0xff] }
 0x559   :  { %3929 = vmatmul.msk.bf16.gmra.mxu1 %vm5250_vm9, %v3928_v49  ;;  %v1761_v49 = vld [vmem:[%s7582_s1 + $0x40] sm:$0xff] }
 0x569   :  { %3932 = vmatmul.msk.bf16.gmra.mxu1 %vm5274_vm8, %v3931_v24  ;;  %v1762_v24 = vld [vmem:[%s7582_s1 + $0x48] sm:$0xff] }
 0x576   :  { %v1600_v50 = vpop.f32.mrf.mxu1 }
 0x577   :  { %1656 = vrot.lane.b32.xlu1 %v1600_v50, %s4392_s18  ;;  %v1757_v50 = vld [vmem:[%s7582_s1 + $0x20] sm:$0xff] }
 0x57e   :  { %v1602_v61 = vpop.f32.mrf.mxu1 }
 0x57f   :  { %1658 = vrot.lane.b32.xlu2 %v1602_v61, %s4392_s18  ;;  %v1764_v61 = vld [vmem:[%s7582_s1 + $0x58] sm:$0xff] }
 0x586   :  { %v1605_v48 = vpop.f32.mrf.mxu1 }
 0x587   :  { %1660 = vrot.lane.b32.xlu0 %v1605_v48, %s4392_s18  ;;  %v1765_v48 = vld [vmem:[%s7582_s1 + $0x60] sm:$0xff] }
 0x58e   :  { %v1607_v51 = vpop.f32.mrf.mxu1 }
 0x58f   :  { %1662 = vrot.lane.b32.xlu1 %v1607_v51, %s4392_s18  ;;  %v1760_v51 = vld [vmem:[%s7582_s1 + $0x38] sm:$0xff] }
 0x596   :  { %v1610_v47 = vpop.f32.mrf.mxu1 }
 0x597   :  { %1664 = vrot.lane.b32.xlu2 %v1610_v47, %s4392_s18 }
 0x59e   :  { %v1612_v25 = vpop.f32.mrf.mxu1 }
 0x59f   :  { %1666 = vrot.lane.b32.xlu0 %v1612_v25, %s4392_s18  ;;  %v1767_v25 = vld [vmem:[%s7582_s1 + $0x70] sm:$0xff] }
 0x5a6   :  { %v1615_v53 = vpop.f32.mrf.mxu1 }
 0x5a7   :  { %1668 = vrot.lane.b32.xlu1 %v1615_v53, %s4392_s18  ;;  %v1763_v53 = vld [vmem:[%s7582_s1 + $0x50] sm:$0xff] }
 0x5ae   :  { %v1617_v32 = vpop.f32.mrf.mxu1 }
 0x5af   :  { %1670 = vrot.lane.b32.xlu2 %v1617_v32, %s4392_s18 }
 0x5b6   :  { %v1620_v31 = vpop.f32.mrf.mxu1 }
 0x5b7   :  { %1672 = vrot.lane.b32.xlu0 %v1620_v31, %s4392_s18  ;;  %v1766_v31 = vld [vmem:[%s7582_s1 + $0x68] sm:$0xff] }
 0x5be   :  { %v1622_v28 = vpop.f32.mrf.mxu1 }
 0x5bf   :  { %1674 = vrot.lane.b32.xlu1 %v1622_v28, %s4392_s18  ;;  %v1453_v28 = vld [vmem:[#allocation4 + $0x30] sm:$0xff] }
 0x5c6   :  { %v1625_v17 = vpop.f32.mrf.mxu1 }
 0x5c7   :  { %1676 = vrot.lane.b32.xlu2 %v1625_v17, %s4392_s18  ;;  %v1549_v17 = vmul.f32 %v5758_v56, %v1453_v28  ;;  %v1462_v28 = vld [vmem:[#allocation4 + $0x78] sm:$0xff] }
 0x5ce   :  { %v1627_v13 = vpop.f32.mrf.mxu1 }
 0x5cf   :  { %1678 = vrot.lane.b32.xlu0 %v1627_v13, %s4392_s18 }
 0x5d6   :  { %v1630_v23 = vpop.f32.mrf.mxu1 }
 0x5d7   :  { %1680 = vrot.lane.b32.xlu1 %v1630_v23, %s4392_s18 }
 0x5d9   :  { %v1659_v12 = vpop.permute.xlu2 %1658 }
 0x5da   :  { %v1705_v0 = vadd.f32 %v1659_v12, %v1544_v20  ;;  %v1456_v12 = vld [vmem:[#allocation4 + $0x48] sm:$0xff] }
 0x5dc   :  { %1722 = vst.msk [vmem:[#allocation4 + $0x8] sm:$0xff] %vm7681_vm6, %v1705_v0  ;;  %v1552_v0 = vmul.f32 %v5760_v30, %v1456_v12 }
 0x5de   :  { %v1632_v41 = vpop.f32.mrf.mxu1 }
 0x5df   :  { %1682 = vrot.lane.b32.xlu2 %v1632_v41, %s4392_s18 }
 0x5e6   :  { %v1635_v34 = vpop.f32.mrf.mxu1 }
 0x5e7   :  { %1772 = vperm.xlu2 %4052, %v1753_v29   ;;  %1684 = vrot.lane.b32.xlu0 %v1635_v34, %s4392_s18 }
 0x5e9   :  { %v5855_v47 = vpop.permute.xlu1 %1656 }
 0x5ea   :  { %7846 = vst [vmem:[#allocation40_spill] sm:$0xff] %v5855_v47  ;;  %v6017_v47 = vld [vmem:[#allocation2 + $0x10] sm:$0xff] }
 0x5ee   :  { %v1637_v14 = vpop.f32.mrf.mxu1 }
 0x5ef   :  { %1787 = vperm.xlu2 %4052, %v1756_v1   ;;  %1777 = vperm.xlu0 %4053, %v1754_v27   ;;  %v5885_v27 = vld [vmem:[%s7583_s2 + $0x2] ss:$0 sm:$0xff] }
 0x5f0   :  { %1686 = vrot.lane.b32.xlu1 %v1637_v14, %s4392_s18 }
 0x5f1   :  { %v5870_v19 = vpop.permute.xlu2 %1664 }
 0x5f2   :  { %7848 = vst [vmem:[#allocation42_spill] sm:$0xff] %v5870_v19  ;;  %v6063_v19 = vld [vmem:[#allocation2 + $0x38] sm:$0xff] }
 0x5f7   :  { %1797 = vperm.xlu2 %4052, %v1758_v45   ;;  %1802 = vperm.xlu0 %4053, %v1759_v8  }
 0x5f8   :  { %1782 = vperm.xlu1 %4054, %v1755_v7  }
 0x5f9   :  { %v5878_v1 = vpop.permute.xlu0 %1660 }
 0x5fa   :  { %7851 = vst [vmem:[#allocation45_spill] sm:$0xff] %v5878_v1 }
 0x5ff   :  { %1812 = vperm.xlu2 %4052, %v1761_v49   ;;  %1817 = vperm.xlu0 %4053, %v1762_v24   ;;  %v1459_v49 = vld [vmem:[#allocation4 + $0x60] sm:$0xff] }
 0x600   :  { %1792 = vperm.xlu1 %4054, %v1757_v50   ;;  %v1555_v24 = vmul.f32 %v5762_v43, %v1459_v49  ;;  %v1558_v43 = vmul.f32 %v5764_v9, %v1462_v28 }
 0x601   :  { %v5863_v32 = vpop.permute.xlu1 %1662 }
 0x602   :  { %7847 = vst [vmem:[#allocation41_spill] sm:$0xff] %v5863_v32 }
 0x607   :  { %1827 = vperm.xlu2 %4052, %v1764_v61   ;;  %1832 = vperm.xlu0 %4053, %v1765_v48  }
 0x608   :  { %1807 = vperm.xlu1 %4054, %v1760_v51  }
 0x609   :  { %v5872_v20 = vpop.permute.xlu2 %1670 }
 0x60a   :  { %7849 = vst [vmem:[#allocation43_spill] sm:$0xff] %v5872_v20  ;;  %v6061_v20 = vld [vmem:[#allocation2 + $0x40] sm:$0xff] }
 0x60b   :  { %7875 = vst [vmem:[#allocation53_spill] sm:$0xff] %v6061_v20 }
 0x60f   :  { %1842 = vperm.xlu2 %4052, %v1767_v25  }
 0x610   :  { %1822 = vperm.xlu1 %4054, %v1763_v53  }
 0x611   :  { %v5887_v14 = vpop.permute.xlu0 %1666 }
 0x612   :  { %7853 = vst [vmem:[#allocation47_spill] sm:$0xff] %v5887_v14 }
 0x618   :  { %1837 = vperm.xlu1 %4054, %v1766_v31  }
 0x619   :  { %v1669_v13 = vpop.permute.xlu1 %1668 }
 0x61a   :  { %v1710_v23 = vadd.f32 %v1669_v13, %v1549_v17 }
 0x61c   :  { %1727 = vst.msk [vmem:[#allocation4 + $0x30] sm:$0xff] %vm7681_vm6, %v1710_v23 }
 0x621   :  { %v5875_v41 = vpop.permute.xlu2 %1676 }
 0x622   :  { %7850 = vst [vmem:[#allocation44_spill] sm:$0xff] %v5875_v41 }
 0x629   :  { %v5895_v61 = vpop.permute.xlu0 %1672 }
 0x62a   :  { %7854 = vst [vmem:[#allocation48_spill] sm:$0xff] %v5895_v61 }
 0x631   :  { %v1675_v29 = vpop.permute.xlu1 %1674 }
 0x632   :  { %v1713_v34 = vadd.f32 %v1675_v29, %v1552_v0 }
 0x634   :  { %1730 = vst.msk [vmem:[#allocation4 + $0x48] sm:$0xff] %vm7681_vm6, %v1713_v34 }
 0x639   :  { %v5880_v56 = vpop.permute.xlu2 %1682 }
 0x63a   :  { %7852 = vst [vmem:[#allocation46_spill] sm:$0xff] %v5880_v56  ;;  %v6036_v56 = vld [vmem:[#allocation2 + $0x20] sm:$0xff] }
 0x641   :  { %v1773_v45 = vpop.permute.xlu2 %1772  ;;  %v5899_v25 = vpop.permute.xlu0 %1678 }
 0x642   :  { %v1851_v30 = vadd.f32 %v5885_v27, %v1773_v45  ;;  %7855 = vst [vmem:[#allocation49_spill] sm:$0xff] %v5899_v25 }
 0x644   :  { %v1867_v8 = vmul.f32 0.2, %v1851_v30 }
 0x646   :  { %v1883_v7 = vmax.f32 %v1851_v30, %v1867_v8 }
 0x648   :  { %v5893_v50 = vsel %vm119_vm1, %v1883_v7, -1e+30 }
 0x649   :  { %v1681_v48 = vpop.permute.xlu1 %1680  ;;  %1931 = vmax.xlane.f32.xlu1 %v5893_v50  ;;  %v1788_v31 = vpop.permute.xlu2 %1787 }
 0x64a   :  { %v1716_v51 = vadd.f32 %v1681_v48, %v1555_v24  ;;  %v1854_v0 = vadd.f32 %v5885_v27, %v1788_v31 }
 0x64c   :  { %1733 = vst.msk [vmem:[#allocation4 + $0x60] sm:$0xff] %vm7681_vm6, %v1716_v51  ;;  %v1870_v30 = vmul.f32 0.2, %v1854_v0 }
 0x64e   :  { %v1886_v48 = vmax.f32 %v1854_v0, %v1870_v30 }
 0x651   :  { %v1798_v29 = vpop.permute.xlu2 %1797 }
 0x652   :  { %v1856_v51 = vadd.f32 %v5885_v27, %v1798_v29 }
 0x659   :  { %v5901_v53 = vpop.permute.xlu0 %1684  ;;  %v1813_v28 = vpop.permute.xlu2 %1812 }
 0x65a   :  { %7856 = vst [vmem:[#allocation50_spill] sm:$0xff] %v5901_v53 }
 0x661   :  { %v1778_v17 = vpop.permute.xlu0 %1777  ;;  %v1828_v53 = vpop.permute.xlu2 %1827 }
 0x662   :  { %v1852_v13 = vadd.f32 %v5885_v27, %v1778_v17  ;;  %v1687_v23 = vpop.permute.xlu1 %1686 }
 0x663   :  { %v1719_v12 = vadd.f32 %v1687_v23, %v1558_v43 }
 0x664   :  { %v1868_v34 = vmul.f32 0.2, %v1852_v13 }
 0x665   :  { %1736 = vst.msk [vmem:[#allocation4 + $0x78] sm:$0xff] %vm7681_vm6, %v1719_v12  ;;  %v1872_v12 = vmul.f32 0.2, %v1856_v51  ;;  %vm7886_vm6 = vcmp.gt.f32.partialorder %v4581_v60, 0.0 }
 0x666   :  { %v1884_v45 = vmax.f32 %v1852_v13, %v1868_v34  ;;  %v7857_v13 = vld [vmem:[#allocation7_spill] sm:$0xff] }
 0x667   :  { %vm7858_vm14 = vcmp.gt.f32.partialorder %v7857_v13, 0.0 }
 0x668   :  { %v5909_v8 = vsel %vm120_vm3, %v1884_v45, -1e+30  ;;  %v5917_v23 = vsel %vm7858_vm14, %v1886_v48, -1e+30  ;;  %v1888_v48 = vmax.f32 %v1856_v51, %v1872_v12  ;;  %vm7861_vm14 = vcmp.gt.f32.partialorder %v7810_v55, 0.0 }
 0x669   :  { %1933 = vmax.xlane.f32.xlu2 %v5909_v8  ;;  %v1803_v9 = vpop.permute.xlu0 %1802 }
 0x66a   :  { %v1783_v7 = vpop.permute.xlu1 %1782  ;;  %v1857_v49 = vadd.f32 %v5885_v27, %v1803_v9 }
 0x66b   :  { %v1853_v24 = vadd.f32 %v5885_v27, %v1783_v7  ;;  %v1859_v7 = vadd.f32 %v5885_v27, %v1813_v28 }
 0x66c   :  { %v1873_v43 = vmul.f32 0.2, %v1857_v49 }
 0x66d   :  { %v1869_v31 = vmul.f32 0.2, %v1853_v24  ;;  %v1875_v25 = vmul.f32 0.2, %v1859_v7 }
 0x66e   :  { %v1889_v29 = vmax.f32 %v1857_v49, %v1873_v43  ;;  %v5935_v49 = vsel %vm7861_vm14, %v1888_v48, -1e+30  ;;  %vm7864_vm14 = vcmp.gt.f32.partialorder %v4642_v63, 0.0 }
 0x66f   :  { %v1885_v17 = vmax.f32 %v1853_v24, %v1869_v31 }
 0x670   :  { %v5930_v31 = vsel %vm7860_vm5, %v1889_v29, -1e+30  ;;  %v1862_v29 = vadd.f32 %v5885_v27, %v1828_v53  ;;  %vm7863_vm5 = vcmp.gt.f32.partialorder %v4613_v35, 0.0  ;;  %v1843_v53 = vpop.permute.xlu2 %1842 }
 0x671   :  { %1937 = vmax.xlane.f32.xlu2 %v5917_v23  ;;  %v5922_v34 = vsel %vm7859_vm10, %v1885_v17, -1e+30  ;;  %v1818_v45 = vpop.permute.xlu0 %1817  ;;  %vm7862_vm10 = vcmp.gt.f32.partialorder %v4541_v37, 0.0 }
 0x672   :  { %1935 = vmax.xlane.f32.xlu0 %v5922_v34  ;;  %v1793_v0 = vpop.permute.xlu1 %1792  ;;  %v1860_v30 = vadd.f32 %v5885_v27, %v1818_v45  ;;  %v1878_v14 = vmul.f32 0.2, %v1862_v29 }
 0x673   :  { %v1855_v9 = vadd.f32 %v5885_v27, %v1793_v0 }
 0x674   :  { %v1876_v39 = vmul.f32 0.2, %v1860_v30 }
 0x675   :  { %v1871_v24 = vmul.f32 0.2, %v1855_v9 }
 0x676   :  { %v1892_v12 = vmax.f32 %v1860_v30, %v1876_v39 }
 0x677   :  { %v1887_v17 = vmax.f32 %v1855_v9, %v1871_v24  ;;  %v1891_v24 = vmax.f32 %v1859_v7, %v1875_v25 }
 0x678   :  { %v5948_v48 = vsel %vm7863_vm5, %v1892_v12, -1e+30  ;;  %vm7866_vm5 = vcmp.gt.f32.partialorder %v7816_v11, 0.0 }
 0x679   :  { %1943 = vmax.xlane.f32.xlu2 %v5930_v31  ;;  %v5939_v43 = vsel %vm7862_vm10, %v1887_v17, -1e+30  ;;  %v1833_v28 = vpop.permute.xlu0 %1832  ;;  %v5953_v39 = vsel %vm7864_vm14, %v1891_v24, -1e+30  ;;  %vm7865_vm10 = vcmp.gt.f32.partialorder %v4581_v60, 0.0  ;;  %vm7867_vm14 = vcmp.gt.f32.partialorder %v4677_v52, 0.0 }
 0x67a   :  { %1941 = vmax.xlane.f32.xlu0 %v5935_v49  ;;  %1939 = vmax.xlane.f32.xlu1 %v5939_v43  ;;  %v1808_v51 = vpop.permute.xlu1 %1807  ;;  %v1863_v45 = vadd.f32 %v5885_v27, %v1833_v28 }
 0x67b   :  { %v1858_v0 = vadd.f32 %v5885_v27, %v1808_v51  ;;  %v1865_v51 = vadd.f32 %v5885_v27, %v1843_v53 }
 0x67c   :  { %v1879_v17 = vmul.f32 0.2, %v1863_v45 }
 0x67d   :  { %v1874_v9 = vmul.f32 0.2, %v1858_v0 }
 0x67e   :  { %v1895_v7 = vmax.f32 %v1863_v45, %v1879_v17 }
 0x67f   :  { %v1890_v61 = vmax.f32 %v1858_v0, %v1874_v9  ;;  %v1894_v0 = vmax.f32 %v1862_v29, %v1878_v14 }
 0x680   :  { %v5965_v9 = vsel %vm7866_vm5, %v1895_v7, -1e+30 }
 0x681   :  { %1949 = vmax.xlane.f32.xlu2 %v5948_v48  ;;  %v5957_v30 = vsel %vm7865_vm10, %v1890_v61, -1e+30  ;;  %v1881_v61 = vmul.f32 0.2, %v1865_v51  ;;  %v5970_v32 = vsel %vm7867_vm14, %v1894_v0, -1e+30 }
 0x682   :  { %1947 = vmax.xlane.f32.xlu0 %v5953_v39  ;;  %1945 = vmax.xlane.f32.xlu1 %v5957_v30  ;;  %v1823_v25 = vpop.permute.xlu1 %1822  ;;  %vm7868_vm10 = vcmp.gt.f32.partialorder %v4615_v36, 0.0  ;;  %v4370_v0 = vld [vmem:[%s7582_s1 + $0x78] sm:$0xff]  ;;  %vm2251_vm14 = vcmask 23568  }
 0x683   :  { %v1861_v28 = vadd.f32 %v5885_v27, %v1823_v25  ;;  %v1897_v53 = vmax.f32 %v1865_v51, %v1881_v61 }
 0x685   :  { %v1877_v12 = vmul.f32 0.2, %v1861_v28  ;;  %v5981_v7 = vsel %vm133_vm12, %v1897_v53, -1e+30 }
 0x686   :  { %7869 = vst [vmem:[#allocation7_spill] sm:$0xff] %v5981_v7 }
 0x687   :  { %v1893_v24 = vmax.f32 %v1861_v28, %v1877_v12  ;;  %v7870_v28 = vld [vmem:[#allocation10_spill] sm:$0xff] }
 0x688   :  { %vm7871_vm5 = vcmp.gt.f32.partialorder %v7870_v28, 0.0  ;;  %7872 = vst [vmem:[#allocation10_spill] sm:$0xff] %v6017_v47 }
 0x689   :  { %1955 = vmax.xlane.f32.xlu2 %v5965_v9  ;;  %v5974_v45 = vsel %vm7868_vm10, %v1893_v24, -1e+30  ;;  %v5992_v24 = vld [vmem:[#allocation2] sm:$0xff]  ;;  %vm7880_vm10 = vcmp.gt.f32.partialorder %v7750_v40, 0.0 }
 0x68a   :  { %1953 = vmax.xlane.f32.xlu0 %v5970_v32  ;;  %1951 = vmax.xlane.f32.xlu1 %v5974_v45  ;;  %v1838_v14 = vpop.permute.xlu1 %1837 }
 0x68b   :  { %v1864_v29 = vadd.f32 %v5885_v27, %v1838_v14 }
 0x68d   :  { %v1880_v17 = vmul.f32 0.2, %v1864_v29 }
 0x68f   :  { %v1896_v25 = vmax.f32 %v1864_v29, %v1880_v17  ;;  %v6002_v29 = vld [vmem:[#allocation2 + $0x8] sm:$0xff] }
 0x691   :  { %v5985_v12 = vsel %vm7871_vm5, %v1896_v25, -1e+30  ;;  %vm7881_vm5 = vcmp.gt.f32.partialorder %v7857_v13, 0.0 }
 0x692   :  { %1959 = vmax.xlane.f32.xlu0 %v5981_v7  ;;  %1957 = vmax.xlane.f32.xlu1 %v5985_v12 }
 0x6a6   :  { %1847 = vperm.xlu0 %4053, %v4370_v0   ;;  %v6012_v0 = vld [vmem:[#allocation2 + $0x18] sm:$0xff] }
 0x6bc   :  { %v1932_v51 = vpop.xlane.xlu1 %1931 }
 0x6bd   :  { %v5995_v61 = vmax.f32 %v5992_v24, %v1932_v51 }
 0x6bf   :  { %2558 = vst.msk [vmem:[#allocation2] sm:$0xff] %vm2251_vm14, %v5995_v61  ;;  %2029 = vperm.xlu1 %4054, %v5995_v61  }
 0x6dc   :  { %v1934_v17 = vpop.xlane.xlu2 %1933 }
 0x6dd   :  { %v6005_v53 = vmax.f32 %v6002_v29, %v1934_v17 }
 0x6df   :  { %2559 = vst.msk [vmem:[#allocation2 + $0x8] sm:$0xff] %vm2251_vm14, %v6005_v53  ;;  %2034 = vperm.xlu0 %4053, %v6005_v53  }
 0x6e4   :  { %v1938_v51 = vpop.xlane.xlu2 %1937 }
 0x6e5   :  { %v6015_v14 = vmax.f32 %v6012_v0, %v1938_v51  ;;  %v1936_v6 = vpop.xlane.xlu0 %1935 }
 0x6e6   :  { %v6020_v17 = vmax.f32 %v6017_v47, %v1936_v6 }
 0x6e7   :  { %2561 = vst.msk [vmem:[#allocation2 + $0x18] sm:$0xff] %vm2251_vm14, %v6015_v14  ;;  %2044 = vperm.xlu0 %4053, %v6015_v14  }
 0x6e8   :  { %2560 = vst.msk [vmem:[#allocation2 + $0x10] sm:$0xff] %vm2251_vm14, %v6020_v17 }
 0x6ec   :  { %v1944_v51 = vpop.xlane.xlu2 %1943 }
 0x6ed   :  { %v6032_v18 = vmax.f32 %v6029_v38, %v1944_v51  ;;  %v1942_v6 = vpop.xlane.xlu0 %1941  ;;  %v1940_v25 = vpop.xlane.xlu1 %1939 }
 0x6ee   :  { %v6039_v58 = vmax.f32 %v6034_v44, %v1942_v6  ;;  %v6042_v41 = vmax.f32 %v6036_v56, %v1940_v25  ;;  %v6056_v25 = vld [vmem:[#allocation2 + $0x48] sm:$0xff] }
 0x6ef   :  { %2564 = vst.msk [vmem:[#allocation2 + $0x30] sm:$0xff] %vm2251_vm14, %v6032_v18  ;;  %2059 = vperm.xlu0 %4053, %v6032_v18  }
 0x6f0   :  { %7874 = vst [vmem:[#allocation52_spill] sm:$0xff] %v6039_v58  ;;  %2049 = vperm.xlu1 %4054, %v6042_v41  }
 0x6f1   :  { %2563 = vst.msk [vmem:[#allocation2 + $0x28] sm:$0xff] %vm2251_vm14, %v6039_v58 }
 0x6f2   :  { %2562 = vst.msk [vmem:[#allocation2 + $0x20] sm:$0xff] %vm2251_vm14, %v6042_v41 }
 0x6f4   :  { %v1950_v6 = vpop.xlane.xlu2 %1949 }
 0x6f5   :  { %v6059_v46 = vmax.f32 %v6056_v25, %v1950_v6  ;;  %v1948_v2 = vpop.xlane.xlu0 %1947  ;;  %v1946_v3 = vpop.xlane.xlu1 %1945 }
 0x6f6   :  { %v6066_v1 = vmax.f32 %v6061_v20, %v1948_v2  ;;  %v6069_v51 = vmax.f32 %v6063_v19, %v1946_v3  ;;  %v6083_v3 = vld [vmem:[#allocation2 + $0x60] sm:$0xff] }
 0x6f7   :  { %2567 = vst.msk [vmem:[#allocation2 + $0x48] sm:$0xff] %vm2251_vm14, %v6059_v46  ;;  %2074 = vperm.xlu0 %4053, %v6059_v46  }
 0x6f8   :  { %7876 = vst [vmem:[#allocation54_spill] sm:$0xff] %v6066_v1  ;;  %2064 = vperm.xlu1 %4054, %v6069_v51  }
 0x6f9   :  { %2566 = vst.msk [vmem:[#allocation2 + $0x40] sm:$0xff] %vm2251_vm14, %v6066_v1 }
 0x6fa   :  { %2565 = vst.msk [vmem:[#allocation2 + $0x38] sm:$0xff] %vm2251_vm14, %v6069_v51 }
 0x6fc   :  { %v1956_v2 = vpop.xlane.xlu2 %1955 }
 0x6fd   :  { %v6086_v62 = vmax.f32 %v6083_v3, %v1956_v2  ;;  %v1954_v33 = vpop.xlane.xlu0 %1953  ;;  %v1952_v22 = vpop.xlane.xlu1 %1951 }
 0x6fe   :  { %v6093_v16 = vmax.f32 %v6088_v4, %v1954_v33  ;;  %v6096_v6 = vmax.f32 %v6090_v10, %v1952_v22  ;;  %v6110_v22 = vld [vmem:[#allocation2 + $0x70] sm:$0xff] }
 0x6ff   :  { %2570 = vst.msk [vmem:[#allocation2 + $0x60] sm:$0xff] %vm2251_vm14, %v6086_v62  ;;  %2089 = vperm.xlu0 %4053, %v6086_v62  }
 0x700   :  { %7878 = vst [vmem:[#allocation56_spill] sm:$0xff] %v6093_v16  ;;  %2079 = vperm.xlu1 %4054, %v6096_v6  }
 0x701   :  { %2569 = vst.msk [vmem:[#allocation2 + $0x58] sm:$0xff] %vm2251_vm14, %v6093_v16 }
 0x702   :  { %2568 = vst.msk [vmem:[#allocation2 + $0x50] sm:$0xff] %vm2251_vm14, %v6096_v6 }
 0x703   :  { %7879 = vst [vmem:[#allocation57_spill] sm:$0xff] %v6110_v22 }
 0x705   :  { %v1960_v33 = vpop.xlane.xlu0 %1959  ;;  %v1958_v54 = vpop.xlane.xlu1 %1957 }
 0x706   :  { %v6115_v15 = vmax.f32 %v6110_v22, %v1960_v33  ;;  %v6118_v4 = vmax.f32 %v6112_v5, %v1958_v54 }
 0x708   :  { %2572 = vst.msk [vmem:[#allocation2 + $0x70] sm:$0xff] %vm2251_vm14, %v6115_v15  ;;  %2094 = vperm.xlu1 %4054, %v6118_v4  }
 0x709   :  { %2571 = vst.msk [vmem:[#allocation2 + $0x68] sm:$0xff] %vm2251_vm14, %v6118_v4 }
 0x718   :  { %v1848_v20 = vpop.permute.xlu0 %1847 }
 0x719   :  { %v1866_v44 = vadd.f32 %v5885_v27, %v1848_v20 }
 0x71b   :  { %v1882_v21 = vmul.f32 0.2, %v1866_v44 }
 0x71d   :  { %v1898_v33 = vmax.f32 %v1866_v44, %v1882_v21 }
 0x71f   :  { %v6130_v54 = vsel %vm7880_vm10, %v1898_v33, -1e+30  ;;  %vm7882_vm10 = vcmp.gt.f32.partialorder %v4579_v59, 0.0 }
 0x720   :  { %1961 = vmax.xlane.f32.xlu2 %v6130_v54 }
 0x731   :  { %v2030_v22 = vpop.permute.xlu1 %2029 }
 0x732   :  { %v2107_v47 = vsub.f32 %v5893_v50, %v2030_v22 }
 0x734   :  { %v2123_v2 = vmul.f32 1.442695, %v2107_v47 }
 0x736   :  { %4202 = vpow2.f32 %v2123_v2 }
 0x738   :  { %2039 = vperm.xlu2 %4052, %v6020_v17  }
 0x73c   :  { %v6135_v7 = vpop.eup %4202 }
 0x73d   :  { %v2155_v20 = vsel %vm119_vm1, %v6135_v7, 0.0 }
 0x73e   :  { %2203 = vadd.xlane.f32.xlu1 %v2155_v20 }
 0x740   :  { %2054 = vperm.xlu2 %4052, %v6039_v58  }
 0x748   :  { %2069 = vperm.xlu2 %4052, %v6066_v1  }
 0x750   :  { %2084 = vperm.xlu2 %4052, %v6093_v16  }
 0x751   :  { %v2035_v21 = vpop.permute.xlu0 %2034 }
 0x752   :  { %v2108_v44 = vsub.f32 %v5909_v8, %v2035_v21 }
 0x754   :  { %v2125_v47 = vmul.f32 1.442695, %v2108_v44 }
 0x756   :  { %4204 = vpow2.f32 %v2125_v47 }
 0x759   :  { %v2045_v27 = vpop.permute.xlu0 %2044 }
 0x75a   :  { %v2110_v50 = vsub.f32 %v5917_v23, %v2045_v27 }
 0x75c   :  { %v6145_v2 = vpop.eup %4204  ;;  %v2129_v22 = vmul.f32 1.442695, %v2110_v50 }
 0x75e   :  { %4206 = vpow2.f32 %v2129_v22 }
 0x761   :  { %v2060_v20 = vpop.permute.xlu0 %2059 }
 0x762   :  { %v2113_v26 = vsub.f32 %v5930_v31, %v2060_v20  ;;  %v2050_v1 = vpop.permute.xlu1 %2049 }
 0x763   :  { %v2111_v22 = vsub.f32 %v5939_v43, %v2050_v1  ;;  %v2156_v43 = vsel %vm120_vm3, %v6145_v2, 0.0 }
 0x764   :  { %v6150_v16 = vpop.eup %4206  ;;  %v2135_v58 = vmul.f32 1.442695, %v2113_v26 }
 0x765   :  { %v2158_v8 = vsel %vm7881_vm5, %v6150_v16, 0.0  ;;  %vm7883_vm5 = vcmp.gt.f32.partialorder %v4613_v35, 0.0 }
 0x766   :  { %4208 = vpow2.f32 %v2135_v58  ;;  %2209 = vadd.xlane.f32.xlu1 %v2158_v8  ;;  %v2131_v8 = vmul.f32 1.442695, %v2111_v22 }
 0x769   :  { %v2075_v23 = vpop.permute.xlu0 %2074 }
 0x76a   :  { %v2116_v21 = vsub.f32 %v5948_v48, %v2075_v23  ;;  %v2065_v44 = vpop.permute.xlu1 %2064 }
 0x76b   :  { %v2114_v47 = vsub.f32 %v5957_v30, %v2065_v44 }
 0x76c   :  { %v6157_v27 = vpop.eup %4208  ;;  %v2141_v50 = vmul.f32 1.442695, %v2116_v21 }
 0x76d   :  { %v2137_v31 = vmul.f32 1.442695, %v2114_v47  ;;  %v2161_v26 = vsel %vm7882_vm10, %v6157_v27, 0.0  ;;  %vm7884_vm10 = vcmp.gt.f32.partialorder %v7816_v11, 0.0 }
 0x76e   :  { %4210 = vpow2.f32 %v2141_v50  ;;  %2215 = vadd.xlane.f32.xlu1 %v2161_v26 }
 0x76f   :  { %4212 = vpow2.f32 %v2137_v31 }
 0x771   :  { %v2090_v58 = vpop.permute.xlu0 %2089 }
 0x772   :  { %v2119_v20 = vsub.f32 %v5965_v9, %v2090_v58  ;;  %v2080_v48 = vpop.permute.xlu1 %2079 }
 0x773   :  { %v2117_v58 = vsub.f32 %v5974_v45, %v2080_v48  ;;  %v6200_v48 = vld [vmem:[#allocation2 + $0x78] sm:$0xff] }
 0x774   :  { %v6164_v23 = vpop.eup %4210  ;;  %v2147_v30 = vmul.f32 1.442695, %v2119_v20 }
 0x775   :  { %v6166_v44 = vpop.eup %4212  ;;  %v2164_v21 = vsel %vm7883_vm5, %v6164_v23, 0.0  ;;  %vm7885_vm5 = vcmp.gt.f32.partialorder %v4541_v37, 0.0 }
 0x776   :  { %4214 = vpow2.f32 %v2147_v30  ;;  %2221 = vadd.xlane.f32.xlu1 %v2164_v21  ;;  %v2162_v21 = vsel %vm7886_vm6, %v6166_v44, 0.0  ;;  %vm7888_vm6 = vcmp.gt.f32.partialorder %v7870_v28, 0.0  ;;  %v2171_v30 = vld [vmem:[#allocation3] sm:$0xff] }
 0x777   :  { %4216 = vpow2.f32 %v2131_v8  ;;  %v2143_v8 = vmul.f32 1.442695, %v2117_v58  ;;  %v7889_v58 = vsub.f32 %v5992_v24, %v5995_v61 }
 0x779   :  { %2205 = vadd.xlane.f32.xlu2 %v2156_v43 }
 0x77a   :  { %v2095_v9 = vpop.permute.xlu1 %2094 }
 0x77b   :  { %v2120_v47 = vsub.f32 %v5985_v12, %v2095_v9 }
 0x77c   :  { %v6177_v50 = vpop.eup %4214 }
 0x77d   :  { %v6179_v31 = vpop.eup %4216  ;;  %v2149_v26 = vmul.f32 1.442695, %v2120_v47  ;;  %v2167_v22 = vsel %vm7884_vm10, %v6177_v50, 0.0  ;;  %vm7887_vm10 = vcmp.gt.f32.partialorder %v4615_v36, 0.0 }
 0x77e   :  { %2227 = vadd.xlane.f32.xlu1 %v2167_v22  ;;  %v2159_v20 = vsel %vm7885_vm5, %v6179_v31, 0.0  ;;  %vm7892_vm5 = vcmp.gt.f32.partialorder %v7808_v57, 0.0 }
 0x77f   :  { %4218 = vpow2.f32 %v2149_v26 }
 0x780   :  { %4220 = vpow2.f32 %v2143_v8 }
 0x781   :  { %2211 = vadd.xlane.f32.xlu2 %v2159_v20  ;;  %v1995_v20 = vmul.f32 1.442695, %v7889_v58 }
 0x783   :  { %4222 = vpow2.f32 %v1995_v20 }
 0x785   :  { %v6188_v12 = vpop.eup %4218 }
 0x786   :  { %v6195_v43 = vpop.eup %4220  ;;  %v2168_v22 = vsel %vm7888_vm6, %v6188_v12, 0.0  ;;  %vm7897_vm6 = vcmp.gt.f32.partialorder %v4642_v63, 0.0 }
 0x787   :  { %v2165_v45 = vsel %vm7887_vm10, %v6195_v43, 0.0  ;;  %vm7894_vm10 = vcmp.gt.f32.partialorder %v7810_v55, 0.0 }
 0x789   :  { %2217 = vadd.xlane.f32.xlu2 %v2162_v21  ;;  %v4223_v21 = vpop.eup %4222 }
 0x78a   :  { %v2187_v1 = vmul.f32 %v4223_v21, %v2171_v30  ;;  %v7891_v30 = vsub.f32 %v6063_v19, %v6069_v51  ;;  %v7893_v19 = vsub.f32 %v6090_v10, %v6096_v6 }
 0x78c   :  { %v2015_v51 = vmul.f32 1.442695, %v7893_v19 }
 0x791   :  { %2223 = vadd.xlane.f32.xlu2 %v2165_v45 }
 0x793   :  { %v1962_v9 = vpop.xlane.xlu2 %1961 }
 0x794   :  { %v6203_v47 = vmax.f32 %v6200_v48, %v1962_v9 }
 0x796   :  { %2573 = vst.msk [vmem:[#allocation2 + $0x78] sm:$0xff] %vm2251_vm14, %v6203_v47  ;;  %2104 = vperm.xlu0 %4053, %v6203_v47  }
 0x799   :  { %2229 = vadd.xlane.f32.xlu2 %v2168_v22  ;;  %v7890_v22 = vsub.f32 %v6036_v56, %v6042_v41 }
 0x79b   :  { %v2040_v8 = vpop.permute.xlu2 %2039  ;;  %v2003_v24 = vmul.f32 1.442695, %v7890_v22 }
 0x79c   :  { %v2109_v45 = vsub.f32 %v5922_v34, %v2040_v8  ;;  %v2009_v8 = vmul.f32 1.442695, %v7891_v30 }
 0x79e   :  { %v2127_v26 = vmul.f32 1.442695, %v2109_v45 }
 0x7a0   :  { %4224 = vpow2.f32 %v2127_v26 }
 0x7a1   :  { %4226 = vpow2.f32 %v2003_v24 }
 0x7a3   :  { %v2055_v9 = vpop.permute.xlu2 %2054 }
 0x7a4   :  { %v2112_v61 = vsub.f32 %v5935_v49, %v2055_v9  ;;  %v7895_v9 = vsub.f32 %v6012_v0, %v6015_v14  ;;  %v7898_v14 = vsub.f32 %v6029_v38, %v6032_v18  ;;  %v7901_v38 = vsub.f32 %v6056_v25, %v6059_v46 }
 0x7a5   :  { %v7904_v25 = vsub.f32 %v6083_v3, %v6086_v62  ;;  %v2172_v62 = vld [vmem:[#allocation3 + $0x8] sm:$0xff] }
 0x7a6   :  { %v2133_v34 = vmul.f32 1.442695, %v2112_v61  ;;  %v6223_v20 = vpop.eup %4224  ;;  %v2001_v22 = vmul.f32 1.442695, %v7895_v9  ;;  %v2007_v0 = vmul.f32 1.442695, %v7898_v14 }
 0x7a7   :  { %v2157_v41 = vsel %vm7892_vm5, %v6223_v20, 0.0  ;;  %v6232_v56 = vpop.eup %4226  ;;  %vm7900_vm5 = vcmp.gt.f32.partialorder %v4677_v52, 0.0  ;;  %v2019_v9 = vmul.f32 1.442695, %v7904_v25 }
 0x7a8   :  { %4228 = vpow2.f32 %v2133_v34  ;;  %v2174_v34 = vld [vmem:[#allocation3 + $0x18] sm:$0xff] }
 0x7a9   :  { %4230 = vpow2.f32 %v2009_v8 }
 0x7ab   :  { %v2070_v58 = vpop.permute.xlu2 %2069 }
 0x7b1   :  { %2099 = vperm.xlu2 %4052, %v6115_v15   ;;  %v2204_v33 = vpop.xlane.xlu1 %2203 }
 0x7b2   :  { %v2235_v11 = vadd.f32 %v2204_v33, %v2187_v1  ;;  %v6235_v1 = vpop.eup %4228 }
 0x7b3   :  { %v2085_v33 = vpop.permute.xlu2 %2084  ;;  %v2160_v26 = vsel %vm7894_vm10, %v6235_v1, 0.0  ;;  %vm7908_vm10 = vcmp.gt.f32.partialorder %v7750_v40, 0.0 }
 0x7b4   :  { %2252 = vst.msk [vmem:[#allocation3] sm:$0xff] %vm2251_vm14, %v2235_v11  ;;  %v2115_v11 = vsub.f32 %v5953_v39, %v2070_v58  ;;  %v2118_v39 = vsub.f32 %v5970_v32, %v2085_v33  ;;  %v7896_v32 = vsub.f32 %v6112_v5, %v6118_v4  ;;  %v7903_v33 = vsub.f32 %v6002_v29, %v6005_v53  ;;  %v2180_v53 = vld [vmem:[#allocation3 + $0x48] sm:$0xff] }
 0x7b6   :  { %v2139_v49 = vmul.f32 1.442695, %v2115_v11  ;;  %v2145_v45 = vmul.f32 1.442695, %v2118_v39  ;;  %v2021_v6 = vmul.f32 1.442695, %v7896_v32 }
 0x7b7   :  { %v1997_v19 = vmul.f32 1.442695, %v7903_v33  ;;  %v2175_v33 = vld [vmem:[#allocation3 + $0x20] sm:$0xff] }
 0x7b8   :  { %4232 = vpow2.f32 %v2139_v49 }
 0x7b9   :  { %2286 = vperm.xlu2 %4052, %v4223_v21   ;;  %v6244_v21 = vpop.eup %4230  ;;  %4234 = vpow2.f32 %v2015_v51  ;;  %v2177_v51 = vld [vmem:[#allocation3 + $0x30] sm:$0xff] }
 0x7ba   :  { %4236 = vpow2.f32 %v2145_v45  ;;  %v4371_v45 = vld [vmem:[%s7585_s3] sm:$0xff] }
 0x7bb   :  { %4238 = vpow2.f32 %v2001_v22 }
 0x7bc   :  { %4240 = vpow2.f32 %v2021_v6 }
 0x7bd   :  { %4242 = vpow2.f32 %v2007_v0 }
 0x7be   :  { %v6250_v10 = vpop.eup %4232 }
 0x7bf   :  { %v2163_v24 = vsel %vm7897_vm6, %v6250_v10, 0.0  ;;  %v6258_v61 = vpop.eup %4234  ;;  %vm7960_vm6 = vcmp.gt.f32.partialorder %v4541_v37, 0.0 }
 0x7c0   :  { %2207 = vadd.xlane.f32.xlu0 %v2157_v41  ;;  %v6264_v58 = vpop.eup %4236  ;;  %v2013_v41 = vmul.f32 1.442695, %v7901_v38  ;;  %v4373_v38 = vld [vmem:[%s7585_s3 + $0x30] sm:$0xff] }
 0x7c1   :  { %2306 = vperm.xlu2 %4052, %v6232_v56   ;;  %v6266_v5 = vpop.eup %4238  ;;  %v2166_v4 = vsel %vm7900_vm5, %v6264_v58, 0.0  ;;  %vm7961_vm5 = vcmp.gt.f32.partialorder %v7808_v57, 0.0 }
 0x7c2   :  { %7899 = vst [vmem:[#allocation58_spill] sm:$0xff] %v6266_v5  ;;  %v6271_v30 = vpop.eup %4240  ;;  %v2190_v8 = vmul.f32 %v6266_v5, %v2174_v34  ;;  %4244 = vpow2.f32 %v2013_v41 }
 0x7c3   :  { %v6279_v49 = vpop.eup %4242  ;;  %4246 = vpow2.f32 %v1997_v19  ;;  %v2191_v19 = vmul.f32 %v6232_v56, %v2175_v33 }
 0x7c4   :  { %7902 = vst [vmem:[#allocation59_spill] sm:$0xff] %v6279_v49  ;;  %v2193_v39 = vmul.f32 %v6279_v49, %v2177_v51  ;;  %4248 = vpow2.f32 %v2019_v9  ;;  %v2181_v9 = vld [vmem:[#allocation3 + $0x50] sm:$0xff] }
 0x7c8   :  { %2213 = vadd.xlane.f32.xlu0 %v2160_v26  ;;  %v6293_v29 = vpop.eup %4244 }
 0x7c9   :  { %2321 = vperm.xlu2 %4052, %v6244_v21   ;;  %7905 = vst [vmem:[#allocation60_spill] sm:$0xff] %v6293_v29  ;;  %v6295_v22 = vpop.eup %4246  ;;  %v2196_v32 = vmul.f32 %v6293_v29, %v2180_v53  ;;  %v2197_v53 = vmul.f32 %v6258_v61, %v2181_v9 }
 0x7ca   :  { %7906 = vst [vmem:[#allocation61_spill] sm:$0xff] %v6295_v22  ;;  %v2188_v3 = vmul.f32 %v6295_v22, %v2172_v62  ;;  %v6661_v22 = vld [vmem:[#allocation2 + $0x28] sm:$0xff] }
 0x7d0   :  { %2219 = vadd.xlane.f32.xlu0 %v2163_v24  ;;  %v4372_v24 = vld [vmem:[%s7585_s3 + $0x18] sm:$0xff] }
 0x7d1   :  { %2336 = vperm.xlu2 %4052, %v6258_v61  }
 0x7d8   :  { %2225 = vadd.xlane.f32.xlu0 %v2166_v4  ;;  %v6304_v4 = vpop.eup %4248 }
 0x7d9   :  { %2351 = vperm.xlu2 %4052, %v6271_v30   ;;  %v2210_v11 = vpop.xlane.xlu1 %2209  ;;  %7907 = vst [vmem:[#allocation62_spill] sm:$0xff] %v6304_v4 }
 0x7da   :  { %v2238_v18 = vadd.f32 %v2210_v11, %v2190_v8  ;;  %v2183_v8 = vld [vmem:[#allocation3 + $0x60] sm:$0xff] }
 0x7db   :  { %v2199_v11 = vmul.f32 %v6304_v4, %v2183_v8 }
 0x7dc   :  { %2255 = vst.msk [vmem:[#allocation3 + $0x18] sm:$0xff] %vm2251_vm14, %v2238_v18 }
 0x7e1   :  { %v2216_v26 = vpop.xlane.xlu1 %2215  ;;  %2388 = vrot.lane.b32.xlu2 %v4371_v45, %s4394_s28 }
 0x7e2   :  { %v2241_v46 = vadd.f32 %v2216_v26, %v2193_v39  ;;  %v2178_v26 = vld [vmem:[#allocation3 + $0x38] sm:$0xff] }
 0x7e3   :  { %v2194_v45 = vmul.f32 %v6244_v21, %v2178_v26  ;;  %v7912_v26 = vld [vmem:[#allocation52_spill] sm:$0xff] }
 0x7e4   :  { %2258 = vst.msk [vmem:[#allocation3 + $0x30] sm:$0xff] %vm2251_vm14, %v2241_v46 }
 0x7e9   :  { %v2222_v6 = vpop.xlane.xlu1 %2221  ;;  %2394 = vrot.lane.b32.xlu2 %v4372_v24, %s4394_s28 }
 0x7ea   :  { %v2244_v14 = vadd.f32 %v2222_v6, %v2196_v32 }
 0x7ec   :  { %2261 = vst.msk [vmem:[#allocation3 + $0x48] sm:$0xff] %vm2251_vm14, %v2244_v14  ;;  %v2206_v0 = vpop.xlane.xlu2 %2205  ;;  %v2184_v14 = vld [vmem:[#allocation3 + $0x68] sm:$0xff] }
 0x7ed   :  { %v2236_v34 = vadd.f32 %v2206_v0, %v2188_v3  ;;  %v2200_v3 = vmul.f32 %v6271_v30, %v2184_v14  ;;  %v7910_v30 = vld [vmem:[#allocation10_spill] sm:$0xff] }
 0x7ef   :  { %2253 = vst.msk [vmem:[#allocation3 + $0x8] sm:$0xff] %vm2251_vm14, %v2236_v34 }
 0x7f1   :  { %v2228_v18 = vpop.xlane.xlu1 %2227  ;;  %2400 = vrot.lane.b32.xlu2 %v4373_v38, %s4394_s28 }
 0x7f2   :  { %v2247_v41 = vadd.f32 %v2228_v18, %v2199_v11  ;;  %v7909_v11 = vld [vmem:[#allocation7_spill] sm:$0xff] }
 0x7f4   :  { %2264 = vst.msk [vmem:[#allocation3 + $0x60] sm:$0xff] %vm2251_vm14, %v2247_v41  ;;  %v2212_v51 = vpop.xlane.xlu2 %2211  ;;  %v1981_v41 = vsub.f32 %v7910_v30, %v6020_v17 }
 0x7f5   :  { %v2239_v39 = vadd.f32 %v2212_v51, %v2191_v19 }
 0x7f7   :  { %2256 = vst.msk [vmem:[#allocation3 + $0x20] sm:$0xff] %vm2251_vm14, %v2239_v39  ;;  %v1999_v39 = vmul.f32 1.442695, %v1981_v41 }
 0x7fc   :  { %v2218_v46 = vpop.xlane.xlu2 %2217 }
 0x7fd   :  { %v2242_v25 = vadd.f32 %v2218_v46, %v2194_v45  ;;  %v7913_v45 = vld [vmem:[#allocation51_spill] sm:$0xff] }
 0x7fe   :  { %v1984_v46 = vsub.f32 %v7913_v45, %v7912_v26  ;;  %v7918_v26 = vld [vmem:[#allocation57_spill] sm:$0xff] }
 0x7ff   :  { %2259 = vst.msk [vmem:[#allocation3 + $0x38] sm:$0xff] %vm2251_vm14, %v2242_v25  ;;  %v1993_v45 = vsub.f32 %v7918_v26, %v6115_v15  ;;  %v4376_v15 = vld [vmem:[%s7585_s3 + $0x8] sm:$0xff] }
 0x800   :  { %v2005_v25 = vmul.f32 1.442695, %v1984_v46  ;;  %v2179_v46 = vld [vmem:[#allocation3 + $0x40] sm:$0xff] }
 0x804   :  { %v2224_v32 = vpop.xlane.xlu2 %2223 }
 0x805   :  { %v2245_v6 = vadd.f32 %v2224_v32, %v2197_v53  ;;  %v7914_v53 = vld [vmem:[#allocation54_spill] sm:$0xff]  ;;  %v7915_v32 = vld [vmem:[#allocation53_spill] sm:$0xff] }
 0x806   :  { %v1987_v17 = vsub.f32 %v7915_v32, %v7914_v53 }
 0x807   :  { %2262 = vst.msk [vmem:[#allocation3 + $0x50] sm:$0xff] %vm2251_vm14, %v2245_v6  ;;  %v2173_v6 = vld [vmem:[#allocation3 + $0x10] sm:$0xff] }
 0x808   :  { %v2105_v56 = vpop.permute.xlu0 %2104 }
 0x809   :  { %v2122_v24 = vsub.f32 %v6130_v54, %v2105_v56 }
 0x80b   :  { %v2153_v62 = vmul.f32 1.442695, %v2122_v24  ;;  %v2011_v24 = vmul.f32 1.442695, %v1987_v17 }
 0x80c   :  { %v2230_v0 = vpop.xlane.xlu2 %2229 }
 0x80d   :  { %4250 = vpow2.f32 %v2153_v62  ;;  %v2248_v21 = vadd.f32 %v2230_v0, %v2200_v3  ;;  %v4374_v0 = vld [vmem:[%s7585_s3 + $0x10] sm:$0xff] }
 0x80f   :  { %2265 = vst.msk [vmem:[#allocation3 + $0x68] sm:$0xff] %vm2251_vm14, %v2248_v21  ;;  %v7916_v21 = vld [vmem:[#allocation56_spill] sm:$0xff] }
 0x813   :  { %v6322_v34 = vpop.eup %4250 }
 0x814   :  { %v2100_v8 = vpop.permute.xlu2 %2099  ;;  %v2170_v61 = vsel %vm7908_vm10, %v6322_v34, 0.0  ;;  %vm7962_vm10 = vcmp.gt.f32.partialorder %v7810_v55, 0.0 }
 0x815   :  { %v2121_v18 = vsub.f32 %v7909_v11, %v2100_v8  ;;  %2233 = vadd.xlane.f32.xlu1 %v2170_v61  ;;  %v7917_v8 = vld [vmem:[#allocation55_spill] sm:$0xff]  ;;  %v2176_v11 = vld [vmem:[#allocation3 + $0x28] sm:$0xff] }
 0x816   :  { %v1990_v61 = vsub.f32 %v7917_v8, %v7916_v21  ;;  %v7919_v21 = vsub.f32 %v6200_v48, %v6203_v47 }
 0x817   :  { %v2151_v54 = vmul.f32 1.442695, %v2121_v18 }
 0x818   :  { %v2025_v8 = vmul.f32 1.442695, %v7919_v21 }
 0x819   :  { %4252 = vpow2.f32 %v2151_v54  ;;  %v2017_v54 = vmul.f32 1.442695, %v1990_v61 }
 0x81a   :  { %4254 = vpow2.f32 %v1999_v39  ;;  %v4375_v39 = vld [vmem:[%s7585_s3 + $0x28] sm:$0xff] }
 0x81b   :  { %4256 = vpow2.f32 %v2005_v25 }
 0x81c   :  { %4258 = vpow2.f32 %v2011_v24 }
 0x81d   :  { %4260 = vpow2.f32 %v2017_v54 }
 0x81f   :  { %v6328_v38 = vpop.eup %4252 }
 0x820   :  { %v2169_v19 = vsel %vm133_vm12, %v6328_v38, 0.0  ;;  %v3955_v51 = vpack.c.bf16 %v6322_v34, %v6328_v38  ;;  %v4255_v9 = vpop.eup %4254 }
 0x821   :  { %2231 = vadd.xlane.f32.xlu0 %v2169_v19  ;;  %v2189_v56 = vmul.f32 %v4255_v9, %v2173_v6  ;;  %v4257_v3 = vpop.eup %4256  ;;  %v2182_v6 = vld [vmem:[#allocation3 + $0x58] sm:$0xff] }
 0x822   :  { %v2192_v18 = vmul.f32 %v4257_v3, %v2176_v11  ;;  %v4259_v19 = vpop.eup %4258  ;;  %v2186_v11 = vld [vmem:[#allocation3 + $0x78] sm:$0xff] }
 0x823   :  { %v2195_v25 = vmul.f32 %v4259_v19, %v2179_v46  ;;  %v4261_v17 = vpop.eup %4260 }
 0x82e   :  { %2296 = vperm.xlu1 %4054, %v4255_v9   ;;  %v2023_v9 = vmul.f32 1.442695, %v1993_v45  ;;  %v6376_v45 = vpop.permute.xlu2 %2286 }
 0x82f   :  { %7921 = vst [vmem:[#allocation10_spill] sm:$0xff] %v6376_v45 }
 0x830   :  { %4262 = vpow2.f32 %v2023_v9 }
 0x831   :  { %4264 = vpow2.f32 %v2025_v8  ;;  %v7931_v8 = vpack.c.bf16 %v6145_v2, %v6135_v7  ;;  %v3946_v7 = vpack.c.bf16 %v6164_v23, %v6250_v10 }
 0x833   :  { %v2208_v14 = vpop.xlane.xlu0 %2207 }
 0x834   :  { %v2237_v62 = vadd.f32 %v2208_v14, %v2189_v56  ;;  %v2198_v56 = vmul.f32 %v4261_v17, %v2182_v6 }
 0x835   :  { %2392 = vrot.lane.b32.xlu0 %v4374_v0, %s4394_s28  ;;  %v4378_v0 = vld [vmem:[%s7585_s3 + $0x38] sm:$0xff] }
 0x836   :  { %2254 = vst.msk [vmem:[#allocation3 + $0x10] sm:$0xff] %vm2251_vm14, %v2237_v62  ;;  %2311 = vperm.xlu1 %4054, %v4257_v3   ;;  %v4263_v62 = vpop.eup %4262  ;;  %v4377_v3 = vld [vmem:[%s7585_s3 + $0x20] sm:$0xff]  ;;  %v6379_v48 = vpop.permute.xlu2 %2306 }
 0x837   :  { %v6372_v61 = vpop.eup %4264  ;;  %7922 = vst [vmem:[#allocation52_spill] sm:$0xff] %v6379_v48 }
 0x838   :  { %7920 = vst [vmem:[#allocation7_spill] sm:$0xff] %v6372_v61 }
 0x83b   :  { %v2214_v30 = vpop.xlane.xlu0 %2213 }
 0x83c   :  { %v2240_v41 = vadd.f32 %v2214_v30, %v2192_v18  ;;  %v2202_v18 = vmul.f32 %v6372_v61, %v2186_v11 }
 0x83d   :  { %2398 = vrot.lane.b32.xlu0 %v4375_v39, %s4394_s28 }
 0x83e   :  { %2257 = vst.msk [vmem:[#allocation3 + $0x28] sm:$0xff] %vm2251_vm14, %v2240_v41  ;;  %2326 = vperm.xlu1 %4054, %v4259_v19   ;;  %v2185_v41 = vld [vmem:[#allocation3 + $0x70] sm:$0xff] }
 0x83f   :  { %v2201_v19 = vmul.f32 %v4263_v62, %v2185_v41  ;;  %v6685_v41 = vld [vmem:[#allocation2 + $0x40] sm:$0xff] }
 0x840   :  { %7973 = vst [vmem:[#allocation80_spill] sm:$0xff] %v6685_v41 }
 0x843   :  { %v2220_v53 = vpop.xlane.xlu0 %2219 }
 0x844   :  { %v2243_v32 = vadd.f32 %v2220_v53, %v2195_v25  ;;  %v6385_v25 = vpop.permute.xlu2 %2321 }
 0x845   :  { %7925 = vst [vmem:[#allocation53_spill] sm:$0xff] %v6385_v25 }
 0x846   :  { %2260 = vst.msk [vmem:[#allocation3 + $0x40] sm:$0xff] %vm2251_vm14, %v2243_v32  ;;  %2341 = vperm.xlu1 %4054, %v4261_v17  }
 0x84b   :  { %v2226_v24 = vpop.xlane.xlu0 %2225 }
 0x84c   :  { %v2246_v14 = vadd.f32 %v2226_v24, %v2198_v56  ;;  %v6389_v53 = vpop.permute.xlu2 %2336 }
 0x84d   :  { %7927 = vst [vmem:[#allocation55_spill] sm:$0xff] %v6389_v53  ;;  %v6709_v53 = vld [vmem:[#allocation2 + $0x58] sm:$0xff] }
 0x84e   :  { %2263 = vst.msk [vmem:[#allocation3 + $0x58] sm:$0xff] %vm2251_vm14, %v2246_v14  ;;  %2356 = vperm.xlu1 %4054, %v4263_v62  }
 0x84f   :  { %7975 = vst [vmem:[#allocation82_spill] sm:$0xff] %v6709_v53 }
 0x854   :  { %v6393_v17 = vpop.permute.xlu2 %2351 }
 0x855   :  { %7929 = vst [vmem:[#allocation63_spill] sm:$0xff] %v6393_v17 }
 0x856   :  { %2390 = vrot.lane.b32.xlu1 %v4376_v15, %s4394_s28 }
 0x85c   :  { %v2389_v56 = vpop.permute.xlu2 %2388 }
 0x85e   :  { %2396 = vrot.lane.b32.xlu1 %v4377_v3, %s4394_s28 }
 0x864   :  { %v2395_v62 = vpop.permute.xlu2 %2394 }
 0x866   :  { %2402 = vrot.lane.b32.xlu1 %v4378_v0, %s4394_s28 }
 0x86c   :  { %v2401_v0 = vpop.permute.xlu2 %2400 }
 0x888   :  { %v2234_v54 = vpop.xlane.xlu1 %2233 }
 0x889   :  { %v2250_v30 = vadd.f32 %v2234_v54, %v2202_v18  ;;  %v3937_v18 = vpack.c.bf16 %v6150_v16, %v6223_v20  ;;  %v3949_v16 = vpack.c.bf16 %v6264_v58, %v6195_v43  ;;  %v6687_v54 = vld [vmem:[#allocation2 + $0x50] sm:$0xff] }
 0x88b   :  { %2267 = vst.msk [vmem:[#allocation3 + $0x78] sm:$0xff] %vm2251_vm14, %v2250_v30  ;;  %v3940_v30 = vpack.c.bf16 %v6235_v1, %v6179_v31  ;;  %v7939_v31 = vpack.c.bf16 %v6188_v12, %v6177_v50 }
 0x894   :  { %v2232_v39 = vpop.xlane.xlu0 %2231 }
 0x895   :  { %v2249_v26 = vadd.f32 %v2232_v39, %v2201_v19  ;;  %v7935_v19 = vpack.c.bf16 %v6166_v44, %v6157_v27 }
 0x897   :  { %2266 = vst.msk [vmem:[#allocation3 + $0x70] sm:$0xff] %vm2251_vm14, %v2249_v26  ;;  %v7683_v26 = vmov 3   ;;  %vm7954_vm14 = vcmp.gt.f32.partialorder %v7857_v13, 0.0 }
 0x898   :  { %4055 = vset.pattern.permute.xlu2 %v7683_v26  ;;  %4056 = vset.pattern.permute.xlu1 %v7683_v26 }
 0x899   :  { %4057 = vset.pattern.permute.xlu0 %v7683_v26 }
 0x8a0   :  { %v6381_v47 = vpop.permute.xlu1 %2296 }
 0x8a1   :  { %7923 = vst [vmem:[#allocation51_spill] sm:$0xff] %v6381_v47 }
 0x8a7   :  { %v2393_v15 = vpop.permute.xlu0 %2392 }
 0x8a8   :  { %v6383_v46 = vpop.permute.xlu1 %2311 }
 0x8a9   :  { %7924 = vst [vmem:[#allocation54_spill] sm:$0xff] %v6383_v46 }
 0x8af   :  { %v2399_v21 = vpop.permute.xlu0 %2398 }
 0x8b0   :  { %v6387_v9 = vpop.permute.xlu1 %2326 }
 0x8b1   :  { %7926 = vst [vmem:[#allocation56_spill] sm:$0xff] %v6387_v9 }
 0x8b8   :  { %v6391_v32 = vpop.permute.xlu1 %2341 }
 0x8b9   :  { %7928 = vst [vmem:[#allocation57_spill] sm:$0xff] %v6391_v32 }
 0x8c0   :  { %v6395_v6 = vpop.permute.xlu1 %2356 }
 0x8c1   :  { %7930 = vst [vmem:[#allocation64_spill] sm:$0xff] %v6395_v6 }
 0x8c8   :  { %v2391_v24 = vpop.permute.xlu1 %2390 }
 0x8d0   :  { %v2397_v14 = vpop.permute.xlu1 %2396 }
 0x8d8   :  { %v2403_v3 = vpop.permute.xlu1 %2402 }
 0x8d9   :  { %2412 = vmatpush.bf16.msra.mxu2 %v2403_v3 }
 0x8dd   :  { %2413 = vmatpush.bf16.msra.mxu2 %v2401_v0  ;;  %v2577_v0 = vld [vmem:[%s7582_s1 + $0x18] sm:$0xff] }
 0x8e1   :  { %2414 = vmatpush.bf16.msra.mxu2 %v2399_v21  ;;  %v2575_v21 = vld [vmem:[%s7582_s1 + $0x8] sm:$0xff] }
 0x8e5   :  { %2415 = vmatpush.bf16.msra.mxu2 %v2397_v14 }
 0x8e9   :  { %2416 = vmatpush.bf16.msra.mxu2 %v2395_v62 }
 0x8ed   :  { %2417 = vmatpush.bf16.msra.mxu2 %v2393_v15  ;;  %v2574_v15 = vld [vmem:[%s7582_s1] sm:$0xff] }
 0x8f1   :  { %2418 = vmatpush.bf16.msra.mxu2 %v2391_v24 }
 0x8f5   :  { %2419 = vmatpush.bf16.msra.mxu2 %v2389_v56 }
 0x8f8   :  { %3935 = vmatmul.msk.bf16.vlgmr.msra.gmra.mxu2 %vm5005_vm13, %v7931_v8 }
 0x908   :  { %3938 = vmatmul.msk.bf16.gmra.mxu2 %vm5025_vm15, %v3937_v18  ;;  %v2578_v18 = vld [vmem:[%s7582_s1 + $0x20] sm:$0xff] }
 0x918   :  { %3941 = vmatmul.msk.bf16.gmra.mxu2 %vm5061_vm4, %v3940_v30  ;;  %v2579_v30 = vld [vmem:[%s7582_s1 + $0x28] sm:$0xff] }
 0x928   :  { %3944 = vmatmul.msk.bf16.gmra.mxu2 %vm5114_vm11, %v7935_v19  ;;  %v2576_v19 = vld [vmem:[%s7582_s1 + $0x10] sm:$0xff] }
 0x938   :  { %3947 = vmatmul.msk.bf16.gmra.mxu2 %vm5163_vm2, %v3946_v7  ;;  %v2580_v7 = vld [vmem:[%s7582_s1 + $0x30] sm:$0xff] }
 0x948   :  { %3950 = vmatmul.msk.bf16.gmra.mxu2 %vm5209_vm0, %v3949_v16  ;;  %v2582_v16 = vld [vmem:[%s7582_s1 + $0x40] sm:$0xff] }
 0x958   :  { %3953 = vmatmul.msk.bf16.gmra.mxu2 %vm5250_vm9, %v7939_v31  ;;  %v2581_v31 = vld [vmem:[%s7582_s1 + $0x38] sm:$0xff] }
 0x968   :  { %3956 = vmatmul.msk.bf16.gmra.mxu2 %vm5274_vm8, %v3955_v51 }
 0x97b   :  { %v2421_v23 = vpop.f32.mrf.mxu2 }
 0x97c   :  { %2477 = vrot.lane.b32.xlu0 %v2421_v23, %s4395_s16  ;;  %v2583_v23 = vld [vmem:[%s7582_s1 + $0x48] sm:$0xff] }
 0x983   :  { %v2423_v44 = vpop.f32.mrf.mxu2 }
 0x984   :  { %2479 = vrot.lane.b32.xlu2 %v2423_v44, %s4395_s16  ;;  %v2585_v44 = vld [vmem:[%s7582_s1 + $0x58] sm:$0xff] }
 0x98b   :  { %v2426_v43 = vpop.f32.mrf.mxu2 }
 0x98c   :  { %2481 = vrot.lane.b32.xlu1 %v2426_v43, %s4395_s16  ;;  %v2584_v43 = vld [vmem:[%s7582_s1 + $0x50] sm:$0xff] }
 0x993   :  { %v2428_v50 = vpop.f32.mrf.mxu2 }
 0x994   :  { %2483 = vrot.lane.b32.xlu0 %v2428_v50, %s4395_s16  ;;  %v2586_v50 = vld [vmem:[%s7582_s1 + $0x60] sm:$0xff] }
 0x99b   :  { %v2431_v12 = vpop.f32.mrf.mxu2 }
 0x99c   :  { %2485 = vrot.lane.b32.xlu2 %v2431_v12, %s4395_s16  ;;  %v2587_v12 = vld [vmem:[%s7582_s1 + $0x68] sm:$0xff] }
 0x9a3   :  { %v2433_v10 = vpop.f32.mrf.mxu2 }
 0x9a4   :  { %2487 = vrot.lane.b32.xlu1 %v2433_v10, %s4395_s16 }
 0x9ab   :  { %v2436_v58 = vpop.f32.mrf.mxu2 }
 0x9ac   :  { %2489 = vrot.lane.b32.xlu0 %v2436_v58, %s4395_s16 }
 0x9b3   :  { %v2438_v34 = vpop.f32.mrf.mxu2 }
 0x9b4   :  { %2491 = vrot.lane.b32.xlu2 %v2438_v34, %s4395_s16 }
 0x9bb   :  { %v2441_v38 = vpop.f32.mrf.mxu2 }
 0x9bc   :  { %2493 = vrot.lane.b32.xlu1 %v2441_v38, %s4395_s16 }
 0x9c3   :  { %v2443_v51 = vpop.f32.mrf.mxu2 }
 0x9c4   :  { %2495 = vrot.lane.b32.xlu0 %v2443_v51, %s4395_s16 }
 0x9cb   :  { %v2446_v56 = vpop.f32.mrf.mxu2 }
 0x9cc   :  { %2497 = vrot.lane.b32.xlu2 %v2446_v56, %s4395_s16 }
 0x9d3   :  { %v2448_v24 = vpop.f32.mrf.mxu2 }
 0x9d4   :  { %2499 = vrot.lane.b32.xlu1 %v2448_v24, %s4395_s16 }
 0x9db   :  { %v2451_v14 = vpop.f32.mrf.mxu2 }
 0x9dc   :  { %2501 = vrot.lane.b32.xlu0 %v2451_v14, %s4395_s16  ;;  %v6511_v14 = vld [vmem:[%s7583_s2 + $0x3] ss:$0 sm:$0xff] }
 0x9de   :  { %v6494_v10 = vpop.permute.xlu2 %2479 }
 0x9df   :  { %7942 = vst [vmem:[#allocation65_spill] sm:$0xff] %v6494_v10 }
 0x9e3   :  { %v2453_v62 = vpop.f32.mrf.mxu2 }
 0x9e4   :  { %2503 = vrot.lane.b32.xlu2 %v2453_v62, %s4395_s16 }
 0x9eb   :  { %v2456_v3 = vpop.f32.mrf.mxu2 }
 0x9ec   :  { %2593 = vperm.xlu2 %4055, %v2574_v15   ;;  %2505 = vrot.lane.b32.xlu1 %v2456_v3, %s4395_s16 }
 0x9ee   :  { %v6506_v24 = vpop.permute.xlu0 %2477 }
 0x9ef   :  { %7948 = vst [vmem:[#allocation71_spill] sm:$0xff] %v6506_v24 }
 0x9f3   :  { %v2458_v8 = vpop.f32.mrf.mxu2 }
 0x9f4   :  { %2608 = vperm.xlu2 %4055, %v2577_v0   ;;  %2598 = vperm.xlu1 %4056, %v2575_v21  }
 0x9f5   :  { %2507 = vrot.lane.b32.xlu0 %v2458_v8, %s4395_s16 }
 0x9f6   :  { %v6496_v58 = vpop.permute.xlu2 %2485 }
 0x9f7   :  { %7943 = vst [vmem:[#allocation66_spill] sm:$0xff] %v6496_v58 }
 0x9fc   :  { %2613 = vperm.xlu1 %4056, %v2578_v18   ;;  %2618 = vperm.xlu2 %4055, %v2579_v30  }
 0x9fd   :  { %2603 = vperm.xlu0 %4057, %v2576_v19  }
 0x9fe   :  { %v6502_v51 = vpop.permute.xlu1 %2481 }
 0x9ff   :  { %7946 = vst [vmem:[#allocation69_spill] sm:$0xff] %v6502_v51  ;;  %v2589_v51 = vld [vmem:[%s7582_s1 + $0x78] sm:$0xff] }
 0xa04   :  { %2623 = vperm.xlu1 %4056, %v2580_v7   ;;  %2633 = vperm.xlu2 %4055, %v2582_v16  }
 0xa05   :  { %2628 = vperm.xlu0 %4057, %v2581_v31  }
 0xa06   :  { %v6515_v3 = vpop.permute.xlu0 %2483 }
 0xa07   :  { %7950 = vst [vmem:[#allocation73_spill] sm:$0xff] %v6515_v3 }
 0xa0c   :  { %2638 = vperm.xlu1 %4056, %v2583_v23   ;;  %2648 = vperm.xlu2 %4055, %v2585_v44  }
 0xa0d   :  { %2643 = vperm.xlu0 %4057, %v2584_v43  }
 0xa0e   :  { %v6498_v34 = vpop.permute.xlu2 %2491 }
 0xa0f   :  { %7944 = vst [vmem:[#allocation67_spill] sm:$0xff] %v6498_v34  ;;  %v6711_v34 = vld [vmem:[#allocation2 + $0x68] sm:$0xff] }
 0xa14   :  { %2653 = vperm.xlu1 %4056, %v2586_v50  }
 0xa15   :  { %2658 = vperm.xlu0 %4057, %v2587_v12  }
 0xa16   :  { %v6513_v62 = vpop.permute.xlu1 %2487 }
 0xa17   :  { %7949 = vst [vmem:[#allocation72_spill] sm:$0xff] %v6513_v62 }
 0xa1e   :  { %v6525_v16 = vpop.permute.xlu0 %2489 }
 0xa1f   :  { %7953 = vst [vmem:[#allocation74_spill] sm:$0xff] %v6525_v16 }
 0xa26   :  { %v6500_v38 = vpop.permute.xlu2 %2497 }
 0xa27   :  { %7945 = vst [vmem:[#allocation68_spill] sm:$0xff] %v6500_v38 }
 0xa2e   :  { %v6522_v19 = vpop.permute.xlu1 %2493 }
 0xa2f   :  { %7952 = vst [vmem:[#allocation6_spill] sm:$0xff] %v6522_v19 }
 0xa36   :  { %v6535_v12 = vpop.permute.xlu0 %2495 }
 0xa37   :  { %7956 = vst [vmem:[#allocation76_spill] sm:$0xff] %v6535_v12 }
 0xa3e   :  { %v6504_v56 = vpop.permute.xlu2 %2503 }
 0xa3f   :  { %7947 = vst [vmem:[#allocation70_spill] sm:$0xff] %v6504_v56 }
 0xa46   :  { %v2594_v15 = vpop.permute.xlu2 %2593  ;;  %v6532_v50 = vpop.permute.xlu1 %2499 }
 0xa47   :  { %v2672_v0 = vadd.f32 %v6511_v14, %v2594_v15  ;;  %7955 = vst [vmem:[#allocation75_spill] sm:$0xff] %v6532_v50 }
 0xa49   :  { %v2688_v21 = vmul.f32 0.2, %v2672_v0 }
 0xa4b   :  { %v2704_v8 = vmax.f32 %v2672_v0, %v2688_v21 }
 0xa4d   :  { %v6520_v30 = vsel %vm119_vm1, %v2704_v8, -1e+30 }
 0xa4e   :  { %v2609_v7 = vpop.permute.xlu2 %2608  ;;  %2752 = vmax.xlane.f32.xlu0 %v6520_v30  ;;  %v6539_v0 = vpop.permute.xlu0 %2501 }
 0xa4f   :  { %v2675_v31 = vadd.f32 %v6511_v14, %v2609_v7  ;;  %7958 = vst [vmem:[#allocation78_spill] sm:$0xff] %v6539_v0 }
 0xa51   :  { %v2691_v23 = vmul.f32 0.2, %v2675_v31 }
 0xa53   :  { %v2707_v44 = vmax.f32 %v2675_v31, %v2691_v23 }
 0xa55   :  { %v6530_v43 = vsel %vm7954_vm14, %v2707_v44, -1e+30  ;;  %vm7963_vm14 = vcmp.gt.f32.partialorder %v4579_v59, 0.0 }
 0xa56   :  { %2758 = vmax.xlane.f32.xlu0 %v6530_v43  ;;  %v2619_v23 = vpop.permute.xlu2 %2618 }
 0xa57   :  { %v2677_v0 = vadd.f32 %v6511_v14, %v2619_v23 }
 0xa59   :  { %v2693_v6 = vmul.f32 0.2, %v2677_v0 }
 0xa5e   :  { %v6537_v15 = vpop.permute.xlu1 %2505 }
 0xa5f   :  { %7957 = vst [vmem:[#allocation77_spill] sm:$0xff] %v6537_v15 }
 0xa66   :  { %v2599_v21 = vpop.permute.xlu1 %2598 }
 0xa67   :  { %v2673_v8 = vadd.f32 %v6511_v14, %v2599_v21  ;;  %v6542_v7 = vpop.permute.xlu0 %2507 }
 0xa68   :  { %7959 = vst [vmem:[#allocation79_spill] sm:$0xff] %v6542_v7 }
 0xa69   :  { %v2689_v31 = vmul.f32 0.2, %v2673_v8 }
 0xa6b   :  { %v2705_v26 = vmax.f32 %v2673_v8, %v2689_v31  ;;  %v2634_v8 = vpop.permute.xlu2 %2633 }
 0xa6d   :  { %v6546_v44 = vsel %vm120_vm3, %v2705_v26, -1e+30 }
 0xa6e   :  { %2754 = vmax.xlane.f32.xlu2 %v6546_v44  ;;  %v2614_v16 = vpop.permute.xlu1 %2613 }
 0xa6f   :  { %v2676_v12 = vadd.f32 %v6511_v14, %v2614_v16  ;;  %v2604_v3 = vpop.permute.xlu0 %2603 }
 0xa70   :  { %v2674_v10 = vadd.f32 %v6511_v14, %v2604_v3 }
 0xa71   :  { %v2692_v21 = vmul.f32 0.2, %v2676_v12 }
 0xa72   :  { %v2690_v15 = vmul.f32 0.2, %v2674_v10 }
 0xa73   :  { %v2708_v7 = vmax.f32 %v2676_v12, %v2692_v21  ;;  %v2680_v12 = vadd.f32 %v6511_v14, %v2634_v8 }
 0xa74   :  { %v2706_v50 = vmax.f32 %v2674_v10, %v2690_v15  ;;  %v2709_v15 = vmax.f32 %v2677_v0, %v2693_v6  ;;  %v2649_v6 = vpop.permute.xlu2 %2648 }
 0xa75   :  { %v6554_v26 = vsel %vm7960_vm6, %v2708_v7, -1e+30  ;;  %v2696_v19 = vmul.f32 0.2, %v2680_v12  ;;  %vm7964_vm6 = vcmp.gt.f32.partialorder %v4581_v60, 0.0 }
 0xa76   :  { %2760 = vmax.xlane.f32.xlu2 %v6554_v26  ;;  %v2624_v31 = vpop.permute.xlu1 %2623  ;;  %v6559_v16 = vsel %vm7961_vm5, %v2706_v50, -1e+30  ;;  %v6567_v9 = vsel %vm7962_vm10, %v2709_v15, -1e+30  ;;  %v2683_v15 = vadd.f32 %v6511_v14, %v2649_v6  ;;  %vm7965_vm5 = vcmp.gt.f32.partialorder %v4642_v63, 0.0 }
 0xa77   :  { %v2678_v23 = vadd.f32 %v6511_v14, %v2624_v31  ;;  %2756 = vmax.xlane.f32.xlu1 %v6559_v16  ;;  %v2629_v3 = vpop.permute.xlu0 %2628  ;;  %vm7966_vm10 = vcmp.gt.f32.partialorder %v4613_v35, 0.0 }
 0xa78   :  { %v2679_v10 = vadd.f32 %v6511_v14, %v2629_v3  ;;  %v2699_v61 = vmul.f32 0.2, %v2683_v15 }
 0xa79   :  { %v2694_v21 = vmul.f32 0.2, %v2678_v23 }
 0xa7a   :  { %v2695_v7 = vmul.f32 0.2, %v2679_v10 }
 0xa7b   :  { %v2710_v32 = vmax.f32 %v2678_v23, %v2694_v21 }
 0xa7c   :  { %v2711_v50 = vmax.f32 %v2679_v10, %v2695_v7  ;;  %v2712_v10 = vmax.f32 %v2680_v12, %v2696_v19 }
 0xa7d   :  { %v6571_v31 = vsel %vm7963_vm14, %v2710_v32, -1e+30  ;;  %vm7967_vm14 = vcmp.gt.f32.partialorder %v4615_v36, 0.0 }
 0xa7e   :  { %v2639_v62 = vpop.permute.xlu1 %2638  ;;  %2764 = vmax.xlane.f32.xlu0 %v6571_v31  ;;  %v6576_v8 = vsel %vm7964_vm6, %v2711_v50, -1e+30  ;;  %v6585_v50 = vsel %vm7965_vm5, %v2712_v10, -1e+30  ;;  %v2715_v10 = vmax.f32 %v2683_v15, %v2699_v61  ;;  %vm7970_vm5 = vcmp.gt.f32.partialorder %v4677_v52, 0.0  ;;  %v2588_v61 = vld [vmem:[%s7582_s1 + $0x70] sm:$0xff] }
 0xa7f   :  { %v2681_v0 = vadd.f32 %v6511_v14, %v2639_v62  ;;  %2762 = vmax.xlane.f32.xlu1 %v6567_v9  ;;  %2766 = vmax.xlane.f32.xlu2 %v6576_v8  ;;  %v2644_v23 = vpop.permute.xlu0 %2643  ;;  %v6618_v15 = vld [vmem:[#allocation2] sm:$0xff] }
 0xa80   :  { %v2682_v3 = vadd.f32 %v6511_v14, %v2644_v23 }
 0xa81   :  { %v2697_v32 = vmul.f32 0.2, %v2681_v0 }
 0xa82   :  { %v2698_v21 = vmul.f32 0.2, %v2682_v3 }
 0xa83   :  { %v2713_v7 = vmax.f32 %v2681_v0, %v2697_v32 }
 0xa84   :  { %v2714_v46 = vmax.f32 %v2682_v3, %v2698_v21 }
 0xa85   :  { %v6589_v62 = vsel %vm7966_vm10, %v2713_v7, -1e+30  ;;  %v7968_v7 = vld [vmem:[#allocation9_spill] sm:$0xff]  ;;  %vm7971_vm10 = vcmp.gt.f32.partialorder %v7870_v28, 0.0 }
 0xa86   :  { %v2654_v24 = vpop.permute.xlu1 %2653  ;;  %2770 = vmax.xlane.f32.xlu0 %v6589_v62  ;;  %v6594_v19 = vsel %vm7967_vm14, %v2714_v46, -1e+30  ;;  %vm7969_vm6 = vcmp.gt.f32.partialorder %v7968_v7, 0.0  ;;  %v6607_v46 = vsel %vm7970_vm5, %v2715_v10, -1e+30  ;;  %vm3072_vm14 = vcmask 31768  }
 0xa87   :  { %v2684_v12 = vadd.f32 %v6511_v14, %v2654_v24  ;;  %2768 = vmax.xlane.f32.xlu1 %v6585_v50  ;;  %2772 = vmax.xlane.f32.xlu2 %v6594_v19  ;;  %v2659_v6 = vpop.permute.xlu0 %2658  ;;  %7972 = vst [vmem:[#allocation9_spill] sm:$0xff] %v6661_v22  ;;  %vm7984_vm5 = vcmp.gt.f32.partialorder %v4613_v35, 0.0 }
 0xa88   :  { %v2685_v0 = vadd.f32 %v6511_v14, %v2659_v6 }
 0xa89   :  { %v2700_v23 = vmul.f32 0.2, %v2684_v12 }
 0xa8a   :  { %v2701_v3 = vmul.f32 0.2, %v2685_v0 }
 0xa8b   :  { %v2716_v32 = vmax.f32 %v2684_v12, %v2700_v23  ;;  %v6628_v23 = vld [vmem:[#allocation2 + $0x18] sm:$0xff] }
 0xa8c   :  { %v2717_v21 = vmax.f32 %v2685_v0, %v2701_v3  ;;  %v6645_v0 = vld [vmem:[#allocation2 + $0x20] sm:$0xff] }
 0xa8d   :  { %v6602_v45 = vsel %vm7969_vm6, %v2716_v32, -1e+30  ;;  %v6650_v32 = vld [vmem:[#allocation2 + $0x10] sm:$0xff]  ;;  %vm7979_vm6 = vcmp.gt.f32.partialorder %v7750_v40, 0.0 }
 0xa8e   :  { %2776 = vmax.xlane.f32.xlu0 %v6602_v45  ;;  %v6611_v24 = vsel %vm7971_vm10, %v2717_v21, -1e+30  ;;  %v6638_v21 = vld [vmem:[#allocation2 + $0x8] sm:$0xff]  ;;  %vm7985_vm10 = vcmp.gt.f32.partialorder %v7968_v7, 0.0 }
 0xa8f   :  { %2774 = vmax.xlane.f32.xlu1 %v6607_v46  ;;  %2778 = vmax.xlane.f32.xlu2 %v6611_v24 }
 0xaa7   :  { %2663 = vperm.xlu2 %4055, %v2588_v61  }
 0xac1   :  { %v2753_v12 = vpop.xlane.xlu0 %2752 }
 0xac2   :  { %v6621_v6 = vmax.f32 %v6618_v15, %v2753_v12 }
 0xac4   :  { %3379 = vst.msk [vmem:[#allocation2] sm:$0xff] %vm3072_vm14, %v6621_v6  ;;  %2850 = vperm.xlu2 %4055, %v6621_v6  }
 0xac9   :  { %v2759_v3 = vpop.xlane.xlu0 %2758 }
 0xaca   :  { %v6631_v10 = vmax.f32 %v6628_v23, %v2759_v3 }
 0xacc   :  { %3382 = vst.msk [vmem:[#allocation2 + $0x18] sm:$0xff] %vm3072_vm14, %v6631_v10  ;;  %2865 = vperm.xlu2 %4055, %v6631_v10  }
 0xae1   :  { %v2755_v61 = vpop.xlane.xlu2 %2754 }
 0xae2   :  { %v6641_v12 = vmax.f32 %v6638_v21, %v2755_v61  ;;  %v6659_v61 = vld [vmem:[#allocation2 + $0x30] sm:$0xff] }
 0xae4   :  { %3380 = vst.msk [vmem:[#allocation2 + $0x8] sm:$0xff] %vm3072_vm14, %v6641_v12 }
 0xae9   :  { %v2761_v3 = vpop.xlane.xlu2 %2760 }
 0xaea   :  { %v6648_v4 = vmax.f32 %v6645_v0, %v2761_v3  ;;  %v2757_v29 = vpop.xlane.xlu1 %2756  ;;  %v6663_v3 = vld [vmem:[#allocation2 + $0x38] sm:$0xff] }
 0xaeb   :  { %v6653_v49 = vmax.f32 %v6650_v32, %v2757_v29 }
 0xaec   :  { %3383 = vst.msk [vmem:[#allocation2 + $0x20] sm:$0xff] %vm3072_vm14, %v6648_v4 }
 0xaed   :  { %3381 = vst.msk [vmem:[#allocation2 + $0x10] sm:$0xff] %vm3072_vm14, %v6653_v49 }
 0xaf1   :  { %v2765_v5 = vpop.xlane.xlu0 %2764 }
 0xaf2   :  { %v2763_v27 = vpop.xlane.xlu1 %2762  ;;  %v2767_v1 = vpop.xlane.xlu2 %2766  ;;  %v6666_v20 = vmax.f32 %v6659_v61, %v2765_v5  ;;  %v6683_v5 = vld [vmem:[#allocation2 + $0x48] sm:$0xff] }
 0xaf3   :  { %v6669_v29 = vmax.f32 %v6661_v22, %v2763_v27  ;;  %v6672_v2 = vmax.f32 %v6663_v3, %v2767_v1 }
 0xaf4   :  { %3385 = vst.msk [vmem:[#allocation2 + $0x30] sm:$0xff] %vm3072_vm14, %v6666_v20  ;;  %2880 = vperm.xlu2 %4055, %v6666_v20  }
 0xaf5   :  { %3384 = vst.msk [vmem:[#allocation2 + $0x28] sm:$0xff] %vm3072_vm14, %v6669_v29 }
 0xaf6   :  { %3386 = vst.msk [vmem:[#allocation2 + $0x38] sm:$0xff] %vm3072_vm14, %v6672_v2 }
 0xaf9   :  { %v2771_v27 = vpop.xlane.xlu0 %2770 }
 0xafa   :  { %v2769_v1 = vpop.xlane.xlu1 %2768  ;;  %v2773_v39 = vpop.xlane.xlu2 %2772  ;;  %v6690_v11 = vmax.f32 %v6683_v5, %v2771_v27  ;;  %v6707_v27 = vld [vmem:[#allocation2 + $0x60] sm:$0xff] }
 0xafb   :  { %v6693_v56 = vmax.f32 %v6685_v41, %v2769_v1  ;;  %v6696_v17 = vmax.f32 %v6687_v54, %v2773_v39 }
 0xafc   :  { %3388 = vst.msk [vmem:[#allocation2 + $0x48] sm:$0xff] %vm3072_vm14, %v6690_v11  ;;  %2895 = vperm.xlu2 %4055, %v6690_v11  }
 0xafd   :  { %7974 = vst [vmem:[#allocation81_spill] sm:$0xff] %v6693_v56 }
 0xafe   :  { %3387 = vst.msk [vmem:[#allocation2 + $0x40] sm:$0xff] %vm3072_vm14, %v6693_v56 }
 0xaff   :  { %3389 = vst.msk [vmem:[#allocation2 + $0x50] sm:$0xff] %vm3072_vm14, %v6696_v17 }
 0xb01   :  { %v2777_v1 = vpop.xlane.xlu0 %2776 }
 0xb02   :  { %v2775_v39 = vpop.xlane.xlu1 %2774  ;;  %v2779_v38 = vpop.xlane.xlu2 %2778  ;;  %v6714_v25 = vmax.f32 %v6707_v27, %v2777_v1 }
 0xb03   :  { %v6717_v58 = vmax.f32 %v6709_v53, %v2775_v39  ;;  %v6720_v48 = vmax.f32 %v6711_v34, %v2779_v38 }
 0xb04   :  { %3391 = vst.msk [vmem:[#allocation2 + $0x60] sm:$0xff] %vm3072_vm14, %v6714_v25  ;;  %2910 = vperm.xlu2 %4055, %v6714_v25  }
 0xb05   :  { %7976 = vst [vmem:[#allocation83_spill] sm:$0xff] %v6717_v58 }
 0xb06   :  { %3390 = vst.msk [vmem:[#allocation2 + $0x58] sm:$0xff] %vm3072_vm14, %v6717_v58 }
 0xb07   :  { %3392 = vst.msk [vmem:[#allocation2 + $0x68] sm:$0xff] %vm3072_vm14, %v6720_v48 }
 0xb0a   :  { %v2664_v1 = vpop.permute.xlu2 %2663 }
 0xb0b   :  { %v2686_v39 = vadd.f32 %v6511_v14, %v2664_v1 }
 0xb0d   :  { %v2702_v47 = vmul.f32 0.2, %v2686_v39 }
 0xb0f   :  { %v2718_v38 = vmax.f32 %v2686_v39, %v2702_v47  ;;  %v6744_v47 = vld [vmem:[#allocation2 + $0x70] sm:$0xff] }
 0xb10   :  { %7978 = vst [vmem:[#allocation85_spill] sm:$0xff] %v6744_v47 }
 0xb11   :  { %v6734_v53 = vsel %vm133_vm12, %v2718_v38, -1e+30 }
 0xb12   :  { %7977 = vst [vmem:[#allocation84_spill] sm:$0xff] %v6734_v53  ;;  %2780 = vmax.xlane.f32.xlu1 %v6734_v53 }
 0xb2b   :  { %2668 = vperm.xlu1 %4056, %v2589_v51  }
 0xb33   :  { %2855 = vperm.xlu1 %4056, %v6641_v12  }
 0xb3b   :  { %2875 = vperm.xlu1 %4056, %v6669_v29  }
 0xb43   :  { %2890 = vperm.xlu1 %4056, %v6693_v56  }
 0xb4b   :  { %2905 = vperm.xlu1 %4056, %v6717_v58  }
 0xb85   :  { %v2781_v1 = vpop.xlane.xlu1 %2780 }
 0xb86   :  { %v6747_v39 = vmax.f32 %v6744_v47, %v2781_v1 }
 0xb88   :  { %3393 = vst.msk [vmem:[#allocation2 + $0x70] sm:$0xff] %vm3072_vm14, %v6747_v39 }
 0xb9d   :  { %v2669_v38 = vpop.permute.xlu1 %2668 }
 0xb9e   :  { %v2687_v51 = vadd.f32 %v6511_v14, %v2669_v38 }
 0xba0   :  { %v2703_v33 = vmul.f32 0.2, %v2687_v51 }
 0xba2   :  { %v2719_v53 = vmax.f32 %v2687_v51, %v2703_v33  ;;  %v7981_v33 = vmov 0  }
 0xba4   :  { %v6754_v41 = vsel %vm7979_vm6, %v2719_v53, -1e+30  ;;  %vm7986_vm6 = vcmp.gt.f32.partialorder %v7808_v57, 0.0 }
 0xba5   :  { %2782 = vmax.xlane.f32.xlu0 %v6754_v41  ;;  %v2856_v58 = vpop.permute.xlu1 %2855 }
 0xba6   :  { %v2929_v56 = vsub.f32 %v6546_v44, %v2856_v58 }
 0xba8   :  { %v2946_v22 = vmul.f32 1.442695, %v2929_v56 }
 0xbaa   :  { %4266 = vpow2.f32 %v2946_v22  ;;  %v2851_v22 = vpop.permute.xlu2 %2850 }
 0xbab   :  { %v2928_v53 = vsub.f32 %v6520_v30, %v2851_v22 }
 0xbad   :  { %v2944_v56 = vmul.f32 1.442695, %v2928_v53 }
 0xbaf   :  { %4268 = vpow2.f32 %v2944_v56 }
 0xbb0   :  { %v6758_v1 = vpop.eup %4266 }
 0xbb1   :  { %7980 = vst [vmem:[#allocation86_spill] sm:$0xff] %v6758_v1  ;;  %v2977_v47 = vsel %vm120_vm3, %v6758_v1, 0.0  ;;  %vm7982_vm3 = vcmp.gt.f32.partialorder %v7857_v13, 0.0 }
 0xbb2   :  { %3026 = vadd.xlane.f32.xlu1 %v2977_v47  ;;  %v2866_v58 = vpop.permute.xlu2 %2865 }
 0xbb3   :  { %v2931_v42 = vsub.f32 %v6530_v43, %v2866_v58  ;;  %v2876_v43 = vpop.permute.xlu1 %2875 }
 0xbb5   :  { %v2950_v44 = vmul.f32 1.442695, %v2931_v42  ;;  %v6771_v47 = vpop.eup %4268 }
 0xbb6   :  { %v2976_v51 = vsel %vm119_vm1, %v6771_v47, 0.0  ;;  %vm7983_vm1 = vcmp.gt.f32.partialorder %v4579_v59, 0.0 }
 0xbb7   :  { %4270 = vpow2.f32 %v2950_v44  ;;  %v6793_v44 = vld [vmem:[#allocation2 + $0x78] sm:$0xff] }
 0xbb9   :  { %2860 = vperm.xlu0 %4057, %v6653_v49  }
 0xbba   :  { %v2881_v14 = vpop.permute.xlu2 %2880 }
 0xbbb   :  { %v2934_v38 = vsub.f32 %v6571_v31, %v2881_v14 }
 0xbbd   :  { %v2956_v40 = vmul.f32 1.442695, %v2934_v38  ;;  %v6777_v30 = vpop.eup %4270 }
 0xbbe   :  { %v2979_v53 = vsel %vm7982_vm3, %v6777_v30, 0.0  ;;  %vm7987_vm3 = vcmp.gt.f32.partialorder %v7810_v55, 0.0 }
 0xbbf   :  { %4272 = vpow2.f32 %v2956_v40  ;;  %v2801_v40 = vsub.f32 %v6638_v21, %v6641_v12 }
 0xbc1   :  { %2870 = vperm.xlu0 %4057, %v6648_v4   ;;  %v2818_v14 = vmul.f32 1.442695, %v2801_v40  ;;  %v2933_v40 = vsub.f32 %v6567_v9, %v2876_v43 }
 0xbc2   :  { %v2896_v1 = vpop.permute.xlu2 %2895 }
 0xbc3   :  { %v2937_v22 = vsub.f32 %v6589_v62, %v2896_v1  ;;  %v2891_v62 = vpop.permute.xlu1 %2890 }
 0xbc5   :  { %v2962_v58 = vmul.f32 1.442695, %v2937_v22  ;;  %v6783_v56 = vpop.eup %4272 }
 0xbc6   :  { %v2982_v42 = vsel %vm7983_vm1, %v6783_v56, 0.0  ;;  %vm7988_vm1 = vcmp.gt.f32.partialorder %v4541_v37, 0.0 }
 0xbc7   :  { %4274 = vpow2.f32 %v2962_v58 }
 0xbc9   :  { %2885 = vperm.xlu0 %4057, %v6672_v2  }
 0xbca   :  { %v2911_v31 = vpop.permute.xlu2 %2910 }
 0xbcb   :  { %v2940_v18 = vsub.f32 %v6602_v45, %v2911_v31  ;;  %v2906_v45 = vpop.permute.xlu1 %2905 }
 0xbcd   :  { %v2968_v1 = vmul.f32 1.442695, %v2940_v18  ;;  %v6791_v13 = vpop.eup %4274 }
 0xbce   :  { %v2985_v59 = vsel %vm7984_vm5, %v6791_v13, 0.0  ;;  %vm7989_vm5 = vcmp.gt.f32.partialorder %v4642_v63, 0.0 }
 0xbcf   :  { %4276 = vpow2.f32 %v2968_v1 }
 0xbd0   :  { %4278 = vpow2.f32 %v2818_v14  ;;  %v2954_v14 = vmul.f32 1.442695, %v2933_v40 }
 0xbd1   :  { %2900 = vperm.xlu0 %4057, %v6696_v17  }
 0xbd5   :  { %v6803_v21 = vpop.eup %4276 }
 0xbd6   :  { %v6805_v12 = vpop.eup %4278  ;;  %v2988_v22 = vsel %vm7985_vm10, %v6803_v21, 0.0  ;;  %vm7990_vm10 = vcmp.gt.f32.partialorder %v4581_v60, 0.0 }
 0xbd9   :  { %2915 = vperm.xlu0 %4057, %v6720_v48  }
 0xbe1   :  { %4058 = vset.pattern.permute.xlu0 %v7981_v33 }
 0xc03   :  { %3024 = vadd.xlane.f32.xlu0 %v2976_v51 }
 0xc0b   :  { %3030 = vadd.xlane.f32.xlu0 %v2979_v53  ;;  %v2993_v53 = vld [vmem:[#allocation3 + $0x8] sm:$0xff] }
 0xc0c   :  { %v3009_v58 = vmul.f32 %v6805_v12, %v2993_v53 }
 0xc13   :  { %3036 = vadd.xlane.f32.xlu0 %v2982_v42 }
 0xc18   :  { %v2783_v38 = vpop.xlane.xlu0 %2782 }
 0xc19   :  { %v6796_v51 = vmax.f32 %v6793_v44, %v2783_v38 }
 0xc1b   :  { %3394 = vst.msk [vmem:[#allocation2 + $0x78] sm:$0xff] %vm3072_vm14, %v6796_v51  ;;  %3042 = vadd.xlane.f32.xlu0 %v2985_v59 }
 0xc23   :  { %3048 = vadd.xlane.f32.xlu0 %v2988_v22  ;;  %v2936_v22 = vsub.f32 %v6585_v50, %v2891_v62 }
 0xc25   :  { %v3027_v35 = vpop.xlane.xlu1 %3026 }
 0xc26   :  { %v3057_v31 = vadd.f32 %v3027_v35, %v3009_v58 }
 0xc28   :  { %3074 = vst.msk [vmem:[#allocation3 + $0x8] sm:$0xff] %vm3072_vm14, %v3057_v31 }
 0xc2b   :  { %v2861_v18 = vpop.permute.xlu0 %2860 }
 0xc2c   :  { %v2930_v42 = vsub.f32 %v6559_v16, %v2861_v18  ;;  %v2960_v16 = vmul.f32 1.442695, %v2936_v22 }
 0xc2e   :  { %v2948_v1 = vmul.f32 1.442695, %v2930_v42 }
 0xc30   :  { %4280 = vpow2.f32 %v2948_v1 }
 0xc31   :  { %4282 = vpow2.f32 %v2954_v14 }
 0xc33   :  { %v2871_v38 = vpop.permute.xlu0 %2870 }
 0xc34   :  { %v2932_v7 = vsub.f32 %v6554_v26, %v2871_v38  ;;  %v2939_v26 = vsub.f32 %v6607_v46, %v2906_v45 }
 0xc36   :  { %v6815_v59 = vpop.eup %4280  ;;  %v2952_v53 = vmul.f32 1.442695, %v2932_v7  ;;  %v2966_v62 = vmul.f32 1.442695, %v2939_v26 }
 0xc37   :  { %v2978_v58 = vsel %vm7986_vm6, %v6815_v59, 0.0  ;;  %v6821_v43 = vpop.eup %4282  ;;  %vm7991_vm6 = vcmp.gt.f32.partialorder %v4677_v52, 0.0  ;;  %v7995_v52 = vsub.f32 %v6628_v23, %v6631_v10  ;;  %v2807_v10 = vsub.f32 %v6663_v3, %v6672_v2  ;;  %v2998_v3 = vld [vmem:[#allocation3 + $0x30] sm:$0xff] }
 0xc38   :  { %4284 = vpow2.f32 %v2952_v53  ;;  %3028 = vadd.xlane.f32.xlu2 %v2978_v58  ;;  %v2981_v50 = vsel %vm7987_vm3, %v6821_v43, 0.0  ;;  %vm7992_vm3 = vcmp.gt.f32.partialorder %v4615_v36, 0.0  ;;  %v7994_v53 = vsub.f32 %v6618_v15, %v6621_v6 }
 0xc39   :  { %4286 = vpow2.f32 %v2960_v16  ;;  %v2822_v36 = vmul.f32 1.442695, %v7995_v52  ;;  %v7996_v15 = vsub.f32 %v6659_v61, %v6666_v20  ;;  %v7997_v20 = vsub.f32 %v6683_v5, %v6690_v11 }
 0xc3a   :  { %v2816_v58 = vmul.f32 1.442695, %v7994_v53  ;;  %v2810_v2 = vsub.f32 %v6687_v54, %v6696_v17  ;;  %v7998_v11 = vsub.f32 %v6707_v27, %v6714_v25  ;;  %v2813_v17 = vsub.f32 %v6711_v34, %v6720_v48  ;;  %v3001_v54 = vld [vmem:[#allocation3 + $0x48] sm:$0xff]  ;;  %v3004_v27 = vld [vmem:[#allocation3 + $0x60] sm:$0xff] }
 0xc3b   :  { %v2886_v9 = vpop.permute.xlu0 %2885  ;;  %v2828_v6 = vmul.f32 1.442695, %v7996_v15  ;;  %v2834_v61 = vmul.f32 1.442695, %v7997_v20  ;;  %v2802_v34 = vsub.f32 %v6650_v32, %v6653_v49  ;;  %v8000_v15 = vld [vmem:[#allocation81_spill] sm:$0xff] }
 0xc3c   :  { %v2935_v35 = vsub.f32 %v6576_v8, %v2886_v9  ;;  %v2804_v9 = vsub.f32 %v6645_v0, %v6648_v4  ;;  %v2995_v4 = vld [vmem:[#allocation3 + $0x18] sm:$0xff]  ;;  %v2840_v5 = vmul.f32 1.442695, %v7998_v11 }
 0xc3e   :  { %v6824_v31 = vpop.eup %4284  ;;  %v2958_v18 = vmul.f32 1.442695, %v2935_v35  ;;  %v2992_v35 = vld [vmem:[#allocation3] sm:$0xff]  ;;  %v2824_v26 = vmul.f32 1.442695, %v2804_v9 }
 0xc3f   :  { %v2980_v57 = vsel %vm7988_vm1, %v6824_v31, 0.0  ;;  %v6833_v8 = vpop.eup %4286  ;;  %vm7993_vm1 = vcmp.gt.f32.partialorder %v7870_v28, 0.0 }
 0xc40   :  { %4288 = vpow2.f32 %v2958_v18  ;;  %3034 = vadd.xlane.f32.xlu2 %v2981_v50  ;;  %3032 = vadd.xlane.f32.xlu1 %v2980_v57  ;;  %v2984_v55 = vsel %vm7989_vm5, %v6833_v8, 0.0  ;;  %v2830_v57 = vmul.f32 1.442695, %v2807_v10 }
 0xc41   :  { %4290 = vpow2.f32 %v2966_v62 }
 0xc43   :  { %v2901_v42 = vpop.permute.xlu0 %2900 }
 0xc44   :  { %v2938_v40 = vsub.f32 %v6594_v19, %v2901_v42 }
 0xc46   :  { %v6836_v1 = vpop.eup %4288  ;;  %v2964_v46 = vmul.f32 1.442695, %v2938_v40 }
 0xc47   :  { %v2983_v37 = vsel %vm7990_vm10, %v6836_v1, 0.0  ;;  %v6844_v14 = vpop.eup %4290  ;;  %vm2541_vm10 = vcmask 195712  }
 0xc48   :  { %4292 = vpow2.f32 %v2964_v46  ;;  %3040 = vadd.xlane.f32.xlu2 %v2984_v55  ;;  %3038 = vadd.xlane.f32.xlu1 %v2983_v37  ;;  %v2987_v63 = vsel %vm7991_vm6, %v6844_v14, 0.0  ;;  %v2836_v37 = vmul.f32 1.442695, %v2810_v2  ;;  %v2996_v2 = vld [vmem:[#allocation3 + $0x20] sm:$0xff] }
 0xc4b   :  { %v2916_v45 = vpop.permute.xlu0 %2915 }
 0xc4c   :  { %v2941_v19 = vsub.f32 %v6611_v24, %v2916_v45 }
 0xc4e   :  { %v6847_v38 = vpop.eup %4292  ;;  %v2970_v7 = vmul.f32 1.442695, %v2941_v19 }
 0xc4f   :  { %v2986_v60 = vsel %vm7992_vm3, %v6847_v38, 0.0 }
 0xc50   :  { %4294 = vpow2.f32 %v2970_v7  ;;  %3046 = vadd.xlane.f32.xlu2 %v2987_v63  ;;  %3044 = vadd.xlane.f32.xlu1 %v2986_v60 }
 0xc51   :  { %4296 = vpow2.f32 %v2816_v58 }
 0xc52   :  { %4298 = vpow2.f32 %v2822_v36 }
 0xc53   :  { %4300 = vpow2.f32 %v2824_v26 }
 0xc54   :  { %4302 = vpow2.f32 %v2828_v6  ;;  %v8001_v6 = vld [vmem:[#allocation80_spill] sm:$0xff] }
 0xc55   :  { %4304 = vpow2.f32 %v2830_v57  ;;  %v2808_v10 = vsub.f32 %v8001_v6, %v8000_v15 }
 0xc56   :  { %v6855_v22 = vpop.eup %4294  ;;  %4306 = vpow2.f32 %v2834_v61  ;;  %v2997_v61 = vld [vmem:[#allocation3 + $0x28] sm:$0xff] }
 0xc57   :  { %v2989_v24 = vsel %vm7993_vm1, %v6855_v22, 0.0  ;;  %v4297_v16 = vpop.eup %4296  ;;  %4308 = vpow2.f32 %v2836_v37  ;;  %v2832_v57 = vmul.f32 1.442695, %v2808_v10 }
 0xc58   :  { %3050 = vadd.xlane.f32.xlu1 %v2989_v24  ;;  %v3008_v28 = vmul.f32 %v4297_v16, %v2992_v35  ;;  %v6873_v23 = vpop.eup %4298  ;;  %4310 = vpow2.f32 %v2840_v5  ;;  %v2842_v24 = vmul.f32 1.442695, %v2813_v17  ;;  %v2820_v35 = vmul.f32 1.442695, %v2802_v34  ;;  %v3002_v34 = vld [vmem:[#allocation3 + $0x50] sm:$0xff] }
 0xc59   :  { %v3011_v0 = vmul.f32 %v6873_v23, %v2995_v4  ;;  %v4301_v40 = vpop.eup %4300  ;;  %v2994_v4 = vld [vmem:[#allocation3 + $0x10] sm:$0xff] }
 0xc5a   :  { %v6882_v46 = vpop.eup %4302  ;;  %4312 = vpow2.f32 %v2842_v24 }
 0xc5b   :  { %v3014_v55 = vmul.f32 %v6882_v46, %v2998_v3  ;;  %v4305_v7 = vpop.eup %4304  ;;  %4314 = vpow2.f32 %v2820_v35 }
 0xc5c   :  { %v6891_v63 = vpop.eup %4306 }
 0xc5d   :  { %v3017_v60 = vmul.f32 %v6891_v63, %v3001_v54  ;;  %v4309_v52 = vpop.eup %4308  ;;  %v3000_v54 = vld [vmem:[#allocation3 + $0x40] sm:$0xff] }
 0xc5e   :  { %v6897_v25 = vpop.eup %4310 }
 0xc5f   :  { %v3020_v36 = vmul.f32 %v6897_v25, %v3004_v27 }
 0xc60   :  { %v4313_v48 = vpop.eup %4312 }
 0xc71   :  { %2920 = vperm.xlu1 %4056, %v6747_v39  }
 0xc76   :  { %v3025_v18 = vpop.xlane.xlu0 %3024 }
 0xc77   :  { %v3056_v50 = vadd.f32 %v3025_v18, %v3008_v28  ;;  %v7999_v28 = vld [vmem:[#allocation9_spill] sm:$0xff] }
 0xc78   :  { %v2805_v26 = vsub.f32 %v7999_v28, %v6669_v29  ;;  %v8002_v29 = vld [vmem:[#allocation83_spill] sm:$0xff]  ;;  %v3018_v28 = vmul.f32 %v4309_v52, %v3002_v34  ;;  %v4386_v34 = vld [vmem:[%s7585_s3 + $0x28] sm:$0xff] }
 0xc79   :  { %3073 = vst.msk [vmem:[#allocation3] sm:$0xff] %vm3072_vm14, %v3056_v50  ;;  %3107 = vperm.xlu1 %4056, %v4297_v16   ;;  %v6906_v50 = vpop.eup %4314 }
 0xc7a   :  { %v2826_v18 = vmul.f32 1.442695, %v2805_v26  ;;  %v3010_v49 = vmul.f32 %v6906_v50, %v2994_v4 }
 0xc7c   :  { %4316 = vpow2.f32 %v2826_v18 }
 0xc7d   :  { %4318 = vpow2.f32 %v2832_v57 }
 0xc7e   :  { %v3031_v62 = vpop.xlane.xlu0 %3030 }
 0xc7f   :  { %v3059_v42 = vadd.f32 %v3031_v62, %v3011_v0 }
 0xc81   :  { %3076 = vst.msk [vmem:[#allocation3 + $0x18] sm:$0xff] %vm3072_vm14, %v3059_v42  ;;  %3127 = vperm.xlu1 %4056, %v4301_v40   ;;  %v8003_v42 = vld [vmem:[#allocation82_spill] sm:$0xff] }
 0xc82   :  { %v4317_v62 = vpop.eup %4316  ;;  %v2811_v20 = vsub.f32 %v8003_v42, %v8002_v29 }
 0xc83   :  { %v3013_v3 = vmul.f32 %v4317_v62, %v2997_v61  ;;  %v4319_v17 = vpop.eup %4318 }
 0xc84   :  { %v2838_v5 = vmul.f32 1.442695, %v2811_v20  ;;  %v3016_v24 = vmul.f32 %v4319_v17, %v3000_v54 }
 0xc86   :  { %v3037_v45 = vpop.xlane.xlu0 %3036  ;;  %4320 = vpow2.f32 %v2838_v5 }
 0xc87   :  { %v3062_v19 = vadd.f32 %v3037_v45, %v3014_v55  ;;  %v3012_v55 = vmul.f32 %v4301_v40, %v2996_v2 }
 0xc89   :  { %3079 = vst.msk [vmem:[#allocation3 + $0x30] sm:$0xff] %vm3072_vm14, %v3062_v19  ;;  %3142 = vperm.xlu1 %4056, %v4305_v7  }
 0xc8c   :  { %v4321_v40 = vpop.eup %4320 }
 0xc8e   :  { %v3043_v53 = vpop.xlane.xlu0 %3042 }
 0xc8f   :  { %v3065_v58 = vadd.f32 %v3043_v53, %v3017_v60  ;;  %v2999_v60 = vld [vmem:[#allocation3 + $0x38] sm:$0xff] }
 0xc90   :  { %v3015_v53 = vmul.f32 %v4305_v7, %v2999_v60  ;;  %v3005_v7 = vld [vmem:[#allocation3 + $0x68] sm:$0xff] }
 0xc91   :  { %3082 = vst.msk [vmem:[#allocation3 + $0x48] sm:$0xff] %vm3072_vm14, %v3065_v58  ;;  %3157 = vperm.xlu1 %4056, %v4309_v52   ;;  %v3021_v10 = vmul.f32 %v4313_v48, %v3005_v7 }
 0xc96   :  { %v3049_v16 = vpop.xlane.xlu0 %3048 }
 0xc97   :  { %v3068_v9 = vadd.f32 %v3049_v16, %v3020_v36 }
 0xc99   :  { %3085 = vst.msk [vmem:[#allocation3 + $0x60] sm:$0xff] %vm3072_vm14, %v3068_v9  ;;  %3172 = vperm.xlu1 %4056, %v4313_v48   ;;  %v3003_v9 = vld [vmem:[#allocation3 + $0x58] sm:$0xff]  ;;  %v8006_v48 = vld [vmem:[#allocation85_spill] sm:$0xff] }
 0xc9a   :  { %v3019_v35 = vmul.f32 %v4321_v40, %v3003_v9  ;;  %v2814_v61 = vsub.f32 %v8006_v48, %v6747_v39  ;;  %v4381_v39 = vld [vmem:[%s7585_s3 + $0x30] sm:$0xff]  ;;  %v8013_v9 = vld [vmem:[#allocation20_spill] sm:$0xff] }
 0xc9c   :  { %v2844_v2 = vmul.f32 1.442695, %v2814_v61  ;;  %v668_v61 = vld [vmem:[#allocation4 + $0x10] sm:$0xff] }
 0xca1   :  { %4059 = vset.pattern.permute.xlu1 %v7981_v33 }
 0xcab   :  { %v3029_v32 = vpop.xlane.xlu2 %3028 }
 0xcac   :  { %v3058_v0 = vadd.f32 %v3029_v32, %v3010_v49 }
 0xcae   :  { %3075 = vst.msk [vmem:[#allocation3 + $0x10] sm:$0xff] %vm3072_vm14, %v3058_v0  ;;  %v8004_v0 = vld [vmem:[#allocation84_spill] sm:$0xff] }
 0xcb3   :  { %v3035_v37 = vpop.xlane.xlu2 %3034  ;;  %v3033_v45 = vpop.xlane.xlu1 %3032 }
 0xcb4   :  { %v3061_v19 = vadd.f32 %v3035_v37, %v3013_v3  ;;  %v3060_v11 = vadd.f32 %v3033_v45, %v3012_v55  ;;  %v4379_v3 = vld [vmem:[%s7585_s3] sm:$0xff]  ;;  %v4380_v55 = vld [vmem:[%s7585_s3 + $0x18] sm:$0xff] }
 0xcb5   :  { %3209 = vrot.lane.b32.xlu1 %v4379_v3, %s4397_s24  ;;  %v4383_v37 = vld [vmem:[%s7585_s3 + $0x20] sm:$0xff]  ;;  %v4384_v45 = vld [vmem:[%s7585_s3 + $0x38] sm:$0xff] }
 0xcb6   :  { %3078 = vst.msk [vmem:[#allocation3 + $0x28] sm:$0xff] %vm3072_vm14, %v3061_v19  ;;  %v3006_v19 = vld [vmem:[#allocation3 + $0x70] sm:$0xff] }
 0xcb7   :  { %3077 = vst.msk [vmem:[#allocation3 + $0x20] sm:$0xff] %vm3072_vm14, %v3060_v11 }
 0xcbb   :  { %v3041_v58 = vpop.xlane.xlu2 %3040  ;;  %v3039_v27 = vpop.xlane.xlu1 %3038 }
 0xcbc   :  { %v3064_v36 = vadd.f32 %v3041_v58, %v3016_v24  ;;  %v3063_v16 = vadd.f32 %v3039_v27, %v3015_v53  ;;  %v8007_v53 = vld [vmem:[#allocation11_spill] sm:$0xff]  ;;  %v8009_v27 = vld [vmem:[#allocation14_spill] sm:$0xff] }
 0xcbd   :  { %3215 = vrot.lane.b32.xlu1 %v4380_v55, %s4397_s24 }
 0xcbe   :  { %3081 = vst.msk [vmem:[#allocation3 + $0x40] sm:$0xff] %vm3072_vm14, %v3064_v36  ;;  %v8010_v36 = vld [vmem:[#allocation16_spill] sm:$0xff] }
 0xcbf   :  { %3080 = vst.msk [vmem:[#allocation3 + $0x38] sm:$0xff] %vm3072_vm14, %v3063_v16  ;;  %v8011_v16 = vld [vmem:[#allocation18_spill] sm:$0xff] }
 0xcc3   :  { %v3047_v26 = vpop.xlane.xlu2 %3046  ;;  %v3045_v18 = vpop.xlane.xlu1 %3044 }
 0xcc4   :  { %v3067_v15 = vadd.f32 %v3047_v26, %v3019_v35  ;;  %v3066_v6 = vadd.f32 %v3045_v18, %v3018_v28 }
 0xcc5   :  { %3221 = vrot.lane.b32.xlu1 %v4381_v39, %s4397_s24 }
 0xcc6   :  { %3084 = vst.msk [vmem:[#allocation3 + $0x58] sm:$0xff] %vm3072_vm14, %v3067_v15  ;;  %v2815_v15 = vsub.f32 %v6793_v44, %v6796_v51 }
 0xcc7   :  { %3083 = vst.msk [vmem:[#allocation3 + $0x50] sm:$0xff] %vm3072_vm14, %v3066_v6 }
 0xcc8   :  { %v2846_v7 = vmul.f32 1.442695, %v2815_v15  ;;  %v8020_v15 = vld [vmem:[#allocation23_spill] sm:$0xff] }
 0xccb   :  { %v3051_v4 = vpop.xlane.xlu1 %3050 }
 0xccc   :  { %v3069_v49 = vadd.f32 %v3051_v4, %v3021_v10 }
 0xcce   :  { %3086 = vst.msk [vmem:[#allocation3 + $0x68] sm:$0xff] %vm3072_vm14, %v3069_v49 }
 0xce3   :  { %v2921_v32 = vpop.permute.xlu1 %2920 }
 0xce4   :  { %v2942_v57 = vsub.f32 %v8004_v0, %v2921_v32  ;;  %v3007_v0 = vld [vmem:[#allocation3 + $0x78] sm:$0xff] }
 0xce6   :  { %v2972_v29 = vmul.f32 1.442695, %v2942_v57 }
 0xce8   :  { %4322 = vpow2.f32 %v2972_v29 }
 0xce9   :  { %4324 = vpow2.f32 %v2844_v2 }
 0xceb   :  { %v6978_v28 = vpop.permute.xlu1 %3107 }
 0xcee   :  { %v6922_v52 = vpop.eup %4322 }
 0xcef   :  { %v2990_v20 = vsel %vm133_vm12, %v6922_v52, 0.0  ;;  %vm8008_vm12 = vcmp.gt.f32.partialorder %v8007_v53, 0.0 }
 0xcf0   :  { %3052 = vadd.xlane.f32.xlu2 %v2990_v20 }
 0xcf3   :  { %v6982_v18 = vpop.permute.xlu1 %3127 }
 0xcfb   :  { %v6988_v10 = vpop.permute.xlu1 %3142 }
 0xd03   :  { %v6994_v32 = vpop.permute.xlu1 %3157 }
 0xd08   :  { %2925 = vperm.xlu2 %4055, %v6796_v51  }
 0xd0b   :  { %v7000_v51 = vpop.permute.xlu1 %3172 }
 0xd10   :  { %3112 = vperm.xlu2 %4055, %v6805_v12   ;;  %v4325_v12 = vpop.eup %4324 }
 0xd11   :  { %v3022_v11 = vmul.f32 %v4325_v12, %v3006_v19 }
 0xd18   :  { %3132 = vperm.xlu2 %4055, %v4317_v62   ;;  %v4382_v62 = vld [vmem:[%s7585_s3 + $0x8] sm:$0xff] }
 0xd20   :  { %3147 = vperm.xlu2 %4055, %v4319_v17  }
 0xd27   :  { %v7004_v48 = vpop.permute.xlu1 %3209 }
 0xd28   :  { %3162 = vperm.xlu2 %4055, %v4321_v40   ;;  %v8012_v40 = vld [vmem:[#allocation19_spill] sm:$0xff] }
 0xd30   :  { %3177 = vperm.xlu2 %4055, %v4325_v12   ;;  %v8014_v12 = vld [vmem:[#allocation15_spill] sm:$0xff] }
 0xd38   :  { %3211 = vrot.lane.b32.xlu2 %v4382_v62, %s4397_s24  ;;  %v7010_v62 = vpop.permute.xlu1 %3215 }
 0xd39   :  { %4060 = vset.pattern.permute.xlu2 %v7981_v33 }
 0xd40   :  { %3217 = vrot.lane.b32.xlu2 %v4383_v37, %s4397_s24  ;;  %v670_v37 = vld [vmem:[#allocation4 + $0x20] sm:$0xff]  ;;  %v3222_v53 = vpop.permute.xlu1 %3221 }
 0xd48   :  { %3223 = vrot.lane.b32.xlu2 %v4384_v45, %s4397_s24 }
 0xd63   :  { %v3053_v5 = vpop.xlane.xlu2 %3052 }
 0xd64   :  { %v3070_v17 = vadd.f32 %v3053_v5, %v3022_v11  ;;  %v8015_v5 = vld [vmem:[#allocation17_spill] sm:$0xff] }
 0xd66   :  { %3087 = vst.msk [vmem:[#allocation3 + $0x70] sm:$0xff] %vm3072_vm14, %v3070_v17 }
 0xd6b   :  { %v2926_v54 = vpop.permute.xlu2 %2925 }
 0xd6c   :  { %v2943_v33 = vsub.f32 %v6754_v41, %v2926_v54  ;;  %v4385_v41 = vld [vmem:[%s7585_s3 + $0x10] sm:$0xff]  ;;  %s4398_s3 = smov 24  }
 0xd6e   :  { %v2974_v60 = vmul.f32 1.442695, %v2943_v33  ;;  %v8016_v33 = vld [vmem:[#allocation39_spill] sm:$0xff] }
 0xd70   :  { %4326 = vpow2.f32 %v2974_v60 }
 0xd71   :  { %4328 = vpow2.f32 %v2846_v7 }
 0xd73   :  { %v6976_v35 = vpop.permute.xlu2 %3112 }
 0xd76   :  { %v6958_v24 = vpop.eup %4326 }
 0xd77   :  { %v2991_v58 = vsel %vm8008_vm12, %v6958_v24, 0.0  ;;  %v6992_v49 = vpop.eup %4328  ;;  %vm3815_vm12 = vcmask 195584  }
 0xd78   :  { %3054 = vadd.xlane.f32.xlu0 %v2991_v58  ;;  %v3023_v57 = vmul.f32 %v6992_v49, %v3007_v0  ;;  %v673_v58 = vld [vmem:[#allocation4 + $0x38] sm:$0xff]  ;;  %v676_v0 = vld [vmem:[#allocation4 + $0x50] sm:$0xff] }
 0xd7b   :  { %v6980_v26 = vpop.permute.xlu2 %3132 }
 0xd83   :  { %v6986_v6 = vpop.permute.xlu2 %3147 }
 0xd8b   :  { %v6990_v4 = vpop.permute.xlu2 %3162 }
 0xd8c   :  { %694 = vperm.xlu0 %4058, %v8009_v27   ;;  %v8017_v27 = vld [vmem:[#allocation45_spill] sm:$0xff] }
 0xd93   :  { %v6998_v44 = vpop.permute.xlu2 %3177 }
 0xd94   :  { %704 = vperm.xlu0 %4058, %v8010_v36  }
 0xd9b   :  { %v7002_v20 = vpop.permute.xlu2 %3211 }
 0xd9c   :  { %719 = vperm.xlu0 %4058, %v8011_v16  }
 0xda3   :  { %v7006_v55 = vpop.permute.xlu2 %3217 }
 0xda4   :  { %734 = vperm.xlu0 %4058, %v8012_v40  }
 0xdab   :  { %v3224_v11 = vpop.permute.xlu2 %3223 }
 0xdac   :  { %749 = vperm.xlu0 %4058, %v8013_v9   ;;  %3233 = vmatpush.bf16.msra.mxu3 %v3224_v11  ;;  %v8019_v9 = vld [vmem:[#allocation22_spill] sm:$0xff] }
 0xdb0   :  { %3234 = vmatpush.bf16.msra.mxu3 %v3222_v53 }
 0xdb4   :  { %3213 = vrot.lane.b32.xlu0 %v4385_v41, %s4397_s24 }
 0xdbc   :  { %3219 = vrot.lane.b32.xlu0 %v4386_v34, %s4397_s24 }
 0xdeb   :  { %v3055_v29 = vpop.xlane.xlu0 %3054 }
 0xdec   :  { %v3071_v42 = vadd.f32 %v3055_v29, %v3023_v57  ;;  %v8021_v57 = vld [vmem:[#allocation42_spill] sm:$0xff] }
 0xdee   :  { %3088 = vst.msk [vmem:[#allocation3 + $0x78] sm:$0xff] %vm3072_vm14, %v3071_v42  ;;  %vm8018_vm14 = vcmask 130112  }
 0xdef   :  { %vm8022_vm5 = vmmov %vm8018_vm14 }
 0xdf0   :  { %vm8028_vm6 = vmmov %vm8022_vm5 }
 0xdf1   :  { %vm8034_vm3 = vmmov %vm8022_vm5 }
 0xdf2   :  { %vm8039_vm1 = vmmov %vm8034_vm3 }
 0xdfe   :  { %v695_v2 = vpop.permute.xlu0 %694 }
 0xdff   :  { %v764_v3 = vmul.f32 %v695_v2, %v668_v61 }
 0xe01   :  { %v885_v39 = vadd.f32 %v8014_v12, %v764_v3  ;;  %v8023_v3 = vld [vmem:[#allocation51_spill] sm:$0xff] }
 0xe03   :  { %902 = vst.msk [vmem:[#allocation4 + $0x10] sm:$0xff] %vm899_vm7, %v885_v39  ;;  %v8024_v39 = vld [vmem:[#allocation34_spill] sm:$0xff] }
 0xe06   :  { %v705_v45 = vpop.permute.xlu0 %704 }
 0xe07   :  { %v766_v19 = vmul.f32 %v705_v45, %v670_v37  ;;  %v8025_v45 = vld [vmem:[#allocation69_spill] sm:$0xff] }
 0xe09   :  { %v887_v17 = vadd.f32 %v8015_v5, %v766_v19  ;;  %v8026_v5 = vld [vmem:[#allocation31_spill] sm:$0xff] }
 0xe0a   :  { %v1449_v54 = vld [vmem:[#allocation4 + $0x10] sm:$0xff] }
 0xe0b   :  { %v1545_v60 = vmul.f32 %v8016_v33, %v1449_v54  ;;  %904 = vst.msk [vmem:[#allocation4 + $0x20] sm:$0xff] %vm899_vm7, %v887_v17  ;;  %v679_v54 = vld [vmem:[#allocation4 + $0x68] sm:$0xff]  ;;  %v8027_v33 = vld [vmem:[#allocation43_spill] sm:$0xff] }
 0xe0d   :  { %v1706_v36 = vadd.f32 %v8017_v27, %v1545_v60 }
 0xe0e   :  { %v720_v16 = vpop.permute.xlu0 %719 }
 0xe0f   :  { %1723 = vst.msk [vmem:[#allocation4 + $0x10] sm:$0xff] %vm8018_vm14, %v1706_v36  ;;  %v769_v40 = vmul.f32 %v720_v16, %v673_v58  ;;  %v8029_v36 = vld [vmem:[#allocation52_spill] sm:$0xff]  ;;  %vm8099_vm14 = vcmask 261120  }
 0xe11   :  { %v890_v41 = vadd.f32 %v8019_v9, %v769_v40  ;;  %v8030_v40 = vld [vmem:[#allocation36_spill] sm:$0xff] }
 0xe12   :  { %v1451_v34 = vld [vmem:[#allocation4 + $0x20] sm:$0xff] }
 0xe13   :  { %v1547_v7 = vmul.f32 %v8020_v15, %v1451_v34  ;;  %907 = vst.msk [vmem:[#allocation4 + $0x38] sm:$0xff] %vm899_vm7, %v890_v41  ;;  %v8031_v41 = vld [vmem:[#allocation66_spill] sm:$0xff] }
 0xe15   :  { %v1708_v29 = vadd.f32 %v8021_v57, %v1547_v7  ;;  %v8032_v7 = vld [vmem:[#allocation35_spill] sm:$0xff]  ;;  %v8033_v57 = vld [vmem:[#allocation44_spill] sm:$0xff] }
 0xe16   :  { %v735_v42 = vpop.permute.xlu0 %734  ;;  %v2270_v61 = vld [vmem:[#allocation4 + $0x10] sm:$0xff] }
 0xe17   :  { %1725 = vst.msk [vmem:[#allocation4 + $0x20] sm:$0xff] %vm8022_vm5, %v1708_v29  ;;  %v772_v2 = vmul.f32 %v735_v42, %v676_v0  ;;  %v2366_v12 = vmul.f32 %v8023_v3, %v2270_v61  ;;  %vm8101_vm5 = vmmov %vm8099_vm14 }
 0xe19   :  { %v893_v37 = vadd.f32 %v8024_v39, %v772_v2  ;;  %v2527_v19 = vadd.f32 %v8025_v45, %v2366_v12  ;;  %v8035_v2 = vld [vmem:[#allocation53_spill] sm:$0xff]  ;;  %v8036_v12 = vld [vmem:[#allocation67_spill] sm:$0xff]  ;;  %v8037_v45 = vld [vmem:[#allocation32_spill] sm:$0xff] }
 0xe1a   :  { %v1454_v11 = vld [vmem:[#allocation4 + $0x38] sm:$0xff] }
 0xe1b   :  { %v1550_v17 = vmul.f32 %v8026_v5, %v1454_v11  ;;  %910 = vst.msk [vmem:[#allocation4 + $0x50] sm:$0xff] %vm899_vm7, %v893_v37  ;;  %v8038_v11 = vld [vmem:[#allocation46_spill] sm:$0xff] }
 0xe1c   :  { %2544 = vst.msk [vmem:[#allocation4 + $0x10] sm:$0xff] %vm2541_vm10, %v2527_v19 }
 0xe1d   :  { %v1711_v60 = vadd.f32 %v8027_v33, %v1550_v17  ;;  %v8040_v33 = vld [vmem:[#allocation55_spill] sm:$0xff] }
 0xe1e   :  { %v750_v53 = vpop.permute.xlu0 %749  ;;  %v2272_v58 = vld [vmem:[#allocation4 + $0x20] sm:$0xff] }
 0xe1f   :  { %1728 = vst.msk [vmem:[#allocation4 + $0x38] sm:$0xff] %vm8028_vm6, %v1711_v60  ;;  %v775_v27 = vmul.f32 %v750_v53, %v679_v54  ;;  %v2368_v16 = vmul.f32 %v8029_v36, %v2272_v58  ;;  %v8041_v53 = vld [vmem:[#allocation68_spill] sm:$0xff]  ;;  %v8042_v36 = vld [vmem:[#allocation63_spill] sm:$0xff]  ;;  %vm8104_vm6 = vmmov %vm8101_vm5 }
 0xe21   :  { %v896_v9 = vadd.f32 %v8030_v40, %v775_v27  ;;  %v2529_v34 = vadd.f32 %v8031_v41, %v2368_v16  ;;  %v8043_v40 = vld [vmem:[#allocation70_spill] sm:$0xff] }
 0xe22   :  { %v1457_v15 = vld [vmem:[#allocation4 + $0x50] sm:$0xff]  ;;  %v8044_v41 = vld [vmem:[#allocation86_spill] sm:$0xff] }
 0xe23   :  { %v1553_v0 = vmul.f32 %v8032_v7, %v1457_v15  ;;  %913 = vst.msk [vmem:[#allocation4 + $0x68] sm:$0xff] %vm899_vm7, %v896_v9  ;;  %v3964_v7 = vpack.c.bf16 %v6821_v43, %v6824_v31  ;;  %v3976_v43 = vpack.c.bf16 %v6855_v22, %v6803_v21  ;;  %v3408_v15 = vld [vmem:[#allocation3 + $0x50] sm:$0xff] }
 0xe24   :  { %2546 = vst.msk [vmem:[#allocation4 + $0x20] sm:$0xff] %vm2541_vm10, %v2529_v34  ;;  %v3958_v34 = vpack.c.bf16 %v8044_v41, %v6771_v47  ;;  %v3970_v47 = vpack.c.bf16 %v6791_v13, %v6833_v8  ;;  %v3407_v41 = vld [vmem:[#allocation3 + $0x48] sm:$0xff] }
 0xe25   :  { %v1714_v29 = vadd.f32 %v8033_v57, %v1553_v0  ;;  %v3412_v57 = vld [vmem:[#allocation3 + $0x70] sm:$0xff] }
 0xe26   :  { %v3214_v42 = vpop.permute.xlu0 %3213  ;;  %v2275_v61 = vld [vmem:[#allocation4 + $0x38] sm:$0xff] }
 0xe27   :  { %1731 = vst.msk [vmem:[#allocation4 + $0x50] sm:$0xff] %vm8034_vm3, %v1714_v29  ;;  %v2371_v3 = vmul.f32 %v8035_v2, %v2275_v61  ;;  %vm8106_vm3 = vmmov %vm8101_vm5 }
 0xe29   :  { %v2532_v39 = vadd.f32 %v8036_v12, %v2371_v3  ;;  %v3398_v12 = vld [vmem:[#allocation3] sm:$0xff] }
 0xe2a   :  { %v1460_v37 = vld [vmem:[#allocation4 + $0x68] sm:$0xff]  ;;  %4330 = vrcp.f32 %v3398_v12  ;;  %v8056_v12 = vld [vmem:[#allocation5_spill] sm:$0xff] }
 0xe2b   :  { %v1556_v19 = vmul.f32 %v8037_v45, %v1460_v37  ;;  %2549 = vst.msk [vmem:[#allocation4 + $0x38] sm:$0xff] %vm2541_vm10, %v2532_v39  ;;  %v3399_v37 = vld [vmem:[#allocation3 + $0x8] sm:$0xff]  ;;  %v3401_v45 = vld [vmem:[#allocation3 + $0x18] sm:$0xff] }
 0xe2c   :  { %4332 = vrcp.f32 %v3399_v37 }
 0xe2d   :  { %v1717_v5 = vadd.f32 %v8038_v11, %v1556_v19  ;;  %4334 = vrcp.f32 %v3401_v45 }
 0xe2e   :  { %v3220_v17 = vpop.permute.xlu0 %3219  ;;  %v2278_v54 = vld [vmem:[#allocation4 + $0x50] sm:$0xff] }
 0xe2f   :  { %1734 = vst.msk [vmem:[#allocation4 + $0x68] sm:$0xff] %vm8039_vm1, %v1717_v5  ;;  %3235 = vmatpush.bf16.msra.mxu3 %v3220_v17  ;;  %v2374_v60 = vmul.f32 %v8040_v33, %v2278_v54  ;;  %v3403_v5 = vld [vmem:[#allocation3 + $0x28] sm:$0xff]  ;;  %v3402_v54 = vld [vmem:[#allocation3 + $0x20] sm:$0xff] }
 0xe30   :  { %v7100_v19 = vpop.eup %4330  ;;  %4336 = vrcp.f32 %v3403_v5  ;;  %v8058_v5 = vld [vmem:[#allocation33_spill] sm:$0xff] }
 0xe31   :  { %v2535_v58 = vadd.f32 %v8041_v53, %v2374_v60  ;;  %v3400_v53 = vld [vmem:[#allocation3 + $0x10] sm:$0xff]  ;;  %4338 = vrcp.f32 %v3402_v54 }
 0xe32   :  { %v7104_v17 = vpop.eup %4332  ;;  %4340 = vrcp.f32 %v3400_v53 }
 0xe33   :  { %3236 = vmatpush.bf16.msra.mxu3 %v7006_v55  ;;  %2552 = vst.msk [vmem:[#allocation4 + $0x50] sm:$0xff] %vm2541_vm10, %v2535_v58  ;;  %v7106_v33 = vpop.eup %4334  ;;  %v3404_v58 = vld [vmem:[#allocation3 + $0x30] sm:$0xff]  ;;  %v3409_v55 = vld [vmem:[#allocation3 + $0x58] sm:$0xff] }
 0xe34   :  { %4342 = vrcp.f32 %v3404_v58  ;;  %v8059_v58 = vld [vmem:[#allocation21_spill] sm:$0xff] }
 0xe36   :  { %v2281_v27 = vld [vmem:[#allocation4 + $0x68] sm:$0xff] }
 0xe37   :  { %3237 = vmatpush.bf16.msra.mxu3 %v7010_v62  ;;  %v2377_v16 = vmul.f32 %v8042_v36, %v2281_v27  ;;  %v3961_v62 = vpack.c.bf16 %v6777_v30, %v6815_v59  ;;  %v3973_v30 = vpack.c.bf16 %v6844_v14, %v6847_v38  ;;  %v7111_v27 = vpop.eup %4336  ;;  %v3406_v36 = vld [vmem:[#allocation3 + $0x40] sm:$0xff]  ;;  %v3411_v59 = vld [vmem:[#allocation3 + $0x68] sm:$0xff] }
 0xe38   :  { %4344 = vrcp.f32 %v3406_v36 }
 0xe39   :  { %v2538_v9 = vadd.f32 %v8043_v40, %v2377_v16  ;;  %v7113_v16 = vpop.eup %4338  ;;  %v3405_v40 = vld [vmem:[#allocation3 + $0x38] sm:$0xff] }
 0xe3a   :  { %4346 = vrcp.f32 %v3405_v40  ;;  %v3099_v37 = vld [vmem:[#allocation4 + $0x50] sm:$0xff] }
 0xe3b   :  { %3238 = vmatpush.bf16.msra.mxu3 %v3214_v42  ;;  %2555 = vst.msk [vmem:[#allocation4 + $0x68] sm:$0xff] %vm2541_vm10, %v2538_v9  ;;  %v7115_v9 = vpop.eup %4340  ;;  %4348 = vrcp.f32 %v3407_v41  ;;  %v3195_v45 = vmul.f32 %v6994_v32, %v3099_v37  ;;  %v8060_v32 = vmov 2  }
 0xe3c   :  { %4350 = vrcp.f32 %v3409_v55 }
 0xe3d   :  { %4352 = vrcp.f32 %v3408_v15 }
 0xe3f   :  { %3239 = vmatpush.bf16.msra.mxu3 %v7002_v20  ;;  %v3967_v20 = vpack.c.bf16 %v6836_v1, %v6783_v56  ;;  %v3979_v56 = vpack.c.bf16 %v6958_v24, %v6922_v52 }
 0xe42   :  { %v3102_v15 = vld [vmem:[#allocation4 + $0x68] sm:$0xff] }
 0xe43   :  { %3240 = vmatpush.bf16.msra.mxu3 %v7004_v48 }
 0xe46   :  { %3959 = vmatmul.msk.bf16.vlgmr.msra.gmra.mxu3 %vm5005_vm13, %v3958_v34  ;;  %v7120_v34 = vpop.eup %4342  ;;  %vm8090_vm13 = vmmov %vm8039_vm1 }
 0xe56   :  { %3962 = vmatmul.msk.bf16.gmra.mxu3 %vm5025_vm15, %v3961_v62  ;;  %v7122_v62 = vpop.eup %4344  ;;  %vm8095_vm15 = vmmov %vm8039_vm1 }
 0xe66   :  { %3965 = vmatmul.msk.bf16.gmra.mxu3 %vm5061_vm4, %v3964_v7  ;;  %v7124_v7 = vpop.eup %4346  ;;  %vm8076_vm4 = vmmov %vm8039_vm1 }
 0xe67   :  { %v7131_v48 = vpop.eup %4348 }
 0xe76   :  { %3968 = vmatmul.msk.bf16.gmra.mxu3 %vm5114_vm11, %v3967_v20  ;;  %v3410_v20 = vld [vmem:[#allocation3 + $0x60] sm:$0xff]  ;;  %vm8087_vm11 = vmmov %vm8039_vm1 }
 0xe77   :  { %4354 = vrcp.f32 %v3410_v20  ;;  %v3198_v20 = vmul.f32 %v7000_v51, %v3102_v15  ;;  %v8073_v15 = vld [vmem:[#allocation59_spill] sm:$0xff] }
 0xe78   :  { %4356 = vrcp.f32 %v3412_v57 }
 0xe79   :  { %4358 = vrcp.f32 %v3411_v59 }
 0xe86   :  { %3971 = vmatmul.msk.bf16.gmra.mxu3 %vm5163_vm2, %v3970_v47  ;;  %v3093_v47 = vld [vmem:[#allocation4 + $0x20] sm:$0xff]  ;;  %vm3362_vm2 = vcmask 261312  }
 0xe87   :  { %v3189_v31 = vmul.f32 %v6982_v18, %v3093_v47 }
 0xe96   :  { %3974 = vmatmul.msk.bf16.gmra.mxu3 %vm5209_vm0, %v3973_v30  ;;  %v7133_v30 = vpop.eup %4350  ;;  %vm3798_vm0 = vcmask 130048  }
 0xea6   :  { %3977 = vmatmul.msk.bf16.gmra.mxu3 %vm5250_vm9, %v3976_v43  ;;  %v7135_v43 = vpop.eup %4352  ;;  %vm8084_vm9 = vmmov %vm8039_vm1 }
 0xeb6   :  { %3980 = vmatmul.msk.bf16.gmra.mxu3 %vm5274_vm8, %v3979_v56  ;;  %vm8080_vm8 = vmmov %vm8039_vm1 }
 0xeb7   :  { %vm8108_vm1 = vmmov %vm8106_vm3 }
 0xec9   :  { %v3242_v13 = vpop.f32.mrf.mxu3 }
 0xeca   :  { %3298 = vrot.lane.b32.xlu0 %v3242_v13, %s4398_s3  ;;  %v7142_v13 = vpop.eup %4354 }
 0xed1   :  { %v3244_v8 = vpop.f32.mrf.mxu3 }
 0xed2   :  { %3300 = vrot.lane.b32.xlu1 %v3244_v8, %s4398_s3  ;;  %v3413_v8 = vld [vmem:[#allocation3 + $0x78] sm:$0xff] }
 0xed3   :  { %4360 = vrcp.f32 %v3413_v8 }
 0xed9   :  { %v3247_v14 = vpop.f32.mrf.mxu3 }
 0xeda   :  { %3302 = vrot.lane.b32.xlu2 %v3247_v14, %s4398_s3  ;;  %v7144_v14 = vpop.eup %4356 }
 0xee1   :  { %v3249_v21 = vpop.f32.mrf.mxu3 }
 0xee2   :  { %3304 = vrot.lane.b32.xlu0 %v3249_v21, %s4398_s3  ;;  %v7146_v21 = vpop.eup %4358 }
 0xee3   :  { %v7151_v18 = vpop.eup %4360 }
 0xee9   :  { %v3252_v38 = vpop.f32.mrf.mxu3 }
 0xeea   :  { %3306 = vrot.lane.b32.xlu1 %v3252_v38, %s4398_s3  ;;  %v8053_v38 = vmov 1  }
 0xef1   :  { %v3254_v22 = vpop.f32.mrf.mxu3 }
 0xef2   :  { %3308 = vrot.lane.b32.xlu2 %v3254_v22, %s4398_s3  ;;  %v8054_v22 = vld [vmem:[#allocation37_spill] sm:$0xff] }
 0xef9   :  { %v3257_v52 = vpop.f32.mrf.mxu3 }
 0xefa   :  { %3310 = vrot.lane.b32.xlu0 %v3257_v52, %s4398_s3  ;;  %v3096_v52 = vld [vmem:[#allocation4 + $0x38] sm:$0xff] }
 0xf01   :  { %v3259_v24 = vpop.f32.mrf.mxu3 }
 0xf02   :  { %3312 = vrot.lane.b32.xlu1 %v3259_v24, %s4398_s3  ;;  %v3192_v24 = vmul.f32 %v6988_v10, %v3096_v52 }
 0xf09   :  { %v3262_v29 = vpop.f32.mrf.mxu3 }
 0xf0a   :  { %3314 = vrot.lane.b32.xlu2 %v3262_v29, %s4398_s3 }
 0xf11   :  { %v3264_v42 = vpop.f32.mrf.mxu3 }
 0xf12   :  { %3316 = vrot.lane.b32.xlu0 %v3264_v42, %s4398_s3  ;;  %v8055_v42 = vld [vmem:[#allocation38_spill] sm:$0xff] }
 0xf19   :  { %v3267_v61 = vpop.f32.mrf.mxu3 }
 0xf1a   :  { %3318 = vrot.lane.b32.xlu1 %v3267_v61, %s4398_s3 }
 0xf21   :  { %v3269_v2 = vpop.f32.mrf.mxu3 }
 0xf22   :  { %3320 = vrot.lane.b32.xlu2 %v3269_v2, %s4398_s3 }
 0xf29   :  { %v3272_v3 = vpop.f32.mrf.mxu3 }
 0xf2a   :  { %3322 = vrot.lane.b32.xlu0 %v3272_v3, %s4398_s3 }
 0xf31   :  { %v3274_v39 = vpop.f32.mrf.mxu3 }
 0xf32   :  { %3324 = vrot.lane.b32.xlu1 %v3274_v39, %s4398_s3  ;;  %v8057_v39 = vld [vmem:[#allocation8_spill] sm:$0xff] }
 0xf34   :  { %v7162_v29 = vpop.permute.xlu2 %3302 }
 0xf39   :  { %v3277_v11 = vpop.f32.mrf.mxu3 }
 0xf3a   :  { %3448 = vperm.xlu1 %4059, %v7100_v19   ;;  %3326 = vrot.lane.b32.xlu2 %v3277_v11, %s4398_s3 }
 0xf41   :  { %v3279_v60 = vpop.f32.mrf.mxu3 }
 0xf42   :  { %3463 = vperm.xlu1 %4059, %v7106_v33   ;;  %3453 = vperm.xlu2 %4060, %v7104_v17  }
 0xf43   :  { %3328 = vrot.lane.b32.xlu0 %v3279_v60, %s4398_s3  ;;  %v7182_v60 = vpop.permute.xlu0 %3298 }
 0xf44   :  { %v7129_v0 = vpop.permute.xlu1 %3300 }
 0xf4a   :  { %3473 = vperm.xlu1 %4059, %v7111_v27   ;;  %3468 = vperm.xlu2 %4060, %v7113_v16  }
 0xf4b   :  { %3458 = vperm.xlu0 %4058, %v7115_v9  }
 0xf4c   :  { %v7168_v3 = vpop.permute.xlu2 %3308 }
 0xf52   :  { %3488 = vperm.xlu1 %4059, %v7122_v62   ;;  %3478 = vperm.xlu2 %4060, %v7120_v34  }
 0xf53   :  { %3483 = vperm.xlu0 %4058, %v7124_v7  }
 0xf54   :  { %v7190_v40 = vpop.permute.xlu0 %3304 }
 0xf5a   :  { %3503 = vperm.xlu1 %4059, %v7133_v30   ;;  %3493 = vperm.xlu2 %4060, %v7131_v48  }
 0xf5b   :  { %3498 = vperm.xlu0 %4058, %v7135_v43  }
 0xf5c   :  { %v3307_v56 = vpop.permute.xlu1 %3306 }
 0xf5d   :  { %v3350_v1 = vadd.f32 %v3307_v56, %v3189_v31 }
 0xf5f   :  { %3367 = vst.msk [vmem:[#allocation4 + $0x20] sm:$0xff] %vm3362_vm2, %v3350_v1 }
 0xf62   :  { %3518 = vperm.xlu1 %4059, %v7144_v14   ;;  %3508 = vperm.xlu2 %4060, %v7142_v13  }
 0xf63   :  { %3513 = vperm.xlu0 %4058, %v7146_v21  }
 0xf64   :  { %v7173_v10 = vpop.permute.xlu2 %3314 }
 0xf6a   :  { %4062 = vset.pattern.permute.xlu1 %v8053_v38  ;;  %3523 = vperm.xlu2 %4060, %v7151_v18  }
 0xf6b   :  { %4061 = vset.pattern.permute.xlu0 %v8053_v38  ;;  %3547 = vperm.xlu1 %4062, %v7104_v17  }
 0xf6c   :  { %1465 = vperm.xlu0 %4061, %v8054_v22   ;;  %v7198_v55 = vpop.permute.xlu0 %3310 }
 0xf72   :  { %4063 = vset.pattern.permute.xlu2 %v8053_v38 }
 0xf73   :  { %3555 = vperm.xlu1 %4062, %v7106_v33   ;;  %3551 = vperm.xlu2 %4063, %v7115_v9  }
 0xf74   :  { %1480 = vperm.xlu0 %4061, %v8055_v42   ;;  %v3313_v61 = vpop.permute.xlu1 %3312 }
 0xf75   :  { %v3353_v2 = vadd.f32 %v3313_v61, %v3192_v24  ;;  %v8068_v61 = vmov 3  }
 0xf77   :  { %3370 = vst.msk [vmem:[#allocation4 + $0x38] sm:$0xff] %vm3362_vm2, %v3353_v2 }
 0xf7b   :  { %3567 = vperm.xlu1 %4062, %v7120_v34   ;;  %3559 = vperm.xlu2 %4063, %v7113_v16  }
 0xf7c   :  { %1490 = vperm.xlu0 %4061, %v8056_v12   ;;  %v7179_v11 = vpop.permute.xlu2 %3320 }
 0xf83   :  { %3579 = vperm.xlu1 %4062, %v7131_v48   ;;  %3571 = vperm.xlu2 %4063, %v7124_v7  }
 0xf84   :  { %1505 = vperm.xlu0 %4061, %v8057_v39   ;;  %v7204_v59 = vpop.permute.xlu0 %3316  ;;  %v8070_v39 = vld [vmem:[#allocation61_spill] sm:$0xff] }
 0xf85   :  { %8061 = vst [vmem:[#allocation9_spill] sm:$0xff] %v7204_v59 }
 0xf8b   :  { %3591 = vperm.xlu1 %4062, %v7142_v13   ;;  %3583 = vperm.xlu2 %4063, %v7135_v43  }
 0xf8c   :  { %1520 = vperm.xlu0 %4061, %v8058_v5   ;;  %v3319_v54 = vpop.permute.xlu1 %3318  ;;  %v8071_v5 = vld [vmem:[#allocation58_spill] sm:$0xff] }
 0xf8d   :  { %v3356_v53 = vadd.f32 %v3319_v54, %v3195_v45 }
 0xf8f   :  { %3373 = vst.msk [vmem:[#allocation4 + $0x50] sm:$0xff] %vm3362_vm2, %v3356_v53 }
 0xf93   :  { %3603 = vperm.xlu1 %4062, %v7151_v18   ;;  %3595 = vperm.xlu2 %4063, %v7146_v21  }
 0xf94   :  { %1535 = vperm.xlu0 %4061, %v8059_v58   ;;  %v7188_v36 = vpop.permute.xlu2 %3326 }
 0xf9b   :  { %4066 = vset.pattern.permute.xlu1 %v8060_v32  ;;  %4065 = vset.pattern.permute.xlu2 %v8060_v32 }
 0xf9c   :  { %3543 = vperm.xlu0 %4061, %v7100_v19   ;;  %3631 = vperm.xlu1 %4066, %v7115_v9   ;;  %v7196_v41 = vpop.permute.xlu2 %3453  ;;  %v7214_v1 = vpop.permute.xlu0 %3322 }
 0xf9d   :  { %3623 = vperm.xlu2 %4065, %v7100_v19   ;;  %8063 = vst [vmem:[#allocation80_spill] sm:$0xff] %v7214_v1 }
 0xfa4   :  { %3563 = vperm.xlu0 %4061, %v7111_v27   ;;  %3639 = vperm.xlu1 %4066, %v7113_v16   ;;  %v3325_v47 = vpop.permute.xlu1 %3324  ;;  %v3469_v57 = vpop.permute.xlu2 %3468 }
 0xfa5   :  { %v3359_v31 = vadd.f32 %v3325_v47, %v3198_v20  ;;  %3635 = vperm.xlu2 %4065, %v7106_v33  }
 0xfa7   :  { %3376 = vst.msk [vmem:[#allocation4 + $0x68] sm:$0xff] %vm3362_vm2, %v3359_v31 }
 0xfac   :  { %3575 = vperm.xlu0 %4061, %v7122_v62   ;;  %3651 = vperm.xlu1 %4066, %v7124_v7   ;;  %v7210_v56 = vpop.permute.xlu1 %3448  ;;  %v7212_v51 = vpop.permute.xlu2 %3478 }
 0xfad   :  { %8062 = vst [vmem:[#allocation81_spill] sm:$0xff] %v7212_v51  ;;  %3643 = vperm.xlu2 %4065, %v7111_v27   ;;  %v8082_v51 = vld [vmem:[#allocation7_spill] sm:$0xff] }
 0xfb4   :  { %3587 = vperm.xlu0 %4061, %v7133_v30   ;;  %3663 = vperm.xlu1 %4066, %v7135_v43   ;;  %v7219_v8 = vpop.permute.xlu1 %3463  ;;  %v7221_v38 = vpop.permute.xlu2 %3493 }
 0xfb5   :  { %8064 = vst [vmem:[#allocation83_spill] sm:$0xff] %v7221_v38  ;;  %3655 = vperm.xlu2 %4065, %v7122_v62   ;;  %v7224_v22 = vpop.permute.xlu0 %3328 }
 0xfb6   :  { %8065 = vst [vmem:[#allocation82_spill] sm:$0xff] %v7224_v22 }
 0xfbc   :  { %3599 = vperm.xlu0 %4061, %v7144_v14   ;;  %3675 = vperm.xlu1 %4066, %v7146_v21   ;;  %v7228_v52 = vpop.permute.xlu1 %3473  ;;  %v7230_v24 = vpop.permute.xlu2 %3508 }
 0xfbd   :  { %8066 = vst [vmem:[#allocation84_spill] sm:$0xff] %v7230_v24  ;;  %3667 = vperm.xlu2 %4065, %v7133_v30   ;;  %v7233_v42 = vpop.permute.xlu0 %3458 }
 0xfbe   :  { %8067 = vst [vmem:[#allocation13_spill] sm:$0xff] %v7233_v42  ;;  %v8077_v42 = vld [vmem:[#allocation62_spill] sm:$0xff] }
 0xfc4   :  { %4064 = vset.pattern.permute.xlu0 %v8060_v32  ;;  %4068 = vset.pattern.permute.xlu1 %v8068_v61  ;;  %v7237_v2 = vpop.permute.xlu1 %3488  ;;  %v7239_v12 = vpop.permute.xlu2 %3523  ;;  %v7254_v32 = vld [vmem:[#allocation4 + $0x20] sm:$0xff] }
 0xfc5   :  { %8069 = vst [vmem:[#allocation85_spill] sm:$0xff] %v7239_v12  ;;  %3679 = vperm.xlu2 %4065, %v7144_v14   ;;  %2291 = vperm.xlu0 %4064, %v8070_v39   ;;  %v3484_v37 = vpop.permute.xlu0 %3483  ;;  %v3530_v47 = vmul.f32 %v3469_v57, %v7254_v32  ;;  %v7264_v39 = vld [vmem:[#allocation4 + $0x38] sm:$0xff] }
 0xfc6   :  { %3703 = vperm.xlu1 %4068, %v7100_v19   ;;  %v3533_v24 = vmul.f32 %v3484_v37, %v7264_v39 }
 0xfcc   :  { %v7244_v45 = vpop.permute.xlu1 %3503 }
 0xfcd   :  { %4069 = vset.pattern.permute.xlu2 %v8068_v61  ;;  %2301 = vperm.xlu0 %4064, %v8071_v5   ;;  %v3499_v54 = vpop.permute.xlu0 %3498  ;;  %v7248_v53 = vpop.permute.xlu2 %3551  ;;  %v8074_v5 = vld [vmem:[#allocation60_spill] sm:$0xff] }
 0xfce   :  { %8072 = vst [vmem:[#allocation11_spill] sm:$0xff] %v7248_v53  ;;  %3715 = vperm.xlu1 %4068, %v7106_v33   ;;  %3707 = vperm.xlu2 %4069, %v7104_v17  }
 0xfd4   :  { %v7252_v58 = vpop.permute.xlu1 %3518 }
 0xfd5   :  { %2316 = vperm.xlu0 %4064, %v8073_v15   ;;  %v3514_v19 = vpop.permute.xlu0 %3513  ;;  %v3560_v20 = vpop.permute.xlu2 %3559 }
 0xfd6   :  { %3723 = vperm.xlu1 %4068, %v7111_v27   ;;  %3719 = vperm.xlu2 %4069, %v7113_v16   ;;  %v3610_v31 = vmul.f32 %v3560_v20, %v7254_v32  ;;  %v1447_v16 = vld [vmem:[#allocation4] sm:$0xff] }
 0xfd8   :  { %v7262_v33 = vsel %vm899_vm7, %v3530_v47, %v3610_v31  ;;  %v8075_v31 = vld [vmem:[#allocation40_spill] sm:$0xff] }
 0xfdd   :  { %2331 = vperm.xlu0 %4064, %v8074_v5   ;;  %v7267_v12 = vpop.permute.xlu1 %3547  ;;  %v3572_v15 = vpop.permute.xlu2 %3571  ;;  %v7278_v5 = vld [vmem:[#allocation4 + $0x50] sm:$0xff] }
 0xfde   :  { %3735 = vperm.xlu1 %4068, %v7122_v62   ;;  %3727 = vperm.xlu2 %4069, %v7120_v34   ;;  %v3613_v27 = vmul.f32 %v3572_v15, %v7264_v39  ;;  %v1466_v57 = vpop.permute.xlu0 %1465  ;;  %v3536_v22 = vmul.f32 %v3499_v54, %v7278_v5  ;;  %v1450_v15 = vld [vmem:[#allocation4 + $0x18] sm:$0xff]  ;;  %v7293_v54 = vld [vmem:[#allocation4 + $0x68] sm:$0xff] }
 0xfdf   :  { %v1543_v20 = vmul.f32 %v1466_v57, %v1447_v16  ;;  %v8078_v57 = vld [vmem:[#allocation41_spill] sm:$0xff] }
 0xfe0   :  { %v7274_v47 = vsel %vm899_vm7, %v3533_v24, %v3613_v27 }
 0xfe1   :  { %v1704_v53 = vadd.f32 %v8075_v31, %v1543_v20  ;;  %v8079_v31 = vld [vmem:[#allocation10_spill] sm:$0xff] }
 0xfe3   :  { %1721 = vst.msk [vmem:[#allocation4] sm:$0xff] %vm8076_vm4, %v1704_v53  ;;  %vm8110_vm4 = vmmov %vm8108_vm1 }
 0xfe5   :  { %2346 = vperm.xlu0 %4064, %v8077_v42   ;;  %v7281_v37 = vpop.permute.xlu1 %3555  ;;  %v3584_v62 = vpop.permute.xlu2 %3583 }
 0xfe6   :  { %3747 = vperm.xlu1 %4068, %v7133_v30   ;;  %3739 = vperm.xlu2 %4069, %v7131_v48   ;;  %v3616_v24 = vmul.f32 %v3584_v62, %v7278_v5  ;;  %v1481_v27 = vpop.permute.xlu0 %1480  ;;  %v8081_v30 = vld [vmem:[#allocation71_spill] sm:$0xff] }
 0xfe7   :  { %v1546_v16 = vmul.f32 %v1481_v27, %v1450_v15  ;;  %v3539_v15 = vmul.f32 %v3514_v19, %v7293_v54 }
 0xfe8   :  { %v7288_v53 = vsel %vm899_vm7, %v3536_v22, %v3616_v24  ;;  %v1452_v24 = vld [vmem:[#allocation4 + $0x28] sm:$0xff] }
 0xfe9   :  { %v1707_v20 = vadd.f32 %v8078_v57, %v1546_v16 }
 0xfea   :  { %v2268_v42 = vld [vmem:[#allocation4] sm:$0xff] }
 0xfeb   :  { %v2364_v38 = vmul.f32 %v8079_v31, %v2268_v42  ;;  %1724 = vst.msk [vmem:[#allocation4 + $0x18] sm:$0xff] %vm8080_vm8, %v1707_v20  ;;  %vm8112_vm8 = vmmov %vm8108_vm1 }
 0xfed   :  { %v2525_v1 = vadd.f32 %v8081_v30, %v2364_v38  ;;  %2361 = vperm.xlu0 %4064, %v8082_v51   ;;  %v7297_v62 = vpop.permute.xlu1 %3567  ;;  %v3596_v59 = vpop.permute.xlu2 %3595  ;;  %v8083_v51 = vld [vmem:[#allocation47_spill] sm:$0xff] }
 0xfee   :  { %3759 = vperm.xlu1 %4068, %v7144_v14   ;;  %3751 = vperm.xlu2 %4069, %v7142_v13   ;;  %v3619_v22 = vmul.f32 %v3596_v59, %v7293_v54  ;;  %v1491_v27 = vpop.permute.xlu0 %1490  ;;  %v1455_v59 = vld [vmem:[#allocation4 + $0x40] sm:$0xff] }
 0xfef   :  { %2542 = vst.msk [vmem:[#allocation4] sm:$0xff] %vm2541_vm10, %v2525_v1  ;;  %v1548_v16 = vmul.f32 %v1491_v27, %v1452_v24 }
 0xff0   :  { %v7305_v38 = vsel %vm899_vm7, %v3539_v15, %v3619_v22  ;;  %v8085_v15 = vld [vmem:[#allocation48_spill] sm:$0xff] }
 0xff1   :  { %v1709_v57 = vadd.f32 %v8083_v51, %v1548_v16  ;;  %v8088_v16 = vld [vmem:[#allocation72_spill] sm:$0xff] }
 0xff3   :  { %1726 = vst.msk [vmem:[#allocation4 + $0x28] sm:$0xff] %vm8084_vm9, %v1709_v57  ;;  %vm8115_vm9 = vmmov %vm8108_vm1 }
 0xff5   :  { %3627 = vperm.xlu0 %4064, %v7104_v17   ;;  %v7310_v19 = vpop.permute.xlu1 %3579  ;;  %v8086_v17 = vld [vmem:[#allocation54_spill] sm:$0xff] }
 0xff6   :  { %v3089_v14 = vld [vmem:[#allocation4] sm:$0xff]  ;;  %3763 = vperm.xlu2 %4069, %v7151_v18   ;;  %v1506_v20 = vpop.permute.xlu0 %1505 }
 0xff7   :  { %v3185_v42 = vmul.f32 %v6978_v28, %v3089_v14  ;;  %v1551_v1 = vmul.f32 %v1506_v20, %v1455_v59  ;;  %v7314_v31 = vpop.permute.xlu2 %3623  ;;  %v1458_v28 = vld [vmem:[#allocation4 + $0x58] sm:$0xff]  ;;  %v8089_v20 = vld [vmem:[#allocation49_spill] sm:$0xff] }
 0xff9   :  { %v3346_v30 = vadd.f32 %v7182_v60, %v3185_v42  ;;  %v1712_v22 = vadd.f32 %v8085_v15, %v1551_v1 }
 0xffa   :  { %v2273_v24 = vld [vmem:[#allocation4 + $0x28] sm:$0xff] }
 0xffb   :  { %3363 = vst.msk [vmem:[#allocation4] sm:$0xff] %vm3362_vm2, %v3346_v30  ;;  %v2369_v27 = vmul.f32 %v8086_v17, %v2273_v24  ;;  %v8091_v30 = vld [vmem:[#allocation56_spill] sm:$0xff]  ;;  %v8092_v24 = vld [vmem:[#allocation6_spill] sm:$0xff] }
 0xffc   :  { %1729 = vst.msk [vmem:[#allocation4 + $0x40] sm:$0xff] %vm8087_vm11, %v1712_v22  ;;  %vm8118_vm11 = vmmov %vm8108_vm1 }
 0xffd   :  { %v2530_v51 = vadd.f32 %v8088_v16, %v2369_v27  ;;  %3647 = vperm.xlu0 %4064, %v7120_v34   ;;  %v7323_v57 = vpop.permute.xlu1 %3591  ;;  %v1461_v27 = vld [vmem:[#allocation4 + $0x70] sm:$0xff] }
 0xffe   :  { %v1521_v14 = vpop.permute.xlu0 %1520 }
 0xfff   :  { %2547 = vst.msk [vmem:[#allocation4 + $0x28] sm:$0xff] %vm2541_vm10, %v2530_v51  ;;  %v1554_v60 = vmul.f32 %v1521_v14, %v1458_v28  ;;  %v7326_v59 = vpop.permute.xlu2 %3635 }
0x1001   :  { %v1715_v42 = vadd.f32 %v8089_v20, %v1554_v60  ;;  %v8093_v20 = vld [vmem:[#allocation50_spill] sm:$0xff] }
0x1003   :  { %v2276_v1 = vld [vmem:[#allocation4 + $0x40] sm:$0xff]  ;;  %1732 = vst.msk [vmem:[#allocation4 + $0x58] sm:$0xff] %vm8090_vm13, %v1715_v42  ;;  %vm8123_vm13 = vmmov %vm8108_vm1 }
0x1004   :  { %v2372_v15 = vmul.f32 %v8091_v30, %v2276_v1 }
0x1005   :  { %3659 = vperm.xlu0 %4064, %v7131_v48   ;;  %v7332_v22 = vpop.permute.xlu1 %3603  ;;  %v8094_v48 = vld [vmem:[#allocation57_spill] sm:$0xff] }
0x1006   :  { %v3094_v34 = vld [vmem:[#allocation4 + $0x28] sm:$0xff]  ;;  %v2533_v17 = vadd.f32 %v8092_v24, %v2372_v15  ;;  %v1536_v16 = vpop.permute.xlu0 %1535  ;;  %v8096_v15 = vld [vmem:[#allocation75_spill] sm:$0xff] }
0x1007   :  { %v3190_v51 = vmul.f32 %v6980_v26, %v3094_v34  ;;  %v1557_v28 = vmul.f32 %v1536_v16, %v1461_v27  ;;  %v7336_v14 = vpop.permute.xlu2 %3643 }
0x1008   :  { %2550 = vst.msk [vmem:[#allocation4 + $0x40] sm:$0xff] %vm2541_vm10, %v2533_v17 }
0x1009   :  { %v3351_v60 = vadd.f32 %v7168_v3, %v3190_v51  ;;  %v1718_v42 = vadd.f32 %v8093_v20, %v1557_v28  ;;  %v8097_v28 = vld [vmem:[#allocation64_spill] sm:$0xff]  ;;  %v8098_v20 = vld [vmem:[#allocation77_spill] sm:$0xff] }
0x100a   :  { %v2279_v1 = vld [vmem:[#allocation4 + $0x58] sm:$0xff] }
0x100b   :  { %3368 = vst.msk [vmem:[#allocation4 + $0x28] sm:$0xff] %vm3362_vm2, %v3351_v60  ;;  %v2375_v30 = vmul.f32 %v8094_v48, %v2279_v1 }
0x100c   :  { %1735 = vst.msk [vmem:[#allocation4 + $0x70] sm:$0xff] %vm8095_vm15, %v1718_v42  ;;  %vm8126_vm15 = vmmov %vm8108_vm1 }
0x100d   :  { %v2536_v24 = vadd.f32 %v8096_v15, %v2375_v30  ;;  %3671 = vperm.xlu0 %4064, %v7142_v13  }
0x100e   :  { %v3544_v26 = vpop.permute.xlu0 %3543  ;;  %v7346_v34 = vpop.permute.xlu1 %3631 }
0x100f   :  { %v3097_v27 = vld [vmem:[#allocation4 + $0x40] sm:$0xff]  ;;  %2553 = vst.msk [vmem:[#allocation4 + $0x58] sm:$0xff] %vm2541_vm10, %v2536_v24  ;;  %v7349_v3 = vpop.permute.xlu2 %3655 }
0x1010   :  { %v3193_v17 = vmul.f32 %v6986_v6, %v3097_v27 }
0x1012   :  { %v3354_v16 = vadd.f32 %v7173_v10, %v3193_v17 }
0x1013   :  { %v2282_v51 = vld [vmem:[#allocation4 + $0x70] sm:$0xff] }
0x1014   :  { %3371 = vst.msk [vmem:[#allocation4 + $0x40] sm:$0xff] %vm3362_vm2, %v3354_v16  ;;  %v2378_v60 = vmul.f32 %v8097_v28, %v2282_v51 }
0x1015   :  { %3683 = vperm.xlu0 %4064, %v7151_v18  }
0x1016   :  { %v3100_v13 = vld [vmem:[#allocation4 + $0x58] sm:$0xff]  ;;  %v2539_v42 = vadd.f32 %v8098_v20, %v2378_v60  ;;  %v3564_v1 = vpop.permute.xlu0 %3563  ;;  %v3640_v48 = vpop.permute.xlu1 %3639 }
0x1017   :  { %v3196_v30 = vmul.f32 %v6990_v4, %v3100_v13  ;;  %v7358_v15 = vpop.permute.xlu2 %3667 }
0x1018   :  { %2556 = vst.msk [vmem:[#allocation4 + $0x70] sm:$0xff] %vm2541_vm10, %v2539_v42 }
0x1019   :  { %v3357_v6 = vadd.f32 %v7179_v11, %v3196_v30  ;;  %v3430_v30 = vld [vmem:[#allocation4] sm:$0xff] }
0x101b   :  { %3374 = vst.msk [vmem:[#allocation4 + $0x58] sm:$0xff] %vm3362_vm2, %v3357_v6  ;;  %v3526_v6 = vmul.f32 %v7210_v56, %v3430_v30 }
0x101d   :  { %4067 = vset.pattern.permute.xlu0 %v8068_v61 }
0x101e   :  { %3117 = vperm.xlu0 %4067, %v6906_v50   ;;  %v7365_v18 = vpop.permute.xlu0 %3575  ;;  %v3652_v10 = vpop.permute.xlu1 %3651 }
0x101f   :  { %v3103_v24 = vld [vmem:[#allocation4 + $0x70] sm:$0xff]  ;;  %v3693_v27 = vmul.f32 %v3652_v10, %v7264_v39  ;;  %v7368_v17 = vpop.permute.xlu2 %3679  ;;  %v2269_v10 = vld [vmem:[#allocation4 + $0x8] sm:$0xff] }
0x1020   :  { %v3199_v4 = vmul.f32 %v6998_v44, %v3103_v24  ;;  %v3686_v24 = vmul.f32 %v7314_v31, %v3430_v30 }
0x1021   :  { %v7373_v11 = vsel %vm3798_vm0, %v7274_v47, %v3693_v27  ;;  %v3690_v47 = vmul.f32 %v3640_v48, %v7254_v32  ;;  %v3606_v48 = vmul.f32 %v3544_v26, %v3430_v30 }
0x1022   :  { %v3360_v16 = vadd.f32 %v7188_v36, %v3199_v4  ;;  %v8100_v4 = vld [vmem:[#allocation65_spill] sm:$0xff] }
0x1024   :  { %3377 = vst.msk [vmem:[#allocation4 + $0x70] sm:$0xff] %vm3362_vm2, %v3360_v16 }
0x1026   :  { %3122 = vperm.xlu0 %4067, %v6873_v23   ;;  %v7378_v50 = vpop.permute.xlu0 %3587  ;;  %v3664_v61 = vpop.permute.xlu1 %3663 }
0x1027   :  { %v3696_v51 = vmul.f32 %v3664_v61, %v7278_v5 }
0x1028   :  { %v7381_v28 = vpop.permute.xlu2 %3707 }
0x1029   :  { %v7385_v44 = vsel %vm3798_vm0, %v7288_v53, %v3696_v51  ;;  %v3803_v53 = vsel %vm3798_vm0, %v7262_v33, %v3690_v47 }
0x102e   :  { %3137 = vperm.xlu0 %4067, %v6882_v46   ;;  %v7389_v36 = vpop.permute.xlu0 %3599  ;;  %v3676_v60 = vpop.permute.xlu1 %3675 }
0x102f   :  { %v3699_v23 = vmul.f32 %v3676_v60, %v7293_v54  ;;  %v3435_v60 = vld [vmem:[#allocation4 + $0x28] sm:$0xff] }
0x1030   :  { %v3720_v13 = vpop.permute.xlu2 %3719 }
0x1031   :  { %v7394_v20 = vsel %vm3798_vm0, %v7305_v38, %v3699_v23  ;;  %v3770_v42 = vmul.f32 %v3720_v13, %v7254_v32  ;;  %v3782_v38 = vsel %vm899_vm7, %v3526_v6, %v3606_v48  ;;  %v8102_v23 = vld [vmem:[#allocation73_spill] sm:$0xff]  ;;  %v3531_v48 = vmul.f32 %v7228_v52, %v3435_v60  ;;  %v2274_v6 = vld [vmem:[#allocation4 + $0x30] sm:$0xff] }
0x1032   :  { %v3799_v61 = vsel %vm3798_vm0, %v3782_v38, %v3686_v24 }
0x1033   :  { %v3820_v46 = vsel %vm3815_vm12, %v3803_v53, %v3770_v42  ;;  %v3611_v42 = vmul.f32 %v3564_v1, %v3435_v60 }
0x1034   :  { %3837 = vst.msk [vmem:[%s7586_s4 + $0x20] sm:$0xff] %vm8099_vm14, %v3820_v46  ;;  %vm8127_vm14 = vmmov %vm8108_vm1 }
0x1036   :  { %3152 = vperm.xlu0 %4067, %v6891_v63   ;;  %v2271_v63 = vld [vmem:[#allocation4 + $0x18] sm:$0xff] }
0x1037   :  { %v2292_v32 = vpop.permute.xlu0 %2291 }
0x1038   :  { %v2365_v27 = vmul.f32 %v2292_v32, %v2269_v10  ;;  %v3704_v33 = vpop.permute.xlu1 %3703  ;;  %v3691_v10 = vmul.f32 %v7336_v14, %v3435_v60 }
0x1039   :  { %v3766_v26 = vmul.f32 %v3704_v33, %v3430_v30 }
0x103a   :  { %v2526_v16 = vadd.f32 %v8100_v4, %v2365_v27  ;;  %v8103_v27 = vld [vmem:[#allocation74_spill] sm:$0xff] }
0x103b   :  { %v3816_v51 = vsel %vm3815_vm12, %v3799_v61, %v3766_v26  ;;  %v2277_v4 = vld [vmem:[#allocation4 + $0x48] sm:$0xff] }
0x103c   :  { %2543 = vst.msk [vmem:[#allocation4 + $0x8] sm:$0xff] %vm2541_vm10, %v2526_v16 }
0x103d   :  { %3833 = vst.msk [vmem:[%s7586_s4] sm:$0xff] %vm8101_vm5, %v3816_v51 }
0x103e   :  { %3167 = vperm.xlu0 %4067, %v6897_v25   ;;  %v3787_v25 = vsel %vm899_vm7, %v3531_v48, %v3611_v42  ;;  %v2280_v42 = vld [vmem:[#allocation4 + $0x60] sm:$0xff] }
0x103f   :  { %v2302_v56 = vpop.permute.xlu0 %2301  ;;  %v3804_v52 = vsel %vm3798_vm0, %v3787_v25, %v3691_v10  ;;  %v3444_v25 = vld [vmem:[#allocation4 + $0x70] sm:$0xff] }
0x1040   :  { %v2367_v31 = vmul.f32 %v2302_v56, %v2271_v63  ;;  %v7417_v47 = vpop.permute.xlu1 %3715  ;;  %v3441_v56 = vld [vmem:[#allocation4 + $0x58] sm:$0xff]  ;;  %v3620_v10 = vmul.f32 %v7389_v36, %v3444_v25 }
0x1042   :  { %v2528_v13 = vadd.f32 %v8102_v23, %v2367_v31  ;;  %v8105_v31 = vld [vmem:[#allocation76_spill] sm:$0xff]  ;;  %v3617_v23 = vmul.f32 %v7378_v50, %v3441_v56 }
0x1043   :  { %v3090_v30 = vld [vmem:[#allocation4 + $0x8] sm:$0xff] }
0x1044   :  { %v3186_v53 = vmul.f32 %v6976_v35, %v3090_v30  ;;  %2545 = vst.msk [vmem:[#allocation4 + $0x18] sm:$0xff] %vm2541_vm10, %v2528_v13  ;;  %v3438_v35 = vld [vmem:[#allocation4 + $0x40] sm:$0xff] }
0x1045   :  { %v3534_v26 = vmul.f32 %v7237_v2, %v3438_v35  ;;  %v3694_v61 = vmul.f32 %v7349_v3, %v3438_v35 }
0x1046   :  { %v3347_v46 = vadd.f32 %v7129_v0, %v3186_v53  ;;  %3182 = vperm.xlu0 %4067, %v6992_v49   ;;  %v3614_v0 = vmul.f32 %v7365_v18, %v3438_v35  ;;  %v3697_v53 = vmul.f32 %v7358_v15, %v3441_v56 }
0x1047   :  { %v2317_v38 = vpop.permute.xlu0 %2316 }
0x1048   :  { %3364 = vst.msk [vmem:[#allocation4 + $0x8] sm:$0xff] %vm3362_vm2, %v3347_v46  ;;  %v2370_v1 = vmul.f32 %v2317_v38, %v2274_v6  ;;  %v3724_v32 = vpop.permute.xlu1 %3723  ;;  %v3790_v14 = vsel %vm899_vm7, %v3534_v26, %v3614_v0  ;;  %v8107_v6 = vld [vmem:[#allocation78_spill] sm:$0xff] }
0x1049   :  { %v3771_v24 = vmul.f32 %v3724_v32, %v3435_v60  ;;  %v3807_v2 = vsel %vm3798_vm0, %v3790_v14, %v3694_v61  ;;  %v2283_v32 = vld [vmem:[#allocation4 + $0x78] sm:$0xff] }
0x104a   :  { %v2531_v33 = vadd.f32 %v8103_v27, %v2370_v1 }
0x104b   :  { %v3821_v49 = vsel %vm3815_vm12, %v3804_v52, %v3771_v24  ;;  %v8109_v52 = vld [vmem:[#allocation79_spill] sm:$0xff] }
0x104c   :  { %2548 = vst.msk [vmem:[#allocation4 + $0x30] sm:$0xff] %vm2541_vm10, %v2531_v33 }
0x104d   :  { %3838 = vst.msk [vmem:[%s7586_s4 + $0x28] sm:$0xff] %vm8104_vm6, %v3821_v49 }
0x104e   :  { %3711 = vperm.xlu0 %4067, %v7115_v9   ;;  %v3537_v9 = vmul.f32 %v7244_v45, %v3441_v56 }
0x104f   :  { %v2332_v16 = vpop.permute.xlu0 %2331  ;;  %v3431_v49 = vld [vmem:[#allocation4 + $0x8] sm:$0xff] }
0x1050   :  { %v2373_v18 = vmul.f32 %v2332_v16, %v2277_v4  ;;  %v3736_v51 = vpop.permute.xlu1 %3735  ;;  %v3793_v3 = vsel %vm899_vm7, %v3537_v9, %v3617_v23  ;;  %v3767_v16 = vmul.f32 %v7381_v28, %v3431_v49 }
0x1051   :  { %v3774_v63 = vmul.f32 %v3736_v51, %v3438_v35  ;;  %v3810_v45 = vsel %vm3798_vm0, %v3793_v3, %v3697_v53  ;;  %v3700_v35 = vmul.f32 %v7368_v17, %v3444_v25  ;;  %v3607_v17 = vmul.f32 %v7267_v12, %v3431_v49 }
0x1052   :  { %v2534_v60 = vadd.f32 %v8105_v31, %v2373_v18 }
0x1053   :  { %v3824_v13 = vsel %vm3815_vm12, %v3807_v2, %v3774_v63  ;;  %v3092_v2 = vld [vmem:[#allocation4 + $0x18] sm:$0xff]  ;;  %v3095_v3 = vld [vmem:[#allocation4 + $0x30] sm:$0xff] }
0x1054   :  { %2551 = vst.msk [vmem:[#allocation4 + $0x48] sm:$0xff] %vm2541_vm10, %v2534_v60 }
0x1055   :  { %3841 = vst.msk [vmem:[%s7586_s4 + $0x40] sm:$0xff] %vm8106_vm3, %v3824_v13 }
0x1056   :  { %3731 = vperm.xlu0 %4067, %v7124_v7   ;;  %v3540_v7 = vmul.f32 %v7252_v58, %v3444_v25 }
0x1057   :  { %v2347_v30 = vpop.permute.xlu0 %2346 }
0x1058   :  { %v2376_v50 = vmul.f32 %v2347_v30, %v2280_v42  ;;  %v3748_v48 = vpop.permute.xlu1 %3747  ;;  %v3796_v15 = vsel %vm899_vm7, %v3540_v7, %v3620_v10  ;;  %v8114_v7 = vld [vmem:[#allocation81_spill] sm:$0xff] }
0x1059   :  { %v3777_v46 = vmul.f32 %v3748_v48, %v3441_v56  ;;  %v3813_v58 = vsel %vm3798_vm0, %v3796_v15, %v3700_v35  ;;  %v3091_v56 = vld [vmem:[#allocation4 + $0x10] sm:$0xff] }
0x105a   :  { %v2537_v38 = vadd.f32 %v8107_v6, %v2376_v50  ;;  %v3728_v6 = vpop.permute.xlu2 %3727 }
0x105b   :  { %v3827_v1 = vsel %vm3815_vm12, %v3810_v45, %v3777_v46  ;;  %v3098_v45 = vld [vmem:[#allocation4 + $0x48] sm:$0xff] }
0x105c   :  { %2554 = vst.msk [vmem:[#allocation4 + $0x60] sm:$0xff] %vm2541_vm10, %v2537_v38 }
0x105d   :  { %3844 = vst.msk [vmem:[%s7586_s4 + $0x58] sm:$0xff] %vm8108_vm1, %v3827_v1 }
0x105e   :  { %3743 = vperm.xlu0 %4067, %v7135_v43   ;;  %v3527_v43 = vmul.f32 %v7196_v41, %v3431_v49 }
0x105f   :  { %v2362_v24 = vpop.permute.xlu0 %2361 }
0x1060   :  { %v2379_v36 = vmul.f32 %v2362_v24, %v2283_v32  ;;  %v3760_v27 = vpop.permute.xlu1 %3759  ;;  %v3783_v61 = vsel %vm899_vm7, %v3527_v43, %v3607_v17  ;;  %v8117_v43 = vld [vmem:[#allocation83_spill] sm:$0xff] }
0x1061   :  { %v3780_v33 = vmul.f32 %v3760_v27, %v3444_v25 }
0x1062   :  { %v2540_v0 = vadd.f32 %v8109_v52, %v2379_v36 }
0x1063   :  { %v3830_v26 = vsel %vm3815_vm12, %v3813_v58, %v3780_v33  ;;  %v3101_v27 = vld [vmem:[#allocation4 + $0x60] sm:$0xff]  ;;  %v3740_v58 = vpop.permute.xlu2 %3739 }
0x1064   :  { %2557 = vst.msk [vmem:[#allocation4 + $0x78] sm:$0xff] %vm2541_vm10, %v2540_v0  ;;  %vm8111_vm10 = vmmov %vm8108_vm1 }
0x1065   :  { %3847 = vst.msk [vmem:[%s7586_s4 + $0x70] sm:$0xff] %vm8110_vm4, %v3830_v26 }
0x1066   :  { %3755 = vperm.xlu0 %4067, %v7146_v21  }
0x1067   :  { %v3628_v14 = vpop.permute.xlu0 %3627 }
0x1068   :  { %v3687_v4 = vmul.f32 %v3628_v14, %v3431_v49 }
0x106a   :  { %v3800_v18 = vsel %vm3798_vm0, %v3783_v61, %v3687_v4 }
0x106b   :  { %v3817_v51 = vsel %vm3815_vm12, %v3800_v18, %v3767_v16 }
0x106c   :  { %3834 = vst.msk [vmem:[%s7586_s4 + $0x8] sm:$0xff] %vm8111_vm10, %v3817_v51  ;;  %v3104_v51 = vld [vmem:[#allocation4 + $0x78] sm:$0xff] }
0x106f   :  { %v3648_v41 = vpop.permute.xlu0 %3647 }
0x1077   :  { %v3660_v63 = vpop.permute.xlu0 %3659 }
0x107f   :  { %v7486_v12 = vpop.permute.xlu0 %3671 }
0x1087   :  { %v7488_v21 = vpop.permute.xlu0 %3683 }
0x1090   :  { %v3118_v31 = vpop.permute.xlu0 %3117 }
0x1091   :  { %v3187_v28 = vmul.f32 %v3118_v31, %v3091_v56 }
0x1093   :  { %v3348_v60 = vadd.f32 %v7162_v29, %v3187_v28 }
0x1095   :  { %3365 = vst.msk [vmem:[#allocation4 + $0x10] sm:$0xff] %vm3362_vm2, %v3348_v60  ;;  %v8120_v60 = vld [vmem:[#allocation13_spill] sm:$0xff] }
0x1098   :  { %v3123_v23 = vpop.permute.xlu0 %3122 }
0x1099   :  { %v3188_v13 = vmul.f32 %v3123_v23, %v3092_v2  ;;  %v8121_v23 = vld [vmem:[#allocation11_spill] sm:$0xff] }
0x109b   :  { %v3349_v9 = vadd.f32 %v7190_v40, %v3188_v13 }
0x109c   :  { %v3432_v56 = vld [vmem:[#allocation4 + $0x10] sm:$0xff] }
0x109d   :  { %3366 = vst.msk [vmem:[#allocation4 + $0x18] sm:$0xff] %vm3362_vm2, %v3349_v9  ;;  %v3528_v2 = vmul.f32 %v8120_v60, %v3432_v56  ;;  %v3608_v13 = vmul.f32 %v8121_v23, %v3432_v56  ;;  %v3752_v9 = vpop.permute.xlu2 %3751 }
0x10a0   :  { %v3138_v42 = vpop.permute.xlu0 %3137 }
0x10a1   :  { %v3191_v30 = vmul.f32 %v3138_v42, %v3095_v3  ;;  %v8122_v42 = vld [vmem:[#allocation84_spill] sm:$0xff] }
0x10a3   :  { %v3352_v53 = vadd.f32 %v7198_v55, %v3191_v30 }
0x10a4   :  { %v3433_v50 = vld [vmem:[#allocation4 + $0x18] sm:$0xff] }
0x10a5   :  { %v3529_v48 = vmul.f32 %v7219_v8, %v3433_v50  ;;  %v3609_v46 = vmul.f32 %v7281_v37, %v3433_v50  ;;  %v3689_v29 = vmul.f32 %v7326_v59, %v3433_v50  ;;  %3369 = vst.msk [vmem:[#allocation4 + $0x30] sm:$0xff] %vm3362_vm2, %v3352_v53  ;;  %v3769_v25 = vmul.f32 %v7417_v47, %v3433_v50  ;;  %v8113_v8 = vld [vmem:[#allocation9_spill] sm:$0xff] }
0x10a7   :  { %v3785_v40 = vsel %vm899_vm7, %v3529_v48, %v3609_v46  ;;  %v3688_v48 = vmul.f32 %v7346_v34, %v3432_v56 }
0x10a8   :  { %v3802_v38 = vsel %vm3798_vm0, %v3785_v40, %v3689_v29  ;;  %v3153_v10 = vpop.permute.xlu0 %3152 }
0x10a9   :  { %v3819_v55 = vsel %vm3815_vm12, %v3802_v38, %v3769_v25  ;;  %v3194_v1 = vmul.f32 %v3153_v10, %v3098_v45  ;;  %v3784_v25 = vsel %vm899_vm7, %v3528_v2, %v3608_v13  ;;  %v8125_v10 = vld [vmem:[#allocation85_spill] sm:$0xff] }
0x10aa   :  { %3836 = vst.msk [vmem:[%s7586_s4 + $0x18] sm:$0xff] %vm8112_vm8, %v3819_v55 }
0x10ab   :  { %v3355_v37 = vadd.f32 %v8113_v8, %v3194_v1 }
0x10ac   :  { %v3436_v59 = vld [vmem:[#allocation4 + $0x30] sm:$0xff] }
0x10ad   :  { %v3532_v47 = vmul.f32 %v8114_v7, %v3436_v59  ;;  %v3612_v15 = vmul.f32 %v7297_v62, %v3436_v59  ;;  %v3692_v32 = vmul.f32 %v3648_v41, %v3436_v59  ;;  %3372 = vst.msk [vmem:[#allocation4 + $0x48] sm:$0xff] %vm3362_vm2, %v3355_v37  ;;  %v3772_v24 = vmul.f32 %v3728_v6, %v3436_v59  ;;  %v8116_v62 = vld [vmem:[#allocation80_spill] sm:$0xff]  ;;  %v3764_v37 = vpop.permute.xlu2 %3763 }
0x10af   :  { %v3788_v35 = vsel %vm899_vm7, %v3532_v47, %v3612_v15 }
0x10b0   :  { %v3805_v36 = vsel %vm3798_vm0, %v3788_v35, %v3692_v32  ;;  %v3168_v33 = vpop.permute.xlu0 %3167 }
0x10b1   :  { %v3822_v52 = vsel %vm3815_vm12, %v3805_v36, %v3772_v24  ;;  %v3197_v0 = vmul.f32 %v3168_v33, %v3101_v27 }
0x10b2   :  { %3839 = vst.msk [vmem:[%s7586_s4 + $0x30] sm:$0xff] %vm8115_vm9, %v3822_v52 }
0x10b3   :  { %v3358_v49 = vadd.f32 %v8116_v62, %v3197_v0 }
0x10b4   :  { %v3439_v26 = vld [vmem:[#allocation4 + $0x48] sm:$0xff] }
0x10b5   :  { %v3535_v17 = vmul.f32 %v8117_v43, %v3439_v26  ;;  %v3615_v14 = vmul.f32 %v7310_v19, %v3439_v26  ;;  %v3695_v4 = vmul.f32 %v3660_v63, %v3439_v26  ;;  %3375 = vst.msk [vmem:[#allocation4 + $0x60] sm:$0xff] %vm3362_vm2, %v3358_v49  ;;  %v3775_v16 = vmul.f32 %v3740_v58, %v3439_v26  ;;  %v8119_v19 = vld [vmem:[#allocation82_spill] sm:$0xff] }
0x10b7   :  { %v3791_v61 = vsel %vm899_vm7, %v3535_v17, %v3615_v14 }
0x10b8   :  { %v3808_v18 = vsel %vm3798_vm0, %v3791_v61, %v3695_v4  ;;  %v3183_v41 = vpop.permute.xlu0 %3182 }
0x10b9   :  { %v3825_v31 = vsel %vm3815_vm12, %v3808_v18, %v3775_v16  ;;  %v3200_v28 = vmul.f32 %v3183_v41, %v3104_v51 }
0x10ba   :  { %3842 = vst.msk [vmem:[%s7586_s4 + $0x48] sm:$0xff] %vm8118_vm11, %v3825_v31 }
0x10bb   :  { %v3361_v63 = vadd.f32 %v8119_v19, %v3200_v28 }
0x10bc   :  { %v3442_v3 = vld [vmem:[#allocation4 + $0x60] sm:$0xff] }
0x10bd   :  { %v3538_v30 = vmul.f32 %v8122_v42, %v3442_v3  ;;  %v3618_v53 = vmul.f32 %v7323_v57, %v3442_v3  ;;  %v3698_v50 = vmul.f32 %v7486_v12, %v3442_v3  ;;  %3378 = vst.msk [vmem:[#allocation4 + $0x78] sm:$0xff] %vm3362_vm2, %v3361_v63  ;;  %v3778_v46 = vmul.f32 %v3752_v9, %v3442_v3  ;;  %vm8124_vm2 = vmmov %vm8108_vm1 }
0x10be   :  { %v3801_v57 = vsel %vm3798_vm0, %v3784_v25, %v3688_v48 }
0x10bf   :  { %v3794_v29 = vsel %vm899_vm7, %v3538_v30, %v3618_v53 }
0x10c0   :  { %v3811_v40 = vsel %vm3798_vm0, %v3794_v29, %v3698_v50  ;;  %v3712_v6 = vpop.permute.xlu0 %3711 }
0x10c1   :  { %v3828_v38 = vsel %vm3815_vm12, %v3811_v40, %v3778_v46  ;;  %v3768_v45 = vmul.f32 %v3712_v6, %v3432_v56 }
0x10c2   :  { %3845 = vst.msk [vmem:[%s7586_s4 + $0x60] sm:$0xff] %vm8123_vm13, %v3828_v38 }
0x10c3   :  { %v3818_v34 = vsel %vm3815_vm12, %v3801_v57, %v3768_v45 }
0x10c4   :  { %v3445_v12 = vld [vmem:[#allocation4 + $0x78] sm:$0xff]  ;;  %3835 = vst.msk [vmem:[%s7586_s4 + $0x10] sm:$0xff] %vm8124_vm2, %v3818_v34 }
0x10c5   :  { %v3541_v55 = vmul.f32 %v8125_v10, %v3445_v12  ;;  %v3621_v1 = vmul.f32 %v7332_v22, %v3445_v12  ;;  %v3701_v8 = vmul.f32 %v7488_v21, %v3445_v12  ;;  %v3781_v59 = vmul.f32 %v3764_v37, %v3445_v12 }
0x10c7   :  { %v3797_v7 = vsel %vm899_vm7, %v3541_v55, %v3621_v1  ;;  %vm8128_vm7 = vmmov %vm8108_vm1 }
0x10c8   :  { %v3814_v47 = vsel %vm3798_vm0, %v3797_v7, %v3701_v8  ;;  %v3732_v15 = vpop.permute.xlu0 %3731  ;;  %vm8129_vm0 = vmmov %vm8108_vm1 }
0x10c9   :  { %v3831_v32 = vsel %vm3815_vm12, %v3814_v47, %v3781_v59  ;;  %v3773_v24 = vmul.f32 %v3732_v15, %v7264_v39 }
0x10ca   :  { %3848 = vst.msk [vmem:[%s7586_s4 + $0x78] sm:$0xff] %vm8126_vm15, %v3831_v32 }
0x10cb   :  { %v3823_v22 = vsel %vm3815_vm12, %v7373_v11, %v3773_v24 }
0x10cc   :  { %3840 = vst.msk [vmem:[%s7586_s4 + $0x38] sm:$0xff] %vm8127_vm14, %v3823_v22 }
0x10d0   :  { %v3744_v21 = vpop.permute.xlu0 %3743 }
0x10d1   :  { %v3776_v35 = vmul.f32 %v3744_v21, %v7278_v5 }
0x10d3   :  { %v3826_v36 = vsel %vm3815_vm12, %v7385_v44, %v3776_v35 }
0x10d4   :  { %3843 = vst.msk [vmem:[%s7586_s4 + $0x50] sm:$0xff] %vm8128_vm7, %v3826_v36 }
0x10d8   :  { %v3756_v39 = vpop.permute.xlu0 %3755 }
0x10d9   :  { %v3779_v27 = vmul.f32 %v3756_v39, %v7293_v54 }
0x10db   :  { %v3829_v11 = vsel %vm3815_vm12, %v7394_v20, %v3779_v27 }
0x10dc   :  { %3846 = vst.msk [vmem:[%s7586_s4 + $0x68] sm:$0xff] %vm8129_vm0, %v3829_v11 }

</bundles_post_ra>
